<compile_context>
chip_gen: v7x
topology: tpu7x:2x2x1
jax: 0.10.0
libtpu: 0.0.40
codegen_flags: <defaults>
</compile_context>

<pallas_src>
import functools
import math

import numpy as np
import jax
import jax.numpy as jnp
from jax.experimental import pallas as pl
from jax.experimental.pallas import tpu as pltpu


# ----------------------------- in-kernel helpers ----------------------------

def _shift_right_zero(x, pad, out_width):
    """[zeros(pad) | x[:, :out_width-pad]] via an exact 0/1 selection matmul."""
    t = x.shape[1]
    rows = jax.lax.broadcasted_iota(jnp.int32, (t, out_width), 0)
    cols = jax.lax.broadcasted_iota(jnp.int32, (t, out_width), 1)
    sel = jnp.where(rows + pad == cols, 1.0, 0.0).astype(jnp.float32)
    return jnp.dot(x, sel, preferred_element_type=jnp.float32)


def _maxpool3_stride2(h):
    """nn.MaxPool1d(kernel_size=3, stride=2) along the lane axis, fully fused.

    Window max uses three static lane slices; the stride-2 decimation is an
    exact 0/1 selection matmul (keeps everything dense / layout friendly).
    """
    c, l = h.shape
    m = jnp.maximum(jnp.maximum(h[:, : l - 2], h[:, 1: l - 1]), h[:, 2: l])
    lm = l - 2
    l_out = (lm + 1) // 2                      # == (l - 3) // 2 + 1
    rows = jax.lax.broadcasted_iota(jnp.int32, (lm, l_out), 0)
    cols = jax.lax.broadcasted_iota(jnp.int32, (lm, l_out), 1)
    sel = jnp.where(rows == 2 * cols, 1.0, 0.0).astype(jnp.float32)
    return jnp.dot(m, sel, preferred_element_type=jnp.float32)


# --------------------------- fused forward kernel ---------------------------

def _make_fused_kernel(dilations, r_ch, d_ch):
    n_layers = len(dilations)

    def kernel(*refs):
        assert len(refs) == 2 + 3 * n_layers + 4 + 1
        x_ref, sw_ref = refs[0], refs[1]
        layer_refs = refs[2:2 + 3 * n_layers]
        e1w_ref, e1b_ref, e2w_ref, e2b_ref = refs[2 + 3 * n_layers:6 + 3 * n_layers]
        out_ref = refs[6 + 3 * n_layers]

        # start_conv: 1x1 conv, no bias (input channels zero-padded to 8).
        canon = jnp.dot(sw_ref[...], x_ref[...],
                        preferred_element_type=jnp.float32)      # (R, L)

        skip = None
        for i, (dil, init_dil) in enumerate(dilations):
            wfg0 = layer_refs[3 * i][...]      # (2D, R)  rows: [Wf | Wg], tap 0
            wfg1 = layer_refs[3 * i + 1][...]  # (2D, R)  rows: [Wf | Wg], tap 1
            wrs = layer_refs[3 * i + 2][...]   # (R+S, D) rows: [Wres | Wskip]

            t = canon.shape[1]
            # `dilate` (fast-WaveNet re-fold) == (in canonical time) a left
            # zero-pad making the folded length a multiple of the fold factor.
            if dil > init_dil:
                pad = ((-(t // init_dil)) % (dil // init_dil)) * init_dil
            else:
                pad = 0
            w_out = t + pad - dil              # layer output length

            # conv taps (kernel_size == 2, dilation = dil) in canonical time:
            #   r0[:, u] = padded[:, u]      = [0_pad | canon[:, :t-dil]]
            #   r1[:, u] = padded[:, u+dil]  = canon[:, dil-pad:]
            r1 = canon[:, dil - pad:]
            if pad:
                r0 = _shift_right_zero(canon, pad, w_out)
            else:
                r0 = canon[:, :w_out]

            fg = (jnp.dot(wfg0, r0, preferred_element_type=jnp.float32)
                  + jnp.dot(wfg1, r1, preferred_element_type=jnp.float32))
            gated = jnp.tanh(fg[:d_ch]) * jax.nn.sigmoid(fg[d_ch:])   # (D, w_out)

            xs = jnp.dot(wrs, gated, preferred_element_type=jnp.float32)
            canon = xs[:r_ch] + r1             # residual path  (R, w_out)
            s = xs[r_ch:]                      # skip path, already at dilation 1
            skip = s if skip is None else s + skip[:, skip.shape[1] - w_out:]

        # tail: relu -> end_conv_1(+b) -> relu -> pool -> end_conv_2(+b) -> relu -> pool
        h = jnp.maximum(skip, 0.0)
        h = jnp.dot(e1w_ref[...], h, preferred_element_type=jnp.float32) + e1b_ref[...]
        h = jnp.maximum(h, 0.0)
        h = _maxpool3_stride2(h)
        h = jnp.dot(e2w_ref[...], h, preferred_element_type=jnp.float32) + e2b_ref[...]
        h = jnp.maximum(h, 0.0)
        h = _maxpool3_stride2(h)
        out_ref[...] = h

    return kernel


def _mlp_kernel(x_ref, w1_ref, b1_ref, w2_ref, b2_ref, w3_ref, b3_ref,
                logit_ref, prob_ref):
    """output_layer: Linear->ReLU->(Dropout=id)->Linear->ReLU->(Dropout=id)->Linear,
    plus the softmax for Y_prob (weights already transposed at prep time)."""
    h = jnp.dot(x_ref[...], w1_ref[...], preferred_element_type=jnp.float32)
    h = jnp.maximum(h + b1_ref[...], 0.0)
    h = jnp.dot(h, w2_ref[...], preferred_element_type=jnp.float32)
    h = jnp.maximum(h + b2_ref[...], 0.0)
    logits = jnp.dot(h, w3_ref[...], preferred_element_type=jnp.float32) + b3_ref[...]
    logit_ref[...] = logits
    m = jnp.max(logits, axis=1, keepdims=True)
    ex = jnp.exp(logits - m)
    prob_ref[...] = ex / jnp.sum(ex, axis=1, keepdims=True)


# ------------------------------- call wrappers -------------------------------

def wavenet_features(x, pp, cfg):
    """x: (N, C_in, L) -> pooled features (N, end_channels//4, L_pool2)."""
    assert cfg["kernel_size"] == 2  # TODO(synk): general kernel_size tap loop.
    n, c_in, length = x.shape
    r, d, s = cfg["residual_channels"], cfg["dilation_channels"], cfg["skip_channels"]
    e, e4 = cfg["end_channels"], cfg["end_channels"] // 4
    c_pad = pp["start_w"].shape[1]
    if c_in != c_pad:                          # pad C_in (5 -> 8) for clean sublane tiles
        x = jnp.pad(x, ((0, 0), (0, c_pad - c_in), (0, 0)))

    skip_len = compute_skip_length(length, cfg)
    l1 = (skip_len - 3) // 2 + 1
    l2 = (l1 - 3) // 2 + 1

    operands = [x, pp["start_w"]]
    in_specs = [pl.BlockSpec((None, c_pad, length), lambda i: (i, 0, 0)),
                pl.BlockSpec((r, c_pad), lambda i: (0, 0))]
    for (wfg0, wfg1, wrs) in pp["layers"]:
        operands += [wfg0, wfg1, wrs]
        in_specs += [pl.BlockSpec((2 * d, r), lambda i: (0, 0)),
                     pl.BlockSpec((2 * d, r), lambda i: (0, 0)),
                     pl.BlockSpec((r + s, d), lambda i: (0, 0))]
    operands += [pp["e1w"], pp["e1b"], pp["e2w"], pp["e2b"]]
    in_specs += [pl.BlockSpec((e, s), lambda i: (0, 0)),
                 pl.BlockSpec((e, 1), lambda i: (0, 0)),
                 pl.BlockSpec((e4, e), lambda i: (0, 0)),
                 pl.BlockSpec((e4, 1), lambda i: (0, 0))]

    kernel = _make_fused_kernel(tuple(cfg["dilations"]), r, d)
    return pl.pallas_call(
        kernel,
        out_shape=jax.ShapeDtypeStruct((n, e4, l2), jnp.float32),
        grid=(n,),
        in_specs=in_specs,
        out_specs=pl.BlockSpec((None, e4, l2), lambda i: (i, 0, 0)),
        compiler_params=pltpu.CompilerParams(dimension_semantics=("parallel",)),
    )(*operands)


def mlp_head(feats, pp):
    n = feats.shape[0]
    nc = pp["w3t"].shape[1]
    return pl.pallas_call(
        _mlp_kernel,
        out_shape=(jax.ShapeDtypeStruct((n, nc), jnp.float32),
                   jax.ShapeDtypeStruct((n, nc), jnp.float32)),
    )(feats, pp["w1t"], pp["b1"], pp["w2t"], pp["b2"], pp["w3t"], pp["b3"])


def forward(x, pp, cfg):
    feat = wavenet_features(x, pp, cfg)                 # (N, E/4, L2)
    # TODO(synk): the flatten is a tiny (N x 416 f32) XLA reshape between the
    # two fused kernels; folding it in would require an in-kernel lane<->sublane
    # reshape for no measurable gain at these sizes.
    feats = feat.reshape(feat.shape[0], -1)
    logits, probs = mlp_head(feats, pp)
    y_hat = jnp.argmax(logits, axis=1)
    return {"value": logits, "Y_prob": probs, "Y_hat": y_hat}


# --------------------------- config / params / prep --------------------------

def make_config(layers=3, blocks=2, dilation_channels=32, residual_channels=32,
                skip_channels=256, end_channels=128, input_channels=5,
                kernel_size=2, num_classes=2):
    dilations = []
    init_d = 1
    for _b in range(blocks):
        new_d = 1
        for _i in range(layers):
            dilations.append((new_d, init_d))
            init_d = new_d
            new_d *= 2
    return dict(layers=layers, blocks=blocks, dilation_channels=dilation_channels,
                residual_channels=residual_channels, skip_channels=skip_channels,
                end_channels=end_channels, input_channels=input_channels,
                kernel_size=kernel_size, num_classes=num_classes,
                dilations=dilations)


def compute_skip_length(length, cfg):
    """Canonical-time length arithmetic of the dilated stack (matches `dilate`)."""
    t = length
    out = None
    for (dil, init_dil) in cfg["dilations"]:
        if dil > init_dil:
            factor = dil // init_dil
            t += ((-(t // init_dil)) % factor) * init_dil
        t -= dil * (cfg["kernel_size"] - 1)
        out = t if out is None else min(out, t)
    return out


def compute_last_channels(length, cfg):
    skip_len = compute_skip_length(length, cfg)
    l1 = (skip_len - 3) // 2 + 1
    l2 = (l1 - 3) // 2 + 1
    return (cfg["end_channels"] // 4) * l2


def init_params(key, cfg, last_channels):
    n_layers = cfg["blocks"] * cfg["layers"]
    kit = iter(jax.random.split(key, 1 + 4 * n_layers + 10))

    def nrm(shape, fan_in):
        return (jax.random.normal(next(kit), shape, dtype=jnp.float32)
                / np.sqrt(fan_in)).astype(jnp.float32)

    r, d = cfg["residual_channels"], cfg["dilation_channels"]
    s, e = cfg["skip_channels"], cfg["end_channels"]
    cin, k, nc = cfg["input_channels"], cfg["kernel_size"], cfg["num_classes"]

    params = {"start_w": nrm((r, cin), cin), "layers": []}
    for _ in range(n_layers):
        params["layers"].append(dict(
            wf=nrm((d, r, k), r * k),
            wg=nrm((d, r, k), r * k),
            wr=nrm((r, d), d),
            ws=nrm((s, d), d),
        ))
    params["end1_w"] = nrm((e, s), s)
    params["end1_b"] = nrm((e,), s)
    params["end2_w"] = nrm((e // 4, e), e)
    params["end2_b"] = nrm((e // 4,), e)
    params["w1"] = nrm((1024, last_channels), last_channels)
    params["b1"] = nrm((1024,), last_channels)
    params["w2"] = nrm((256, 1024), 1024)
    params["b2"] = nrm((256,), 1024)
    params["w3"] = nrm((nc, 256), 256)
    params["b3"] = nrm((nc,), 256)
    return params


def prepare_params(params, cfg):
    """One-time packing / transposing of weights into the kernel-friendly layout."""
    sw = params["start_w"]
    c_in = sw.shape[1]
    c_pad = ((c_in + 7) // 8) * 8
    layers = []
    for lp in params["layers"]:
        wfg0 = jnp.concatenate([lp["wf"][:, :, 0], lp["wg"][:, :, 0]], axis=0)  # (2D, R)
        wfg1 = jnp.concatenate([lp["wf"][:, :, 1], lp["wg"][:, :, 1]], axis=0)  # (2D, R)
        wrs = jnp.concatenate([lp["wr"], lp["ws"]], axis=0)                     # (R+S, D)
        layers.append((wfg0, wfg1, wrs))
    return dict(
        start_w=jnp.pad(sw, ((0, 0), (0, c_pad - c_in))),
        layers=layers,
        e1w=params["end1_w"], e1b=params["end1_b"].reshape(-1, 1),
        e2w=params["end2_w"], e2b=params["end2_b"].reshape(-1, 1),
        w1t=params["w1"].T, b1=params["b1"].reshape(1, -1),
        w2t=params["w2"].T, b2=params["b2"].reshape(1, -1),
        w3t=params["w3"].T, b3=params["b3"].reshape(1, -1),
    )


# ------------------------ pure-JAX reference (check) -------------------------

def dilate(x, dilation, init_dilation=1, pad_start=True):
    """Exact JAX port of the fast-WaveNet `dilate` (batch/time re-folding)."""
    n, c, l = x.shape
    factor = dilation / init_dilation
    if factor == 1:
        return x
    new_l = int(np.ceil(l / factor) * factor)
    if new_l != l:
        pad = new_l - l
        cfg = ((0, 0), (0, 0), (pad, 0)) if pad_start else ((0, 0), (0, 0), (0, pad))
        x = jnp.pad(x, cfg)
        l = new_l
    l_new = int(math.ceil(l * init_dilation / dilation))
    n_new = int(math.ceil(n * dilation / init_dilation))
    x = jnp.transpose(x, (1, 2, 0))
    x = x.reshape(c, l_new, n_new)
    x = jnp.transpose(x, (2, 0, 1))
    return x


def _maxpool_ref(x):
    _, _, l = x.shape
    l_out = (l - 3) // 2 + 1
    w = jnp.stack([x[:, :, 2 * t:2 * t + 3] for t in range(l_out)], axis=2)
    return w.max(axis=3)


def _reference_logits(x, params, cfg):
    def pw(h, w, b=None):
        y = jnp.einsum("oc,ncl->nol", w, h)
        return y if b is None else y + b[None, :, None]

    h = pw(x, params["start_w"])
    skip = None
    for i, (dil, init_dil) in enumerate(cfg["dilations"]):
        res = dilate(h, dil, init_dil)
        lp = params["layers"][i]
        r0, r1 = res[:, :, :-1], res[:, :, 1:]
        f = (jnp.einsum("or,nrl->nol", lp["wf"][:, :, 0], r0)
             + jnp.einsum("or,nrl->nol", lp["wf"][:, :, 1], r1))
        g = (jnp.einsum("or,nrl->nol", lp["wg"][:, :, 0], r0)
             + jnp.einsum("or,nrl->nol", lp["wg"][:, :, 1], r1))
        xg = jnp.tanh(f) * jax.nn.sigmoid(g)
        s = xg
        if xg.shape[2] != 1:
            s = dilate(xg, 1, init_dilation=dil)
        s = pw(s, lp["ws"])
        skip = s if skip is None else s + skip[:, :, -s.shape[2]:]
        h = pw(xg, lp["wr"]) + r1
    y = jax.nn.relu(skip)
    y = _maxpool_ref(jax.nn.relu(pw(y, params["end1_w"], params["end1_b"])))
    y = _maxpool_ref(jax.nn.relu(pw(y, params["end2_w"], params["end2_b"])))
    yf = y.reshape(y.shape[0], -1)
    h1 = jax.nn.relu(yf @ params["w1"].T + params["b1"])
    h2 = jax.nn.relu(h1 @ params["w2"].T + params["b2"])
    return h2 @ params["w3"].T + params["b3"]


# ---------------------------------- main -------------------------------------

if __name__ == "__main__":
    cfg = make_config()                     # layers=3, blocks=2, Cin=5, K=2, ...
    batch, length = 2, 64
    last_channels = compute_last_channels(length, cfg)

    key = jax.random.PRNGKey(0)
    k_in, k_par = jax.random.split(key)
    x = jax.random.normal(k_in, (batch, cfg["input_channels"], length), jnp.float32)
    params = init_params(k_par, cfg, last_channels)
    pparams = prepare_params(params, cfg)   # packing / transposes once, outside jit

    run = jax.jit(functools.partial(forward, cfg=cfg))
    out = run(x, pparams)
    out = jax.block_until_ready(out)

    # sanity checks
    assert out["value"].shape == (batch, cfg["num_classes"])
    assert out["Y_prob"].shape == (batch, cfg["num_classes"])
    assert out["Y_hat"].shape == (batch,)

    with jax.default_matmul_precision("highest"):
        ref = _reference_logits(x, params, cfg)
    np.testing.assert_allclose(np.asarray(out["value"]), np.asarray(ref),
                               rtol=1e-2, atol=1e-2)
    ref_probs = jax.nn.softmax(ref, axis=1)
    np.testing.assert_allclose(np.asarray(out["Y_prob"]), np.asarray(ref_probs),
                               rtol=1e-2, atol=1e-2)

    print("KERNEL_OK")
</pallas_src>

<mosaic_0001>
module attributes {stable_mosaic.version = 11 : i64} {
  func.func @_mlp_kernel(%arg0: memref<2x416xf32, #tpu.memory_space<vmem>>, %arg1: memref<416x1024xf32, #tpu.memory_space<vmem>>, %arg2: memref<1x1024xf32, #tpu.memory_space<vmem>>, %arg3: memref<1024x256xf32, #tpu.memory_space<vmem>>, %arg4: memref<1x256xf32, #tpu.memory_space<vmem>>, %arg5: memref<256x2xf32, #tpu.memory_space<vmem>>, %arg6: memref<1x2xf32, #tpu.memory_space<vmem>>, %arg7: memref<2x2xf32, #tpu.memory_space<vmem>>, %arg8: memref<2x2xf32, #tpu.memory_space<vmem>>) attributes {dimension_semantics = [], scalar_prefetch = 0 : i64, scratch_operands = 0 : i64, tpu.core_type = #tpu.core_type<tc>} {
    %c0 = arith.constant 0 : index
    %c0_0 = arith.constant 0 : index
    %0 = vector.load %arg0[%c0, %c0_0] : memref<2x416xf32, #tpu.memory_space<vmem>>, vector<2x416xf32>
    %c0_1 = arith.constant 0 : index
    %c0_2 = arith.constant 0 : index
    %1 = vector.load %arg1[%c0_1, %c0_2] : memref<416x1024xf32, #tpu.memory_space<vmem>>, vector<416x1024xf32>
    %cst = arith.constant dense<0.000000e+00> : vector<2x1024xf32>
    %2 = tpu.matmul %0, %1, %cst {dimension_numbers = #tpu.dot_dimension_numbers<[1], [0], [0], [1], [0, 0, 1, 1], [], []>} : vector<2x416xf32>, vector<416x1024xf32>, vector<2x1024xf32> -> vector<2x1024xf32>
    %c0_3 = arith.constant 0 : index
    %c0_4 = arith.constant 0 : index
    %3 = vector.load %arg2[%c0_3, %c0_4] : memref<1x1024xf32, #tpu.memory_space<vmem>>, vector<1x1024xf32>
    %4 = vector.broadcast %3 : vector<1x1024xf32> to vector<2x1024xf32>
    %5 = arith.addf %2, %4 : vector<2x1024xf32>
    %cst_5 = arith.constant 0.000000e+00 : f32
    %6 = vector.broadcast %cst_5 : f32 to vector<2x1024xf32>
    %7 = arith.maximumf %5, %6 : vector<2x1024xf32>
    %c0_6 = arith.constant 0 : index
    %c0_7 = arith.constant 0 : index
    %8 = vector.load %arg3[%c0_6, %c0_7] : memref<1024x256xf32, #tpu.memory_space<vmem>>, vector<1024x256xf32>
    %cst_8 = arith.constant dense<0.000000e+00> : vector<2x256xf32>
    %9 = tpu.matmul %7, %8, %cst_8 {dimension_numbers = #tpu.dot_dimension_numbers<[1], [0], [0], [1], [0, 0, 1, 1], [], []>} : vector<2x1024xf32>, vector<1024x256xf32>, vector<2x256xf32> -> vector<2x256xf32>
    %c0_9 = arith.constant 0 : index
    %c0_10 = arith.constant 0 : index
    %10 = vector.load %arg4[%c0_9, %c0_10] : memref<1x256xf32, #tpu.memory_space<vmem>>, vector<1x256xf32>
    %11 = vector.broadcast %10 : vector<1x256xf32> to vector<2x256xf32>
    %12 = arith.addf %9, %11 : vector<2x256xf32>
    %cst_11 = arith.constant 0.000000e+00 : f32
    %13 = vector.broadcast %cst_11 : f32 to vector<2x256xf32>
    %14 = arith.maximumf %12, %13 : vector<2x256xf32>
    %c0_12 = arith.constant 0 : index
    %c0_13 = arith.constant 0 : index
    %15 = vector.load %arg5[%c0_12, %c0_13] : memref<256x2xf32, #tpu.memory_space<vmem>>, vector<256x2xf32>
    %cst_14 = arith.constant dense<0.000000e+00> : vector<2x2xf32>
    %16 = tpu.matmul %14, %15, %cst_14 {dimension_numbers = #tpu.dot_dimension_numbers<[1], [0], [0], [1], [0, 0, 1, 1], [], []>} : vector<2x256xf32>, vector<256x2xf32>, vector<2x2xf32> -> vector<2x2xf32>
    %c0_15 = arith.constant 0 : index
    %c0_16 = arith.constant 0 : index
    %17 = vector.load %arg6[%c0_15, %c0_16] : memref<1x2xf32, #tpu.memory_space<vmem>>, vector<1x2xf32>
    %18 = vector.broadcast %17 : vector<1x2xf32> to vector<2x2xf32>
    %19 = arith.addf %16, %18 : vector<2x2xf32>
    %c0_17 = arith.constant 0 : index
    %c0_18 = arith.constant 0 : index
    %20 = vector.load %arg7[%c0_17, %c0_18] : memref<2x2xf32, #tpu.memory_space<vmem>>, vector<2x2xf32>
    tpu.vector_store %arg7[%c0_17, %c0_18], %19 {strides = array<i32>} : memref<2x2xf32, #tpu.memory_space<vmem>>, vector<2x2xf32>,
    %cst_19 = arith.constant dense<0xFF800000> : vector<2xf32>
    %21 = vector.multi_reduction <maximumf>, %19, %cst_19 [1] : vector<2x2xf32> to vector<2xf32>
    %22 = vector.shape_cast %21 : vector<2xf32> to vector<2x1xf32>
    %23 = vector.broadcast %22 : vector<2x1xf32> to vector<2x2xf32>
    %24 = arith.subf %19, %23 : vector<2x2xf32>
    %25 = math.exp %24 : vector<2x2xf32>
    %cst_20 = arith.constant dense<0.000000e+00> : vector<2xf32>
    %26 = vector.multi_reduction <add>, %25, %cst_20 [1] : vector<2x2xf32> to vector<2xf32>
    %27 = vector.shape_cast %26 : vector<2xf32> to vector<2x1xf32>
    %28 = vector.broadcast %27 : vector<2x1xf32> to vector<2x2xf32>
    %29 = arith.divf %25, %28 : vector<2x2xf32>
    %c0_21 = arith.constant 0 : index
    %c0_22 = arith.constant 0 : index
    %30 = vector.load %arg8[%c0_21, %c0_22] : memref<2x2xf32, #tpu.memory_space<vmem>>, vector<2x2xf32>
    tpu.vector_store %arg8[%c0_21, %c0_22], %29 {strides = array<i32>} : memref<2x2xf32, #tpu.memory_space<vmem>>, vector<2x2xf32>,
    return
  }
}

module attributes {stable_mosaic.version = 11 : i64} {
  func.func @kernel(%arg0: i32, %arg1: memref<1x8x64xf32, #tpu.memory_space<vmem>>, %arg2: memref<32x8xf32, #tpu.memory_space<vmem>>, %arg3: memref<64x32xf32, #tpu.memory_space<vmem>>, %arg4: memref<64x32xf32, #tpu.memory_space<vmem>>, %arg5: memref<288x32xf32, #tpu.memory_space<vmem>>, %arg6: memref<64x32xf32, #tpu.memory_space<vmem>>, %arg7: memref<64x32xf32, #tpu.memory_space<vmem>>, %arg8: memref<288x32xf32, #tpu.memory_space<vmem>>, %arg9: memref<64x32xf32, #tpu.memory_space<vmem>>, %arg10: memref<64x32xf32, #tpu.memory_space<vmem>>, %arg11: memref<288x32xf32, #tpu.memory_space<vmem>>, %arg12: memref<64x32xf32, #tpu.memory_space<vmem>>, %arg13: memref<64x32xf32, #tpu.memory_space<vmem>>, %arg14: memref<288x32xf32, #tpu.memory_space<vmem>>, %arg15: memref<64x32xf32, #tpu.memory_space<vmem>>, %arg16: memref<64x32xf32, #tpu.memory_space<vmem>>, %arg17: memref<288x32xf32, #tpu.memory_space<vmem>>, %arg18: memref<64x32xf32, #tpu.memory_space<vmem>>, %arg19: memref<64x32xf32, #tpu.memory_space<vmem>>, %arg20: memref<288x32xf32, #tpu.memory_space<vmem>>, %arg21: memref<128x256xf32, #tpu.memory_space<vmem>>, %arg22: memref<128x1xf32, #tpu.memory_space<vmem>>, %arg23: memref<32x128xf32, #tpu.memory_space<vmem>>, %arg24: memref<32x1xf32, #tpu.memory_space<vmem>>, %arg25: memref<1x32x13xf32, #tpu.memory_space<vmem>>) attributes {dimension_semantics = [#tpu.dimension_semantics<parallel>], iteration_bounds = array<i64: 2>, scalar_prefetch = 0 : i64, scratch_operands = 0 : i64, tpu.core_type = #tpu.core_type<tc>, window_params = [{transform_indices = @transform_0, window_bounds = array<i64: 1, 8, 64>}, {pipeline_mode = #tpu.pipeline_mode<synchronous>, transform_indices = @transform_1, window_bounds = array<i64: 32, 8>}, {pipeline_mode = #tpu.pipeline_mode<synchronous>, transform_indices = @transform_2, window_bounds = array<i64: 64, 32>}, {pipeline_mode = #tpu.pipeline_mode<synchronous>, transform_indices = @transform_3, window_bounds = array<i64: 64, 32>}, {pipeline_mode = #tpu.pipeline_mode<synchronous>, transform_indices = @transform_4, window_bounds = array<i64: 288, 32>}, {pipeline_mode = #tpu.pipeline_mode<synchronous>, transform_indices = @transform_5, window_bounds = array<i64: 64, 32>}, {pipeline_mode = #tpu.pipeline_mode<synchronous>, transform_indices = @transform_6, window_bounds = array<i64: 64, 32>}, {pipeline_mode = #tpu.pipeline_mode<synchronous>, transform_indices = @transform_7, window_bounds = array<i64: 288, 32>}, {pipeline_mode = #tpu.pipeline_mode<synchronous>, transform_indices = @transform_8, window_bounds = array<i64: 64, 32>}, {pipeline_mode = #tpu.pipeline_mode<synchronous>, transform_indices = @transform_9, window_bounds = array<i64: 64, 32>}, {pipeline_mode = #tpu.pipeline_mode<synchronous>, transform_indices = @transform_10, window_bounds = array<i64: 288, 32>}, {pipeline_mode = #tpu.pipeline_mode<synchronous>, transform_indices = @transform_11, window_bounds = array<i64: 64, 32>}, {pipeline_mode = #tpu.pipeline_mode<synchronous>, transform_indices = @transform_12, window_bounds = array<i64: 64, 32>}, {pipeline_mode = #tpu.pipeline_mode<synchronous>, transform_indices = @transform_13, window_bounds = array<i64: 288, 32>}, {pipeline_mode = #tpu.pipeline_mode<synchronous>, transform_indices = @transform_14, window_bounds = array<i64: 64, 32>}, {pipeline_mode = #tpu.pipeline_mode<synchronous>, transform_indices = @transform_15, window_bounds = array<i64: 64, 32>}, {pipeline_mode = #tpu.pipeline_mode<synchronous>, transform_indices = @transform_16, window_bounds = array<i64: 288, 32>}, {pipeline_mode = #tpu.pipeline_mode<synchronous>, transform_indices = @transform_17, window_bounds = array<i64: 64, 32>}, {pipeline_mode = #tpu.pipeline_mode<synchronous>, transform_indices = @transform_18, window_bounds = array<i64: 64, 32>}, {pipeline_mode = #tpu.pipeline_mode<synchronous>, transform_indices = @transform_19, window_bounds = array<i64: 288, 32>}, {pipeline_mode = #tpu.pipeline_mode<synchronous>, transform_indices = @transform_20, window_bounds = array<i64: 128, 256>}, {pipeline_mode = #tpu.pipeline_mode<synchronous>, transform_indices = @transform_21, window_bounds = array<i64: 128, 1>}, {pipeline_mode = #tpu.pipeline_mode<synchronous>, transform_indices = @transform_22, window_bounds = array<i64: 32, 128>}, {pipeline_mode = #tpu.pipeline_mode<synchronous>, transform_indices = @transform_23, window_bounds = array<i64: 32, 1>}, {transform_indices = @transform_24, window_bounds = array<i64: 1, 32, 13>}]} {
    %c0 = arith.constant 0 : index
    %c0_0 = arith.constant 0 : index
    %0 = vector.load %arg2[%c0, %c0_0] : memref<32x8xf32, #tpu.memory_space<vmem>>, vector<32x8xf32>
    %c0_1 = arith.constant 0 : index
    %c0_2 = arith.constant 0 : index
    %c0_3 = arith.constant 0 : index
    %1 = vector.load %arg1[%c0_1, %c0_2, %c0_3] : memref<1x8x64xf32, #tpu.memory_space<vmem>>, vector<1x8x64xf32>
    %2 = vector.shape_cast %1 : vector<1x8x64xf32> to vector<8x64xf32>
    %cst = arith.constant dense<0.000000e+00> : vector<32x64xf32>
    %3 = tpu.matmul %0, %2, %cst {dimension_numbers = #tpu.dot_dimension_numbers<[1], [0], [0], [1], [0, 0, 1, 1], [], []>} : vector<32x8xf32>, vector<8x64xf32>, vector<32x64xf32> -> vector<32x64xf32>
    %c0_4 = arith.constant 0 : index
    %c0_5 = arith.constant 0 : index
    %4 = vector.load %arg3[%c0_4, %c0_5] : memref<64x32xf32, #tpu.memory_space<vmem>>, vector<64x32xf32>
    %c0_6 = arith.constant 0 : index
    %c0_7 = arith.constant 0 : index
    %5 = vector.load %arg4[%c0_6, %c0_7] : memref<64x32xf32, #tpu.memory_space<vmem>>, vector<64x32xf32>
    %c0_8 = arith.constant 0 : index
    %c0_9 = arith.constant 0 : index
    %6 = vector.load %arg5[%c0_8, %c0_9] : memref<288x32xf32, #tpu.memory_space<vmem>>, vector<288x32xf32>
    %7 = vector.extract_strided_slice %3 {offsets = [0, 1], sizes = [32, 63], strides = [1, 1]} : vector<32x64xf32> to vector<32x63xf32>
    %8 = vector.extract_strided_slice %3 {offsets = [0, 0], sizes = [32, 63], strides = [1, 1]} : vector<32x64xf32> to vector<32x63xf32>
    %cst_10 = arith.constant dense<0.000000e+00> : vector<64x63xf32>
    %9 = tpu.matmul %4, %8, %cst_10 {dimension_numbers = #tpu.dot_dimension_numbers<[1], [0], [0], [1], [0, 0, 1, 1], [], []>} : vector<64x32xf32>, vector<32x63xf32>, vector<64x63xf32> -> vector<64x63xf32>
    %cst_11 = arith.constant dense<0.000000e+00> : vector<64x63xf32>
    %10 = tpu.matmul %5, %7, %cst_11 {dimension_numbers = #tpu.dot_dimension_numbers<[1], [0], [0], [1], [0, 0, 1, 1], [], []>} : vector<64x32xf32>, vector<32x63xf32>, vector<64x63xf32> -> vector<64x63xf32>
    %11 = arith.addf %9, %10 : vector<64x63xf32>
    %12 = vector.extract_strided_slice %11 {offsets = [0, 0], sizes = [32, 63], strides = [1, 1]} : vector<64x63xf32> to vector<32x63xf32>
    %13 = math.tanh %12 : vector<32x63xf32>
    %14 = vector.extract_strided_slice %11 {offsets = [32, 0], sizes = [32, 63], strides = [1, 1]} : vector<64x63xf32> to vector<32x63xf32>
    %15 = arith.negf %14 : vector<32x63xf32>
    %16 = math.exp %15 : vector<32x63xf32>
    %cst_12 = arith.constant 1.000000e+00 : f32
    %17 = vector.broadcast %cst_12 : f32 to vector<32x63xf32>
    %18 = arith.addf %17, %16 : vector<32x63xf32>
    %19 = arith.divf %17, %18 : vector<32x63xf32>
    %20 = arith.mulf %13, %19 : vector<32x63xf32>
    %cst_13 = arith.constant dense<0.000000e+00> : vector<288x63xf32>
    %21 = tpu.matmul %6, %20, %cst_13 {dimension_numbers = #tpu.dot_dimension_numbers<[1], [0], [0], [1], [0, 0, 1, 1], [], []>} : vector<288x32xf32>, vector<32x63xf32>, vector<288x63xf32> -> vector<288x63xf32>
    %22 = vector.extract_strided_slice %21 {offsets = [0, 0], sizes = [32, 63], strides = [1, 1]} : vector<288x63xf32> to vector<32x63xf32>
    %23 = arith.addf %22, %7 : vector<32x63xf32>
    %24 = vector.extract_strided_slice %21 {offsets = [32, 0], sizes = [256, 63], strides = [1, 1]} : vector<288x63xf32> to vector<256x63xf32>
    %c0_14 = arith.constant 0 : index
    %c0_15 = arith.constant 0 : index
    %25 = vector.load %arg6[%c0_14, %c0_15] : memref<64x32xf32, #tpu.memory_space<vmem>>, vector<64x32xf32>
    %c0_16 = arith.constant 0 : index
    %c0_17 = arith.constant 0 : index
    %26 = vector.load %arg7[%c0_16, %c0_17] : memref<64x32xf32, #tpu.memory_space<vmem>>, vector<64x32xf32>
    %c0_18 = arith.constant 0 : index
    %c0_19 = arith.constant 0 : index
    %27 = vector.load %arg8[%c0_18, %c0_19] : memref<288x32xf32, #tpu.memory_space<vmem>>, vector<288x32xf32>
    %28 = vector.extract_strided_slice %23 {offsets = [0, 1], sizes = [32, 62], strides = [1, 1]} : vector<32x63xf32> to vector<32x62xf32>
    %29 = tpu.iota {dimensions = array<i32: 0>} : vector<63x62xi32>
    %30 = tpu.iota {dimensions = array<i32: 1>} : vector<63x62xi32>
    %c1_i32 = arith.constant 1 : i32
    %31 = vector.broadcast %c1_i32 : i32 to vector<63x62xi32>
    %32 = arith.addi %29, %31 : vector<63x62xi32>
    %33 = arith.cmpi eq, %32, %30 : vector<63x62xi32>
    %cst_20 = arith.constant 1.000000e+00 : f32
    %cst_21 = arith.constant 0.000000e+00 : f32
    %34 = vector.broadcast %cst_20 : f32 to vector<63x62xf32>
    %35 = vector.broadcast %cst_21 : f32 to vector<63x62xf32>
    %36 = arith.select %33, %34, %35 : vector<63x62xi1>, vector<63x62xf32>
    %cst_22 = arith.constant dense<0.000000e+00> : vector<32x62xf32>
    %37 = tpu.matmul %23, %36, %cst_22 {dimension_numbers = #tpu.dot_dimension_numbers<[1], [0], [0], [1], [0, 0, 1, 1], [], []>} : vector<32x63xf32>, vector<63x62xf32>, vector<32x62xf32> -> vector<32x62xf32>
    %cst_23 = arith.constant dense<0.000000e+00> : vector<64x62xf32>
    %38 = tpu.matmul %25, %37, %cst_23 {dimension_numbers = #tpu.dot_dimension_numbers<[1], [0], [0], [1], [0, 0, 1, 1], [], []>} : vector<64x32xf32>, vector<32x62xf32>, vector<64x62xf32> -> vector<64x62xf32>
    %cst_24 = arith.constant dense<0.000000e+00> : vector<64x62xf32>
    %39 = tpu.matmul %26, %28, %cst_24 {dimension_numbers = #tpu.dot_dimension_numbers<[1], [0], [0], [1], [0, 0, 1, 1], [], []>} : vector<64x32xf32>, vector<32x62xf32>, vector<64x62xf32> -> vector<64x62xf32>
    %40 = arith.addf %38, %39 : vector<64x62xf32>
    %41 = vector.extract_strided_slice %40 {offsets = [0, 0], sizes = [32, 62], strides = [1, 1]} : vector<64x62xf32> to vector<32x62xf32>
    %42 = math.tanh %41 : vector<32x62xf32>
    %43 = vector.extract_strided_slice %40 {offsets = [32, 0], sizes = [32, 62], strides = [1, 1]} : vector<64x62xf32> to vector<32x62xf32>
    %44 = arith.negf %43 : vector<32x62xf32>
    %45 = math.exp %44 : vector<32x62xf32>
    %cst_25 = arith.constant 1.000000e+00 : f32
    %46 = vector.broadcast %cst_25 : f32 to vector<32x62xf32>
    %47 = arith.addf %46, %45 : vector<32x62xf32>
    %48 = arith.divf %46, %47 : vector<32x62xf32>
    %49 = arith.mulf %42, %48 : vector<32x62xf32>
    %cst_26 = arith.constant dense<0.000000e+00> : vector<288x62xf32>
    %50 = tpu.matmul %27, %49, %cst_26 {dimension_numbers = #tpu.dot_dimension_numbers<[1], [0], [0], [1], [0, 0, 1, 1], [], []>} : vector<288x32xf32>, vector<32x62xf32>, vector<288x62xf32> -> vector<288x62xf32>
    %51 = vector.extract_strided_slice %50 {offsets = [0, 0], sizes = [32, 62], strides = [1, 1]} : vector<288x62xf32> to vector<32x62xf32>
    %52 = arith.addf %51, %28 : vector<32x62xf32>
    %53 = vector.extract_strided_slice %50 {offsets = [32, 0], sizes = [256, 62], strides = [1, 1]} : vector<288x62xf32> to vector<256x62xf32>
    %54 = vector.extract_strided_slice %24 {offsets = [0, 1], sizes = [256, 62], strides = [1, 1]} : vector<256x63xf32> to vector<256x62xf32>
    %55 = arith.addf %53, %54 : vector<256x62xf32>
    %c0_27 = arith.constant 0 : index
    %c0_28 = arith.constant 0 : index
    %56 = vector.load %arg9[%c0_27, %c0_28] : memref<64x32xf32, #tpu.memory_space<vmem>>, vector<64x32xf32>
    %c0_29 = arith.constant 0 : index
    %c0_30 = arith.constant 0 : index
    %57 = vector.load %arg10[%c0_29, %c0_30] : memref<64x32xf32, #tpu.memory_space<vmem>>, vector<64x32xf32>
    %c0_31 = arith.constant 0 : index
    %c0_32 = arith.constant 0 : index
    %58 = vector.load %arg11[%c0_31, %c0_32] : memref<288x32xf32, #tpu.memory_space<vmem>>, vector<288x32xf32>
    %59 = vector.extract_strided_slice %52 {offsets = [0, 2], sizes = [32, 60], strides = [1, 1]} : vector<32x62xf32> to vector<32x60xf32>
    %60 = tpu.iota {dimensions = array<i32: 0>} : vector<62x60xi32>
    %61 = tpu.iota {dimensions = array<i32: 1>} : vector<62x60xi32>
    %c2_i32 = arith.constant 2 : i32
    %62 = vector.broadcast %c2_i32 : i32 to vector<62x60xi32>
    %63 = arith.addi %60, %62 : vector<62x60xi32>
    %64 = arith.cmpi eq, %63, %61 : vector<62x60xi32>
    %cst_33 = arith.constant 1.000000e+00 : f32
    %cst_34 = arith.constant 0.000000e+00 : f32
    %65 = vector.broadcast %cst_33 : f32 to vector<62x60xf32>
    %66 = vector.broadcast %cst_34 : f32 to vector<62x60xf32>
    %67 = arith.select %64, %65, %66 : vector<62x60xi1>, vector<62x60xf32>
    %cst_35 = arith.constant dense<0.000000e+00> : vector<32x60xf32>
    %68 = tpu.matmul %52, %67, %cst_35 {dimension_numbers = #tpu.dot_dimension_numbers<[1], [0], [0], [1], [0, 0, 1, 1], [], []>} : vector<32x62xf32>, vector<62x60xf32>, vector<32x60xf32> -> vector<32x60xf32>
    %cst_36 = arith.constant dense<0.000000e+00> : vector<64x60xf32>
    %69 = tpu.matmul %56, %68, %cst_36 {dimension_numbers = #tpu.dot_dimension_numbers<[1], [0], [0], [1], [0, 0, 1, 1], [], []>} : vector<64x32xf32>, vector<32x60xf32>, vector<64x60xf32> -> vector<64x60xf32>
    %cst_37 = arith.constant dense<0.000000e+00> : vector<64x60xf32>
    %70 = tpu.matmul %57, %59, %cst_37 {dimension_numbers = #tpu.dot_dimension_numbers<[1], [0], [0], [1], [0, 0, 1, 1], [], []>} : vector<64x32xf32>, vector<32x60xf32>, vector<64x60xf32> -> vector<64x60xf32>
    %71 = arith.addf %69, %70 : vector<64x60xf32>
    %72 = vector.extract_strided_slice %71 {offsets = [0, 0], sizes = [32, 60], strides = [1, 1]} : vector<64x60xf32> to vector<32x60xf32>
    %73 = math.tanh %72 : vector<32x60xf32>
    %74 = vector.extract_strided_slice %71 {offsets = [32, 0], sizes = [32, 60], strides = [1, 1]} : vector<64x60xf32> to vector<32x60xf32>
    %75 = arith.negf %74 : vector<32x60xf32>
    %76 = math.exp %75 : vector<32x60xf32>
    %cst_38 = arith.constant 1.000000e+00 : f32
    %77 = vector.broadcast %cst_38 : f32 to vector<32x60xf32>
    %78 = arith.addf %77, %76 : vector<32x60xf32>
    %79 = arith.divf %77, %78 : vector<32x60xf32>
    %80 = arith.mulf %73, %79 : vector<32x60xf32>
    %cst_39 = arith.constant dense<0.000000e+00> : vector<288x60xf32>
    %81 = tpu.matmul %58, %80, %cst_39 {dimension_numbers = #tpu.dot_dimension_numbers<[1], [0], [0], [1], [0, 0, 1, 1], [], []>} : vector<288x32xf32>, vector<32x60xf32>, vector<288x60xf32> -> vector<288x60xf32>
    %82 = vector.extract_strided_slice %81 {offsets = [0, 0], sizes = [32, 60], strides = [1, 1]} : vector<288x60xf32> to vector<32x60xf32>
    %83 = arith.addf %82, %59 : vector<32x60xf32>
    %84 = vector.extract_strided_slice %81 {offsets = [32, 0], sizes = [256, 60], strides = [1, 1]} : vector<288x60xf32> to vector<256x60xf32>
    %85 = vector.extract_strided_slice %55 {offsets = [0, 2], sizes = [256, 60], strides = [1, 1]} : vector<256x62xf32> to vector<256x60xf32>
    %86 = arith.addf %84, %85 : vector<256x60xf32>
    %c0_40 = arith.constant 0 : index
    %c0_41 = arith.constant 0 : index
    %87 = vector.load %arg12[%c0_40, %c0_41] : memref<64x32xf32, #tpu.memory_space<vmem>>, vector<64x32xf32>
    %c0_42 = arith.constant 0 : index
    %c0_43 = arith.constant 0 : index
    %88 = vector.load %arg13[%c0_42, %c0_43] : memref<64x32xf32, #tpu.memory_space<vmem>>, vector<64x32xf32>
    %c0_44 = arith.constant 0 : index
    %c0_45 = arith.constant 0 : index
    %89 = vector.load %arg14[%c0_44, %c0_45] : memref<288x32xf32, #tpu.memory_space<vmem>>, vector<288x32xf32>
    %90 = vector.extract_strided_slice %83 {offsets = [0, 1], sizes = [32, 59], strides = [1, 1]} : vector<32x60xf32> to vector<32x59xf32>
    %91 = vector.extract_strided_slice %83 {offsets = [0, 0], sizes = [32, 59], strides = [1, 1]} : vector<32x60xf32> to vector<32x59xf32>
    %cst_46 = arith.constant dense<0.000000e+00> : vector<64x59xf32>
    %92 = tpu.matmul %87, %91, %cst_46 {dimension_numbers = #tpu.dot_dimension_numbers<[1], [0], [0], [1], [0, 0, 1, 1], [], []>} : vector<64x32xf32>, vector<32x59xf32>, vector<64x59xf32> -> vector<64x59xf32>
    %cst_47 = arith.constant dense<0.000000e+00> : vector<64x59xf32>
    %93 = tpu.matmul %88, %90, %cst_47 {dimension_numbers = #tpu.dot_dimension_numbers<[1], [0], [0], [1], [0, 0, 1, 1], [], []>} : vector<64x32xf32>, vector<32x59xf32>, vector<64x59xf32> -> vector<64x59xf32>
    %94 = arith.addf %92, %93 : vector<64x59xf32>
    %95 = vector.extract_strided_slice %94 {offsets = [0, 0], sizes = [32, 59], strides = [1, 1]} : vector<64x59xf32> to vector<32x59xf32>
    %96 = math.tanh %95 : vector<32x59xf32>
    %97 = vector.extract_strided_slice %94 {offsets = [32, 0], sizes = [32, 59], strides = [1, 1]} : vector<64x59xf32> to vector<32x59xf32>
    %98 = arith.negf %97 : vector<32x59xf32>
    %99 = math.exp %98 : vector<32x59xf32>
    %cst_48 = arith.constant 1.000000e+00 : f32
    %100 = vector.broadcast %cst_48 : f32 to vector<32x59xf32>
    %101 = arith.addf %100, %99 : vector<32x59xf32>
    %102 = arith.divf %100, %101 : vector<32x59xf32>
    %103 = arith.mulf %96, %102 : vector<32x59xf32>
    %cst_49 = arith.constant dense<0.000000e+00> : vector<288x59xf32>
    %104 = tpu.matmul %89, %103, %cst_49 {dimension_numbers = #tpu.dot_dimension_numbers<[1], [0], [0], [1], [0, 0, 1, 1], [], []>} : vector<288x32xf32>, vector<32x59xf32>, vector<288x59xf32> -> vector<288x59xf32>
    %105 = vector.extract_strided_slice %104 {offsets = [0, 0], sizes = [32, 59], strides = [1, 1]} : vector<288x59xf32> to vector<32x59xf32>
    %106 = arith.addf %105, %90 : vector<32x59xf32>
    %107 = vector.extract_strided_slice %104 {offsets = [32, 0], sizes = [256, 59], strides = [1, 1]} : vector<288x59xf32> to vector<256x59xf32>
    %108 = vector.extract_strided_slice %86 {offsets = [0, 1], sizes = [256, 59], strides = [1, 1]} : vector<256x60xf32> to vector<256x59xf32>
    %109 = arith.addf %107, %108 : vector<256x59xf32>
    %c0_50 = arith.constant 0 : index
    %c0_51 = arith.constant 0 : index
    %110 = vector.load %arg15[%c0_50, %c0_51] : memref<64x32xf32, #tpu.memory_space<vmem>>, vector<64x32xf32>
    %c0_52 = arith.constant 0 : index
    %c0_53 = arith.constant 0 : index
    %111 = vector.load %arg16[%c0_52, %c0_53] : memref<64x32xf32, #tpu.memory_space<vmem>>, vector<64x32xf32>
    %c0_54 = arith.constant 0 : index
    %c0_55 = arith.constant 0 : index
    %112 = vector.load %arg17[%c0_54, %c0_55] : memref<288x32xf32, #tpu.memory_space<vmem>>, vector<288x32xf32>
    %113 = vector.extract_strided_slice %106 {offsets = [0, 1], sizes = [32, 58], strides = [1, 1]} : vector<32x59xf32> to vector<32x58xf32>
    %114 = tpu.iota {dimensions = array<i32: 0>} : vector<59x58xi32>
    %115 = tpu.iota {dimensions = array<i32: 1>} : vector<59x58xi32>
    %c1_i32_56 = arith.constant 1 : i32
    %116 = vector.broadcast %c1_i32_56 : i32 to vector<59x58xi32>
    %117 = arith.addi %114, %116 : vector<59x58xi32>
    %118 = arith.cmpi eq, %117, %115 : vector<59x58xi32>
    %cst_57 = arith.constant 1.000000e+00 : f32
    %cst_58 = arith.constant 0.000000e+00 : f32
    %119 = vector.broadcast %cst_57 : f32 to vector<59x58xf32>
    %120 = vector.broadcast %cst_58 : f32 to vector<59x58xf32>
    %121 = arith.select %118, %119, %120 : vector<59x58xi1>, vector<59x58xf32>
    %cst_59 = arith.constant dense<0.000000e+00> : vector<32x58xf32>
    %122 = tpu.matmul %106, %121, %cst_59 {dimension_numbers = #tpu.dot_dimension_numbers<[1], [0], [0], [1], [0, 0, 1, 1], [], []>} : vector<32x59xf32>, vector<59x58xf32>, vector<32x58xf32> -> vector<32x58xf32>
    %cst_60 = arith.constant dense<0.000000e+00> : vector<64x58xf32>
    %123 = tpu.matmul %110, %122, %cst_60 {dimension_numbers = #tpu.dot_dimension_numbers<[1], [0], [0], [1], [0, 0, 1, 1], [], []>} : vector<64x32xf32>, vector<32x58xf32>, vector<64x58xf32> -> vector<64x58xf32>
    %cst_61 = arith.constant dense<0.000000e+00> : vector<64x58xf32>
    %124 = tpu.matmul %111, %113, %cst_61 {dimension_numbers = #tpu.dot_dimension_numbers<[1], [0], [0], [1], [0, 0, 1, 1], [], []>} : vector<64x32xf32>, vector<32x58xf32>, vector<64x58xf32> -> vector<64x58xf32>
    %125 = arith.addf %123, %124 : vector<64x58xf32>
    %126 = vector.extract_strided_slice %125 {offsets = [0, 0], sizes = [32, 58], strides = [1, 1]} : vector<64x58xf32> to vector<32x58xf32>
    %127 = math.tanh %126 : vector<32x58xf32>
    %128 = vector.extract_strided_slice %125 {offsets = [32, 0], sizes = [32, 58], strides = [1, 1]} : vector<64x58xf32> to vector<32x58xf32>
    %129 = arith.negf %128 : vector<32x58xf32>
    %130 = math.exp %129 : vector<32x58xf32>
    %cst_62 = arith.constant 1.000000e+00 : f32
    %131 = vector.broadcast %cst_62 : f32 to vector<32x58xf32>
    %132 = arith.addf %131, %130 : vector<32x58xf32>
    %133 = arith.divf %131, %132 : vector<32x58xf32>
    %134 = arith.mulf %127, %133 : vector<32x58xf32>
    %cst_63 = arith.constant dense<0.000000e+00> : vector<288x58xf32>
    %135 = tpu.matmul %112, %134, %cst_63 {dimension_numbers = #tpu.dot_dimension_numbers<[1], [0], [0], [1], [0, 0, 1, 1], [], []>} : vector<288x32xf32>, vector<32x58xf32>, vector<288x58xf32> -> vector<288x58xf32>
    %136 = vector.extract_strided_slice %135 {offsets = [0, 0], sizes = [32, 58], strides = [1, 1]} : vector<288x58xf32> to vector<32x58xf32>
    %137 = arith.addf %136, %113 : vector<32x58xf32>
    %138 = vector.extract_strided_slice %135 {offsets = [32, 0], sizes = [256, 58], strides = [1, 1]} : vector<288x58xf32> to vector<256x58xf32>
    %139 = vector.extract_strided_slice %109 {offsets = [0, 1], sizes = [256, 58], strides = [1, 1]} : vector<256x59xf32> to vector<256x58xf32>
    %140 = arith.addf %138, %139 : vector<256x58xf32>
    %c0_64 = arith.constant 0 : index
    %c0_65 = arith.constant 0 : index
    %141 = vector.load %arg18[%c0_64, %c0_65] : memref<64x32xf32, #tpu.memory_space<vmem>>, vector<64x32xf32>
    %c0_66 = arith.constant 0 : index
    %c0_67 = arith.constant 0 : index
    %142 = vector.load %arg19[%c0_66, %c0_67] : memref<64x32xf32, #tpu.memory_space<vmem>>, vector<64x32xf32>
    %c0_68 = arith.constant 0 : index
    %c0_69 = arith.constant 0 : index
    %143 = vector.load %arg20[%c0_68, %c0_69] : memref<288x32xf32, #tpu.memory_space<vmem>>, vector<288x32xf32>
    %144 = vector.extract_strided_slice %137 {offsets = [0, 2], sizes = [32, 56], strides = [1, 1]} : vector<32x58xf32> to vector<32x56xf32>
    %145 = tpu.iota {dimensions = array<i32: 0>} : vector<58x56xi32>
    %146 = tpu.iota {dimensions = array<i32: 1>} : vector<58x56xi32>
    %c2_i32_70 = arith.constant 2 : i32
    %147 = vector.broadcast %c2_i32_70 : i32 to vector<58x56xi32>
    %148 = arith.addi %145, %147 : vector<58x56xi32>
    %149 = arith.cmpi eq, %148, %146 : vector<58x56xi32>
    %cst_71 = arith.constant 1.000000e+00 : f32
    %cst_72 = arith.constant 0.000000e+00 : f32
    %150 = vector.broadcast %cst_71 : f32 to vector<58x56xf32>
    %151 = vector.broadcast %cst_72 : f32 to vector<58x56xf32>
    %152 = arith.select %149, %150, %151 : vector<58x56xi1>, vector<58x56xf32>
    %cst_73 = arith.constant dense<0.000000e+00> : vector<32x56xf32>
    %153 = tpu.matmul %137, %152, %cst_73 {dimension_numbers = #tpu.dot_dimension_numbers<[1], [0], [0], [1], [0, 0, 1, 1], [], []>} : vector<32x58xf32>, vector<58x56xf32>, vector<32x56xf32> -> vector<32x56xf32>
    %cst_74 = arith.constant dense<0.000000e+00> : vector<64x56xf32>
    %154 = tpu.matmul %141, %153, %cst_74 {dimension_numbers = #tpu.dot_dimension_numbers<[1], [0], [0], [1], [0, 0, 1, 1], [], []>} : vector<64x32xf32>, vector<32x56xf32>, vector<64x56xf32> -> vector<64x56xf32>
    %cst_75 = arith.constant dense<0.000000e+00> : vector<64x56xf32>
    %155 = tpu.matmul %142, %144, %cst_75 {dimension_numbers = #tpu.dot_dimension_numbers<[1], [0], [0], [1], [0, 0, 1, 1], [], []>} : vector<64x32xf32>, vector<32x56xf32>, vector<64x56xf32> -> vector<64x56xf32>
    %156 = arith.addf %154, %155 : vector<64x56xf32>
    %157 = vector.extract_strided_slice %156 {offsets = [0, 0], sizes = [32, 56], strides = [1, 1]} : vector<64x56xf32> to vector<32x56xf32>
    %158 = math.tanh %157 : vector<32x56xf32>
    %159 = vector.extract_strided_slice %156 {offsets = [32, 0], sizes = [32, 56], strides = [1, 1]} : vector<64x56xf32> to vector<32x56xf32>
    %160 = arith.negf %159 : vector<32x56xf32>
    %161 = math.exp %160 : vector<32x56xf32>
    %cst_76 = arith.constant 1.000000e+00 : f32
    %162 = vector.broadcast %cst_76 : f32 to vector<32x56xf32>
    %163 = arith.addf %162, %161 : vector<32x56xf32>
    %164 = arith.divf %162, %163 : vector<32x56xf32>
    %165 = arith.mulf %158, %164 : vector<32x56xf32>
    %cst_77 = arith.constant dense<0.000000e+00> : vector<288x56xf32>
    %166 = tpu.matmul %143, %165, %cst_77 {dimension_numbers = #tpu.dot_dimension_numbers<[1], [0], [0], [1], [0, 0, 1, 1], [], []>} : vector<288x32xf32>, vector<32x56xf32>, vector<288x56xf32> -> vector<288x56xf32>
    %167 = vector.extract_strided_slice %166 {offsets = [32, 0], sizes = [256, 56], strides = [1, 1]} : vector<288x56xf32> to vector<256x56xf32>
    %168 = vector.extract_strided_slice %140 {offsets = [0, 2], sizes = [256, 56], strides = [1, 1]} : vector<256x58xf32> to vector<256x56xf32>
    %169 = arith.addf %167, %168 : vector<256x56xf32>
    %cst_78 = arith.constant 0.000000e+00 : f32
    %170 = vector.broadcast %cst_78 : f32 to vector<256x56xf32>
    %171 = arith.maximumf %169, %170 : vector<256x56xf32>
    %c0_79 = arith.constant 0 : index
    %c0_80 = arith.constant 0 : index
    %172 = vector.load %arg21[%c0_79, %c0_80] : memref<128x256xf32, #tpu.memory_space<vmem>>, vector<128x256xf32>
    %cst_81 = arith.constant dense<0.000000e+00> : vector<128x56xf32>
    %173 = tpu.matmul %172, %171, %cst_81 {dimension_numbers = #tpu.dot_dimension_numbers<[1], [0], [0], [1], [0, 0, 1, 1], [], []>} : vector<128x256xf32>, vector<256x56xf32>, vector<128x56xf32> -> vector<128x56xf32>
    %c0_82 = arith.constant 0 : index
    %c0_83 = arith.constant 0 : index
    %174 = vector.load %arg22[%c0_82, %c0_83] : memref<128x1xf32, #tpu.memory_space<vmem>>, vector<128x1xf32>
    %175 = vector.broadcast %174 : vector<128x1xf32> to vector<128x56xf32>
    %176 = arith.addf %173, %175 : vector<128x56xf32>
    %cst_84 = arith.constant 0.000000e+00 : f32
    %177 = vector.broadcast %cst_84 : f32 to vector<128x56xf32>
    %178 = arith.maximumf %176, %177 : vector<128x56xf32>
    %179 = vector.extract_strided_slice %178 {offsets = [0, 0], sizes = [128, 54], strides = [1, 1]} : vector<128x56xf32> to vector<128x54xf32>
    %180 = vector.extract_strided_slice %178 {offsets = [0, 1], sizes = [128, 54], strides = [1, 1]} : vector<128x56xf32> to vector<128x54xf32>
    %181 = arith.maximumf %179, %180 : vector<128x54xf32>
    %182 = vector.extract_strided_slice %178 {offsets = [0, 2], sizes = [128, 54], strides = [1, 1]} : vector<128x56xf32> to vector<128x54xf32>
    %183 = arith.maximumf %181, %182 : vector<128x54xf32>
    %184 = tpu.iota {dimensions = array<i32: 0>} : vector<54x27xi32>
    %185 = tpu.iota {dimensions = array<i32: 1>} : vector<54x27xi32>
    %c2_i32_85 = arith.constant 2 : i32
    %186 = vector.broadcast %c2_i32_85 : i32 to vector<54x27xi32>
    %187 = arith.muli %186, %185 : vector<54x27xi32>
    %188 = arith.cmpi eq, %184, %187 : vector<54x27xi32>
    %cst_86 = arith.constant 1.000000e+00 : f32
    %cst_87 = arith.constant 0.000000e+00 : f32
    %189 = vector.broadcast %cst_86 : f32 to vector<54x27xf32>
    %190 = vector.broadcast %cst_87 : f32 to vector<54x27xf32>
    %191 = arith.select %188, %189, %190 : vector<54x27xi1>, vector<54x27xf32>
    %cst_88 = arith.constant dense<0.000000e+00> : vector<128x27xf32>
    %192 = tpu.matmul %183, %191, %cst_88 {dimension_numbers = #tpu.dot_dimension_numbers<[1], [0], [0], [1], [0, 0, 1, 1], [], []>} : vector<128x54xf32>, vector<54x27xf32>, vector<128x27xf32> -> vector<128x27xf32>
    %c0_89 = arith.constant 0 : index
    %c0_90 = arith.constant 0 : index
    %193 = vector.load %arg23[%c0_89, %c0_90] : memref<32x128xf32, #tpu.memory_space<vmem>>, vector<32x128xf32>
    %cst_91 = arith.constant dense<0.000000e+00> : vector<32x27xf32>
    %194 = tpu.matmul %193, %192, %cst_91 {dimension_numbers = #tpu.dot_dimension_numbers<[1], [0], [0], [1], [0, 0, 1, 1], [], []>} : vector<32x128xf32>, vector<128x27xf32>, vector<32x27xf32> -> vector<32x27xf32>
    %c0_92 = arith.constant 0 : index
    %c0_93 = arith.constant 0 : index
    %195 = vector.load %arg24[%c0_92, %c0_93] : memref<32x1xf32, #tpu.memory_space<vmem>>, vector<32x1xf32>
    %196 = vector.broadcast %195 : vector<32x1xf32> to vector<32x27xf32>
    %197 = arith.addf %194, %196 : vector<32x27xf32>
    %cst_94 = arith.constant 0.000000e+00 : f32
    %198 = vector.broadcast %cst_94 : f32 to vector<32x27xf32>
    %199 = arith.maximumf %197, %198 : vector<32x27xf32>
    %200 = vector.extract_strided_slice %199 {offsets = [0, 0], sizes = [32, 25], strides = [1, 1]} : vector<32x27xf32> to vector<32x25xf32>
    %201 = vector.extract_strided_slice %199 {offsets = [0, 1], sizes = [32, 25], strides = [1, 1]} : vector<32x27xf32> to vector<32x25xf32>
    %202 = arith.maximumf %200, %201 : vector<32x25xf32>
    %203 = vector.extract_strided_slice %199 {offsets = [0, 2], sizes = [32, 25], strides = [1, 1]} : vector<32x27xf32> to vector<32x25xf32>
    %204 = arith.maximumf %202, %203 : vector<32x25xf32>
    %205 = tpu.iota {dimensions = array<i32: 0>} : vector<25x13xi32>
    %206 = tpu.iota {dimensions = array<i32: 1>} : vector<25x13xi32>
    %c2_i32_95 = arith.constant 2 : i32
    %207 = vector.broadcast %c2_i32_95 : i32 to vector<25x13xi32>
    %208 = arith.muli %207, %206 : vector<25x13xi32>
    %209 = arith.cmpi eq, %205, %208 : vector<25x13xi32>
    %cst_96 = arith.constant 1.000000e+00 : f32
    %cst_97 = arith.constant 0.000000e+00 : f32
    %210 = vector.broadcast %cst_96 : f32 to vector<25x13xf32>
    %211 = vector.broadcast %cst_97 : f32 to vector<25x13xf32>
    %212 = arith.select %209, %210, %211 : vector<25x13xi1>, vector<25x13xf32>
    %cst_98 = arith.constant dense<0.000000e+00> : vector<32x13xf32>
    %213 = tpu.matmul %204, %212, %cst_98 {dimension_numbers = #tpu.dot_dimension_numbers<[1], [0], [0], [1], [0, 0, 1, 1], [], []>} : vector<32x25xf32>, vector<25x13xf32>, vector<32x13xf32> -> vector<32x13xf32>
    %c0_99 = arith.constant 0 : index
    %c0_100 = arith.constant 0 : index
    %c0_101 = arith.constant 0 : index
    %214 = vector.load %arg25[%c0_99, %c0_100, %c0_101] : memref<1x32x13xf32, #tpu.memory_space<vmem>>, vector<1x32x13xf32>
    %215 = vector.shape_cast %214 : vector<1x32x13xf32> to vector<32x13xf32>
    %216 = vector.shape_cast %213 : vector<32x13xf32> to vector<1x32x13xf32>
    tpu.vector_store %arg25[%c0_99, %c0_100, %c0_101], %216 {strides = array<i32>} : memref<1x32x13xf32, #tpu.memory_space<vmem>>, vector<1x32x13xf32>,
    return
  }
  func.func @transform_0(%arg0: i32) -> (i32, i32, i32) {
    %c0_i32 = arith.constant 0 : i32
    %c0_i32_0 = arith.constant 0 : i32
    %c0_i32_1 = arith.constant 0 : i32
    return %arg0, %c0_i32, %c0_i32_0 : i32, i32, i32
  }
  func.func @transform_1(%arg0: i32) -> (i32, i32) {
    %c0_i32 = arith.constant 0 : i32
    %c0_i32_0 = arith.constant 0 : i32
    %c0_i32_1 = arith.constant 0 : i32
    return %c0_i32, %c0_i32_0 : i32, i32
  }
  func.func @transform_2(%arg0: i32) -> (i32, i32) {
    %c0_i32 = arith.constant 0 : i32
    %c0_i32_0 = arith.constant 0 : i32
    %c0_i32_1 = arith.constant 0 : i32
    return %c0_i32, %c0_i32_0 : i32, i32
  }
  func.func @transform_3(%arg0: i32) -> (i32, i32) {
    %c0_i32 = arith.constant 0 : i32
    %c0_i32_0 = arith.constant 0 : i32
    %c0_i32_1 = arith.constant 0 : i32
    return %c0_i32, %c0_i32_0 : i32, i32
  }
  func.func @transform_4(%arg0: i32) -> (i32, i32) {
    %c0_i32 = arith.constant 0 : i32
    %c0_i32_0 = arith.constant 0 : i32
    %c0_i32_1 = arith.constant 0 : i32
    return %c0_i32, %c0_i32_0 : i32, i32
  }
  func.func @transform_5(%arg0: i32) -> (i32, i32) {
    %c0_i32 = arith.constant 0 : i32
    %c0_i32_0 = arith.constant 0 : i32
    %c0_i32_1 = arith.constant 0 : i32
    return %c0_i32, %c0_i32_0 : i32, i32
  }
  func.func @transform_6(%arg0: i32) -> (i32, i32) {
    %c0_i32 = arith.constant 0 : i32
    %c0_i32_0 = arith.constant 0 : i32
    %c0_i32_1 = arith.constant 0 : i32
    return %c0_i32, %c0_i32_0 : i32, i32
  }
  func.func @transform_7(%arg0: i32) -> (i32, i32) {
    %c0_i32 = arith.constant 0 : i32
    %c0_i32_0 = arith.constant 0 : i32
    %c0_i32_1 = arith.constant 0 : i32
    return %c0_i32, %c0_i32_0 : i32, i32
  }
  func.func @transform_8(%arg0: i32) -> (i32, i32) {
    %c0_i32 = arith.constant 0 : i32
    %c0_i32_0 = arith.constant 0 : i32
    %c0_i32_1 = arith.constant 0 : i32
    return %c0_i32, %c0_i32_0 : i32, i32
  }
  func.func @transform_9(%arg0: i32) -> (i32, i32) {
    %c0_i32 = arith.constant 0 : i32
    %c0_i32_0 = arith.constant 0 : i32
    %c0_i32_1 = arith.constant 0 : i32
    return %c0_i32, %c0_i32_0 : i32, i32
  }
  func.func @transform_10(%arg0: i32) -> (i32, i32) {
    %c0_i32 = arith.constant 0 : i32
    %c0_i32_0 = arith.constant 0 : i32
    %c0_i32_1 = arith.constant 0 : i32
    return %c0_i32, %c0_i32_0 : i32, i32
  }
  func.func @transform_11(%arg0: i32) -> (i32, i32) {
    %c0_i32 = arith.constant 0 : i32
    %c0_i32_0 = arith.constant 0 : i32
    %c0_i32_1 = arith.constant 0 : i32
    return %c0_i32, %c0_i32_0 : i32, i32
  }
  func.func @transform_12(%arg0: i32) -> (i32, i32) {
    %c0_i32 = arith.constant 0 : i32
    %c0_i32_0 = arith.constant 0 : i32
    %c0_i32_1 = arith.constant 0 : i32
    return %c0_i32, %c0_i32_0 : i32, i32
  }
  func.func @transform_13(%arg0: i32) -> (i32, i32) {
    %c0_i32 = arith.constant 0 : i32
    %c0_i32_0 = arith.constant 0 : i32
    %c0_i32_1 = arith.constant 0 : i32
    return %c0_i32, %c0_i32_0 : i32, i32
  }
  func.func @transform_14(%arg0: i32) -> (i32, i32) {
    %c0_i32 = arith.constant 0 : i32
    %c0_i32_0 = arith.constant 0 : i32
    %c0_i32_1 = arith.constant 0 : i32
    return %c0_i32, %c0_i32_0 : i32, i32
  }
  func.func @transform_15(%arg0: i32) -> (i32, i32) {
    %c0_i32 = arith.constant 0 : i32
    %c0_i32_0 = arith.constant 0 : i32
    %c0_i32_1 = arith.constant 0 : i32
    return %c0_i32, %c0_i32_0 : i32, i32
  }
  func.func @transform_16(%arg0: i32) -> (i32, i32) {
    %c0_i32 = arith.constant 0 : i32
    %c0_i32_0 = arith.constant 0 : i32
    %c0_i32_1 = arith.constant 0 : i32
    return %c0_i32, %c0_i32_0 : i32, i32
  }
  func.func @transform_17(%arg0: i32) -> (i32, i32) {
    %c0_i32 = arith.constant 0 : i32
    %c0_i32_0 = arith.constant 0 : i32
    %c0_i32_1 = arith.constant 0 : i32
    return %c0_i32, %c0_i32_0 : i32, i32
  }
  func.func @transform_18(%arg0: i32) -> (i32, i32) {
    %c0_i32 = arith.constant 0 : i32
    %c0_i32_0 = arith.constant 0 : i32
    %c0_i32_1 = arith.constant 0 : i32
    return %c0_i32, %c0_i32_0 : i32, i32
  }
  func.func @transform_19(%arg0: i32) -> (i32, i32) {
    %c0_i32 = arith.constant 0 : i32
    %c0_i32_0 = arith.constant 0 : i32
    %c0_i32_1 = arith.constant 0 : i32
    return %c0_i32, %c0_i32_0 : i32, i32
  }
  func.func @transform_20(%arg0: i32) -> (i32, i32) {
    %c0_i32 = arith.constant 0 : i32
    %c0_i32_0 = arith.constant 0 : i32
    %c0_i32_1 = arith.constant 0 : i32
    return %c0_i32, %c0_i32_0 : i32, i32
  }
  func.func @transform_21(%arg0: i32) -> (i32, i32) {
    %c0_i32 = arith.constant 0 : i32
    %c0_i32_0 = arith.constant 0 : i32
    %c0_i32_1 = arith.constant 0 : i32
    return %c0_i32, %c0_i32_0 : i32, i32
  }
  func.func @transform_22(%arg0: i32) -> (i32, i32) {
    %c0_i32 = arith.constant 0 : i32
    %c0_i32_0 = arith.constant 0 : i32
    %c0_i32_1 = arith.constant 0 : i32
    return %c0_i32, %c0_i32_0 : i32, i32
  }
  func.func @transform_23(%arg0: i32) -> (i32, i32) {
    %c0_i32 = arith.constant 0 : i32
    %c0_i32_0 = arith.constant 0 : i32
    %c0_i32_1 = arith.constant 0 : i32
    return %c0_i32, %c0_i32_0 : i32, i32
  }
  func.func @transform_24(%arg0: i32) -> (i32, i32, i32) {
    %c0_i32 = arith.constant 0 : i32
    %c0_i32_0 = arith.constant 0 : i32
    %c0_i32_1 = arith.constant 0 : i32
    return %arg0, %c0_i32, %c0_i32_0 : i32, i32, i32
  }
}

</mosaic_0001>

<bundles_post_ra>
// kernel: forward.3
= control target key start
LH: loop header
LB: loop body
LE: loop exit
PB: predicated region body
PF: predicated region fallthrough
CT: control target
= control target key end

     0   :  { %v448_v25 = vlaneseq  ;;  %v2582_v26 = vmov 1983009808   ;;  %vm509_vm0 = vcmask 261120   ;;  %s4845_s0 = inlined_call_operand.vmem [shape: f32[2,416], index: 0, kind: input, shape index: {}]   ;;  %s4846_s1 = inlined_call_operand.vmem [shape: f32[416,1024], index: 1, kind: input, shape index: {}]   ;;  %s4847_s2 = inlined_call_operand.vmem [shape: f32[1,1024], index: 2, kind: input, shape index: {}]   ;;  %s4848_s3 = inlined_call_operand.vmem [shape: f32[1024,256], index: 3, kind: input, shape index: {}]   ;;  %s4849_s4 = inlined_call_operand.vmem [shape: f32[1,256], index: 4, kind: input, shape index: {}]   ;;  %s4850_s5 = inlined_call_operand.vmem [shape: f32[256,2], index: 5, kind: input, shape index: {}]   ;;  %s4851_s6 = inlined_call_operand.vmem [shape: f32[1,2], index: 6, kind: input, shape index: {}]   ;;  %s4852_s7 = inlined_call_operand.vmem [shape: f32[2,2], index: 7, kind: output, shape index: {0}]   ;;  %s4853_s8 = inlined_call_operand.hbm [shape: f32[2,2], index: 8, kind: output, shape index: {1}]  }
   0x1   :  { %v31_v0 = vld [vmem:[%s4846_s1 + $0x8] sm:$0xff]  ;;  %v30_v2 = vld [vmem:[%s4846_s1] sm:$0xff]  ;;  %v491_v27 = vunpack.c.l.s4 %v2582_v26 }
   0x2   :  { %v39_v1 = vld [vmem:[%s4846_s1 + $0x48] sm:$0xff]  ;;  %v38_v4 = vld [vmem:[%s4846_s1 + $0x40] sm:$0xff]  ;;  %v2695_v34 = vshrl.u32 %v448_v25, 7 }
   0x3   :  { %v1823_v3 = vpack.c.bf16 %v39_v1, %v31_v0  ;;  %v47_v5 = vld [vmem:[%s4846_s1 + $0x88] sm:$0xff]  ;;  %v1825_v7 = vpack.c.bf16 %v38_v4, %v30_v2  ;;  %v46_v9 = vld [vmem:[%s4846_s1 + $0x80] sm:$0xff]  ;;  %v492_v35 = vunpack.c.0.s8 %v491_v27 }
   0x4   :  { %v55_v6 = vld [vmem:[%s4846_s1 + $0xc8] sm:$0xff]  ;;  %v54_v10 = vld [vmem:[%s4846_s1 + $0xc0] sm:$0xff] }
   0x5   :  { %v1827_v8 = vpack.c.bf16 %v55_v6, %v47_v5  ;;  %v63_v11 = vld [vmem:[%s4846_s1 + $0x108] sm:$0xff]  ;;  %1824 = vmatprep.subr.bf16.mxu1 %v1823_v3  ;;  %v1829_v13 = vpack.c.bf16 %v54_v10, %v46_v9  ;;  %v62_v15 = vld [vmem:[%s4846_s1 + $0x100] sm:$0xff]  ;;  %v2710_v42 = vsub.s32 %v492_v35, %v2695_v34 }
   0x6   :  { %v71_v12 = vld [vmem:[%s4846_s1 + $0x148] sm:$0xff]  ;;  %1826 = vmatpush1.bf16.msra.mxu1 %v1825_v7  ;;  %v70_v16 = vld [vmem:[%s4846_s1 + $0x140] sm:$0xff] }
   0x7   :  { %1828 = vmatprep.subr.bf16.mxu1 %v1827_v8  ;;  %v1831_v14 = vpack.c.bf16 %v71_v12, %v63_v11  ;;  %v79_v17 = vld [vmem:[%s4846_s1 + $0x188] sm:$0xff]  ;;  %v1833_v19 = vpack.c.bf16 %v70_v16, %v62_v15  ;;  %v78_v21 = vld [vmem:[%s4846_s1 + $0x180] sm:$0xff] }
   0x8   :  { %v87_v18 = vld [vmem:[%s4846_s1 + $0x1c8] sm:$0xff]  ;;  %v86_v22 = vld [vmem:[%s4846_s1 + $0x1c0] sm:$0xff] }
   0x9   :  { %v1835_v20 = vpack.c.bf16 %v87_v18, %v79_v17  ;;  %v95_v23 = vld [vmem:[%s4846_s1 + $0x208] sm:$0xff]  ;;  %v1837_v28 = vpack.c.bf16 %v86_v22, %v78_v21  ;;  %v94_v30 = vld [vmem:[%s4846_s1 + $0x200] sm:$0xff] }
   0xa   :  { %1830 = vmatpush1.bf16.msra.mxu1 %v1829_v13  ;;  %v103_v24 = vld [vmem:[%s4846_s1 + $0x248] sm:$0xff]  ;;  %v102_v31 = vld [vmem:[%s4846_s1 + $0x240] sm:$0xff] }
   0xb   :  { %1832 = vmatprep.subr.bf16.mxu1 %v1831_v14  ;;  %v1839_v29 = vpack.c.bf16 %v103_v24, %v95_v23  ;;  %v111_v32 = vld [vmem:[%s4846_s1 + $0x288] sm:$0xff]  ;;  %v1841_v36 = vpack.c.bf16 %v102_v31, %v94_v30  ;;  %v110_v38 = vld [vmem:[%s4846_s1 + $0x280] sm:$0xff] }
   0xc   :  { %v119_v33 = vld [vmem:[%s4846_s1 + $0x2c8] sm:$0xff]  ;;  %v118_v39 = vld [vmem:[%s4846_s1 + $0x2c0] sm:$0xff] }
   0xd   :  { %v1843_v37 = vpack.c.bf16 %v119_v33, %v111_v32  ;;  %v127_v40 = vld [vmem:[%s4846_s1 + $0x308] sm:$0xff]  ;;  %v1845_v43 = vpack.c.bf16 %v118_v39, %v110_v38  ;;  %v126_v45 = vld [vmem:[%s4846_s1 + $0x300] sm:$0xff] }
   0xe   :  { %1834 = vmatpush1.bf16.msra.mxu1 %v1833_v19  ;;  %v135_v41 = vld [vmem:[%s4846_s1 + $0x348] sm:$0xff]  ;;  %v134_v46 = vld [vmem:[%s4846_s1 + $0x340] sm:$0xff] }
   0xf   :  { %1836 = vmatprep.subr.bf16.mxu1 %v1835_v20  ;;  %v1847_v44 = vpack.c.bf16 %v135_v41, %v127_v40  ;;  %v2721_v47 = vld [vmem:[%s4845_s0] sm:$0xff]  ;;  %v143_v48 = vld [vmem:[%s4846_s1 + $0x388] sm:$0xff]  ;;  %v1849_v51 = vpack.c.bf16 %v134_v46, %v126_v45 }
  0x10   :  { %v151_v49 = vld [vmem:[%s4846_s1 + $0x3c8] sm:$0xff]  ;;  %v2731_v50 = vrot.slane %v2721_v47, %v2710_v42  ;;  %v142_v54 = vld [vmem:[%s4846_s1 + $0x380] sm:$0xff] }
  0x11   :  { %v1851_v53 = vpack.c.bf16 %v151_v49, %v143_v48  ;;  %v150_v55 = vld [vmem:[%s4846_s1 + $0x3c0] sm:$0xff]  ;;  %v159_v56 = vld [vmem:[%s4846_s1 + $0x408] sm:$0xff] }
  0x12   :  { %1838 = vmatpush1.bf16.msra.mxu1 %v1837_v28  ;;  %v2735_v52 = vcombine.high %v2731_v50, %v2731_v50  ;;  %v167_v57 = vld [vmem:[%s4846_s1 + $0x448] sm:$0xff]  ;;  %v1853_v58 = vpack.c.bf16 %v150_v55, %v142_v54  ;;  %v158_v60 = vld [vmem:[%s4846_s1 + $0x400] sm:$0xff] }
  0x13   :  { %1840 = vmatprep.subr.bf16.mxu1 %v1839_v29  ;;  %v1855_v59 = vpack.c.bf16 %v167_v57, %v159_v56  ;;  %v166_v61 = vld [vmem:[%s4846_s1 + $0x440] sm:$0xff]  ;;  %v175_v62 = vld [vmem:[%s4846_s1 + $0x488] sm:$0xff] }
  0x14   :  { %576 = vmatprep.mubr.f32.mxu1 %v2735_v52  ;;  %860 = vmatprep.mubr.f32.mxu0 %v2735_v52  ;;  %v183_v63 = vld [vmem:[%s4846_s1 + $0x4c8] sm:$0xff]  ;;  %v1857_v0 = vpack.c.bf16 %v166_v61, %v158_v60  ;;  %v174_v2 = vld [vmem:[%s4846_s1 + $0x480] sm:$0xff] }
  0x15   :  { %v1859_v1 = vpack.c.bf16 %v183_v63, %v175_v62  ;;  %v182_v3 = vld [vmem:[%s4846_s1 + $0x4c0] sm:$0xff]  ;;  %v191_v4 = vld [vmem:[%s4846_s1 + $0x508] sm:$0xff] }
  0x16   :  { %1842 = vmatpush1.bf16.msra.mxu1 %v1841_v36  ;;  %v199_v5 = vld [vmem:[%s4846_s1 + $0x548] sm:$0xff]  ;;  %v1861_v6 = vpack.c.bf16 %v182_v3, %v174_v2  ;;  %v190_v8 = vld [vmem:[%s4846_s1 + $0x500] sm:$0xff] }
  0x17   :  { %1844 = vmatprep.subr.bf16.mxu1 %v1843_v37  ;;  %v1863_v7 = vpack.c.bf16 %v199_v5, %v191_v4  ;;  %v198_v9 = vld [vmem:[%s4846_s1 + $0x540] sm:$0xff]  ;;  %v207_v10 = vld [vmem:[%s4846_s1 + $0x588] sm:$0xff]  ;;  %v489_v5 = vcombine.high %v2721_v47, %v2721_v47 }
  0x18   :  { %v215_v11 = vld [vmem:[%s4846_s1 + $0x5c8] sm:$0xff]  ;;  %v1865_v12 = vpack.c.bf16 %v198_v9, %v190_v8  ;;  %v206_v14 = vld [vmem:[%s4846_s1 + $0x580] sm:$0xff] }
  0x19   :  { %v1867_v13 = vpack.c.bf16 %v215_v11, %v207_v10  ;;  %v214_v15 = vld [vmem:[%s4846_s1 + $0x5c0] sm:$0xff]  ;;  %v223_v16 = vld [vmem:[%s4846_s1 + $0x608] sm:$0xff] }
  0x1a   :  { %1846 = vmatpush1.bf16.msra.mxu1 %v1845_v43  ;;  %v231_v17 = vld [vmem:[%s4846_s1 + $0x648] sm:$0xff]  ;;  %v1869_v19 = vpack.c.bf16 %v214_v15, %v206_v14  ;;  %v222_v20 = vld [vmem:[%s4846_s1 + $0x600] sm:$0xff]  ;;  %v2916_v15 = vrot.slane %v489_v5, %v2710_v42 }
  0x1b   :  { %1848 = vmatprep.subr.bf16.mxu1 %v1847_v44  ;;  %v35_v18 = vld [vmem:[%s4846_s1 + $0x28] sm:$0xff]  ;;  %v230_v21 = vld [vmem:[%s4846_s1 + $0x640] sm:$0xff]  ;;  %v1871_v23 = vpack.c.bf16 %v231_v17, %v223_v16 }
  0x1c   :  { %v43_v22 = vld [vmem:[%s4846_s1 + $0x68] sm:$0xff]  ;;  %v34_v26 = vld [vmem:[%s4846_s1 + $0x20] sm:$0xff]  ;;  %v1873_v35 = vpack.c.bf16 %v230_v21, %v222_v20 }
  0x1d   :  { %v239_v24 = vld [vmem:[%s4846_s1 + $0x688] sm:$0xff]  ;;  %v2031_v25 = vpack.c.bf16 %v43_v22, %v35_v18  ;;  %v42_v27 = vld [vmem:[%s4846_s1 + $0x60] sm:$0xff] }
  0x1e   :  { %1850 = vmatpush1.bf16.msra.mxu1 %v1849_v51  ;;  %v247_v28 = vld [vmem:[%s4846_s1 + $0x6c8] sm:$0xff]  ;;  %v2033_v29 = vpack.c.bf16 %v42_v27, %v34_v26  ;;  %v50_v33 = vld [vmem:[%s4846_s1 + $0xa0] sm:$0xff]  ;;  %v2944_v27 = vcombine.high %v2916_v15, %v2916_v15 }
  0x1f   :  { %1852 = vmatprep.subr.bf16.mxu1 %v1851_v53  ;;  %v51_v30 = vld [vmem:[%s4846_s1 + $0xa8] sm:$0xff]  ;;  %2032 = vmatprep.subr.bf16.mxu0 %v2031_v25  ;;  %v238_v36 = vld [vmem:[%s4846_s1 + $0x680] sm:$0xff]  ;;  %v1875_v39 = vpack.c.bf16 %v247_v28, %v239_v24 }
  0x20   :  { %v59_v31 = vld [vmem:[%s4846_s1 + $0xe8] sm:$0xff]  ;;  %v246_v37 = vld [vmem:[%s4846_s1 + $0x6c0] sm:$0xff]  ;;  %2034 = vmatpush1.bf16.msra.mxu0 %v2033_v29 }
  0x21   :  { %v2035_v32 = vpack.c.bf16 %v59_v31, %v51_v30  ;;  %v58_v38 = vld [vmem:[%s4846_s1 + $0xe0] sm:$0xff]  ;;  %v255_v40 = vld [vmem:[%s4846_s1 + $0x708] sm:$0xff]  ;;  %v1877_v53 = vpack.c.bf16 %v246_v37, %v238_v36 }
  0x22   :  { %1854 = vmatpush1.bf16.msra.mxu1 %v1853_v58  ;;  %v2037_v41 = vpack.c.bf16 %v58_v38, %v50_v33  ;;  %v67_v43 = vld [vmem:[%s4846_s1 + $0x128] sm:$0xff]  ;;  %v66_v48 = vld [vmem:[%s4846_s1 + $0x120] sm:$0xff] }
  0x23   :  { %1856 = vmatprep.subr.bf16.mxu1 %v1855_v59  ;;  %2036 = vmatprep.subr.bf16.mxu0 %v2035_v32  ;;  %v75_v44 = vld [vmem:[%s4846_s1 + $0x168] sm:$0xff]  ;;  %v74_v49 = vld [vmem:[%s4846_s1 + $0x160] sm:$0xff] }
  0x24   :  { %v263_v45 = vld [vmem:[%s4846_s1 + $0x748] sm:$0xff]  ;;  %v2039_v46 = vpack.c.bf16 %v75_v44, %v67_v43  ;;  %v254_v54 = vld [vmem:[%s4846_s1 + $0x700] sm:$0xff]  ;;  %2038 = vmatpush1.bf16.msra.mxu0 %v2037_v41  ;;  %v2041_v56 = vpack.c.bf16 %v74_v49, %v66_v48 }
  0x25   :  { %v83_v51 = vld [vmem:[%s4846_s1 + $0x1a8] sm:$0xff]  ;;  %v262_v55 = vld [vmem:[%s4846_s1 + $0x740] sm:$0xff]  ;;  %v1879_v58 = vpack.c.bf16 %v263_v45, %v255_v40 }
  0x26   :  { %1858 = vmatpush1.bf16.msra.mxu1 %v1857_v0  ;;  %v91_v57 = vld [vmem:[%s4846_s1 + $0x1e8] sm:$0xff]  ;;  %2040 = vmatprep.subr.bf16.mxu0 %v2039_v46  ;;  %v82_v61 = vld [vmem:[%s4846_s1 + $0x1a0] sm:$0xff]  ;;  %v1881_v2 = vpack.c.bf16 %v262_v55, %v254_v54 }
  0x27   :  { %1860 = vmatprep.subr.bf16.mxu1 %v1859_v1  ;;  %v271_v59 = vld [vmem:[%s4846_s1 + $0x788] sm:$0xff]  ;;  %v2043_v60 = vpack.c.bf16 %v91_v57, %v83_v51  ;;  %v90_v62 = vld [vmem:[%s4846_s1 + $0x1e0] sm:$0xff] }
  0x28   :  { %v279_v63 = vld [vmem:[%s4846_s1 + $0x7c8] sm:$0xff]  ;;  %v270_v3 = vld [vmem:[%s4846_s1 + $0x780] sm:$0xff]  ;;  %2042 = vmatpush1.bf16.msra.mxu0 %v2041_v56 }
  0x29   :  { %v99_v0 = vld [vmem:[%s4846_s1 + $0x228] sm:$0xff]  ;;  %v278_v4 = vld [vmem:[%s4846_s1 + $0x7c0] sm:$0xff]  ;;  %2044 = vmatprep.subr.bf16.mxu0 %v2043_v60 }
  0x2a   :  { %1862 = vmatpush1.bf16.msra.mxu1 %v1861_v6  ;;  %v107_v1 = vld [vmem:[%s4846_s1 + $0x268] sm:$0xff]  ;;  %v2045_v6 = vpack.c.bf16 %v90_v62, %v82_v61  ;;  %v98_v10 = vld [vmem:[%s4846_s1 + $0x220] sm:$0xff]  ;;  %v1885_v14 = vpack.c.bf16 %v278_v4, %v270_v3 }
  0x2b   :  { %1864 = vmatprep.subr.bf16.mxu1 %v1863_v7  ;;  %v1883_v7 = vpack.c.bf16 %v279_v63, %v271_v59  ;;  %v287_v8 = vld [vmem:[%s4846_s1 + $0x808] sm:$0xff]  ;;  %v2047_v9 = vpack.c.bf16 %v107_v1, %v99_v0  ;;  %v106_v11 = vld [vmem:[%s4846_s1 + $0x260] sm:$0xff] }
  0x2c   :  { %v295_v47 = vld [vmem:[%s4846_s1 + $0x848] sm:$0xff]  ;;  %2046 = vmatpush1.bf16.msra.mxu0 %v2045_v6  ;;  %v2049_v16 = vpack.c.bf16 %v106_v11, %v98_v10  ;;  %v286_v18 = vld [vmem:[%s4846_s1 + $0x800] sm:$0xff] }
  0x2d   :  { %v1887_v17 = vpack.c.bf16 %v295_v47, %v287_v8  ;;  %v303_v20 = vld [vmem:[%s4846_s1 + $0x888] sm:$0xff]  ;;  %2048 = vmatprep.subr.bf16.mxu0 %v2047_v9  ;;  %v114_v22 = vld [vmem:[%s4846_s1 + $0x2a0] sm:$0xff] }
  0x2e   :  { %1866 = vmatpush1.bf16.msra.mxu1 %v1865_v12  ;;  %v115_v12 = vld [vmem:[%s4846_s1 + $0x2a8] sm:$0xff]  ;;  %v302_v29 = vld [vmem:[%s4846_s1 + $0x880] sm:$0xff] }
  0x2f   :  { %1868 = vmatprep.subr.bf16.mxu1 %v1867_v13  ;;  %v123_v13 = vld [vmem:[%s4846_s1 + $0x2e8] sm:$0xff]  ;;  %v310_v30 = vld [vmem:[%s4846_s1 + $0x8c0] sm:$0xff] }
  0x30   :  { %v2051_v21 = vpack.c.bf16 %v123_v13, %v115_v12  ;;  %v311_v42 = vld [vmem:[%s4846_s1 + $0x8c8] sm:$0xff]  ;;  %2050 = vmatpush1.bf16.msra.mxu0 %v2049_v16  ;;  %v130_v36 = vld [vmem:[%s4846_s1 + $0x320] sm:$0xff]  ;;  %v1893_v40 = vpack.c.bf16 %v310_v30, %v302_v29 }
  0x31   :  { %v131_v24 = vld [vmem:[%s4846_s1 + $0x328] sm:$0xff]  ;;  %v1891_v28 = vpack.c.bf16 %v311_v42, %v303_v20  ;;  %v138_v37 = vld [vmem:[%s4846_s1 + $0x360] sm:$0xff] }
  0x32   :  { %1870 = vmatpush1.bf16.msra.mxu1 %v1869_v19  ;;  %v294_v19 = vld [vmem:[%s4846_s1 + $0x840] sm:$0xff]  ;;  %v139_v25 = vld [vmem:[%s4846_s1 + $0x368] sm:$0xff]  ;;  %2052 = vmatprep.subr.bf16.mxu0 %v2051_v21  ;;  %v2057_v46 = vpack.c.bf16 %v138_v37, %v130_v36 }
  0x33   :  { %1872 = vmatprep.subr.bf16.mxu1 %v1871_v23  ;;  %v122_v23 = vld [vmem:[%s4846_s1 + $0x2e0] sm:$0xff]  ;;  %v1889_v26 = vpack.c.bf16 %v294_v19, %v286_v18  ;;  %v319_v31 = vld [vmem:[%s4846_s1 + $0x908] sm:$0xff] }
  0x34   :  { %v2053_v32 = vpack.c.bf16 %v122_v23, %v114_v22  ;;  %v327_v33 = vld [vmem:[%s4846_s1 + $0x948] sm:$0xff]  ;;  %v318_v43 = vld [vmem:[%s4846_s1 + $0x900] sm:$0xff] }
  0x35   :  { %v147_v38 = vld [vmem:[%s4846_s1 + $0x3a8] sm:$0xff]  ;;  %v1895_v41 = vpack.c.bf16 %v327_v33, %v319_v31  ;;  %v326_v44 = vld [vmem:[%s4846_s1 + $0x940] sm:$0xff] }
  0x36   :  { %1874 = vmatpush1.bf16.msra.mxu1 %v1873_v35  ;;  %v2055_v35 = vpack.c.bf16 %v139_v25, %v131_v24  ;;  %v335_v45 = vld [vmem:[%s4846_s1 + $0x988] sm:$0xff]  ;;  %2054 = vmatpush1.bf16.msra.mxu0 %v2053_v32  ;;  %v146_v51 = vld [vmem:[%s4846_s1 + $0x3a0] sm:$0xff]  ;;  %v1897_v56 = vpack.c.bf16 %v326_v44, %v318_v43 }
  0x37   :  { %1876 = vmatprep.subr.bf16.mxu1 %v1875_v39  ;;  %v155_v39 = vld [vmem:[%s4846_s1 + $0x3e8] sm:$0xff]  ;;  %v342_v59 = vld [vmem:[%s4846_s1 + $0x9c0] sm:$0xff] }
  0x38   :  { %v343_v48 = vld [vmem:[%s4846_s1 + $0x9c8] sm:$0xff]  ;;  %2056 = vmatprep.subr.bf16.mxu0 %v2055_v35  ;;  %v2059_v49 = vpack.c.bf16 %v155_v39, %v147_v38  ;;  %v162_v0 = vld [vmem:[%s4846_s1 + $0x420] sm:$0xff] }
  0x39   :  { %v163_v54 = vld [vmem:[%s4846_s1 + $0x428] sm:$0xff]  ;;  %v1899_v57 = vpack.c.bf16 %v343_v48, %v335_v45  ;;  %v170_v1 = vld [vmem:[%s4846_s1 + $0x460] sm:$0xff] }
  0x3a   :  { %1878 = vmatpush1.bf16.msra.mxu1 %v1877_v53  ;;  %v154_v53 = vld [vmem:[%s4846_s1 + $0x3e0] sm:$0xff]  ;;  %v171_v55 = vld [vmem:[%s4846_s1 + $0x468] sm:$0xff]  ;;  %2058 = vmatpush1.bf16.msra.mxu0 %v2057_v46  ;;  %v2065_v9 = vpack.c.bf16 %v170_v1, %v162_v0 }
  0x3b   :  { %1880 = vmatprep.subr.bf16.mxu1 %v1879_v58  ;;  %v334_v58 = vld [vmem:[%s4846_s1 + $0x980] sm:$0xff]  ;;  %v351_v60 = vld [vmem:[%s4846_s1 + $0xa08] sm:$0xff]  ;;  %v2061_v61 = vpack.c.bf16 %v154_v53, %v146_v51  ;;  %2060 = vmatprep.subr.bf16.mxu0 %v2059_v49  ;;  %v2063_v63 = vpack.c.bf16 %v171_v55, %v163_v54 }
  0x3c   :  { %v359_v62 = vld [vmem:[%s4846_s1 + $0xa48] sm:$0xff]  ;;  %v1901_v4 = vpack.c.bf16 %v342_v59, %v334_v58  ;;  %v350_v6 = vld [vmem:[%s4846_s1 + $0xa00] sm:$0xff] }
  0x3d   :  { %v187_v3 = vld [vmem:[%s4846_s1 + $0x4e8] sm:$0xff]  ;;  %v1903_v5 = vpack.c.bf16 %v359_v62, %v351_v60  ;;  %v178_v47 = vld [vmem:[%s4846_s1 + $0x4a0] sm:$0xff] }
  0x3e   :  { %1882 = vmatpush1.bf16.msra.mxu1 %v1881_v2  ;;  %v179_v2 = vld [vmem:[%s4846_s1 + $0x4a8] sm:$0xff]  ;;  %2062 = vmatpush1.bf16.msra.mxu0 %v2061_v61  ;;  %v186_v12 = vld [vmem:[%s4846_s1 + $0x4e0] sm:$0xff] }
  0x3f   :  { %1884 = vmatprep.subr.bf16.mxu1 %v1883_v7  ;;  %v358_v7 = vld [vmem:[%s4846_s1 + $0xa40] sm:$0xff]  ;;  %v367_v8 = vld [vmem:[%s4846_s1 + $0xa88] sm:$0xff]  ;;  %2064 = vmatprep.subr.bf16.mxu0 %v2063_v63  ;;  %v2067_v11 = vpack.c.bf16 %v187_v3, %v179_v2  ;;  %v2069_v21 = vpack.c.bf16 %v186_v12, %v178_v47 }
  0x40   :  { %v375_v10 = vld [vmem:[%s4846_s1 + $0xac8] sm:$0xff]  ;;  %v1905_v16 = vpack.c.bf16 %v358_v7, %v350_v6  ;;  %v366_v18 = vld [vmem:[%s4846_s1 + $0xa80] sm:$0xff] }
  0x41   :  { %v195_v13 = vld [vmem:[%s4846_s1 + $0x528] sm:$0xff]  ;;  %v374_v19 = vld [vmem:[%s4846_s1 + $0xac0] sm:$0xff] }
  0x42   :  { %1886 = vmatpush1.bf16.msra.mxu1 %v1885_v14  ;;  %v203_v14 = vld [vmem:[%s4846_s1 + $0x568] sm:$0xff]  ;;  %2066 = vmatpush1.bf16.msra.mxu0 %v2065_v9  ;;  %v194_v23 = vld [vmem:[%s4846_s1 + $0x520] sm:$0xff]  ;;  %v33_v9 = vld [vmem:[%s4846_s1 + $0x18] sm:$0xff] }
  0x43   :  { %1888 = vmatprep.subr.bf16.mxu1 %v1887_v17  ;;  %v1907_v17 = vpack.c.bf16 %v375_v10, %v367_v8  ;;  %v383_v20 = vld [vmem:[%s4846_s1 + $0xb08] sm:$0xff]  ;;  %2068 = vmatprep.subr.bf16.mxu0 %v2067_v11  ;;  %v2071_v22 = vpack.c.bf16 %v203_v14, %v195_v13  ;;  %v202_v24 = vld [vmem:[%s4846_s1 + $0x560] sm:$0xff]  ;;  %v41_v11 = vld [vmem:[%s4846_s1 + $0x58] sm:$0xff] }
  0x44   :  { %v391_v42 = vld [vmem:[%s4846_s1 + $0xb48] sm:$0xff]  ;;  %v382_v30 = vld [vmem:[%s4846_s1 + $0xb00] sm:$0xff]  ;;  %v2073_v33 = vpack.c.bf16 %v202_v24, %v194_v23 }
  0x45   :  { %577 = vmatmul.mubr.f32.vlgmr.msra.gmra.mrb[0].mxu1 %v2731_v50  ;;  %v211_v25 = vld [vmem:[%s4846_s1 + $0x5a8] sm:$0xff]  ;;  %v1911_v29 = vpack.c.bf16 %v391_v42, %v383_v20  ;;  %v390_v31 = vld [vmem:[%s4846_s1 + $0xb40] sm:$0xff]  ;;  %v40_v20 = vld [vmem:[%s4846_s1 + $0x50] sm:$0xff] }
  0x46   :  { %1890 = vmatpush1.bf16.msra.mxu1 %v1889_v26  ;;  %1783 = vmatprep.mubr.msk.f32.mxu1 %vm509_vm0, %v2944_v27  ;;  %v219_v26 = vld [vmem:[%s4846_s1 + $0x5e8] sm:$0xff]  ;;  %v210_v37 = vld [vmem:[%s4846_s1 + $0x5a0] sm:$0xff] }
  0x47   :  { %1892 = vmatprep.subr.bf16.mxu1 %v1891_v28  ;;  %v1909_v28 = vpack.c.bf16 %v374_v19, %v366_v18  ;;  %v399_v32 = vld [vmem:[%s4846_s1 + $0xb88] sm:$0xff]  ;;  %2070 = vmatpush1.bf16.msra.mxu0 %v2069_v21  ;;  %v2075_v36 = vpack.c.bf16 %v219_v26, %v211_v25  ;;  %v218_v38 = vld [vmem:[%s4846_s1 + $0x5e0] sm:$0xff]  ;;  %v1927_v18 = vpack.c.bf16 %v41_v11, %v33_v9  ;;  %v32_v19 = vld [vmem:[%s4846_s1 + $0x10] sm:$0xff] }
  0x48   :  { %v407_v35 = vld [vmem:[%s4846_s1 + $0xbc8] sm:$0xff]  ;;  %2072 = vmatprep.subr.bf16.mxu0 %v2071_v22  ;;  %v398_v44 = vld [vmem:[%s4846_s1 + $0xb80] sm:$0xff]  ;;  %v2077_v48 = vpack.c.bf16 %v218_v38, %v210_v37  ;;  %v49_v21 = vld [vmem:[%s4846_s1 + $0x98] sm:$0xff] }
  0x49   :  { %v227_v39 = vld [vmem:[%s4846_s1 + $0x628] sm:$0xff]  ;;  %v1915_v43 = vpack.c.bf16 %v407_v35, %v399_v32  ;;  %v406_v45 = vld [vmem:[%s4846_s1 + $0xbc0] sm:$0xff]  ;;  %v57_v22 = vld [vmem:[%s4846_s1 + $0xd8] sm:$0xff] }
  0x4a   :  { %1894 = vmatpush1.bf16.msra.mxu1 %v1893_v40  ;;  %v235_v40 = vld [vmem:[%s4846_s1 + $0x668] sm:$0xff]  ;;  %v226_v53 = vld [vmem:[%s4846_s1 + $0x620] sm:$0xff]  ;;  %v56_v32 = vld [vmem:[%s4846_s1 + $0xd0] sm:$0xff] }
  0x4b   :  { %1896 = vmatprep.subr.bf16.mxu1 %v1895_v41  ;;  %v1913_v41 = vpack.c.bf16 %v390_v31, %v382_v30  ;;  %v415_v46 = vld [vmem:[%s4846_s1 + $0xc08] sm:$0xff]  ;;  %2074 = vmatpush1.bf16.msra.mxu0 %v2073_v33  ;;  %v2079_v51 = vpack.c.bf16 %v235_v40, %v227_v39  ;;  %v234_v54 = vld [vmem:[%s4846_s1 + $0x660] sm:$0xff]  ;;  %v1931_v30 = vpack.c.bf16 %v57_v22, %v49_v21  ;;  %v48_v31 = vld [vmem:[%s4846_s1 + $0x90] sm:$0xff] }
  0x4c   :  { %v423_v49 = vld [vmem:[%s4846_s1 + $0xc48] sm:$0xff]  ;;  %2076 = vmatprep.subr.bf16.mxu0 %v2075_v36  ;;  %v414_v59 = vld [vmem:[%s4846_s1 + $0xc00] sm:$0xff]  ;;  %v2081_v62 = vpack.c.bf16 %v234_v54, %v226_v53  ;;  %v65_v33 = vld [vmem:[%s4846_s1 + $0x118] sm:$0xff] }
  0x4d   :  { %v243_v55 = vld [vmem:[%s4846_s1 + $0x6a8] sm:$0xff]  ;;  %v1919_v58 = vpack.c.bf16 %v423_v49, %v415_v46  ;;  %v422_v60 = vld [vmem:[%s4846_s1 + $0xc40] sm:$0xff]  ;;  %v73_v36 = vld [vmem:[%s4846_s1 + $0x158] sm:$0xff] }
  0x4e   :  { %1898 = vmatpush1.bf16.msra.mxu1 %v1897_v56  ;;  %v251_v56 = vld [vmem:[%s4846_s1 + $0x6e8] sm:$0xff]  ;;  %v242_v1 = vld [vmem:[%s4846_s1 + $0x6a0] sm:$0xff]  ;;  %v72_v46 = vld [vmem:[%s4846_s1 + $0x150] sm:$0xff] }
  0x4f   :  { %1900 = vmatprep.subr.bf16.mxu1 %v1899_v57  ;;  %v1917_v57 = vpack.c.bf16 %v406_v45, %v398_v44  ;;  %v431_v61 = vld [vmem:[%s4846_s1 + $0xc88] sm:$0xff]  ;;  %2078 = vmatpush1.bf16.msra.mxu0 %v2077_v48  ;;  %v2083_v0 = vpack.c.bf16 %v251_v56, %v243_v55  ;;  %v250_v2 = vld [vmem:[%s4846_s1 + $0x6e0] sm:$0xff]  ;;  %v1935_v44 = vpack.c.bf16 %v73_v36, %v65_v33  ;;  %v64_v45 = vld [vmem:[%s4846_s1 + $0x110] sm:$0xff] }
  0x50   :  { %v439_v63 = vld [vmem:[%s4846_s1 + $0xcc8] sm:$0xff]  ;;  %2080 = vmatprep.subr.bf16.mxu0 %v2079_v51  ;;  %v430_v7 = vld [vmem:[%s4846_s1 + $0xc80] sm:$0xff]  ;;  %v2085_v10 = vpack.c.bf16 %v250_v2, %v242_v1  ;;  %v81_v48 = vld [vmem:[%s4846_s1 + $0x198] sm:$0xff] }
  0x51   :  { %v259_v3 = vld [vmem:[%s4846_s1 + $0x728] sm:$0xff]  ;;  %v1923_v6 = vpack.c.bf16 %v439_v63, %v431_v61  ;;  %v438_v8 = vld [vmem:[%s4846_s1 + $0xcc0] sm:$0xff]  ;;  %v89_v51 = vld [vmem:[%s4846_s1 + $0x1d8] sm:$0xff] }
  0x52   :  { %1902 = vmatpush1.bf16.msra.mxu1 %v1901_v4  ;;  %v267_v4 = vld [vmem:[%s4846_s1 + $0x768] sm:$0xff]  ;;  %v258_v12 = vld [vmem:[%s4846_s1 + $0x720] sm:$0xff]  ;;  %v88_v61 = vld [vmem:[%s4846_s1 + $0x1d0] sm:$0xff] }
  0x53   :  { %1904 = vmatprep.subr.bf16.mxu1 %v1903_v5  ;;  %v1921_v5 = vpack.c.bf16 %v422_v60, %v414_v59  ;;  %2082 = vmatpush1.bf16.msra.mxu0 %v2081_v62  ;;  %v2087_v47 = vpack.c.bf16 %v267_v4, %v259_v3  ;;  %v266_v13 = vld [vmem:[%s4846_s1 + $0x760] sm:$0xff]  ;;  %v275_v14 = vld [vmem:[%s4846_s1 + $0x7a8] sm:$0xff]  ;;  %v1939_v59 = vpack.c.bf16 %v89_v51, %v81_v48  ;;  %v80_v60 = vld [vmem:[%s4846_s1 + $0x190] sm:$0xff] }
  0x54   :  { %2084 = vmatprep.subr.bf16.mxu0 %v2083_v0  ;;  %v2089_v42 = vpack.c.bf16 %v266_v13, %v258_v12  ;;  %v274_v24 = vld [vmem:[%s4846_s1 + $0x7a0] sm:$0xff]  ;;  %v291_v26 = vld [vmem:[%s4846_s1 + $0x828] sm:$0xff]  ;;  %v97_v62 = vld [vmem:[%s4846_s1 + $0x218] sm:$0xff] }
  0x55   :  { %v282_v25 = vld [vmem:[%s4846_s1 + $0x7e0] sm:$0xff]  ;;  %v307_v40 = vld [vmem:[%s4846_s1 + $0x8a8] sm:$0xff]  ;;  %v105_v0 = vld [vmem:[%s4846_s1 + $0x258] sm:$0xff] }
  0x56   :  { %1906 = vmatpush1.bf16.msra.mxu1 %v1905_v16  ;;  %v283_v16 = vld [vmem:[%s4846_s1 + $0x7e8] sm:$0xff]  ;;  %v2093_v35 = vpack.c.bf16 %v282_v25, %v274_v24  ;;  %v290_v38 = vld [vmem:[%s4846_s1 + $0x820] sm:$0xff]  ;;  %v104_v9 = vld [vmem:[%s4846_s1 + $0x250] sm:$0xff] }
  0x57   :  { %1908 = vmatprep.subr.bf16.mxu1 %v1907_v17  ;;  %v1925_v17 = vpack.c.bf16 %v438_v8, %v430_v7  ;;  %2086 = vmatpush1.bf16.msra.mxu0 %v2085_v10  ;;  %v2091_v23 = vpack.c.bf16 %v283_v16, %v275_v14  ;;  %v298_v39 = vld [vmem:[%s4846_s1 + $0x860] sm:$0xff]  ;;  %v323_v56 = vld [vmem:[%s4846_s1 + $0x928] sm:$0xff]  ;;  %v96_v7 = vld [vmem:[%s4846_s1 + $0x210] sm:$0xff]  ;;  %v1943_v8 = vpack.c.bf16 %v105_v0, %v97_v62 }
  0x58   :  { %2088 = vmatprep.subr.bf16.mxu0 %v2087_v47  ;;  %v2097_v49 = vpack.c.bf16 %v298_v39, %v290_v38  ;;  %v306_v54 = vld [vmem:[%s4846_s1 + $0x8a0] sm:$0xff]  ;;  %v339_v4 = vld [vmem:[%s4846_s1 + $0x9a8] sm:$0xff]  ;;  %v113_v10 = vld [vmem:[%s4846_s1 + $0x298] sm:$0xff] }
  0x59   :  { %v314_v55 = vld [vmem:[%s4846_s1 + $0x8e0] sm:$0xff] }
  0x5a   :  { %1910 = vmatpush1.bf16.msra.mxu1 %v1909_v28  ;;  %v299_v28 = vld [vmem:[%s4846_s1 + $0x868] sm:$0xff]  ;;  %v2101_v63 = vpack.c.bf16 %v314_v55, %v306_v54  ;;  %v322_v2 = vld [vmem:[%s4846_s1 + $0x920] sm:$0xff] }
  0x5b   :  { %1912 = vmatprep.subr.bf16.mxu1 %v1911_v29  ;;  %v1929_v29 = vpack.c.bf16 %v40_v20, %v32_v19  ;;  %2090 = vmatpush1.bf16.msra.mxu0 %v2089_v42  ;;  %v2095_v37 = vpack.c.bf16 %v299_v28, %v291_v26  ;;  %v330_v3 = vld [vmem:[%s4846_s1 + $0x960] sm:$0xff] }
  0x5c   :  { %2092 = vmatprep.subr.bf16.mxu0 %v2091_v23  ;;  %v2105_v11 = vpack.c.bf16 %v330_v3, %v322_v2 }
  0x5e   :  { %1914 = vmatpush1.bf16.msra.mxu1 %v1913_v41  ;;  %v315_v41 = vld [vmem:[%s4846_s1 + $0x8e8] sm:$0xff] }
  0x5f   :  { %1916 = vmatprep.subr.bf16.mxu1 %v1915_v43  ;;  %v1933_v43 = vpack.c.bf16 %v56_v32, %v48_v31  ;;  %2094 = vmatpush1.bf16.msra.mxu0 %v2093_v35  ;;  %v2099_v53 = vpack.c.bf16 %v315_v41, %v307_v40 }
  0x60   :  { %2096 = vmatprep.subr.bf16.mxu0 %v2095_v37 }
  0x62   :  { %1918 = vmatpush1.bf16.msra.mxu1 %v1917_v57  ;;  %v331_v57 = vld [vmem:[%s4846_s1 + $0x968] sm:$0xff]  ;;  %861 = vmatmul.mubr.f32.vlgmr.msra.gmra.mrb[0].mxu0 %v2731_v50 }
  0x63   :  { %1920 = vmatprep.subr.bf16.mxu1 %v1919_v58  ;;  %v1937_v58 = vpack.c.bf16 %v72_v46, %v64_v45  ;;  %2098 = vmatpush1.bf16.msra.mxu0 %v2097_v49  ;;  %v2103_v1 = vpack.c.bf16 %v331_v57, %v323_v56 }
  0x64   :  { %2100 = vmatprep.subr.bf16.mxu0 %v2099_v53  ;;  %1785 = vmatprep.mubr.msk.f32.mxu0 %vm509_vm0, %v2944_v27 }
  0x66   :  { %1922 = vmatpush1.bf16.msra.mxu1 %v1921_v5  ;;  %v347_v5 = vld [vmem:[%s4846_s1 + $0x9e8] sm:$0xff] }
  0x67   :  { %1924 = vmatprep.subr.bf16.mxu1 %v1923_v6  ;;  %v1941_v6 = vpack.c.bf16 %v88_v61, %v80_v60  ;;  %2102 = vmatpush1.bf16.msra.mxu0 %v2101_v63 }
  0x6a   :  { %1926 = vmatpush1.bf16.msra.mxu1 %v1925_v17 }
  0x6b   :  { %1928 = vmatprep.subr.bf16.mxu1 %v1927_v18 }
  0x6d   :  { %648 = vmatmul.mubr.f32.vlgmr.msra.gmra.mrb[0].mxu1 %v2916_v15 }
  0x6e   :  { %1930 = vmatpush1.bf16.msra.mxu1 %v1929_v29  ;;  %718 = vmatprep.mubr.f32.mxu1 %v2735_v52 }
  0x6f   :  { %1932 = vmatprep.subr.bf16.mxu1 %v1931_v30 }
  0x72   :  { %1934 = vmatpush1.bf16.msra.mxu1 %v1933_v43 }
  0x73   :  { %1936 = vmatprep.subr.bf16.mxu1 %v1935_v44 }
  0x76   :  { %1938 = vmatpush1.bf16.msra.mxu1 %v1937_v58 }
  0x77   :  { %1940 = vmatprep.subr.bf16.mxu1 %v1939_v59 }
  0x78   :  { %14 = vsyncpa [#allocation3], 0  ;;  %v121_v47 = vld [vmem:[%s4846_s1 + $0x2d8] sm:$0xff]  ;;  %2104 = vmatprep.subr.bf16.mxu0 %v2103_v1  ;;  %v2107_v12 = vpack.c.bf16 %v347_v5, %v339_v4  ;;  %v338_v13 = vld [vmem:[%s4846_s1 + $0x9a0] sm:$0xff]  ;;  %v1945_v18 = vpack.c.bf16 %v104_v9, %v96_v7  ;;  %vm1751_vm1 = vcmask 9216  }
  0x79   :  { %v346_v14 = vld [vmem:[%s4846_s1 + $0x9e0] sm:$0xff]  ;;  %v355_v16 = vld [vmem:[%s4846_s1 + $0xa28] sm:$0xff]  ;;  %v1947_v19 = vpack.c.bf16 %v121_v47, %v113_v10  ;;  %v112_v20 = vld [vmem:[%s4846_s1 + $0x290] sm:$0xff]  ;;  %2106 = vmatpush1.bf16.msra.mxu0 %v2105_v11 }
  0x7a   :  { %v363_v17 = vld [vmem:[%s4846_s1 + $0xa68] sm:$0xff]  ;;  %1942 = vmatpush1.bf16.msra.mxu1 %v1941_v6  ;;  %v120_v21 = vld [vmem:[%s4846_s1 + $0x2d0] sm:$0xff]  ;;  %v129_v42 = vld [vmem:[%s4846_s1 + $0x318] sm:$0xff]  ;;  %v2109_v22 = vpack.c.bf16 %v346_v14, %v338_v13  ;;  %2108 = vmatprep.subr.bf16.mxu0 %v2107_v12 }
  0x7b   :  { %1944 = vmatprep.subr.bf16.mxu1 %v1943_v8  ;;  %v137_v23 = vld [vmem:[%s4846_s1 + $0x358] sm:$0xff]  ;;  %v2111_v24 = vpack.c.bf16 %v363_v17, %v355_v16  ;;  %v354_v25 = vld [vmem:[%s4846_s1 + $0xa20] sm:$0xff]  ;;  %v371_v28 = vld [vmem:[%s4846_s1 + $0xaa8] sm:$0xff]  ;;  %v1949_v30 = vpack.c.bf16 %v120_v21, %v112_v20 }
  0x7c   :  { %v362_v26 = vld [vmem:[%s4846_s1 + $0xa60] sm:$0xff]  ;;  %v379_v29 = vld [vmem:[%s4846_s1 + $0xae8] sm:$0xff]  ;;  %v1951_v31 = vpack.c.bf16 %v137_v23, %v129_v42  ;;  %v128_v32 = vld [vmem:[%s4846_s1 + $0x310] sm:$0xff] }
  0x7d   :  { %v136_v33 = vld [vmem:[%s4846_s1 + $0x350] sm:$0xff]  ;;  %v145_v35 = vld [vmem:[%s4846_s1 + $0x398] sm:$0xff]  ;;  %2110 = vmatpush1.bf16.msra.mxu0 %v2109_v22  ;;  %v2113_v36 = vpack.c.bf16 %v362_v26, %v354_v25  ;;  %v2115_v38 = vpack.c.bf16 %v379_v29, %v371_v28  ;;  %v370_v39 = vld [vmem:[%s4846_s1 + $0xaa0] sm:$0xff] }
  0x7e   :  { %1946 = vmatpush1.bf16.msra.mxu1 %v1945_v18  ;;  %v153_v37 = vld [vmem:[%s4846_s1 + $0x3d8] sm:$0xff]  ;;  %2112 = vmatprep.subr.bf16.mxu0 %v2111_v24  ;;  %v378_v40 = vld [vmem:[%s4846_s1 + $0xae0] sm:$0xff]  ;;  %v387_v41 = vld [vmem:[%s4846_s1 + $0xb28] sm:$0xff]  ;;  %v1953_v44 = vpack.c.bf16 %v136_v33, %v128_v32 }
  0x7f   :  { %1948 = vmatprep.subr.bf16.mxu1 %v1947_v19  ;;  %v395_v43 = vld [vmem:[%s4846_s1 + $0xb68] sm:$0xff]  ;;  %v1955_v45 = vpack.c.bf16 %v153_v37, %v145_v35  ;;  %v144_v46 = vld [vmem:[%s4846_s1 + $0x390] sm:$0xff]  ;;  %v161_v49 = vld [vmem:[%s4846_s1 + $0x418] sm:$0xff]  ;;  %v2117_v51 = vpack.c.bf16 %v378_v40, %v370_v39 }
  0x80   :  { %v152_v48 = vld [vmem:[%s4846_s1 + $0x3d0] sm:$0xff]  ;;  %v169_v53 = vld [vmem:[%s4846_s1 + $0x458] sm:$0xff]  ;;  %v2119_v54 = vpack.c.bf16 %v395_v43, %v387_v41  ;;  %v386_v55 = vld [vmem:[%s4846_s1 + $0xb20] sm:$0xff] }
  0x81   :  { %2114 = vmatpush1.bf16.msra.mxu0 %v2113_v36  ;;  %v394_v56 = vld [vmem:[%s4846_s1 + $0xb60] sm:$0xff]  ;;  %v403_v57 = vld [vmem:[%s4846_s1 + $0xba8] sm:$0xff]  ;;  %v1957_v59 = vpack.c.bf16 %v152_v48, %v144_v46  ;;  %v1959_v60 = vpack.c.bf16 %v169_v53, %v161_v49  ;;  %v160_v61 = vld [vmem:[%s4846_s1 + $0x410] sm:$0xff] }
  0x82   :  { %1950 = vmatpush1.bf16.msra.mxu1 %v1949_v30  ;;  %2116 = vmatprep.subr.bf16.mxu0 %v2115_v38  ;;  %v411_v58 = vld [vmem:[%s4846_s1 + $0xbe8] sm:$0xff]  ;;  %v168_v62 = vld [vmem:[%s4846_s1 + $0x450] sm:$0xff]  ;;  %v177_v63 = vld [vmem:[%s4846_s1 + $0x498] sm:$0xff]  ;;  %v2121_v0 = vpack.c.bf16 %v394_v56, %v386_v55 }
  0x83   :  { %1952 = vmatprep.subr.bf16.mxu1 %v1951_v31  ;;  %v185_v1 = vld [vmem:[%s4846_s1 + $0x4d8] sm:$0xff]  ;;  %v2123_v2 = vpack.c.bf16 %v411_v58, %v403_v57  ;;  %v402_v3 = vld [vmem:[%s4846_s1 + $0xba0] sm:$0xff]  ;;  %v419_v5 = vld [vmem:[%s4846_s1 + $0xc28] sm:$0xff]  ;;  %v1961_v7 = vpack.c.bf16 %v168_v62, %v160_v61 }
  0x84   :  { %v410_v4 = vld [vmem:[%s4846_s1 + $0xbe0] sm:$0xff]  ;;  %v427_v6 = vld [vmem:[%s4846_s1 + $0xc68] sm:$0xff]  ;;  %v1963_v8 = vpack.c.bf16 %v185_v1, %v177_v63  ;;  %v176_v9 = vld [vmem:[%s4846_s1 + $0x490] sm:$0xff] }
  0x85   :  { %2118 = vmatpush1.bf16.msra.mxu0 %v2117_v51  ;;  %v184_v10 = vld [vmem:[%s4846_s1 + $0x4d0] sm:$0xff]  ;;  %v193_v11 = vld [vmem:[%s4846_s1 + $0x518] sm:$0xff]  ;;  %v2125_v47 = vpack.c.bf16 %v410_v4, %v402_v3  ;;  %v2127_v13 = vpack.c.bf16 %v427_v6, %v419_v5  ;;  %v418_v14 = vld [vmem:[%s4846_s1 + $0xc20] sm:$0xff] }
  0x86   :  { %1954 = vmatpush1.bf16.msra.mxu1 %v1953_v44  ;;  %2120 = vmatprep.subr.bf16.mxu0 %v2119_v54  ;;  %v201_v12 = vld [vmem:[%s4846_s1 + $0x558] sm:$0xff]  ;;  %v426_v16 = vld [vmem:[%s4846_s1 + $0xc60] sm:$0xff]  ;;  %v435_v17 = vld [vmem:[%s4846_s1 + $0xca8] sm:$0xff]  ;;  %v1965_v19 = vpack.c.bf16 %v184_v10, %v176_v9 }
  0x87   :  { %1956 = vmatprep.subr.bf16.mxu1 %v1955_v45  ;;  %v443_v18 = vld [vmem:[%s4846_s1 + $0xce8] sm:$0xff]  ;;  %v1967_v20 = vpack.c.bf16 %v201_v12, %v193_v11  ;;  %v192_v21 = vld [vmem:[%s4846_s1 + $0x510] sm:$0xff]  ;;  %v209_v22 = vld [vmem:[%s4846_s1 + $0x598] sm:$0xff]  ;;  %v2129_v23 = vpack.c.bf16 %v426_v16, %v418_v14 }
  0x88   :  { %v200_v42 = vld [vmem:[%s4846_s1 + $0x550] sm:$0xff]  ;;  %v217_v24 = vld [vmem:[%s4846_s1 + $0x5d8] sm:$0xff]  ;;  %v2131_v25 = vpack.c.bf16 %v443_v18, %v435_v17  ;;  %v434_v26 = vld [vmem:[%s4846_s1 + $0xca0] sm:$0xff] }
  0x89   :  { %2122 = vmatpush1.bf16.msra.mxu0 %v2121_v0  ;;  %v442_v28 = vld [vmem:[%s4846_s1 + $0xce0] sm:$0xff]  ;;  %v1089_v29 = vld [vmem:[%s4848_s3 + $0x8] sm:$0xff]  ;;  %v1091_v30 = vld [vmem:[%s4848_s3 + $0x18] sm:$0xff]  ;;  %v1969_v31 = vpack.c.bf16 %v200_v42, %v192_v21  ;;  %v1971_v32 = vpack.c.bf16 %v217_v24, %v209_v22 }
  0x8a   :  { %1958 = vmatpush1.bf16.msra.mxu1 %v1957_v59  ;;  %2124 = vmatprep.subr.bf16.mxu0 %v2123_v2  ;;  %v208_v33 = vld [vmem:[%s4846_s1 + $0x590] sm:$0xff]  ;;  %v225_v36 = vld [vmem:[%s4846_s1 + $0x618] sm:$0xff]  ;;  %v2133_v37 = vpack.c.bf16 %v442_v28, %v434_v26  ;;  %v2239_v39 = vpack.c.bf16 %v1091_v30, %v1089_v29  ;;  %v1088_v40 = vld [vmem:[%s4848_s3] sm:$0xff] }
  0x8b   :  { %1960 = vmatprep.subr.bf16.mxu1 %v1959_v60  ;;  %v216_v35 = vld [vmem:[%s4846_s1 + $0x5d0] sm:$0xff]  ;;  %v233_v38 = vld [vmem:[%s4846_s1 + $0x658] sm:$0xff]  ;;  %v1093_v43 = vld [vmem:[%s4848_s3 + $0x28] sm:$0xff] }
  0x8c   :  { %v1090_v41 = vld [vmem:[%s4848_s3 + $0x10] sm:$0xff]  ;;  %v1095_v44 = vld [vmem:[%s4848_s3 + $0x38] sm:$0xff]  ;;  %v1973_v45 = vpack.c.bf16 %v216_v35, %v208_v33  ;;  %v1975_v46 = vpack.c.bf16 %v233_v38, %v225_v36  ;;  %v1092_v56 = vld [vmem:[%s4848_s3 + $0x20] sm:$0xff] }
  0x8d   :  { %2126 = vmatpush1.bf16.msra.mxu0 %v2125_v47  ;;  %v224_v48 = vld [vmem:[%s4846_s1 + $0x610] sm:$0xff]  ;;  %v241_v51 = vld [vmem:[%s4846_s1 + $0x698] sm:$0xff]  ;;  %v2241_v53 = vpack.c.bf16 %v1090_v41, %v1088_v40  ;;  %v2243_v55 = vpack.c.bf16 %v1095_v44, %v1093_v43  ;;  %v1097_v58 = vld [vmem:[%s4848_s3 + $0x48] sm:$0xff] }
  0x8e   :  { %1962 = vmatpush1.bf16.msra.mxu1 %v1961_v7  ;;  %2128 = vmatprep.subr.bf16.mxu0 %v2127_v13  ;;  %v232_v49 = vld [vmem:[%s4846_s1 + $0x650] sm:$0xff]  ;;  %v249_v54 = vld [vmem:[%s4846_s1 + $0x6d8] sm:$0xff]  ;;  %v1096_v4 = vld [vmem:[%s4848_s3 + $0x40] sm:$0xff] }
  0x8f   :  { %1964 = vmatprep.subr.bf16.mxu1 %v1963_v8  ;;  %v1094_v57 = vld [vmem:[%s4848_s3 + $0x30] sm:$0xff]  ;;  %v1099_v59 = vld [vmem:[%s4848_s3 + $0x58] sm:$0xff]  ;;  %v1977_v60 = vpack.c.bf16 %v232_v49, %v224_v48  ;;  %v1979_v61 = vpack.c.bf16 %v249_v54, %v241_v51  ;;  %v1101_v6 = vld [vmem:[%s4848_s3 + $0x68] sm:$0xff] }
  0x90   :  { %v240_v62 = vld [vmem:[%s4846_s1 + $0x690] sm:$0xff]  ;;  %v257_v0 = vld [vmem:[%s4846_s1 + $0x718] sm:$0xff]  ;;  %v2245_v1 = vpack.c.bf16 %v1094_v57, %v1092_v56  ;;  %v2247_v3 = vpack.c.bf16 %v1099_v59, %v1097_v58  ;;  %v1100_v16 = vld [vmem:[%s4848_s3 + $0x60] sm:$0xff] }
  0x91   :  { %2130 = vmatpush1.bf16.msra.mxu0 %v2129_v23  ;;  %v248_v63 = vld [vmem:[%s4846_s1 + $0x6d0] sm:$0xff]  ;;  %v265_v2 = vld [vmem:[%s4846_s1 + $0x758] sm:$0xff]  ;;  %v1105_v18 = vld [vmem:[%s4848_s3 + $0x88] sm:$0xff] }
  0x92   :  { %1966 = vmatpush1.bf16.msra.mxu1 %v1965_v19  ;;  %2132 = vmatprep.subr.bf16.mxu0 %v2131_v25  ;;  %v1098_v5 = vld [vmem:[%s4848_s3 + $0x50] sm:$0xff]  ;;  %v1103_v7 = vld [vmem:[%s4848_s3 + $0x78] sm:$0xff]  ;;  %v1981_v8 = vpack.c.bf16 %v248_v63, %v240_v62  ;;  %v1983_v9 = vpack.c.bf16 %v265_v2, %v257_v0  ;;  %v1104_v28 = vld [vmem:[%s4848_s3 + $0x80] sm:$0xff] }
  0x93   :  { %1968 = vmatprep.subr.bf16.mxu1 %v1967_v20  ;;  %v256_v10 = vld [vmem:[%s4846_s1 + $0x710] sm:$0xff]  ;;  %v273_v47 = vld [vmem:[%s4846_s1 + $0x798] sm:$0xff]  ;;  %v2249_v12 = vpack.c.bf16 %v1098_v5, %v1096_v4  ;;  %v2251_v14 = vpack.c.bf16 %v1103_v7, %v1101_v6  ;;  %v1109_v30 = vld [vmem:[%s4848_s3 + $0xa8] sm:$0xff] }
  0x94   :  { %v264_v11 = vld [vmem:[%s4846_s1 + $0x750] sm:$0xff]  ;;  %v281_v13 = vld [vmem:[%s4846_s1 + $0x7d8] sm:$0xff]  ;;  %v1108_v41 = vld [vmem:[%s4848_s3 + $0xa0] sm:$0xff] }
  0x95   :  { %2134 = vmatpush1.bf16.msra.mxu0 %v2133_v37  ;;  %v1102_v17 = vld [vmem:[%s4848_s3 + $0x70] sm:$0xff]  ;;  %v1107_v19 = vld [vmem:[%s4848_s3 + $0x98] sm:$0xff]  ;;  %v1985_v20 = vpack.c.bf16 %v264_v11, %v256_v10  ;;  %v1987_v21 = vpack.c.bf16 %v281_v13, %v273_v47  ;;  %v1113_v44 = vld [vmem:[%s4848_s3 + $0xc8] sm:$0xff] }
  0x96   :  { %1970 = vmatpush1.bf16.msra.mxu1 %v1969_v31  ;;  %2240 = vmatprep.subr.bf16.mxu0 %v2239_v39  ;;  %v272_v42 = vld [vmem:[%s4846_s1 + $0x790] sm:$0xff]  ;;  %v289_v23 = vld [vmem:[%s4846_s1 + $0x818] sm:$0xff]  ;;  %v2253_v24 = vpack.c.bf16 %v1102_v17, %v1100_v16  ;;  %v2255_v26 = vpack.c.bf16 %v1107_v19, %v1105_v18  ;;  %v1112_v57 = vld [vmem:[%s4848_s3 + $0xc0] sm:$0xff] }
  0x97   :  { %1972 = vmatprep.subr.bf16.mxu1 %v1971_v32  ;;  %v280_v22 = vld [vmem:[%s4846_s1 + $0x7d0] sm:$0xff]  ;;  %v297_v25 = vld [vmem:[%s4846_s1 + $0x858] sm:$0xff]  ;;  %v1117_v59 = vld [vmem:[%s4848_s3 + $0xe8] sm:$0xff] }
  0x98   :  { %932 = vmatmul.mubr.f32.vlgmr.msra.gmra.mrb[0].mxu0 %v2916_v15  ;;  %v1106_v29 = vld [vmem:[%s4848_s3 + $0x90] sm:$0xff]  ;;  %v1111_v31 = vld [vmem:[%s4848_s3 + $0xb8] sm:$0xff]  ;;  %v1989_v32 = vpack.c.bf16 %v280_v22, %v272_v42  ;;  %v1991_v33 = vpack.c.bf16 %v297_v25, %v289_v23  ;;  %v1116_v5 = vld [vmem:[%s4848_s3 + $0xe0] sm:$0xff] }
  0x99   :  { %2242 = vmatpush1.bf16.msra.mxu0 %v2241_v53  ;;  %v288_v35 = vld [vmem:[%s4846_s1 + $0x810] sm:$0xff]  ;;  %v305_v37 = vld [vmem:[%s4846_s1 + $0x898] sm:$0xff]  ;;  %v2257_v38 = vpack.c.bf16 %v1106_v29, %v1104_v28  ;;  %v2259_v40 = vpack.c.bf16 %v1111_v31, %v1109_v30  ;;  %v1121_v7 = vld [vmem:[%s4848_s3 + $0x108] sm:$0xff] }
  0x9a   :  { %1974 = vmatpush1.bf16.msra.mxu1 %v1973_v45  ;;  %2244 = vmatprep.subr.bf16.mxu0 %v2243_v55  ;;  %v296_v36 = vld [vmem:[%s4846_s1 + $0x850] sm:$0xff]  ;;  %v313_v39 = vld [vmem:[%s4846_s1 + $0x8d8] sm:$0xff]  ;;  %v1120_v17 = vld [vmem:[%s4848_s3 + $0x100] sm:$0xff] }
  0x9b   :  { %1976 = vmatprep.subr.bf16.mxu1 %v1975_v46  ;;  %v1110_v43 = vld [vmem:[%s4848_s3 + $0xb0] sm:$0xff]  ;;  %v1115_v45 = vld [vmem:[%s4848_s3 + $0xd8] sm:$0xff]  ;;  %v1993_v46 = vpack.c.bf16 %v296_v36, %v288_v35  ;;  %v1995_v48 = vpack.c.bf16 %v313_v39, %v305_v37  ;;  %v1125_v19 = vld [vmem:[%s4848_s3 + $0x128] sm:$0xff] }
  0x9c   :  { %v304_v49 = vld [vmem:[%s4846_s1 + $0x890] sm:$0xff]  ;;  %v321_v53 = vld [vmem:[%s4846_s1 + $0x918] sm:$0xff]  ;;  %v2261_v54 = vpack.c.bf16 %v1110_v43, %v1108_v41  ;;  %v2263_v56 = vpack.c.bf16 %v1115_v45, %v1113_v44  ;;  %v1124_v29 = vld [vmem:[%s4848_s3 + $0x120] sm:$0xff] }
  0x9d   :  { %2246 = vmatpush1.bf16.msra.mxu0 %v2245_v1  ;;  %v312_v51 = vld [vmem:[%s4846_s1 + $0x8d0] sm:$0xff]  ;;  %v329_v55 = vld [vmem:[%s4846_s1 + $0x958] sm:$0xff]  ;;  %v1129_v31 = vld [vmem:[%s4848_s3 + $0x148] sm:$0xff] }
  0x9e   :  { %1978 = vmatpush1.bf16.msra.mxu1 %v1977_v60  ;;  %2248 = vmatprep.subr.bf16.mxu0 %v2247_v3  ;;  %v1114_v58 = vld [vmem:[%s4848_s3 + $0xd0] sm:$0xff]  ;;  %v1119_v60 = vld [vmem:[%s4848_s3 + $0xf8] sm:$0xff]  ;;  %v1999_v62 = vpack.c.bf16 %v329_v55, %v321_v53  ;;  %v1128_v43 = vld [vmem:[%s4848_s3 + $0x140] sm:$0xff] }
  0x9f   :  { %1980 = vmatprep.subr.bf16.mxu1 %v1979_v61  ;;  %v1997_v61 = vpack.c.bf16 %v312_v51, %v304_v49  ;;  %v320_v63 = vld [vmem:[%s4846_s1 + $0x910] sm:$0xff]  ;;  %v337_v1 = vld [vmem:[%s4846_s1 + $0x998] sm:$0xff]  ;;  %v2265_v2 = vpack.c.bf16 %v1114_v58, %v1112_v57  ;;  %v2267_v4 = vpack.c.bf16 %v1119_v60, %v1117_v59  ;;  %v1133_v45 = vld [vmem:[%s4848_s3 + $0x168] sm:$0xff] }
  0xa0   :  { %v328_v0 = vld [vmem:[%s4846_s1 + $0x950] sm:$0xff]  ;;  %v345_v3 = vld [vmem:[%s4846_s1 + $0x9d8] sm:$0xff]  ;;  %v1132_v58 = vld [vmem:[%s4848_s3 + $0x160] sm:$0xff] }
  0xa1   :  { %2250 = vmatpush1.bf16.msra.mxu0 %v2249_v12  ;;  %v1118_v6 = vld [vmem:[%s4848_s3 + $0xf0] sm:$0xff]  ;;  %v2003_v10 = vpack.c.bf16 %v345_v3, %v337_v1  ;;  %v353_v12 = vld [vmem:[%s4846_s1 + $0xa18] sm:$0xff]  ;;  %v1137_v60 = vld [vmem:[%s4848_s3 + $0x188] sm:$0xff] }
  0xa2   :  { %1982 = vmatpush1.bf16.msra.mxu1 %v1981_v8  ;;  %2252 = vmatprep.subr.bf16.mxu0 %v2251_v14  ;;  %v1123_v8 = vld [vmem:[%s4848_s3 + $0x118] sm:$0xff]  ;;  %v336_v11 = vld [vmem:[%s4846_s1 + $0x990] sm:$0xff]  ;;  %v2269_v13 = vpack.c.bf16 %v1118_v6, %v1116_v5  ;;  %v1136_v6 = vld [vmem:[%s4848_s3 + $0x180] sm:$0xff] }
  0xa3   :  { %1984 = vmatprep.subr.bf16.mxu1 %v1983_v9  ;;  %v2001_v9 = vpack.c.bf16 %v328_v0, %v320_v63  ;;  %v344_v47 = vld [vmem:[%s4846_s1 + $0x9d0] sm:$0xff]  ;;  %v361_v14 = vld [vmem:[%s4846_s1 + $0xa58] sm:$0xff]  ;;  %v2271_v16 = vpack.c.bf16 %v1123_v8, %v1121_v7  ;;  %v1141_v8 = vld [vmem:[%s4848_s3 + $0x1a8] sm:$0xff] }
  0xa4   :  { %v1122_v18 = vld [vmem:[%s4848_s3 + $0x110] sm:$0xff]  ;;  %v2007_v42 = vpack.c.bf16 %v361_v14, %v353_v12 }
  0xa5   :  { %2254 = vmatpush1.bf16.msra.mxu0 %v2253_v24  ;;  %v352_v22 = vld [vmem:[%s4846_s1 + $0xa10] sm:$0xff]  ;;  %v369_v24 = vld [vmem:[%s4846_s1 + $0xa98] sm:$0xff]  ;;  %v2273_v25 = vpack.c.bf16 %v1122_v18, %v1120_v17  ;;  %v1140_v18 = vld [vmem:[%s4848_s3 + $0x1a0] sm:$0xff] }
  0xa6   :  { %1986 = vmatpush1.bf16.msra.mxu1 %v1985_v20  ;;  %2256 = vmatprep.subr.bf16.mxu0 %v2255_v26  ;;  %v1127_v20 = vld [vmem:[%s4848_s3 + $0x138] sm:$0xff]  ;;  %v360_v23 = vld [vmem:[%s4846_s1 + $0xa50] sm:$0xff] }
  0xa7   :  { %1988 = vmatprep.subr.bf16.mxu1 %v1987_v21  ;;  %v2005_v21 = vpack.c.bf16 %v344_v47, %v336_v11  ;;  %v377_v26 = vld [vmem:[%s4846_s1 + $0xad8] sm:$0xff]  ;;  %v2275_v28 = vpack.c.bf16 %v1127_v20, %v1125_v19  ;;  %v1126_v30 = vld [vmem:[%s4848_s3 + $0x130] sm:$0xff]  ;;  %v1145_v20 = vld [vmem:[%s4848_s3 + $0x1c8] sm:$0xff] }
  0xa8   :  { %v2011_v35 = vpack.c.bf16 %v377_v26, %v369_v24  ;;  %v368_v36 = vld [vmem:[%s4846_s1 + $0xa90] sm:$0xff]  ;;  %v2277_v39 = vpack.c.bf16 %v1126_v30, %v1124_v29  ;;  %v1144_v30 = vld [vmem:[%s4848_s3 + $0x1c0] sm:$0xff] }
  0xa9   :  { %2258 = vmatpush1.bf16.msra.mxu0 %v2257_v38  ;;  %v376_v37 = vld [vmem:[%s4846_s1 + $0xad0] sm:$0xff]  ;;  %v385_v38 = vld [vmem:[%s4846_s1 + $0xb18] sm:$0xff] }
  0xaa   :  { %1990 = vmatpush1.bf16.msra.mxu1 %v1989_v32  ;;  %2260 = vmatprep.subr.bf16.mxu0 %v2259_v40  ;;  %v1131_v32 = vld [vmem:[%s4848_s3 + $0x158] sm:$0xff]  ;;  %v1130_v44 = vld [vmem:[%s4848_s3 + $0x150] sm:$0xff] }
  0xab   :  { %1992 = vmatprep.subr.bf16.mxu1 %v1991_v33  ;;  %v2009_v33 = vpack.c.bf16 %v360_v23, %v352_v22  ;;  %v393_v40 = vld [vmem:[%s4846_s1 + $0xb58] sm:$0xff]  ;;  %v2279_v41 = vpack.c.bf16 %v1131_v32, %v1129_v31  ;;  %v384_v51 = vld [vmem:[%s4846_s1 + $0xb10] sm:$0xff]  ;;  %v2281_v55 = vpack.c.bf16 %v1130_v44, %v1128_v43  ;;  %v1149_v32 = vld [vmem:[%s4848_s3 + $0x1e8] sm:$0xff] }
  0xac   :  { %v2015_v49 = vpack.c.bf16 %v393_v40, %v385_v38  ;;  %v392_v53 = vld [vmem:[%s4846_s1 + $0xb50] sm:$0xff]  ;;  %v1148_v44 = vld [vmem:[%s4848_s3 + $0x1e0] sm:$0xff] }
  0xad   :  { %719 = vmatmul.mubr.f32.vlgmr.msra.gmra.mrb[2].mxu1 %v2731_v50  ;;  %2262 = vmatpush1.bf16.msra.mxu0 %v2261_v54  ;;  %v401_v54 = vld [vmem:[%s4846_s1 + $0xb98] sm:$0xff]  ;;  %v1134_v59 = vld [vmem:[%s4848_s3 + $0x170] sm:$0xff] }
  0xae   :  { %1994 = vmatpush1.bf16.msra.mxu1 %v1993_v46  ;;  %1784 = vmatprep.mubr.msk.f32.mxu1 %vm509_vm0, %v2944_v27  ;;  %v1135_v46 = vld [vmem:[%s4848_s3 + $0x178] sm:$0xff]  ;;  %v400_v0 = vld [vmem:[%s4846_s1 + $0xb90] sm:$0xff]  ;;  %v2285_v3 = vpack.c.bf16 %v1134_v59, %v1132_v58 }
  0xaf   :  { %1996 = vmatprep.subr.bf16.mxu1 %v1995_v48  ;;  %2264 = vmatprep.subr.bf16.mxu0 %v2263_v56  ;;  %v2013_v48 = vpack.c.bf16 %v376_v37, %v368_v36  ;;  %v409_v56 = vld [vmem:[%s4846_s1 + $0xbd8] sm:$0xff]  ;;  %v2283_v57 = vpack.c.bf16 %v1135_v46, %v1133_v45  ;;  %v408_v1 = vld [vmem:[%s4846_s1 + $0xbd0] sm:$0xff]  ;;  %v1153_v46 = vld [vmem:[%s4848_s3 + $0x208] sm:$0xff] }
  0xb0   :  { %v2019_v63 = vpack.c.bf16 %v409_v56, %v401_v54  ;;  %v1138_v7 = vld [vmem:[%s4848_s3 + $0x190] sm:$0xff]  ;;  %v69_v56 = vld [vmem:[%s4846_s1 + $0x138] sm:$0xff] }
  0xb1   :  { %2266 = vmatpush1.bf16.msra.mxu0 %v2265_v2  ;;  %v417_v2 = vld [vmem:[%s4846_s1 + $0xc18] sm:$0xff]  ;;  %v416_v47 = vld [vmem:[%s4846_s1 + $0xc10] sm:$0xff]  ;;  %v2289_v14 = vpack.c.bf16 %v1138_v7, %v1136_v6 }
  0xb2   :  { %1998 = vmatpush1.bf16.msra.mxu1 %v1997_v61  ;;  %2268 = vmatprep.subr.bf16.mxu0 %v2267_v4  ;;  %v1139_v61 = vld [vmem:[%s4848_s3 + $0x198] sm:$0xff]  ;;  %v424_v12 = vld [vmem:[%s4846_s1 + $0xc50] sm:$0xff] }
  0xb3   :  { %2000 = vmatprep.subr.bf16.mxu1 %v1999_v62  ;;  %v2017_v62 = vpack.c.bf16 %v392_v53, %v384_v51  ;;  %v425_v4 = vld [vmem:[%s4846_s1 + $0xc58] sm:$0xff]  ;;  %v2287_v5 = vpack.c.bf16 %v1139_v61, %v1137_v60  ;;  %v1142_v19 = vld [vmem:[%s4848_s3 + $0x1b0] sm:$0xff] }
  0xb4   :  { %v2023_v11 = vpack.c.bf16 %v425_v4, %v417_v2  ;;  %v432_v23 = vld [vmem:[%s4846_s1 + $0xc90] sm:$0xff]  ;;  %v2293_v26 = vpack.c.bf16 %v1142_v19, %v1140_v18  ;;  %v101_v4 = vld [vmem:[%s4846_s1 + $0x238] sm:$0xff] }
  0xb5   :  { %2270 = vmatpush1.bf16.msra.mxu0 %v2269_v13  ;;  %v433_v13 = vld [vmem:[%s4846_s1 + $0xc98] sm:$0xff]  ;;  %v440_v24 = vld [vmem:[%s4846_s1 + $0xcd0] sm:$0xff] }
  0xb6   :  { %2002 = vmatpush1.bf16.msra.mxu1 %v2001_v9  ;;  %2272 = vmatprep.subr.bf16.mxu0 %v2271_v16  ;;  %v1143_v9 = vld [vmem:[%s4848_s3 + $0x1b8] sm:$0xff]  ;;  %v1146_v31 = vld [vmem:[%s4848_s3 + $0x1d0] sm:$0xff] }
  0xb7   :  { %2004 = vmatprep.subr.bf16.mxu1 %v2003_v10  ;;  %v2021_v10 = vpack.c.bf16 %v408_v1, %v400_v0  ;;  %v441_v16 = vld [vmem:[%s4846_s1 + $0xcd8] sm:$0xff]  ;;  %v2291_v17 = vpack.c.bf16 %v1143_v9, %v1141_v8  ;;  %v36_v37 = vld [vmem:[%s4846_s1 + $0x30] sm:$0xff]  ;;  %v2297_v40 = vpack.c.bf16 %v1146_v31, %v1144_v30 }
  0xb8   :  { %v2027_v22 = vpack.c.bf16 %v441_v16, %v433_v13  ;;  %v44_v38 = vld [vmem:[%s4846_s1 + $0x70] sm:$0xff]  ;;  %v93_v0 = vld [vmem:[%s4846_s1 + $0x1f8] sm:$0xff] }
  0xb9   :  { %2274 = vmatpush1.bf16.msra.mxu0 %v2273_v25  ;;  %v37_v25 = vld [vmem:[%s4846_s1 + $0x38] sm:$0xff]  ;;  %v1150_v45 = vld [vmem:[%s4848_s3 + $0x1f0] sm:$0xff] }
  0xba   :  { %2006 = vmatpush1.bf16.msra.mxu1 %v2005_v21  ;;  %2276 = vmatprep.subr.bf16.mxu0 %v2275_v28  ;;  %v1147_v21 = vld [vmem:[%s4848_s3 + $0x1d8] sm:$0xff]  ;;  %v52_v53 = vld [vmem:[%s4846_s1 + $0xb0] sm:$0xff] }
  0xbb   :  { %2008 = vmatprep.subr.bf16.mxu1 %v2007_v42  ;;  %v2025_v42 = vpack.c.bf16 %v424_v12, %v416_v47  ;;  %v45_v28 = vld [vmem:[%s4846_s1 + $0x78] sm:$0xff]  ;;  %v2295_v29 = vpack.c.bf16 %v1147_v21, %v1145_v20  ;;  %v60_v54 = vld [vmem:[%s4846_s1 + $0xf0] sm:$0xff] }
  0xbc   :  { %v2135_v36 = vpack.c.bf16 %v45_v28, %v37_v25  ;;  %v2141_v59 = vpack.c.bf16 %v60_v54, %v52_v53  ;;  %v68_v61 = vld [vmem:[%s4846_s1 + $0x130] sm:$0xff]  ;;  %v133_v16 = vld [vmem:[%s4846_s1 + $0x338] sm:$0xff] }
  0xbd   :  { %2278 = vmatpush1.bf16.msra.mxu0 %v2277_v39  ;;  %v53_v39 = vld [vmem:[%s4846_s1 + $0xb8] sm:$0xff]  ;;  %v84_v2 = vld [vmem:[%s4846_s1 + $0x1b0] sm:$0xff] }
  0xbe   :  { %2010 = vmatpush1.bf16.msra.mxu1 %v2009_v33  ;;  %2280 = vmatprep.subr.bf16.mxu0 %v2279_v41  ;;  %v1151_v33 = vld [vmem:[%s4848_s3 + $0x1f8] sm:$0xff]  ;;  %v100_v8 = vld [vmem:[%s4846_s1 + $0x230] sm:$0xff] }
  0xbf   :  { %2012 = vmatprep.subr.bf16.mxu1 %v2011_v35  ;;  %v2029_v35 = vpack.c.bf16 %v440_v24, %v432_v23  ;;  %v61_v41 = vld [vmem:[%s4846_s1 + $0xf8] sm:$0xff]  ;;  %v2299_v43 = vpack.c.bf16 %v1151_v33, %v1149_v32  ;;  %v108_v9 = vld [vmem:[%s4846_s1 + $0x270] sm:$0xff] }
  0xc0   :  { %v2139_v51 = vpack.c.bf16 %v61_v41, %v53_v39  ;;  %v2153_v47 = vpack.c.bf16 %v108_v9, %v100_v8  ;;  %v116_v13 = vld [vmem:[%s4846_s1 + $0x2b0] sm:$0xff]  ;;  %v165_v28 = vld [vmem:[%s4846_s1 + $0x438] sm:$0xff] }
  0xc1   :  { %2282 = vmatpush1.bf16.msra.mxu0 %v2281_v55  ;;  %v2301_v55 = vpack.c.bf16 %v1150_v45, %v1148_v44  ;;  %v132_v20 = vld [vmem:[%s4846_s1 + $0x330] sm:$0xff]  ;;  %v197_v41 = vld [vmem:[%s4846_s1 + $0x538] sm:$0xff] }
  0xc2   :  { %2014 = vmatpush1.bf16.msra.mxu1 %v2013_v48  ;;  %2284 = vmatprep.subr.bf16.mxu0 %v2283_v57  ;;  %v1155_v48 = vld [vmem:[%s4848_s3 + $0x218] sm:$0xff]  ;;  %v140_v21 = vld [vmem:[%s4846_s1 + $0x370] sm:$0xff] }
  0xc3   :  { %2016 = vmatprep.subr.bf16.mxu1 %v2015_v49  ;;  %v2137_v49 = vpack.c.bf16 %v44_v38, %v36_v37  ;;  %v77_v57 = vld [vmem:[%s4846_s1 + $0x178] sm:$0xff]  ;;  %v2303_v58 = vpack.c.bf16 %v1155_v48, %v1153_v46  ;;  %v2161_v23 = vpack.c.bf16 %v140_v21, %v132_v20  ;;  %v148_v25 = vld [vmem:[%s4846_s1 + $0x3b0] sm:$0xff] }
  0xc4   :  { %v2143_v60 = vpack.c.bf16 %v77_v57, %v69_v56  ;;  %v164_v32 = vld [vmem:[%s4846_s1 + $0x430] sm:$0xff]  ;;  %v229_v57 = vld [vmem:[%s4846_s1 + $0x638] sm:$0xff] }
  0xc5   :  { %2286 = vmatpush1.bf16.msra.mxu0 %v2285_v3  ;;  %v92_v3 = vld [vmem:[%s4846_s1 + $0x1f0] sm:$0xff] }
  0xc6   :  { %2018 = vmatpush1.bf16.msra.mxu1 %v2017_v62  ;;  %2288 = vmatprep.subr.bf16.mxu0 %v2287_v5  ;;  %v76_v62 = vld [vmem:[%s4846_s1 + $0x170] sm:$0xff]  ;;  %v109_v5 = vld [vmem:[%s4846_s1 + $0x278] sm:$0xff]  ;;  %v2149_v6 = vpack.c.bf16 %v92_v3, %v84_v2 }
  0xc7   :  { %2020 = vmatprep.subr.bf16.mxu1 %v2019_v63  ;;  %v85_v63 = vld [vmem:[%s4846_s1 + $0x1b8] sm:$0xff]  ;;  %v2151_v7 = vpack.c.bf16 %v109_v5, %v101_v4  ;;  %v172_v33 = vld [vmem:[%s4846_s1 + $0x470] sm:$0xff] }
  0xc8   :  { %v2147_v1 = vpack.c.bf16 %v93_v0, %v85_v63  ;;  %v2169_v37 = vpack.c.bf16 %v172_v33, %v164_v32  ;;  %v180_v39 = vld [vmem:[%s4846_s1 + $0x4b0] sm:$0xff]  ;;  %v245_v63 = vld [vmem:[%s4846_s1 + $0x6b8] sm:$0xff] }
  0xc9   :  { %2290 = vmatpush1.bf16.msra.mxu0 %v2289_v14  ;;  %v124_v14 = vld [vmem:[%s4846_s1 + $0x2f0] sm:$0xff]  ;;  %v253_v0 = vld [vmem:[%s4846_s1 + $0x6f8] sm:$0xff] }
  0xca   :  { %2022 = vmatpush1.bf16.msra.mxu1 %v2021_v10  ;;  %2292 = vmatprep.subr.bf16.mxu0 %v2291_v17  ;;  %v117_v10 = vld [vmem:[%s4846_s1 + $0x2b8] sm:$0xff]  ;;  %v2157_v18 = vpack.c.bf16 %v124_v14, %v116_v13  ;;  %v196_v46 = vld [vmem:[%s4846_s1 + $0x530] sm:$0xff] }
  0xcb   :  { %2024 = vmatprep.subr.bf16.mxu1 %v2023_v11  ;;  %v125_v11 = vld [vmem:[%s4846_s1 + $0x2f8] sm:$0xff]  ;;  %v204_v48 = vld [vmem:[%s4846_s1 + $0x570] sm:$0xff] }
  0xcc   :  { %v2155_v12 = vpack.c.bf16 %v125_v11, %v117_v10  ;;  %v141_v17 = vld [vmem:[%s4846_s1 + $0x378] sm:$0xff]  ;;  %v2177_v53 = vpack.c.bf16 %v204_v48, %v196_v46  ;;  %v220_v56 = vld [vmem:[%s4846_s1 + $0x5f0] sm:$0xff] }
  0xcd   :  { %2294 = vmatpush1.bf16.msra.mxu0 %v2293_v26  ;;  %v2159_v19 = vpack.c.bf16 %v141_v17, %v133_v16  ;;  %v156_v26 = vld [vmem:[%s4846_s1 + $0x3f0] sm:$0xff]  ;;  %v261_v4 = vld [vmem:[%s4846_s1 + $0x738] sm:$0xff] }
  0xce   :  { %2026 = vmatpush1.bf16.msra.mxu1 %v2025_v42  ;;  %2296 = vmatprep.subr.bf16.mxu0 %v2295_v29  ;;  %v149_v42 = vld [vmem:[%s4846_s1 + $0x3b8] sm:$0xff]  ;;  %v2165_v30 = vpack.c.bf16 %v156_v26, %v148_v25  ;;  %v244_v2 = vld [vmem:[%s4846_s1 + $0x6b0] sm:$0xff] }
  0xcf   :  { %2028 = vmatprep.subr.bf16.mxu1 %v2027_v22  ;;  %v157_v22 = vld [vmem:[%s4846_s1 + $0x3f8] sm:$0xff]  ;;  %v252_v3 = vld [vmem:[%s4846_s1 + $0x6f0] sm:$0xff] }
  0xd0   :  { %v2163_v24 = vpack.c.bf16 %v157_v22, %v149_v42  ;;  %v173_v29 = vld [vmem:[%s4846_s1 + $0x478] sm:$0xff]  ;;  %v260_v8 = vld [vmem:[%s4846_s1 + $0x730] sm:$0xff] }
  0xd1   :  { %2298 = vmatpush1.bf16.msra.mxu0 %v2297_v40  ;;  %v2167_v31 = vpack.c.bf16 %v173_v29, %v165_v28  ;;  %v188_v40 = vld [vmem:[%s4846_s1 + $0x4f0] sm:$0xff]  ;;  %v269_v5 = vld [vmem:[%s4846_s1 + $0x778] sm:$0xff] }
  0xd2   :  { %2030 = vmatpush1.bf16.msra.mxu1 %v2029_v35  ;;  %2300 = vmatprep.subr.bf16.mxu0 %v2299_v43  ;;  %v181_v35 = vld [vmem:[%s4846_s1 + $0x4b8] sm:$0xff]  ;;  %v2173_v44 = vpack.c.bf16 %v188_v40, %v180_v39  ;;  %v268_v9 = vld [vmem:[%s4846_s1 + $0x770] sm:$0xff] }
  0xd3   :  { %2136 = vmatprep.subr.bf16.mxu1 %v2135_v36  ;;  %v189_v36 = vld [vmem:[%s4846_s1 + $0x4f8] sm:$0xff]  ;;  %v276_v13 = vld [vmem:[%s4846_s1 + $0x7b0] sm:$0xff] }
  0xd4   :  { %v2171_v38 = vpack.c.bf16 %v189_v36, %v181_v35  ;;  %v205_v43 = vld [vmem:[%s4846_s1 + $0x578] sm:$0xff]  ;;  %v284_v14 = vld [vmem:[%s4846_s1 + $0x7f0] sm:$0xff] }
  0xd5   :  { %790 = vmatmul.mubr.f32.vlgmr.msra.gmra.mrb[2].mxu1 %v2916_v15  ;;  %2302 = vmatpush1.bf16.msra.mxu0 %v2301_v55  ;;  %v2175_v45 = vpack.c.bf16 %v205_v43, %v197_v41  ;;  %v212_v55 = vld [vmem:[%s4846_s1 + $0x5b0] sm:$0xff]  ;;  %v277_v10 = vld [vmem:[%s4846_s1 + $0x7b8] sm:$0xff] }
  0xd6   :  { %2138 = vmatpush1.bf16.msra.mxu1 %v2137_v49  ;;  %1002 = vmatprep.mubr.f32.mxu1 %v2735_v52  ;;  %v2145_v52 = vpack.c.bf16 %v76_v62, %v68_v61  ;;  %v213_v49 = vld [vmem:[%s4846_s1 + $0x5b8] sm:$0xff]  ;;  %v228_v61 = vld [vmem:[%s4846_s1 + $0x630] sm:$0xff] }
  0xd7   :  { %2140 = vmatprep.subr.bf16.mxu1 %v2139_v51  ;;  %2304 = vmatprep.subr.bf16.mxu0 %v2303_v58  ;;  %v221_v51 = vld [vmem:[%s4846_s1 + $0x5f8] sm:$0xff]  ;;  %v236_v62 = vld [vmem:[%s4846_s1 + $0x670] sm:$0xff] }
  0xd8   :  { %v2179_v54 = vpack.c.bf16 %v221_v51, %v213_v49  ;;  %v237_v58 = vld [vmem:[%s4846_s1 + $0x678] sm:$0xff]  ;;  %v292_v20 = vld [vmem:[%s4846_s1 + $0x830] sm:$0xff] }
  0xd9   :  { %v285_v11 = vld [vmem:[%s4846_s1 + $0x7f8] sm:$0xff]  ;;  %v300_v21 = vld [vmem:[%s4846_s1 + $0x870] sm:$0xff] }
  0xda   :  { %2142 = vmatpush1.bf16.msra.mxu1 %v2141_v59  ;;  %v2181_v59 = vpack.c.bf16 %v220_v56, %v212_v55  ;;  %v293_v16 = vld [vmem:[%s4846_s1 + $0x838] sm:$0xff]  ;;  %v308_v25 = vld [vmem:[%s4846_s1 + $0x8b0] sm:$0xff] }
  0xdb   :  { %2144 = vmatprep.subr.bf16.mxu1 %v2143_v60  ;;  %v2183_v60 = vpack.c.bf16 %v237_v58, %v229_v57  ;;  %v301_v17 = vld [vmem:[%s4846_s1 + $0x878] sm:$0xff]  ;;  %v316_v26 = vld [vmem:[%s4846_s1 + $0x8f0] sm:$0xff] }
  0xdc   :  { %v309_v42 = vld [vmem:[%s4846_s1 + $0x8b8] sm:$0xff]  ;;  %v324_v32 = vld [vmem:[%s4846_s1 + $0x930] sm:$0xff] }
  0xdd   :  { %v317_v22 = vld [vmem:[%s4846_s1 + $0x8f8] sm:$0xff]  ;;  %v332_v33 = vld [vmem:[%s4846_s1 + $0x970] sm:$0xff] }
  0xde   :  { %2146 = vmatpush1.bf16.msra.mxu1 %v2145_v52  ;;  %v2185_v52 = vpack.c.bf16 %v236_v62, %v228_v61  ;;  %v325_v28 = vld [vmem:[%s4846_s1 + $0x938] sm:$0xff] }
  0xdf   :  { %2148 = vmatprep.subr.bf16.mxu1 %v2147_v1  ;;  %v2187_v1 = vpack.c.bf16 %v253_v0, %v245_v63  ;;  %v333_v29 = vld [vmem:[%s4846_s1 + $0x978] sm:$0xff] }
  0xe0   :  { %v341_v35 = vld [vmem:[%s4846_s1 + $0x9b8] sm:$0xff] }
  0xe1   :  { %v357_v39 = vld [vmem:[%s4846_s1 + $0xa38] sm:$0xff] }
  0xe2   :  { %2150 = vmatpush1.bf16.msra.mxu1 %v2149_v6  ;;  %v2189_v6 = vpack.c.bf16 %v252_v3, %v244_v2  ;;  %v365_v40 = vld [vmem:[%s4846_s1 + $0xa78] sm:$0xff] }
  0xe3   :  { %2152 = vmatprep.subr.bf16.mxu1 %v2151_v7  ;;  %v2191_v7 = vpack.c.bf16 %v269_v5, %v261_v4  ;;  %v2215_v43 = vpack.c.bf16 %v365_v40, %v357_v39  ;;  %v373_v46 = vld [vmem:[%s4846_s1 + $0xab8] sm:$0xff] }
  0xe4   :  { %v381_v48 = vld [vmem:[%s4846_s1 + $0xaf8] sm:$0xff] }
  0xe5   :  { %v2219_v51 = vpack.c.bf16 %v381_v48, %v373_v46  ;;  %v389_v55 = vld [vmem:[%s4846_s1 + $0xb38] sm:$0xff] }
  0xe6   :  { %2154 = vmatpush1.bf16.msra.mxu1 %v2153_v47  ;;  %v2193_v47 = vpack.c.bf16 %v268_v9, %v260_v8  ;;  %v397_v56 = vld [vmem:[%s4846_s1 + $0xb78] sm:$0xff] }
  0xe7   :  { %2156 = vmatprep.subr.bf16.mxu1 %v2155_v12  ;;  %v2195_v12 = vpack.c.bf16 %v285_v11, %v277_v10  ;;  %v2223_v58 = vpack.c.bf16 %v397_v56, %v389_v55  ;;  %v405_v61 = vld [vmem:[%s4846_s1 + $0xbb8] sm:$0xff] }
  0xe8   :  { %v413_v62 = vld [vmem:[%s4846_s1 + $0xbf8] sm:$0xff] }
  0xe9   :  { %v2227_v0 = vpack.c.bf16 %v413_v62, %v405_v61  ;;  %v421_v2 = vld [vmem:[%s4846_s1 + $0xc38] sm:$0xff] }
  0xea   :  { %2158 = vmatpush1.bf16.msra.mxu1 %v2157_v18  ;;  %v2197_v18 = vpack.c.bf16 %v284_v14, %v276_v13  ;;  %v429_v3 = vld [vmem:[%s4846_s1 + $0xc78] sm:$0xff]  ;;  %v450_v14 = vsub.s32 0, %v2695_v34 }
  0xeb   :  { %2160 = vmatprep.subr.bf16.mxu1 %v2159_v19  ;;  %v2199_v19 = vpack.c.bf16 %v301_v17, %v293_v16  ;;  %v2231_v5 = vpack.c.bf16 %v429_v3, %v421_v2  ;;  %v437_v8 = vld [vmem:[%s4846_s1 + $0xcb8] sm:$0xff]  ;;  %v4125_v16 = vld [vmem:[%s4847_s2] sm:$0xff]  ;;  %v454_v17 = vsub.s32 1, %v2695_v34 }
  0xec   :  { %v445_v9 = vld [vmem:[%s4846_s1 + $0xcf8] sm:$0xff] }
  0xed   :  { %v2235_v11 = vpack.c.bf16 %v445_v9, %v437_v8  ;;  %v1167_v39 = vld [vmem:[%s4848_s3 + $0x278] sm:$0xff] }
  0xee   :  { %2162 = vmatpush1.bf16.msra.mxu1 %v2161_v23  ;;  %v2201_v23 = vpack.c.bf16 %v300_v21, %v292_v20  ;;  %v1171_v46 = vld [vmem:[%s4848_s3 + $0x298] sm:$0xff] }
  0xef   :  { %2164 = vmatprep.subr.bf16.mxu1 %v2163_v24  ;;  %v2203_v24 = vpack.c.bf16 %v317_v22, %v309_v42  ;;  %v1152_v22 = vld [vmem:[%s4848_s3 + $0x200] sm:$0xff]  ;;  %v1175_v55 = vld [vmem:[%s4848_s3 + $0x2b8] sm:$0xff] }
  0xf0   :  { %v1179_v61 = vld [vmem:[%s4848_s3 + $0x2d8] sm:$0xff] }
  0xf1   :  { %v1183_v2 = vld [vmem:[%s4848_s3 + $0x2f8] sm:$0xff] }
  0xf2   :  { %2166 = vmatpush1.bf16.msra.mxu1 %v2165_v30  ;;  %v2205_v30 = vpack.c.bf16 %v316_v26, %v308_v25  ;;  %v1159_v25 = vld [vmem:[%s4848_s3 + $0x238] sm:$0xff] }
  0xf3   :  { %2168 = vmatprep.subr.bf16.mxu1 %v2167_v31  ;;  %v2207_v31 = vpack.c.bf16 %v333_v29, %v325_v28  ;;  %v1187_v8 = vld [vmem:[%s4848_s3 + $0x318] sm:$0xff] }
  0xf6   :  { %2170 = vmatpush1.bf16.msra.mxu1 %v2169_v37  ;;  %v340_v37 = vld [vmem:[%s4846_s1 + $0x9b0] sm:$0xff] }
  0xf7   :  { %2172 = vmatprep.subr.bf16.mxu1 %v2171_v38  ;;  %v348_v38 = vld [vmem:[%s4846_s1 + $0x9f0] sm:$0xff] }
  0xf8   :  { %v2213_v41 = vpack.c.bf16 %v348_v38, %v340_v37  ;;  %v1162_v37 = vld [vmem:[%s4848_s3 + $0x250] sm:$0xff]  ;;  %v1165_v38 = vld [vmem:[%s4848_s3 + $0x268] sm:$0xff] }
  0xfa   :  { %2174 = vmatpush1.bf16.msra.mxu1 %v2173_v44  ;;  %v356_v44 = vld [vmem:[%s4846_s1 + $0xa30] sm:$0xff] }
  0xfb   :  { %2176 = vmatprep.subr.bf16.mxu1 %v2175_v45  ;;  %v364_v45 = vld [vmem:[%s4846_s1 + $0xa70] sm:$0xff] }
  0xfc   :  { %v2217_v49 = vpack.c.bf16 %v364_v45, %v356_v44  ;;  %v1166_v44 = vld [vmem:[%s4848_s3 + $0x270] sm:$0xff]  ;;  %v1169_v45 = vld [vmem:[%s4848_s3 + $0x288] sm:$0xff] }
  0xfe   :  { %2178 = vmatpush1.bf16.msra.mxu1 %v2177_v53  ;;  %v372_v53 = vld [vmem:[%s4846_s1 + $0xab0] sm:$0xff] }
  0xff   :  { %2180 = vmatprep.subr.bf16.mxu1 %v2179_v54  ;;  %v380_v54 = vld [vmem:[%s4846_s1 + $0xaf0] sm:$0xff] }
 0x100   :  { %v2221_v57 = vpack.c.bf16 %v380_v54, %v372_v53  ;;  %v1170_v53 = vld [vmem:[%s4848_s3 + $0x290] sm:$0xff]  ;;  %v1173_v54 = vld [vmem:[%s4848_s3 + $0x2a8] sm:$0xff] }
 0x102   :  { %2182 = vmatpush1.bf16.msra.mxu1 %v2181_v59  ;;  %v388_v59 = vld [vmem:[%s4846_s1 + $0xb30] sm:$0xff] }
 0x103   :  { %2184 = vmatprep.subr.bf16.mxu1 %v2183_v60  ;;  %v396_v60 = vld [vmem:[%s4846_s1 + $0xb70] sm:$0xff] }
 0x104   :  { %v2225_v63 = vpack.c.bf16 %v396_v60, %v388_v59  ;;  %v1174_v59 = vld [vmem:[%s4848_s3 + $0x2b0] sm:$0xff]  ;;  %v1177_v60 = vld [vmem:[%s4848_s3 + $0x2c8] sm:$0xff] }
 0x106   :  { %2186 = vmatpush1.bf16.msra.mxu1 %v2185_v52  ;;  %v404_v52 = vld [vmem:[%s4846_s1 + $0xbb0] sm:$0xff] }
 0x107   :  { %2188 = vmatprep.subr.bf16.mxu1 %v2187_v1  ;;  %v412_v1 = vld [vmem:[%s4846_s1 + $0xbf0] sm:$0xff] }
 0x108   :  { %v2229_v4 = vpack.c.bf16 %v412_v1, %v404_v52  ;;  %v1178_v52 = vld [vmem:[%s4848_s3 + $0x2d0] sm:$0xff]  ;;  %v1181_v1 = vld [vmem:[%s4848_s3 + $0x2e8] sm:$0xff] }
 0x10a   :  { %2190 = vmatpush1.bf16.msra.mxu1 %v2189_v6  ;;  %v420_v6 = vld [vmem:[%s4846_s1 + $0xc30] sm:$0xff] }
 0x10b   :  { %2192 = vmatprep.subr.bf16.mxu1 %v2191_v7  ;;  %v428_v7 = vld [vmem:[%s4846_s1 + $0xc70] sm:$0xff] }
 0x10c   :  { %v2233_v10 = vpack.c.bf16 %v428_v7, %v420_v6  ;;  %v1182_v6 = vld [vmem:[%s4848_s3 + $0x2f0] sm:$0xff]  ;;  %v1185_v7 = vld [vmem:[%s4848_s3 + $0x308] sm:$0xff] }
 0x10e   :  { %2194 = vmatpush1.bf16.msra.mxu1 %v2193_v47  ;;  %v436_v47 = vld [vmem:[%s4846_s1 + $0xcb0] sm:$0xff] }
 0x10f   :  { %2196 = vmatprep.subr.bf16.mxu1 %v2195_v12  ;;  %v444_v12 = vld [vmem:[%s4846_s1 + $0xcf0] sm:$0xff] }
 0x110   :  { %v2237_v13 = vpack.c.bf16 %v444_v12, %v436_v47  ;;  %v1186_v47 = vld [vmem:[%s4848_s3 + $0x310] sm:$0xff]  ;;  %v1189_v12 = vld [vmem:[%s4848_s3 + $0x328] sm:$0xff] }
 0x112   :  { %2198 = vmatpush1.bf16.msra.mxu1 %v2197_v18  ;;  %v451_v18 = vrot.slane %v4125_v16, %v450_v14 }
 0x113   :  { %2200 = vmatprep.subr.bf16.mxu1 %v2199_v19  ;;  %v455_v19 = vrot.slane %v4125_v16, %v454_v17 }
 0x115   :  { %1003 = vmatmul.mubr.f32.vlgmr.msra.gmra.mrb[4].mxu1 %v2731_v50  ;;  %v349_v50 = vld [vmem:[%s4846_s1 + $0x9f8] sm:$0xff] }
 0x116   :  { %2202 = vmatpush1.bf16.msra.mxu1 %v2201_v23  ;;  %1786 = vmatprep.mubr.msk.f32.mxu1 %vm509_vm0, %v2944_v27  ;;  %v2209_v27 = vpack.c.bf16 %v332_v33, %v324_v32  ;;  %v2211_v36 = vpack.c.bf16 %v349_v50, %v341_v35  ;;  %v1154_v23 = vld [vmem:[%s4848_s3 + $0x210] sm:$0xff]  ;;  %v1161_v33 = vld [vmem:[%s4848_s3 + $0x248] sm:$0xff]  ;;  %v1163_v35 = vld [vmem:[%s4848_s3 + $0x258] sm:$0xff] }
 0x117   :  { %2204 = vmatprep.subr.bf16.mxu1 %v2203_v24  ;;  %v1157_v24 = vld [vmem:[%s4848_s3 + $0x228] sm:$0xff]  ;;  %v2305_v28 = vpack.c.bf16 %v1154_v23, %v1152_v22  ;;  %v1158_v32 = vld [vmem:[%s4848_s3 + $0x230] sm:$0xff]  ;;  %v1195_v22 = vld [vmem:[%s4848_s3 + $0x358] sm:$0xff] }
 0x11a   :  { %2206 = vmatpush1.bf16.msra.mxu1 %v2205_v30  ;;  %v2307_v30 = vpack.c.bf16 %v1159_v25, %v1157_v24  ;;  %v1192_v24 = vld [vmem:[%s4848_s3 + $0x340] sm:$0xff]  ;;  %v1194_v25 = vld [vmem:[%s4848_s3 + $0x350] sm:$0xff] }
 0x11b   :  { %2208 = vmatprep.subr.bf16.mxu1 %v2207_v31  ;;  %v1156_v31 = vld [vmem:[%s4848_s3 + $0x220] sm:$0xff] }
 0x11c   :  { %v2309_v50 = vpack.c.bf16 %v1158_v32, %v1156_v31  ;;  %v1196_v31 = vld [vmem:[%s4848_s3 + $0x360] sm:$0xff]  ;;  %v1198_v32 = vld [vmem:[%s4848_s3 + $0x370] sm:$0xff] }
 0x11e   :  { %2210 = vmatpush1.bf16.msra.mxu1 %v2209_v27  ;;  %v2311_v27 = vpack.c.bf16 %v1163_v35, %v1161_v33  ;;  %v1201_v35 = vld [vmem:[%s4848_s3 + $0x388] sm:$0xff] }
 0x11f   :  { %2212 = vmatprep.subr.bf16.mxu1 %v2211_v36  ;;  %v1160_v36 = vld [vmem:[%s4848_s3 + $0x240] sm:$0xff] }
 0x120   :  { %v2313_v40 = vpack.c.bf16 %v1162_v37, %v1160_v36  ;;  %v2349_v36 = vpack.c.bf16 %v1198_v32, %v1196_v31  ;;  %v1642_v31 = vld [vmem:[%s4850_s5] sm:$0xff] }
 0x122   :  { %2214 = vmatpush1.bf16.msra.mxu1 %v2213_v41  ;;  %v2315_v41 = vpack.c.bf16 %v1167_v39, %v1165_v38  ;;  %v1200_v38 = vld [vmem:[%s4848_s3 + $0x380] sm:$0xff]  ;;  %v1202_v39 = vld [vmem:[%s4848_s3 + $0x390] sm:$0xff] }
 0x123   :  { %2216 = vmatprep.subr.bf16.mxu1 %v2215_v43  ;;  %v1164_v43 = vld [vmem:[%s4848_s3 + $0x260] sm:$0xff] }
 0x124   :  { %v2317_v48 = vpack.c.bf16 %v1166_v44, %v1164_v43  ;;  %v2353_v43 = vpack.c.bf16 %v1202_v39, %v1200_v38 }
 0x126   :  { %2218 = vmatpush1.bf16.msra.mxu1 %v2217_v49  ;;  %v2319_v49 = vpack.c.bf16 %v1171_v46, %v1169_v45  ;;  %v1204_v45 = vld [vmem:[%s4848_s3 + $0x3a0] sm:$0xff]  ;;  %v1206_v46 = vld [vmem:[%s4848_s3 + $0x3b0] sm:$0xff] }
 0x127   :  { %2220 = vmatprep.subr.bf16.mxu1 %v2219_v51  ;;  %v1168_v51 = vld [vmem:[%s4848_s3 + $0x280] sm:$0xff] }
 0x128   :  { %v2321_v56 = vpack.c.bf16 %v1170_v53, %v1168_v51  ;;  %v2357_v51 = vpack.c.bf16 %v1206_v46, %v1204_v45  ;;  %v1231_v45 = vld [vmem:[%s4848_s3 + $0x478] sm:$0xff]  ;;  %v1663_v46 = vld [vmem:[%s4850_s5 + $0xa8] sm:$0xff] }
 0x12a   :  { %2222 = vmatpush1.bf16.msra.mxu1 %v2221_v57  ;;  %v2323_v57 = vpack.c.bf16 %v1175_v55, %v1173_v54  ;;  %v1208_v54 = vld [vmem:[%s4848_s3 + $0x3c0] sm:$0xff]  ;;  %v1210_v55 = vld [vmem:[%s4848_s3 + $0x3d0] sm:$0xff] }
 0x12b   :  { %2224 = vmatprep.subr.bf16.mxu1 %v2223_v58  ;;  %v1172_v58 = vld [vmem:[%s4848_s3 + $0x2a0] sm:$0xff] }
 0x12c   :  { %v2325_v62 = vpack.c.bf16 %v1174_v59, %v1172_v58  ;;  %v2361_v58 = vpack.c.bf16 %v1210_v55, %v1208_v54  ;;  %v1646_v54 = vld [vmem:[%s4850_s5 + $0x20] sm:$0xff]  ;;  %v1647_v55 = vld [vmem:[%s4850_s5 + $0x28] sm:$0xff] }
 0x12e   :  { %2226 = vmatpush1.bf16.msra.mxu1 %v2225_v63  ;;  %v2327_v63 = vpack.c.bf16 %v1179_v61, %v1177_v60  ;;  %v1212_v60 = vld [vmem:[%s4848_s3 + $0x3e0] sm:$0xff]  ;;  %v1214_v61 = vld [vmem:[%s4848_s3 + $0x3f0] sm:$0xff] }
 0x12f   :  { %2228 = vmatprep.subr.bf16.mxu1 %v2227_v0  ;;  %v1176_v0 = vld [vmem:[%s4848_s3 + $0x2c0] sm:$0xff] }
 0x130   :  { %v2329_v3 = vpack.c.bf16 %v1178_v52, %v1176_v0  ;;  %v2365_v0 = vpack.c.bf16 %v1214_v61, %v1212_v60  ;;  %v1233_v60 = vld [vmem:[%s4848_s3 + $0x488] sm:$0xff]  ;;  %v1235_v61 = vld [vmem:[%s4848_s3 + $0x498] sm:$0xff] }
 0x132   :  { %2230 = vmatpush1.bf16.msra.mxu1 %v2229_v4  ;;  %v2331_v4 = vpack.c.bf16 %v1183_v2, %v1181_v1  ;;  %v470_v1 = vsub.s32 5, %v2695_v34  ;;  %v458_v2 = vsub.s32 2, %v2695_v34 }
 0x133   :  { %2232 = vmatprep.subr.bf16.mxu1 %v2231_v5  ;;  %v1180_v5 = vld [vmem:[%s4848_s3 + $0x2e0] sm:$0xff] }
 0x134   :  { %v2333_v9 = vpack.c.bf16 %v1182_v6, %v1180_v5  ;;  %v459_v5 = vrot.slane %v4125_v16, %v458_v2  ;;  %v1649_v2 = vld [vmem:[%s4850_s5 + $0x38] sm:$0xff] }
 0x136   :  { %2234 = vmatpush1.bf16.msra.mxu1 %v2233_v10  ;;  %v2335_v10 = vpack.c.bf16 %v1187_v8, %v1185_v7 }
 0x137   :  { %2236 = vmatprep.subr.bf16.mxu1 %v2235_v11  ;;  %v1184_v11 = vld [vmem:[%s4848_s3 + $0x300] sm:$0xff] }
 0x13a   :  { %2238 = vmatpush1.bf16.msra.mxu1 %v2237_v13  ;;  %v1191_v13 = vld [vmem:[%s4848_s3 + $0x338] sm:$0xff] }
 0x13d   :  { %1074 = vmatmul.mubr.f32.vlgmr.msra.gmra.mrb[4].mxu1 %v2916_v15 }
 0x140   :  { %v649_v20 = vpop.f32.mrb[0].mxu1 }
 0x141   :  { %v2527_v21 = vadd.f32 %v649_v20, %v451_v18  ;;  %v651_v42 = vpop.f32.mrb[1].mxu1  ;;  %v2337_v18 = vpack.c.bf16 %v1186_v47, %v1184_v11  ;;  %v1188_v20 = vld [vmem:[%s4848_s3 + $0x320] sm:$0xff]  ;;  %v1218_v47 = vld [vmem:[%s4848_s3 + $0x410] sm:$0xff] }
 0x142   :  { %v2528_v15 = vadd.f32 %v651_v42, %v455_v19  ;;  %v2339_v19 = vpack.c.bf16 %v1191_v13, %v1189_v12  ;;  %v1193_v42 = vld [vmem:[%s4848_s3 + $0x348] sm:$0xff]  ;;  %v1216_v11 = vld [vmem:[%s4848_s3 + $0x400] sm:$0xff] }
 0x143   :  { %v1080_v29 = vmax.f32 %v2527_v21, 0.0  ;;  %v1190_v21 = vld [vmem:[%s4848_s3 + $0x330] sm:$0xff]  ;;  %v1221_v13 = vld [vmem:[%s4848_s3 + $0x428] sm:$0xff] }
 0x144   :  { %v1081_v26 = vmax.f32 %v2528_v15, 0.0  ;;  %v2341_v23 = vpack.c.bf16 %v1190_v21, %v1188_v20  ;;  %v2343_v15 = vpack.c.bf16 %v1195_v22, %v1193_v42  ;;  %v2369_v20 = vpack.c.bf16 %v1218_v47, %v1216_v11  ;;  %v1236_v11 = vld [vmem:[%s4848_s3 + $0x4a0] sm:$0xff] }
 0x146   :  { %1420 = vmatprep.mubr.f32.mxu0 %v1081_v26  ;;  %v1197_v26 = vld [vmem:[%s4848_s3 + $0x368] sm:$0xff] }
 0x147   :  { %1421 = vmatmul.mubr.f32.vlgmr.msra.gmra.mrb[2].mxu0 %v1080_v29  ;;  %v2345_v29 = vpack.c.bf16 %v1194_v25, %v1192_v24  ;;  %v1225_v24 = vld [vmem:[%s4848_s3 + $0x448] sm:$0xff]  ;;  %v1227_v25 = vld [vmem:[%s4848_s3 + $0x458] sm:$0xff] }
 0x148   :  { %2306 = vmatpush1.bf16.msra.mxu0 %v2305_v28  ;;  %v1199_v28 = vld [vmem:[%s4848_s3 + $0x378] sm:$0xff] }
 0x149   :  { %2308 = vmatprep.subr.bf16.mxu0 %v2307_v30  ;;  %v2347_v30 = vpack.c.bf16 %v1199_v28, %v1197_v26  ;;  %v1224_v26 = vld [vmem:[%s4848_s3 + $0x440] sm:$0xff]  ;;  %v1226_v28 = vld [vmem:[%s4848_s3 + $0x450] sm:$0xff] }
 0x14c   :  { %2310 = vmatpush1.bf16.msra.mxu0 %v2309_v50  ;;  %v1203_v50 = vld [vmem:[%s4848_s3 + $0x398] sm:$0xff] }
 0x14d   :  { %2312 = vmatprep.subr.bf16.mxu0 %v2311_v27  ;;  %v2351_v37 = vpack.c.bf16 %v1203_v50, %v1201_v35  ;;  %v1643_v50 = vld [vmem:[%s4850_s5 + $0x8] sm:$0xff] }
 0x14e   :  { %v2497_v38 = vpack.c.bf16 %v1643_v50, %v1642_v31  ;;  %v1670_v31 = vld [vmem:[%s4850_s5 + $0xe0] sm:$0xff]  ;;  %v1247_v50 = vld [vmem:[%s4848_s3 + $0x4f8] sm:$0xff] }
 0x150   :  { %2314 = vmatpush1.bf16.msra.mxu0 %v2313_v40  ;;  %v1205_v40 = vld [vmem:[%s4848_s3 + $0x3a8] sm:$0xff] }
 0x151   :  { %2316 = vmatprep.subr.bf16.mxu0 %v2315_v41  ;;  %v1207_v41 = vld [vmem:[%s4848_s3 + $0x3b8] sm:$0xff] }
 0x152   :  { %v2355_v44 = vpack.c.bf16 %v1207_v41, %v1205_v40  ;;  %v1644_v40 = vld [vmem:[%s4850_s5 + $0x10] sm:$0xff]  ;;  %v1645_v41 = vld [vmem:[%s4850_s5 + $0x18] sm:$0xff] }
 0x154   :  { %2318 = vmatpush1.bf16.msra.mxu0 %v2317_v48  ;;  %v1209_v48 = vld [vmem:[%s4848_s3 + $0x3c8] sm:$0xff] }
 0x155   :  { %2320 = vmatprep.subr.bf16.mxu0 %v2319_v49  ;;  %v1211_v49 = vld [vmem:[%s4848_s3 + $0x3d8] sm:$0xff] }
 0x156   :  { %v2359_v53 = vpack.c.bf16 %v1211_v49, %v1209_v48  ;;  %v2501_v48 = vpack.c.bf16 %v1645_v41, %v1644_v40  ;;  %v2377_v49 = vpack.c.bf16 %v1226_v28, %v1224_v26  ;;  %v1652_v26 = vld [vmem:[%s4850_s5 + $0x50] sm:$0xff]  ;;  %v1653_v28 = vld [vmem:[%s4850_s5 + $0x58] sm:$0xff]  ;;  %v1249_v41 = vld [vmem:[%s4848_s3 + $0x508] sm:$0xff] }
 0x157   :  { %v1246_v40 = vld [vmem:[%s4848_s3 + $0x4f0] sm:$0xff] }
 0x158   :  { %2322 = vmatpush1.bf16.msra.mxu0 %v2321_v56  ;;  %v1213_v56 = vld [vmem:[%s4848_s3 + $0x3e8] sm:$0xff] }
 0x159   :  { %2324 = vmatprep.subr.bf16.mxu0 %v2323_v57  ;;  %v1215_v57 = vld [vmem:[%s4848_s3 + $0x3f8] sm:$0xff] }
 0x15a   :  { %v2363_v59 = vpack.c.bf16 %v1215_v57, %v1213_v56  ;;  %v1230_v57 = vld [vmem:[%s4848_s3 + $0x470] sm:$0xff] }
 0x15c   :  { %2326 = vmatpush1.bf16.msra.mxu0 %v2325_v62  ;;  %v1217_v62 = vld [vmem:[%s4848_s3 + $0x408] sm:$0xff] }
 0x15d   :  { %2328 = vmatprep.subr.bf16.mxu0 %v2327_v63  ;;  %v1219_v63 = vld [vmem:[%s4848_s3 + $0x418] sm:$0xff] }
 0x15e   :  { %v2367_v52 = vpack.c.bf16 %v1219_v63, %v1217_v62  ;;  %v2505_v62 = vpack.c.bf16 %v1647_v55, %v1646_v54  ;;  %v1252_v55 = vld [vmem:[%s4848_s3 + $0x520] sm:$0xff] }
 0x160   :  { %2330 = vmatpush1.bf16.msra.mxu0 %v2329_v3  ;;  %v462_v3 = vsub.s32 3, %v2695_v34 }
 0x161   :  { %2332 = vmatprep.subr.bf16.mxu0 %v2331_v4  ;;  %v471_v4 = vrot.slane %v4125_v16, %v470_v1  ;;  %v1648_v1 = vld [vmem:[%s4850_s5 + $0x30] sm:$0xff] }
 0x162   :  { %v463_v6 = vrot.slane %v4125_v16, %v462_v3  ;;  %v2383_v3 = vpack.c.bf16 %v1235_v61, %v1233_v60  ;;  %v1256_v61 = vld [vmem:[%s4848_s3 + $0x540] sm:$0xff] }
 0x164   :  { %2334 = vmatpush1.bf16.msra.mxu0 %v2333_v9 }
 0x165   :  { %2336 = vmatprep.subr.bf16.mxu0 %v2335_v10 }
 0x168   :  { %2338 = vmatpush1.bf16.msra.mxu0 %v2337_v18  ;;  %v1223_v18 = vld [vmem:[%s4848_s3 + $0x438] sm:$0xff] }
 0x169   :  { %2340 = vmatprep.subr.bf16.mxu0 %v2339_v19  ;;  %v2371_v22 = vpack.c.bf16 %v1223_v18, %v1221_v13  ;;  %v1651_v13 = vld [vmem:[%s4850_s5 + $0x48] sm:$0xff] }
 0x16b   :  { %v4273_v33 = vpop.f32.mrb[0].mxu0 }
 0x16c   :  { %2342 = vmatpush1.bf16.msra.mxu0 %v2341_v23  ;;  %v935_v27 = vpop.f32.mrb[1].mxu0  ;;  %v1220_v23 = vld [vmem:[%s4848_s3 + $0x420] sm:$0xff] }
 0x16d   :  { %2344 = vmatprep.subr.bf16.mxu0 %v2343_v15  ;;  %v2532_v8 = vadd.f32 %v935_v27, %v471_v4  ;;  %v1222_v15 = vld [vmem:[%s4848_s3 + $0x430] sm:$0xff] }
 0x16e   :  { %v2373_v32 = vpack.c.bf16 %v1222_v15, %v1220_v23  ;;  %v1660_v27 = vld [vmem:[%s4850_s5 + $0x90] sm:$0xff] }
 0x16f   :  { %v1085_v21 = vmax.f32 %v2532_v8, 0.0  ;;  %v1234_v4 = vld [vmem:[%s4848_s3 + $0x490] sm:$0xff]  ;;  %v1239_v8 = vld [vmem:[%s4848_s3 + $0x4b8] sm:$0xff] }
 0x170   :  { %2346 = vmatpush1.bf16.msra.mxu0 %v2345_v29  ;;  %v1658_v29 = vld [vmem:[%s4850_s5 + $0x80] sm:$0xff] }
 0x171   :  { %2348 = vmatprep.subr.bf16.mxu0 %v2347_v30  ;;  %v1659_v30 = vld [vmem:[%s4850_s5 + $0x88] sm:$0xff] }
 0x172   :  { %v2495_v35 = vpack.c.bf16 %v1659_v30, %v1658_v29  ;;  %v1242_v30 = vld [vmem:[%s4848_s3 + $0x4d0] sm:$0xff] }
 0x174   :  { %2350 = vmatpush1.bf16.msra.mxu0 %v2349_v36  ;;  %v1661_v36 = vld [vmem:[%s4850_s5 + $0x98] sm:$0xff]  ;;  %2496 = vmatprep.subr.bf16.mxu1 %v2495_v35  ;;  %v1245_v35 = vld [vmem:[%s4848_s3 + $0x4e8] sm:$0xff] }
 0x175   :  { %2352 = vmatprep.subr.bf16.mxu0 %v2351_v37  ;;  %v2375_v37 = vpack.c.bf16 %v1227_v25, %v1225_v24  ;;  %v2499_v39 = vpack.c.bf16 %v1661_v36, %v1660_v27  ;;  %2498 = vmatpush3.bf16.msra.mxu1 %v2497_v38  ;;  %v1240_v24 = vld [vmem:[%s4848_s3 + $0x4c0] sm:$0xff]  ;;  %v2517_v27 = vpack.c.bf16 %v1653_v28, %v1652_v26 }
 0x176   :  { %v2393_v36 = vpack.c.bf16 %v1242_v30, %v1240_v24  ;;  %v2395_v38 = vpack.c.bf16 %v1247_v50, %v1245_v35  ;;  %v1277_v24 = vld [vmem:[%s4848_s3 + $0x5e8] sm:$0xff]  ;;  %v1276_v30 = vld [vmem:[%s4848_s3 + $0x5e0] sm:$0xff]  ;;  %v1283_v35 = vld [vmem:[%s4848_s3 + $0x618] sm:$0xff] }
 0x177   :  { %2500 = vmatprep.subr.bf16.mxu1 %v2499_v39  ;;  %v1244_v39 = vld [vmem:[%s4848_s3 + $0x4e0] sm:$0xff] }
 0x178   :  { %2354 = vmatpush1.bf16.msra.mxu0 %v2353_v43  ;;  %v1662_v43 = vld [vmem:[%s4850_s5 + $0xa0] sm:$0xff] }
 0x179   :  { %2356 = vmatprep.subr.bf16.mxu0 %v2355_v44  ;;  %v1229_v44 = vld [vmem:[%s4848_s3 + $0x468] sm:$0xff]  ;;  %2502 = vmatpush3.bf16.msra.mxu1 %v2501_v48  ;;  %v1250_v48 = vld [vmem:[%s4848_s3 + $0x510] sm:$0xff] }
 0x17a   :  { %v2379_v56 = vpack.c.bf16 %v1231_v45, %v1229_v44  ;;  %v2397_v44 = vpack.c.bf16 %v1246_v40, %v1244_v39  ;;  %v1285_v39 = vld [vmem:[%s4848_s3 + $0x628] sm:$0xff]  ;;  %v1287_v40 = vld [vmem:[%s4848_s3 + $0x638] sm:$0xff] }
 0x17c   :  { %2358 = vmatpush1.bf16.msra.mxu0 %v2357_v51  ;;  %v1228_v51 = vld [vmem:[%s4848_s3 + $0x460] sm:$0xff] }
 0x17d   :  { %2360 = vmatprep.subr.bf16.mxu0 %v2359_v53  ;;  %v2503_v53 = vpack.c.bf16 %v1663_v46, %v1662_v43  ;;  %v2381_v63 = vpack.c.bf16 %v1230_v57, %v1228_v51  ;;  %v1251_v43 = vld [vmem:[%s4848_s3 + $0x518] sm:$0xff]  ;;  %v1248_v46 = vld [vmem:[%s4848_s3 + $0x500] sm:$0xff]  ;;  %v1257_v57 = vld [vmem:[%s4848_s3 + $0x548] sm:$0xff] }
 0x17e   :  { %v2399_v45 = vpack.c.bf16 %v1251_v43, %v1249_v41  ;;  %v1255_v51 = vld [vmem:[%s4848_s3 + $0x538] sm:$0xff]  ;;  %v2435_v43 = vpack.c.bf16 %v1287_v40, %v1285_v39 }
 0x17f   :  { %2504 = vmatprep.subr.bf16.mxu1 %v2503_v53  ;;  %v2401_v53 = vpack.c.bf16 %v1250_v48, %v1248_v46  ;;  %v1289_v46 = vld [vmem:[%s4848_s3 + $0x648] sm:$0xff]  ;;  %v1291_v48 = vld [vmem:[%s4848_s3 + $0x658] sm:$0xff] }
 0x180   :  { %2362 = vmatpush1.bf16.msra.mxu0 %v2361_v58  ;;  %v1664_v58 = vld [vmem:[%s4850_s5 + $0xb0] sm:$0xff]  ;;  %2506 = vmatpush3.bf16.msra.mxu1 %v2505_v62 }
 0x181   :  { %2364 = vmatprep.subr.bf16.mxu0 %v2363_v59  ;;  %v1665_v59 = vld [vmem:[%s4850_s5 + $0xb8] sm:$0xff]  ;;  %v1258_v62 = vld [vmem:[%s4848_s3 + $0x550] sm:$0xff] }
 0x184   :  { %2366 = vmatpush1.bf16.msra.mxu0 %v2365_v0  ;;  %v1232_v0 = vld [vmem:[%s4848_s3 + $0x480] sm:$0xff] }
 0x185   :  { %2368 = vmatprep.subr.bf16.mxu0 %v2367_v52  ;;  %v2507_v52 = vpack.c.bf16 %v1665_v59, %v1664_v58  ;;  %v1259_v58 = vld [vmem:[%s4848_s3 + $0x558] sm:$0xff] }
 0x186   :  { %v2407_v60 = vpack.c.bf16 %v1259_v58, %v1257_v57 }
 0x187   :  { %2508 = vmatprep.subr.bf16.mxu1 %v2507_v52  ;;  %v2409_v52 = vpack.c.bf16 %v1258_v62, %v1256_v61  ;;  %v1297_v61 = vld [vmem:[%s4848_s3 + $0x688] sm:$0xff]  ;;  %v1299_v62 = vld [vmem:[%s4848_s3 + $0x698] sm:$0xff] }
 0x1a8   :  { %v791_v7 = vpop.f32.mrb[2].mxu1 }
 0x1a9   :  { %v2529_v9 = vadd.f32 %v791_v7, %v459_v5  ;;  %v793_v10 = vpop.f32.mrb[3].mxu1  ;;  %v1666_v5 = vld [vmem:[%s4850_s5 + $0xc0] sm:$0xff]  ;;  %v1237_v7 = vld [vmem:[%s4848_s3 + $0x4a8] sm:$0xff] }
 0x1aa   :  { %v2530_v12 = vadd.f32 %v793_v10, %v463_v6  ;;  %v1667_v6 = vld [vmem:[%s4850_s5 + $0xc8] sm:$0xff]  ;;  %v2385_v10 = vpack.c.bf16 %v1234_v4, %v1232_v0  ;;  %v2387_v18 = vpack.c.bf16 %v1239_v8, %v1237_v7  ;;  %v1263_v0 = vld [vmem:[%s4848_s3 + $0x578] sm:$0xff]  ;;  %v1264_v8 = vld [vmem:[%s4848_s3 + $0x580] sm:$0xff] }
 0x1ab   :  { %v1082_v42 = vmax.f32 %v2529_v9, 0.0  ;;  %v2509_v9 = vpack.c.bf16 %v1649_v2, %v1648_v1  ;;  %v2511_v47 = vpack.c.bf16 %v1667_v6, %v1666_v5  ;;  %v1260_v2 = vld [vmem:[%s4848_s3 + $0x560] sm:$0xff]  ;;  %v1265_v4 = vld [vmem:[%s4848_s3 + $0x588] sm:$0xff]  ;;  %v1267_v5 = vld [vmem:[%s4848_s3 + $0x598] sm:$0xff] }
 0x1ac   :  { %v1083_v19 = vmax.f32 %v2530_v12, 0.0  ;;  %v1650_v12 = vld [vmem:[%s4850_s5 + $0x40] sm:$0xff]  ;;  %v2415_v7 = vpack.c.bf16 %v1267_v5, %v1265_v4 }
 0x1ad   :  { %2510 = vmatpush3.bf16.msra.mxu1 %v2509_v9  ;;  %v2513_v23 = vpack.c.bf16 %v1651_v13, %v1650_v12  ;;  %v1266_v9 = vld [vmem:[%s4848_s3 + $0x590] sm:$0xff]  ;;  %v1268_v13 = vld [vmem:[%s4848_s3 + $0x5a0] sm:$0xff] }
 0x1ae   :  { %1491 = vmatprep.mubr.f32.mxu0 %v1083_v19  ;;  %v1238_v19 = vld [vmem:[%s4848_s3 + $0x4b0] sm:$0xff]  ;;  %2512 = vmatprep.subr.bf16.mxu1 %v2511_v47  ;;  %v2417_v47 = vpack.c.bf16 %v1266_v9, %v1264_v8  ;;  %v1305_v8 = vld [vmem:[%s4848_s3 + $0x6c8] sm:$0xff]  ;;  %v1307_v9 = vld [vmem:[%s4848_s3 + $0x6d8] sm:$0xff] }
 0x1af   :  { %1492 = vmatmul.mubr.f32.vlgmr.msra.gmra.mrb[2].mxu0 %v1082_v42  ;;  %v1241_v42 = vld [vmem:[%s4848_s3 + $0x4c8] sm:$0xff]  ;;  %v2389_v15 = vpack.c.bf16 %v1238_v19, %v1236_v11  ;;  %v1271_v11 = vld [vmem:[%s4848_s3 + $0x5b8] sm:$0xff] }
 0x1b0   :  { %2370 = vmatpush1.bf16.msra.mxu0 %v2369_v20  ;;  %1562 = vmatprep.mubr.f32.mxu0 %v1085_v21  ;;  %v1668_v20 = vld [vmem:[%s4850_s5 + $0xd0] sm:$0xff]  ;;  %v1669_v21 = vld [vmem:[%s4850_s5 + $0xd8] sm:$0xff]  ;;  %v1273_v19 = vld [vmem:[%s4848_s3 + $0x5c8] sm:$0xff] }
 0x1b1   :  { %2372 = vmatprep.subr.bf16.mxu0 %v2371_v22  ;;  %v1243_v22 = vld [vmem:[%s4848_s3 + $0x4d8] sm:$0xff]  ;;  %v2515_v25 = vpack.c.bf16 %v1669_v21, %v1668_v20  ;;  %2514 = vmatpush3.bf16.msra.mxu1 %v2513_v23  ;;  %v1272_v23 = vld [vmem:[%s4848_s3 + $0x5c0] sm:$0xff] }
 0x1b2   :  { %v2391_v29 = vpack.c.bf16 %v1243_v22, %v1241_v42  ;;  %v1275_v20 = vld [vmem:[%s4848_s3 + $0x5d8] sm:$0xff]  ;;  %v466_v42 = vsub.s32 4, %v2695_v34 }
 0x1b3   :  { %2516 = vmatprep.subr.bf16.mxu1 %v2515_v25  ;;  %v2423_v22 = vpack.c.bf16 %v1275_v20, %v1273_v19  ;;  %v1279_v25 = vld [vmem:[%s4848_s3 + $0x5f8] sm:$0xff] }
 0x1b4   :  { %2374 = vmatpush1.bf16.msra.mxu0 %v2373_v32  ;;  %v1671_v32 = vld [vmem:[%s4850_s5 + $0xe8] sm:$0xff]  ;;  %v467_v28 = vrot.slane %v4125_v16, %v466_v42  ;;  %v1310_v42 = vld [vmem:[%s4848_s3 + $0x6f0] sm:$0xff] }
 0x1b5   :  { %2376 = vmatprep.subr.bf16.mxu0 %v2375_v37  ;;  %v2519_v37 = vpack.c.bf16 %v1671_v32, %v1670_v31  ;;  %2518 = vmatpush3.bf16.msra.mxu1 %v2517_v27  ;;  %v1278_v31 = vld [vmem:[%s4848_s3 + $0x5f0] sm:$0xff]  ;;  %v1281_v32 = vld [vmem:[%s4848_s3 + $0x608] sm:$0xff] }
 0x1b6   :  { %v2429_v50 = vpack.c.bf16 %v1278_v31, %v1276_v30  ;;  %v2531_v27 = vadd.f32 %v4273_v33, %v467_v28  ;;  %v478_v28 = vsub.s32 7, %v2695_v34  ;;  %v1319_v30 = vld [vmem:[%s4848_s3 + $0x738] sm:$0xff] }
 0x1b7   :  { %2520 = vmatprep.subr.bf16.mxu1 %v2519_v37  ;;  %v1280_v37 = vld [vmem:[%s4848_s3 + $0x600] sm:$0xff] }
 0x1b8   :  { %2378 = vmatpush1.bf16.msra.mxu0 %v2377_v49  ;;  %v1253_v49 = vld [vmem:[%s4848_s3 + $0x528] sm:$0xff]  ;;  %v1084_v41 = vmax.f32 %v2531_v27, 0.0  ;;  %v479_v27 = vrot.slane %v4125_v16, %v478_v28 }
 0x1b9   :  { %2380 = vmatprep.subr.bf16.mxu0 %v2379_v56  ;;  %v2403_v54 = vpack.c.bf16 %v1255_v51, %v1253_v49  ;;  %v1254_v56 = vld [vmem:[%s4848_s3 + $0x530] sm:$0xff]  ;;  %v2439_v51 = vpack.c.bf16 %v1291_v48, %v1289_v46  ;;  %v1327_v46 = vld [vmem:[%s4848_s3 + $0x778] sm:$0xff] }
 0x1ba   :  { %v2405_v59 = vpack.c.bf16 %v1254_v56, %v1252_v55  ;;  %v1293_v55 = vld [vmem:[%s4848_s3 + $0x668] sm:$0xff]  ;;  %v1295_v56 = vld [vmem:[%s4848_s3 + $0x678] sm:$0xff] }
 0x1bb   :  { %v2443_v58 = vpack.c.bf16 %v1295_v56, %v1293_v55  ;;  %v1329_v55 = vld [vmem:[%s4848_s3 + $0x788] sm:$0xff]  ;;  %v1331_v56 = vld [vmem:[%s4848_s3 + $0x798] sm:$0xff] }
 0x1bc   :  { %2382 = vmatpush1.bf16.msra.mxu0 %v2381_v63  ;;  %v1261_v63 = vld [vmem:[%s4848_s3 + $0x568] sm:$0xff] }
 0x1bd   :  { %2384 = vmatprep.subr.bf16.mxu0 %v2383_v3  ;;  %v2411_v1 = vpack.c.bf16 %v1263_v0, %v1261_v63  ;;  %v1262_v3 = vld [vmem:[%s4848_s3 + $0x570] sm:$0xff]  ;;  %v2447_v0 = vpack.c.bf16 %v1299_v62, %v1297_v61  ;;  %v1333_v61 = vld [vmem:[%s4848_s3 + $0x7a8] sm:$0xff]  ;;  %v1335_v62 = vld [vmem:[%s4848_s3 + $0x7b8] sm:$0xff] }
 0x1be   :  { %v2413_v6 = vpack.c.bf16 %v1262_v3, %v1260_v2  ;;  %v1301_v2 = vld [vmem:[%s4848_s3 + $0x6a8] sm:$0xff]  ;;  %v1303_v3 = vld [vmem:[%s4848_s3 + $0x6b8] sm:$0xff] }
 0x1bf   :  { %v2451_v5 = vpack.c.bf16 %v1303_v3, %v1301_v2  ;;  %v1337_v2 = vld [vmem:[%s4848_s3 + $0x7c8] sm:$0xff]  ;;  %v1339_v3 = vld [vmem:[%s4848_s3 + $0x7d8] sm:$0xff] }
 0x1c0   :  { %2386 = vmatpush1.bf16.msra.mxu0 %v2385_v10  ;;  %v1269_v10 = vld [vmem:[%s4848_s3 + $0x5a8] sm:$0xff] }
 0x1c1   :  { %2388 = vmatprep.subr.bf16.mxu0 %v2387_v18  ;;  %v2419_v12 = vpack.c.bf16 %v1271_v11, %v1269_v10  ;;  %v1270_v18 = vld [vmem:[%s4848_s3 + $0x5b0] sm:$0xff]  ;;  %v2455_v11 = vpack.c.bf16 %v1307_v9, %v1305_v8  ;;  %v1341_v9 = vld [vmem:[%s4848_s3 + $0x7e8] sm:$0xff] }
 0x1c2   :  { %v2421_v21 = vpack.c.bf16 %v1270_v18, %v1268_v13  ;;  %v1309_v13 = vld [vmem:[%s4848_s3 + $0x6e8] sm:$0xff]  ;;  %v1311_v18 = vld [vmem:[%s4848_s3 + $0x6f8] sm:$0xff]  ;;  %v1338_v8 = vld [vmem:[%s4848_s3 + $0x7d0] sm:$0xff] }
 0x1c3   :  { %v2459_v20 = vpack.c.bf16 %v1311_v18, %v1309_v13  ;;  %v1340_v13 = vld [vmem:[%s4848_s3 + $0x7e0] sm:$0xff]  ;;  %v1342_v18 = vld [vmem:[%s4848_s3 + $0x7f0] sm:$0xff] }
 0x1c4   :  { %2390 = vmatpush1.bf16.msra.mxu0 %v2389_v15  ;;  %v1274_v15 = vld [vmem:[%s4848_s3 + $0x5d0] sm:$0xff] }
 0x1c5   :  { %2392 = vmatprep.subr.bf16.mxu0 %v2391_v29  ;;  %v2425_v26 = vpack.c.bf16 %v1274_v15, %v1272_v23  ;;  %v2427_v29 = vpack.c.bf16 %v1279_v25, %v1277_v24  ;;  %v1315_v23 = vld [vmem:[%s4848_s3 + $0x718] sm:$0xff]  ;;  %v1312_v25 = vld [vmem:[%s4848_s3 + $0x700] sm:$0xff] }
 0x1c8   :  { %2394 = vmatpush1.bf16.msra.mxu0 %v2393_v36  ;;  %v2431_v36 = vpack.c.bf16 %v1283_v35, %v1281_v32  ;;  %v1316_v35 = vld [vmem:[%s4848_s3 + $0x720] sm:$0xff] }
 0x1c9   :  { %2396 = vmatprep.subr.bf16.mxu0 %v2395_v38  ;;  %v1282_v38 = vld [vmem:[%s4848_s3 + $0x610] sm:$0xff] }
 0x1ca   :  { %v2433_v33 = vpack.c.bf16 %v1282_v38, %v1280_v37  ;;  %v1323_v37 = vld [vmem:[%s4848_s3 + $0x758] sm:$0xff] }
 0x1cc   :  { %2398 = vmatpush1.bf16.msra.mxu0 %v2397_v44  ;;  %v1284_v44 = vld [vmem:[%s4848_s3 + $0x620] sm:$0xff] }
 0x1cd   :  { %2400 = vmatprep.subr.bf16.mxu0 %v2399_v45  ;;  %v1286_v45 = vld [vmem:[%s4848_s3 + $0x630] sm:$0xff] }
 0x1ce   :  { %v2437_v49 = vpack.c.bf16 %v1286_v45, %v1284_v44  ;;  %v1325_v45 = vld [vmem:[%s4848_s3 + $0x768] sm:$0xff] }
 0x1d0   :  { %2402 = vmatpush1.bf16.msra.mxu0 %v2401_v53  ;;  %v1288_v53 = vld [vmem:[%s4848_s3 + $0x640] sm:$0xff] }
 0x1d1   :  { %2404 = vmatprep.subr.bf16.mxu0 %v2403_v54  ;;  %v1290_v54 = vld [vmem:[%s4848_s3 + $0x650] sm:$0xff] }
 0x1d2   :  { %v2441_v57 = vpack.c.bf16 %v1290_v54, %v1288_v53  ;;  %v1324_v53 = vld [vmem:[%s4848_s3 + $0x760] sm:$0xff]  ;;  %v1326_v54 = vld [vmem:[%s4848_s3 + $0x770] sm:$0xff] }
 0x1d4   :  { %2406 = vmatpush1.bf16.msra.mxu0 %v2405_v59  ;;  %v1292_v59 = vld [vmem:[%s4848_s3 + $0x660] sm:$0xff] }
 0x1d5   :  { %2408 = vmatprep.subr.bf16.mxu0 %v2407_v60  ;;  %v1294_v60 = vld [vmem:[%s4848_s3 + $0x670] sm:$0xff] }
 0x1d6   :  { %v2445_v63 = vpack.c.bf16 %v1294_v60, %v1292_v59  ;;  %v1328_v59 = vld [vmem:[%s4848_s3 + $0x780] sm:$0xff]  ;;  %v1330_v60 = vld [vmem:[%s4848_s3 + $0x790] sm:$0xff] }
 0x1d8   :  { %2410 = vmatpush1.bf16.msra.mxu0 %v2409_v52  ;;  %v1296_v52 = vld [vmem:[%s4848_s3 + $0x680] sm:$0xff] }
 0x1d9   :  { %2412 = vmatprep.subr.bf16.mxu0 %v2411_v1  ;;  %v1298_v1 = vld [vmem:[%s4848_s3 + $0x690] sm:$0xff] }
 0x1da   :  { %v2449_v4 = vpack.c.bf16 %v1298_v1, %v1296_v52  ;;  %v1332_v52 = vld [vmem:[%s4848_s3 + $0x7a0] sm:$0xff]  ;;  %v1334_v1 = vld [vmem:[%s4848_s3 + $0x7b0] sm:$0xff] }
 0x1dc   :  { %2414 = vmatpush1.bf16.msra.mxu0 %v2413_v6  ;;  %v1300_v6 = vld [vmem:[%s4848_s3 + $0x6a0] sm:$0xff] }
 0x1dd   :  { %2416 = vmatprep.subr.bf16.mxu0 %v2415_v7  ;;  %v1302_v7 = vld [vmem:[%s4848_s3 + $0x6b0] sm:$0xff] }
 0x1de   :  { %v2453_v10 = vpack.c.bf16 %v1302_v7, %v1300_v6  ;;  %v2487_v6 = vpack.c.bf16 %v1339_v3, %v1337_v2  ;;  %v1336_v7 = vld [vmem:[%s4848_s3 + $0x7c0] sm:$0xff] }
 0x1e0   :  { %2418 = vmatpush1.bf16.msra.mxu0 %v2417_v47  ;;  %v1304_v47 = vld [vmem:[%s4848_s3 + $0x6c0] sm:$0xff] }
 0x1e1   :  { %2420 = vmatprep.subr.bf16.mxu0 %v2419_v12  ;;  %v1306_v12 = vld [vmem:[%s4848_s3 + $0x6d0] sm:$0xff] }
 0x1e2   :  { %v2457_v19 = vpack.c.bf16 %v1306_v12, %v1304_v47 }
 0x1e4   :  { %2422 = vmatpush1.bf16.msra.mxu0 %v2421_v21  ;;  %v1308_v21 = vld [vmem:[%s4848_s3 + $0x6e0] sm:$0xff] }
 0x1e5   :  { %2424 = vmatprep.subr.bf16.mxu0 %v2423_v22  ;;  %v1313_v22 = vld [vmem:[%s4848_s3 + $0x708] sm:$0xff]  ;;  %v2461_v15 = vpack.c.bf16 %v1310_v42, %v1308_v21 }
 0x1e6   :  { %v2463_v24 = vpack.c.bf16 %v1315_v23, %v1313_v22  ;;  %v1655_v42 = vld [vmem:[%s4850_s5 + $0x68] sm:$0xff]  ;;  %v1672_v23 = vld [vmem:[%s4850_s5 + $0xf0] sm:$0xff] }
 0x1e8   :  { %2426 = vmatpush1.bf16.msra.mxu0 %v2425_v26  ;;  %v1314_v26 = vld [vmem:[%s4848_s3 + $0x710] sm:$0xff] }
 0x1e9   :  { %2428 = vmatprep.subr.bf16.mxu0 %v2427_v29  ;;  %v1317_v29 = vld [vmem:[%s4848_s3 + $0x728] sm:$0xff]  ;;  %v2465_v31 = vpack.c.bf16 %v1314_v26, %v1312_v25  ;;  %v1656_v25 = vld [vmem:[%s4850_s5 + $0x70] sm:$0xff]  ;;  %v1657_v26 = vld [vmem:[%s4850_s5 + $0x78] sm:$0xff] }
 0x1ea   :  { %v2467_v32 = vpack.c.bf16 %v1319_v30, %v1317_v29  ;;  %v2525_v28 = vpack.c.bf16 %v1657_v26, %v1656_v25  ;;  %v1344_v29 = vld [vmem:[%s4849_s4] sm:$0x3] }
 0x1eb   :  { %v1349_v30 = vrot.slane %v1344_v29, %v450_v14 }
 0x1ec   :  { %2430 = vmatpush1.bf16.msra.mxu0 %v2429_v50  ;;  %v1318_v50 = vld [vmem:[%s4848_s3 + $0x730] sm:$0xff] }
 0x1ed   :  { %2432 = vmatprep.subr.bf16.mxu0 %v2431_v36  ;;  %v1321_v36 = vld [vmem:[%s4848_s3 + $0x748] sm:$0xff]  ;;  %v2469_v39 = vpack.c.bf16 %v1318_v50, %v1316_v35 }
 0x1ef   :  { %1563 = vmatmul.mubr.f32.vlgmr.msra.gmra.mrb[2].mxu0 %v1084_v41  ;;  %v1320_v41 = vld [vmem:[%s4848_s3 + $0x740] sm:$0xff] }
 0x1f0   :  { %2434 = vmatpush1.bf16.msra.mxu0 %v2433_v33  ;;  %v2471_v33 = vpack.c.bf16 %v1323_v37, %v1321_v36 }
 0x1f1   :  { %2436 = vmatprep.subr.bf16.mxu0 %v2435_v43  ;;  %v1322_v43 = vld [vmem:[%s4848_s3 + $0x750] sm:$0xff] }
 0x1f4   :  { %2438 = vmatpush1.bf16.msra.mxu0 %v2437_v49  ;;  %v2473_v49 = vpack.c.bf16 %v1322_v43, %v1320_v41 }
 0x1f5   :  { %2440 = vmatprep.subr.bf16.mxu0 %v2439_v51  ;;  %v2475_v51 = vpack.c.bf16 %v1327_v46, %v1325_v45 }
 0x1f8   :  { %2442 = vmatpush1.bf16.msra.mxu0 %v2441_v57  ;;  %v2477_v57 = vpack.c.bf16 %v1326_v54, %v1324_v53 }
 0x1f9   :  { %2444 = vmatprep.subr.bf16.mxu0 %v2443_v58  ;;  %v2479_v58 = vpack.c.bf16 %v1331_v56, %v1329_v55 }
 0x1fc   :  { %2446 = vmatpush1.bf16.msra.mxu0 %v2445_v63  ;;  %v2481_v63 = vpack.c.bf16 %v1330_v60, %v1328_v59 }
 0x1fd   :  { %2448 = vmatprep.subr.bf16.mxu0 %v2447_v0  ;;  %v2483_v0 = vpack.c.bf16 %v1335_v62, %v1333_v61 }
 0x200   :  { %2450 = vmatpush1.bf16.msra.mxu0 %v2449_v4  ;;  %v2485_v4 = vpack.c.bf16 %v1334_v1, %v1332_v52 }
 0x201   :  { %2452 = vmatprep.subr.bf16.mxu0 %v2451_v5  ;;  %v474_v5 = vsub.s32 6, %v2695_v34 }
 0x203   :  { %v475_v47 = vrot.slane %v4125_v16, %v474_v5  ;;  %v1654_v16 = vld [vmem:[%s4850_s5 + $0x60] sm:$0xff] }
 0x204   :  { %2454 = vmatpush1.bf16.msra.mxu0 %v2453_v10  ;;  %v1343_v10 = vld [vmem:[%s4848_s3 + $0x7f8] sm:$0xff]  ;;  %v2521_v22 = vpack.c.bf16 %v1655_v42, %v1654_v16 }
 0x205   :  { %2456 = vmatprep.subr.bf16.mxu0 %v2455_v11  ;;  %v2489_v11 = vpack.c.bf16 %v1338_v8, %v1336_v7  ;;  %v2491_v12 = vpack.c.bf16 %v1343_v10, %v1341_v9 }
 0x206   :  { %2522 = vmatpush3.bf16.msra.mxu1 %v2521_v22 }
 0x208   :  { %2458 = vmatpush1.bf16.msra.mxu0 %v2457_v19  ;;  %v2493_v19 = vpack.c.bf16 %v1342_v18, %v1340_v13 }
 0x209   :  { %2460 = vmatprep.subr.bf16.mxu0 %v2459_v20 }
 0x20c   :  { %2462 = vmatpush1.bf16.msra.mxu0 %v2461_v15  ;;  %v1673_v15 = vld [vmem:[%s4850_s5 + $0xf8] sm:$0xff] }
 0x20d   :  { %2464 = vmatprep.subr.bf16.mxu0 %v2463_v24  ;;  %v2523_v24 = vpack.c.bf16 %v1673_v15, %v1672_v23 }
 0x20f   :  { %2524 = vmatprep.subr.bf16.mxu1 %v2523_v24 }
 0x210   :  { %2466 = vmatpush1.bf16.msra.mxu0 %v2465_v31  ;;  %v1075_v38 = vpop.f32.mrb[4].mxu1  ;;  %2526 = vmatpush3.bf16.msra.mxu1 %v2525_v28  ;;  %v1353_v31 = vrot.slane %v1344_v29, %v454_v17 }
 0x211   :  { %v1077_v40 = vpop.f32.mrb[5].mxu1  ;;  %2468 = vmatprep.subr.bf16.mxu0 %v2467_v32  ;;  %v2533_v20 = vadd.f32 %v1075_v38, %v475_v47 }
 0x212   :  { %v2534_v44 = vadd.f32 %v1077_v40, %v479_v27 }
 0x213   :  { %v1086_v21 = vmax.f32 %v2533_v20, 0.0 }
 0x214   :  { %v1087_v48 = vmax.f32 %v2534_v44, 0.0  ;;  %2470 = vmatpush1.bf16.msra.mxu0 %v2469_v39  ;;  %v1787_v39 = vld [vmem:[%s4851_s6] ss:$0 sm:$0xff]  ;;  %s2583_s6 = smov [#allocation2]  }
 0x215   :  { %2472 = vmatprep.subr.bf16.mxu0 %v2471_v33  ;;  %s1773_s28 = sshll.u32 %s2583_s6, 4  ;;  %s1774_s28 = int_to_ptr.vmem [resolvable:$true] %s1773_s28 }
 0x216   :  { %1633 = vmatprep.mubr.f32.mxu0 %v1087_v48  ;;  %s2558_s29 = scalar_lea.vmem %s1774_s28, 32  ;;  %p2563_p1 = scmp.lt.s32.totalorder %s1774_s28, %s1774_s28 }
 0x217   :  { %p2559_p0 = scmp.ne.s32.totalorder %s1774_s28, %s2558_s29  ;;  %p2564_p2 = scmp.lt.s32.totalorder %s2558_s29, %s2558_s29 }
 0x218   :  { %2474 = vmatpush1.bf16.msra.mxu0 %v2473_v49 }
 0x219   :  { %2476 = vmatprep.subr.bf16.mxu0 %v2475_v51  ;;  %p2565_p3 = por %p2564_p2, %p2563_p1 }
 0x21b   :  { %p2566_p4 = pnand %p2565_p3, %p2559_p0 }
 0x21c   :  { %2478 = vmatpush1.bf16.msra.mxu0 %v2477_v57 }
 0x21d   :  { %2480 = vmatprep.subr.bf16.mxu0 %v2479_v58 }
 0x220   :  { %2482 = vmatpush1.bf16.msra.mxu0 %v2481_v63 }
 0x221   :  { %2484 = vmatprep.subr.bf16.mxu0 %v2483_v0 }
 0x224   :  { %2486 = vmatpush1.bf16.msra.mxu0 %v2485_v4 }
 0x225   :  { %2488 = vmatprep.subr.bf16.mxu0 %v2487_v6 }
 0x228   :  { %2490 = vmatpush1.bf16.msra.mxu0 %v2489_v11 }
 0x229   :  { %2492 = vmatprep.subr.bf16.mxu0 %v2491_v12 }
 0x22c   :  { %2494 = vmatpush1.bf16.msra.mxu0 %v2493_v19 }
 0x22f   :  { %1634 = vmatmul.mubr.f32.vlgmr.msra.gmra.mrb[2].mxu0 %v1086_v21 }
 0x302   :  { %v1635_v32 = vpop.f32.mrb[2].mxu0 }
 0x303   :  { %v2535_v35 = vadd.f32 %v1635_v32, %v1349_v30  ;;  %v1637_v50 = vpop.f32.mrb[3].mxu0 }
 0x304   :  { %v2536_v27 = vadd.f32 %v1637_v50, %v1353_v31 }
 0x305   :  { %v1640_v37 = vmax.f32 %v2535_v35, 0.0 }
 0x306   :  { %v1641_v36 = vmax.f32 %v2536_v27, 0.0 }
 0x308   :  { %1745 = vmatprep.mubr.f32.mxu1 %v1641_v36 }
 0x309   :  { %1746 = vmatmul.mubr.f32.vlgmr.msra.gmra.mrb[6].mxu1 %v1640_v37 }
 0x3dc   :  { %v1820_v38 = vpop.f32.mrb[6].mxu1 }
 0x3dd   :  { %v1821_v40 = vpop.f32.mrb[7].mxu1 }
 0x3de   :  { %v1822_v33 = vadd.f32 %v1821_v40, %v1820_v38 }
 0x3e0   :  { %v1748_v14 = vadd.f32 %v1822_v33, %v1787_v39 }
 0x3e2   :  { %v1753_v34 = vsel %vm1751_vm1, %v1748_v14, -inf  ;;  %1752 = vst.msk [vmem:[%s4852_s7] sm:$0x3] %vm1751_vm1, %v1748_v14 }
 0x3e3   :  { %1754 = vmax.xlane.f32.xlu0 %v1753_v34 }
 0x470   :  { %v1755_v17 = vpop.xlane.xlu0 %1754 }
 0x471   :  { %v1756_v41 = vsub.f32 %v1748_v14, %v1755_v17 }
 0x473   :  { %v1757_v43 = vmul.f32 1.442695, %v1756_v41 }
 0x475   :  { %2554 = vpow2.f32 %v1757_v43 }
 0x47f   :  { %v2555_v44 = vpop.eup %2554 }
 0x480   :  { %v1759_v45 = vsel %vm1751_vm1, %v2555_v44, 0.0 }
 0x481   :  { %1760 = vadd.xlane.f32.xlu0 %v1759_v45 }
 0x50e   :  { %v1761_v46 = vpop.xlane.xlu0 %1760 }
 0x50f   :  { %2556 = vrcp.f32 %v1761_v46 }
 0x519   :  { %v2557_v48 = vpop.eup %2556 }
 0x51a   :  { %v1763_v49 = vmul.f32 %v2557_v48, %v2555_v44 }
 0x51c   :  { %1764 = vst.msk [vmem:[#allocation2] sm:$0x3] %vm1751_vm1, %v1763_v49 }
 0x51d   :  { %2569 = shalt.err (!%p2566_p4)
}
 0x51e   :  { %s2570_s1 = scalar_lea.hbm %s4853_s8, 32 }
 0x51f   :  { %p2571_p5 = scmp.ne.s32.totalorder %s4853_s8, %s2570_s1  ;;  %p2574_p6 = scmp.lt.u32.totalorder %s2570_s1, %s4853_s8 }
 0x521   :  { %p2576_p7 = pnand %p2574_p6, %p2571_p5 }
 0x523   :  { %2579 = shalt.err (!%p2576_p7)
}
 0x524   :  { %1776 = dma.vmem_to_hbm [thread:$0]  %s1774_s28, 32, %s4853_s8, [#allocation3]  }
 0x525   :  { %2580 = dma.done.wait [#allocation3], 32  }
 0x526   :  { %2581 = vsyncadd [#allocation3], 4294967264 }
 0x527   :  { %1782 = vsyncpa [#allocation3], 1 }

// kernel: forward.2
= control target key start
LH: loop header
LB: loop body
LE: loop exit
PB: predicated region body
PF: predicated region fallthrough
CT: control target
= control target key end

     0   :  { %s12527_s0 = inlined_call_operand.vmem [shape: f32[2,8,64], index: 0, kind: input, shape index: {}]   ;;  %s12528_s1 = inlined_call_operand.vmem [shape: f32[32,8], index: 1, kind: input, shape index: {}]   ;;  %s12529_s2 = inlined_call_operand.vmem [shape: f32[64,32], index: 2, kind: input, shape index: {}]   ;;  %s12530_s3 = inlined_call_operand.vmem [shape: f32[64,32], index: 3, kind: input, shape index: {}]   ;;  %s12531_s4 = inlined_call_operand.vmem [shape: f32[288,32], index: 4, kind: input, shape index: {}]   ;;  %s12532_s5 = inlined_call_operand.vmem [shape: f32[64,32], index: 5, kind: input, shape index: {}]   ;;  %s12533_s6 = inlined_call_operand.vmem [shape: f32[64,32], index: 6, kind: input, shape index: {}]   ;;  %s12534_s7 = inlined_call_operand.vmem [shape: f32[288,32], index: 7, kind: input, shape index: {}]   ;;  %s12535_s8 = inlined_call_operand.vmem [shape: f32[64,32], index: 8, kind: input, shape index: {}]   ;;  %s12536_s9 = inlined_call_operand.vmem [shape: f32[64,32], index: 9, kind: input, shape index: {}]   ;;  %s12537_s10 = inlined_call_operand.vmem [shape: f32[288,32], index: 10, kind: input, shape index: {}]   ;;  %s12538_s11 = inlined_call_operand.vmem [shape: f32[64,32], index: 11, kind: input, shape index: {}]   ;;  %s12539_s12 = inlined_call_operand.vmem [shape: f32[64,32], index: 12, kind: input, shape index: {}]   ;;  %s12540_s13 = inlined_call_operand.vmem [shape: f32[288,32], index: 13, kind: input, shape index: {}]   ;;  %s12541_s14 = inlined_call_operand.vmem [shape: f32[64,32], index: 14, kind: input, shape index: {}]   ;;  %s12542_s15 = inlined_call_operand.vmem [shape: f32[64,32], index: 15, kind: input, shape index: {}]   ;;  %s12543_s16 = inlined_call_operand.vmem [shape: f32[288,32], index: 16, kind: input, shape index: {}]   ;;  %s12544_s17 = inlined_call_operand.vmem [shape: f32[64,32], index: 17, kind: input, shape index: {}]   ;;  %s12545_s18 = inlined_call_operand.vmem [shape: f32[64,32], index: 18, kind: input, shape index: {}]   ;;  %s12546_s19 = inlined_call_operand.vmem [shape: f32[288,32], index: 19, kind: input, shape index: {}]   ;;  %s12547_s20 = inlined_call_operand.vmem [shape: f32[128,256], index: 20, kind: input, shape index: {}]   ;;  %s12548_s21 = inlined_call_operand.vmem [shape: f32[128,1], index: 21, kind: input, shape index: {}]   ;;  %s12549_s22 = inlined_call_operand.vmem [shape: f32[32,128], index: 22, kind: input, shape index: {}]   ;;  %s12550_s23 = inlined_call_operand.vmem [shape: f32[32,1], index: 23, kind: input, shape index: {}]   ;;  %s12551_s24 = inlined_call_operand.vmem [shape: f32[2,32,13], index: 24, kind: output, shape index: {}]  }
   0x1   :  { %12586 = sst [smem:[#allocation67_spill]] %s12527_s0 }
   0x2   :  { %12587 = sst [smem:[#allocation68_spill]] %s12528_s1 }
   0x3   :  { %12588 = sst [smem:[#allocation69_spill]] %s12529_s2 }
   0x4   :  { %12589 = sst [smem:[#allocation70_spill]] %s12530_s3 }
   0x5   :  { %12590 = sst [smem:[#allocation71_spill]] %s12531_s4 }
   0x6   :  { %12591 = sst [smem:[#allocation72_spill]] %s12532_s5  ;;  %s9821_s5 = smov 0  }
   0x7   :  { %12592 = sst [smem:[#allocation73_spill]] %s12533_s6 }
   0x8   :  { %12593 = sst [smem:[#allocation74_spill]] %s12534_s7 }
   0x9   :  { %12594 = sst [smem:[#allocation75_spill]] %s12535_s8 }
   0xa LB: > { %s7362_s26 = sadd.s32 4294967295, %s9688_s5   ;;  %p7366_p0 = scmp.ge.s32.totalorder %s9688_s5, 1  ;;  %s9688_s5 = sphi %s9821_s5, %s34_s5  }
   0xb   : > { %p661_p1 = scmp.lt.s32.totalorder %s9688_s5, 3 }
   0xd   : > { %p662_p2 = pnand %p7366_p0, %p661_p1 }
   0xf   : > { %665 = sbr.rel (%p662_p2) target bundleno = 5520 (0x1590), region = 116 }
  0x16   : > { %p726_p3 = scmp.lt.s32.totalorder %s7362_s26, 1  ;;  %s12595_s6 = sld [smem:[#allocation68_spill]]  ;;  %vm740_vm0 = vcmask 64512   ;;  %vm906_vm1 = vcmask 261120   ;;  %v1606_v34 = vlaneseq  ;;  %v12569_v49 = vmov 1.0|1.0  }
  0x17   : > { %s12596_s7 = sld [smem:[#allocation67_spill]]  ;;  %s12597_s29 = sld [smem:[#allocation70_spill]]  ;;  %vm1654_vm13 = vcmask 1046528   ;;  %vm1641_vm15 = vcmask 515072  }
  0x18   : > { %s12755_s26 = smov (!%p726_p3, %s7362_s26), 1  ;;  %s12560_s0 = smov 127   ;;  %v9931_v35 = vshrl.u32 %v1606_v34, 7  ;;  %v9933_v36 = vand.u32 127, %v1606_v34 }
  0x19   : > { %s7367_s2 = sshll.u32 %s12755_s26, 3  ;;  %s12598_s1 = sld [smem:[#allocation69_spill]] }
  0x1a   : > { %s12599_s8 = sld [smem:[#allocation71_spill]]  ;;  %12600 = vst [vmem:[#allocation2_spill] sm:$0xff] %v9931_v35  ;;  %v9936_v37 = vadd.s32 8, %v9931_v35  ;;  %v1617_v38 = vadd.s32 1, %v9931_v35  ;;  %v9940_v39 = vadd.s32 16, %v9931_v35  ;;  %v9943_v40 = vadd.s32 24, %v9931_v35 }
  0x1b   : > { %v9946_v41 = vadd.s32 32, %v9931_v35  ;;  %v9949_v42 = vadd.s32 40, %v9931_v35  ;;  %s12613_s4 = sld [smem:[#allocation73_spill]]  ;;  %s12624_s25 = sld [smem:[#allocation75_spill]] }
  0x1c   : > { %v735_v0 = vld [vmem:[%s12595_s6] sm:$0xff]  ;;  %v736_v2 = vld [vmem:[%s12595_s6 + $0x8] sm:$0xff]  ;;  %v737_v3 = vld [vmem:[%s12595_s6 + $0x10] sm:$0xff]  ;;  %12601 = vst [vmem:[#allocation3_spill] sm:$0xff] %v9936_v37  ;;  %v1618_v43 = vadd.s32 1, %v9936_v37  ;;  %vm1625_vm2 = vcmp.eq.s32.totalorder %v1617_v38, %v9933_v36  ;;  %v1619_v44 = vadd.s32 1, %v9940_v39 }
  0x1d   : > { %8362 = vmatprep.mubr.msk.f32.mxu0 %vm740_vm0, %v735_v0  ;;  %s729_s30 = scalar_lea.vmem %s12596_s7, %s7367_s2  ;;  %v738_v4 = vld [vmem:[%s12595_s6 + $0x18] sm:$0xff]  ;;  %v850_v7 = vld [vmem:[%s12597_s29 + $0x20] sm:$0xff]  ;;  %v851_v19 = vld [vmem:[%s12597_s29 + $0x28] sm:$0xff]  ;;  %12602 = vst [vmem:[#allocation4_spill] sm:$0xff] %v9940_v39  ;;  %v1620_v45 = vadd.s32 1, %v9943_v40  ;;  %v1621_v46 = vadd.s32 1, %v9946_v41 }
  0x1e   : > { %v739_v1 = vld [vmem:[%s729_s30] sm:$0xff]  ;;  %8382 = vmatprep.mubr.msk.f32.mxu1 %vm906_vm1, %v850_v7  ;;  %v847_v20 = vld [vmem:[%s12597_s29 + $0x8] sm:$0xff]  ;;  %v852_v21 = vld [vmem:[%s12597_s29 + $0x30] sm:$0xff]  ;;  %12603 = vst [vmem:[#allocation5_spill] sm:$0xff] %v9943_v40  ;;  %v1622_v47 = vadd.s32 1, %v9949_v42  ;;  %vm1626_vm3 = vcmp.eq.s32.totalorder %v1618_v43, %v9933_v36  ;;  %vm1627_vm4 = vcmp.eq.s32.totalorder %v1619_v44, %v9933_v36  ;;  %v10005_v44 = vadd.s32 56, %v9931_v35 }
  0x1f   : > { %8360 = vmatprep.subr.mxu0 %v739_v1  ;;  %v846_v12 = vld [vmem:[%s12597_s29] sm:$0xff]  ;;  %v848_v22 = vld [vmem:[%s12597_s29 + $0x10] sm:$0xff]  ;;  %v853_v23 = vld [vmem:[%s12597_s29 + $0x38] sm:$0xff]  ;;  %12604 = vst [vmem:[#allocation6_spill] sm:$0xff] %v9946_v41  ;;  %vm1628_vm5 = vcmp.eq.s32.totalorder %v1620_v45, %v9933_v36  ;;  %vm1629_vm8 = vcmp.eq.s32.totalorder %v1621_v46, %v9933_v36  ;;  %v10008_v45 = vadd.s32 48, %v9931_v35  ;;  %s12626_s27 = smov 127  }
  0x20   : > { %8361 = vmatpush3.msra.mxu0 %v739_v1  ;;  %v849_v24 = vld [vmem:[%s12597_s29 + $0x18] sm:$0xff]  ;;  %v838_v25 = vld [vmem:[%s12598_s1] sm:$0xff]  ;;  %v839_v26 = vld [vmem:[%s12598_s1 + $0x8] sm:$0xff]  ;;  %12605 = vst [vmem:[#allocation7_spill] sm:$0xff] %v9949_v42  ;;  %vm1630_vm9 = vcmp.eq.s32.totalorder %v1622_v47, %v9933_v36  ;;  %v1624_v46 = vadd.s32 1, %v10005_v44 }
  0x21   : > { %8363 = vmatmul.mubr.msk.f32.vlgmr.msra.gmra.mrb[0].mxu0 %vm740_vm0, %v736_v2  ;;  %v840_v27 = vld [vmem:[%s12598_s1 + $0x10] sm:$0xff]  ;;  %v841_v28 = vld [vmem:[%s12598_s1 + $0x18] sm:$0xff]  ;;  %v842_v29 = vld [vmem:[%s12598_s1 + $0x20] sm:$0xff]  ;;  %12612 = vst [vmem:[#allocation8_spill] sm:$0xff] %v10008_v45  ;;  %v10012_v47 = vadd.s32 1, %v10008_v45 }
  0x22   : > { %8365 = vmatprep.mubr.msk.f32.mxu0 %vm740_vm0, %v737_v3  ;;  %v843_v30 = vld [vmem:[%s12598_s1 + $0x28] sm:$0xff]  ;;  %v844_v31 = vld [vmem:[%s12598_s1 + $0x30] sm:$0xff]  ;;  %v845_v32 = vld [vmem:[%s12598_s1 + $0x38] sm:$0xff]  ;;  %vm1632_vm11 = vcmp.eq.s32.totalorder %v1624_v46, %v9933_v36  ;;  %s12614_s1 = sld [smem:[#allocation72_spill]] }
  0x23   : > { %v854_v33 = vld [vmem:[%s12599_s8] sm:$0xff]  ;;  %vm9960_vm6 = vmpackc.low %vm1626_vm3, %vm1625_vm2  ;;  %v855_v34 = vld [vmem:[%s12599_s8 + $0x8] sm:$0xff]  ;;  %vm1631_vm12 = vcmp.eq.s32.totalorder %v10012_v47, %v9933_v36 }
  0x24   : > { %vm9967_vm7 = vmpackc.low %vm1628_vm5, %vm1627_vm4  ;;  %v856_v38 = vld [vmem:[%s12599_s8 + $0x10] sm:$0xff]  ;;  %v857_v43 = vld [vmem:[%s12599_s8 + $0x18] sm:$0xff] }
  0x25   : > { %8366 = vmatmul.mubr.msk.f32.gmra.mrb[2].mxu0 %vm740_vm0, %v738_v4  ;;  %vm9979_vm10 = vmpackc.low %vm1630_vm9, %vm1629_vm8  ;;  %v862_v46 = vld [vmem:[%s12599_s8 + $0x40] sm:$0xff] }
  0x26   : > { %8376 = vmatprep.mubr.msk.f32.mxu0 %vm906_vm1, %v846_v12  ;;  %vm9195_vm14 = vmpackc.low %vm1654_vm13, %vm1631_vm12 }
  0xf4   : > { %v8364_v5 = vpop.f32.mrb[0].mxu0 }
  0xf5   : > { %v819_v6 = vpop.f32.mrb[1].mxu0 }
  0xf6   : > { %v9166_v8 = vpack.c.bf16 %v8364_v5, %v819_v6  ;;  %894 = vrot.lane.b32.xlu0 %v819_v6, %s12560_s0 }
  0xf8   : > { %v8367_v9 = vpop.f32.mrb[2].mxu0 }
  0xf9   : > { %v829_v10 = vpop.f32.mrb[3].mxu0 }
  0xfa   : > { %v9170_v11 = vpack.c.bf16 %v8367_v9, %v829_v10  ;;  %896 = vrot.lane.b32.xlu0 %v8364_v5, %s12560_s0  ;;  %898 = vrot.lane.b32.xlu1 %v829_v10, %s12560_s0 }
  0xfe   : > { %900 = vrot.lane.b32.xlu1 %v8367_v9, %s12560_s0 }
 0x168   : > { %v9859_v13 = vpop.permute.xlu0 %894 }
 0x16c   : > { %v9861_v14 = vpop.permute.xlu0 %896  ;;  %v9863_v15 = vpop.permute.xlu1 %898 }
 0x16d   : > { %v9158_v16 = vpack.c.bf16 %v9861_v14, %v9859_v13 }
 0x16f   : > { %9159 = vmatprep.subr.bf16.mxu0 %v9158_v16  ;;  %9460 = vmatprep.subr.bf16.mxu1 %v9158_v16 }
 0x170   : > { %9161 = vmatpush3.bf16.msra.mxu0 %v9158_v16  ;;  %9462 = vmatpush3.bf16.msra.mxu1 %v9158_v16  ;;  %v9867_v17 = vpop.permute.xlu1 %900 }
 0x171   : > { %v9162_v18 = vpack.c.bf16 %v9867_v17, %v9863_v15 }
 0x173   : > { %9163 = vmatprep.subr.bf16.mxu0 %v9162_v18  ;;  %9461 = vmatprep.subr.bf16.mxu1 %v9162_v18 }
 0x174   : > { %9165 = vmatpush3.bf16.msra.mxu0 %v9162_v18  ;;  %9463 = vmatpush3.bf16.msra.mxu1 %v9162_v18 }
 0x175   : > { %9167 = vmatprep.subr.bf16.mxu1 %v9166_v8 }
 0x177   : > { %8383 = vmatmul.mubr.msk.f32.vlgmr.msra.gmra.mrb[0].mxu1 %vm906_vm1, %v851_v19  ;;  %8377 = vmatmul.mubr.msk.f32.vlgmr.msra.gmra.mrb[4].mxu0 %vm906_vm1, %v847_v20 }
 0x178   : > { %9169 = vmatpush3.bf16.msra.mxu1 %v9166_v8  ;;  %8385 = vmatprep.mubr.msk.f32.mxu1 %vm906_vm1, %v852_v21 }
 0x179   : > { %9171 = vmatprep.subr.bf16.mxu1 %v9170_v11  ;;  %8379 = vmatprep.mubr.msk.f32.mxu0 %vm906_vm1, %v848_v22 }
 0x17b   : > { %8386 = vmatmul.mubr.msk.f32.gmra.mrb[2].mxu1 %vm906_vm1, %v853_v23  ;;  %8380 = vmatmul.mubr.msk.f32.gmra.mrb[6].mxu0 %vm906_vm1, %v849_v24 }
 0x17c   : > { %9173 = vmatpush3.bf16.msra.mxu1 %v9170_v11  ;;  %8396 = vmatprep.mubr.msk.f32.mxu1 %vm906_vm1, %v838_v25 }
 0x17d   : > { %8416 = vmatprep.mubr.msk.f32.mxu0 %vm906_vm1, %v854_v33  ;;  %9183 = vmatprep.subr.msk.bf16.mxu1 %vm9960_vm6, %v12569_v49 }
 0x17f   : > { %8397 = vmatmul.mubr.msk.f32.vlgmr.msra.gmra.mrb[4].mxu1 %vm906_vm1, %v839_v26 }
 0x180   : > { %8399 = vmatprep.mubr.msk.f32.mxu1 %vm906_vm1, %v840_v27  ;;  %9185 = vmatpush3.bf16.msk.msra.mxu1 %vm9960_vm6, %v12569_v49 }
 0x181   : > { %9187 = vmatprep.subr.msk.bf16.mxu1 %vm9967_vm7, %v12569_v49 }
 0x183   : > { %8400 = vmatmul.mubr.msk.f32.gmra.mrb[6].mxu1 %vm906_vm1, %v841_v28 }
 0x184   : > { %8402 = vmatprep.mubr.msk.f32.mxu1 %vm906_vm1, %v842_v29  ;;  %9189 = vmatpush3.bf16.msk.msra.mxu1 %vm9967_vm7, %v12569_v49 }
 0x185   : > { %9191 = vmatprep.subr.msk.bf16.mxu1 %vm9979_vm10, %v12569_v49 }
 0x187   : > { %8403 = vmatmul.mubr.msk.f32.gmra.mrb[0].mxu1 %vm906_vm1, %v843_v30 }
 0x188   : > { %8405 = vmatprep.mubr.msk.f32.mxu1 %vm906_vm1, %v844_v31  ;;  %9193 = vmatpush3.bf16.msk.msra.mxu1 %vm9979_vm10, %v12569_v49 }
 0x18b   : > { %8406 = vmatmul.mubr.msk.f32.gmra.mrb[2].mxu1 %vm906_vm1, %v845_v32 }
 0x24a   : > { %v8378_v52 = vpop.f32.mrb[4].mxu0 }
 0x24b   : > { %v997_v53 = vpop.f32.mrb[5].mxu0 }
 0x24e   : > { %v8381_v54 = vpop.f32.mrb[6].mxu0 }
 0x24f   : > { %v1007_v55 = vpop.f32.mrb[7].mxu0 }
 0x252   : > { %v8398_v56 = vpop.f32.mrb[4].mxu1 }
 0x253   : > { %v1132_v57 = vadd.f32 %v8398_v56, %v8378_v52  ;;  %v1126_v58 = vpop.f32.mrb[5].mxu1  ;;  %v12567_v52 = vmov 0.0  }
 0x254   : > { %v1127_v59 = vadd.f32 %v1126_v58, %v997_v53  ;;  %v1640_v53 = vsel %vm1632_vm11, 1.0, %v12567_v52 }
 0x256   : > { %v8401_v60 = vpop.f32.mrb[6].mxu1 }
 0x257   : > { %v1142_v61 = vadd.f32 %v8401_v60, %v8381_v54  ;;  %v1136_v62 = vpop.f32.mrb[7].mxu1  ;;  %v12566_v54 = vmov 1.0  }
 0x258   : > { %v1137_v63 = vadd.f32 %v1136_v62, %v1007_v55  ;;  %v10019_v55 = vpack.c.bf16 %v1640_v53, %v12566_v54  ;;  %v2618_v53 = vadd.s32 2, %v9946_v41 }
 0x25a   : > { %v8404_v0 = vpop.f32.mrb[0].mxu1  ;;  %9196 = vmatprep.subr.msk.bf16.mxu1 %vm9195_vm14, %v10019_v55  ;;  %vm2626_vm9 = vcmp.eq.s32.totalorder %v2618_v53, %v9933_v36 }
 0x25b   : > { %v7391_v1 = vmul.f32 -1.442695, %v8404_v0  ;;  %v1146_v2 = vpop.f32.mrb[1].mxu1  ;;  %9199 = vmatpush3.bf16.msk.msra.mxu1 %vm9195_vm14, %v10019_v55 }
 0x25c   : > { %v7390_v3 = vmul.f32 -1.442695, %v1146_v2 }
 0x25d   : > { %9538 = vpow2.f32 %v7391_v1 }
 0x25e   : > { %9540 = vpow2.f32 %v7390_v3  ;;  %v8407_v4 = vpop.f32.mrb[2].mxu1  ;;  %v1563_v3 = vld [vmem:[%s12613_s4 + $0x8] sm:$0xff] }
 0x25f   : > { %v7393_v5 = vmul.f32 -1.442695, %v8407_v4  ;;  %v1156_v6 = vpop.f32.mrb[3].mxu1  ;;  %v1564_v4 = vld [vmem:[%s12613_s4 + $0x10] sm:$0xff] }
 0x260   : > { %v7392_v7 = vmul.f32 -1.442695, %v1156_v6  ;;  %v1566_v6 = vld [vmem:[%s12613_s4 + $0x20] sm:$0xff] }
 0x261   : > { %9542 = vpow2.f32 %v7393_v5  ;;  %v1565_v5 = vld [vmem:[%s12613_s4 + $0x18] sm:$0xff] }
 0x262   : > { %9544 = vpow2.f32 %v7392_v7  ;;  %v1567_v7 = vld [vmem:[%s12613_s4 + $0x28] sm:$0xff] }
 0x263   : > { %9546 = vtanh.f32 %v1132_v57 }
 0x264   : > { %9548 = vtanh.f32 %v1127_v59 }
 0x267   : > { %v9539_v8 = vpop.eup %9538 }
 0x268   : > { %v9541_v9 = vpop.eup %9540  ;;  %v1182_v10 = vadd.f32 1.0, %v9539_v8  ;;  %v1568_v8 = vld [vmem:[%s12613_s4 + $0x30] sm:$0xff] }
 0x269   : > { %v1181_v11 = vadd.f32 1.0, %v9541_v9  ;;  %v1569_v9 = vld [vmem:[%s12613_s4 + $0x38] sm:$0xff] }
 0x26a   : > { %9550 = vrcp.f32 %v1182_v10  ;;  %v1554_v10 = vld [vmem:[%s12614_s1] sm:$0xff] }
 0x26b   : > { %v9543_v12 = vpop.eup %9542  ;;  %9552 = vrcp.f32 %v1181_v11 }
 0x26c   : > { %v9545_v16 = vpop.eup %9544  ;;  %9554 = vtanh.f32 %v1142_v61  ;;  %v1184_v18 = vadd.f32 1.0, %v9543_v12 }
 0x26d   : > { %9556 = vtanh.f32 %v1137_v63  ;;  %v1183_v19 = vadd.f32 1.0, %v9545_v16  ;;  %v9547_v20 = vpop.eup %9546 }
 0x26e   : > { %9558 = vrcp.f32 %v1184_v18  ;;  %v9549_v21 = vpop.eup %9548 }
 0x26f   : > { %9560 = vrcp.f32 %v1183_v19 }
 0x274   : > { %v9551_v22 = vpop.eup %9550 }
 0x275   : > { %v9553_v23 = vpop.eup %9552  ;;  %v1194_v24 = vmul.f32 %v9551_v22, %v9547_v20  ;;  %v1556_v22 = vld [vmem:[%s12614_s1 + $0x10] sm:$0xff] }
 0x276   : > { %v9555_v25 = vpop.eup %9554  ;;  %v1193_v26 = vmul.f32 %v9553_v23, %v9549_v21  ;;  %v1555_v21 = vld [vmem:[%s12614_s1 + $0x8] sm:$0xff]  ;;  %v1557_v23 = vld [vmem:[%s12614_s1 + $0x18] sm:$0xff] }
 0x277   : > { %v9557_v27 = vpop.eup %9556 }
 0x278   : > { %v9559_v28 = vpop.eup %9558  ;;  %v9174_v29 = vpack.c.bf16 %v1194_v24, %v1193_v26  ;;  %v1558_v24 = vld [vmem:[%s12614_s1 + $0x20] sm:$0xff]  ;;  %v1560_v26 = vld [vmem:[%s12614_s1 + $0x30] sm:$0xff] }
 0x279   : > { %v9561_v30 = vpop.eup %9560  ;;  %v1196_v31 = vmul.f32 %v9559_v28, %v9555_v25  ;;  %v1559_v25 = vld [vmem:[%s12614_s1 + $0x28] sm:$0xff] }
 0x27a   : > { %9175 = vmatprep.subr.bf16.mxu0 %v9174_v29  ;;  %v1195_v32 = vmul.f32 %v9561_v30, %v9557_v27  ;;  %v1561_v27 = vld [vmem:[%s12614_s1 + $0x38] sm:$0xff]  ;;  %v859_v30 = vld [vmem:[%s12599_s8 + $0x28] sm:$0xff]  ;;  %s12683_s1 = smov 126  }
 0x27b   : > { %9177 = vmatpush3.bf16.msra.mxu0 %v9174_v29  ;;  %v858_v29 = vld [vmem:[%s12599_s8 + $0x20] sm:$0xff] }
 0x27c   : > { %v9178_v33 = vpack.c.bf16 %v1196_v31, %v1195_v32  ;;  %v860_v31 = vld [vmem:[%s12599_s8 + $0x30] sm:$0xff]  ;;  %v2614_v32 = vadd.s32 2, %v9931_v35 }
 0x27e   : > { %9179 = vmatprep.subr.bf16.mxu0 %v9178_v33  ;;  %vm2622_vm0 = vcmp.eq.s32.totalorder %v2614_v32, %v9933_v36 }
 0x27f   : > { %9181 = vmatpush3.bf16.msra.mxu0 %v9178_v33  ;;  %v2615_v33 = vadd.s32 2, %v9936_v37 }
 0x281   : > { %vm2623_vm2 = vcmp.eq.s32.totalorder %v2615_v33, %v9933_v36 }
 0x282   : > { %8417 = vmatmul.mubr.msk.f32.vlgmr.msra.gmra.mrb[8].mxu0 %vm906_vm1, %v855_v34  ;;  %v2616_v34 = vadd.s32 2, %v9940_v39  ;;  %vm10150_vm5 = vmpackc.low %vm2623_vm2, %vm2622_vm0  ;;  %vm2651_vm0 = vcmask 1045504  }
 0x283   : > { %8419 = vmatprep.mubr.msk.f32.mxu0 %vm906_vm1, %v856_v38  ;;  %v2617_v38 = vadd.s32 2, %v9943_v40  ;;  %9225 = vmatprep.subr.msk.bf16.mxu0 %vm10150_vm5, %v12569_v49 }
 0x284   : > { %vm2624_vm3 = vcmp.eq.s32.totalorder %v2616_v34, %v9933_v36  ;;  %9227 = vmatpush3.bf16.msk.msra.mxu0 %vm10150_vm5, %v12569_v49 }
 0x285   : > { %vm2625_vm4 = vcmp.eq.s32.totalorder %v2617_v38, %v9933_v36 }
 0x286   : > { %8420 = vmatmul.mubr.msk.f32.gmra.mrb[10].mxu0 %vm906_vm1, %v857_v43  ;;  %v861_v43 = vld [vmem:[%s12599_s8 + $0x38] sm:$0xff]  ;;  %vm10157_vm8 = vmpackc.low %vm2625_vm4, %vm2624_vm3  ;;  %vm2638_vm3 = vcmask 506880  }
 0x287   : > { %8422 = vmatprep.mubr.msk.f32.mxu0 %vm906_vm1, %v858_v29  ;;  %9229 = vmatprep.subr.msk.bf16.mxu0 %vm10157_vm8, %v12569_v49 }
 0x288   : > { %9231 = vmatpush3.bf16.msk.msra.mxu0 %vm10157_vm8, %v12569_v49 }
 0x28a   : > { %8423 = vmatmul.mubr.msk.f32.gmra.mrb[12].mxu0 %vm906_vm1, %v859_v30 }
 0x28b   : > { %8425 = vmatprep.mubr.msk.f32.mxu0 %vm906_vm1, %v860_v31 }
 0x28e   : > { %8426 = vmatmul.mubr.msk.f32.gmra.mrb[14].mxu0 %vm906_vm1, %v861_v43 }
 0x28f   : > { %8428 = vmatprep.mubr.msk.f32.mxu0 %vm906_vm1, %v862_v46 }
 0x355   : > { %v8418_v56 = vpop.f32.mrb[8].mxu0 }
 0x356   : > { %v1551_v57 = vadd.f32 %v8418_v56, %v9861_v14  ;;  %v1371_v58 = vpop.f32.mrb[9].mxu0  ;;  %v1562_v14 = vld [vmem:[%s12613_s4] sm:$0xff]  ;;  %s12615_s4 = sld [smem:[#allocation74_spill]]  ;;  %v2619_v56 = vadd.s32 2, %v9949_v42 }
 0x357   : > { %v1550_v59 = vadd.f32 %v1371_v58, %v9859_v13  ;;  %v864_v58 = vld [vmem:[%s12599_s8 + $0x50] sm:$0xff] }
 0x358   : > { %1745 = vrot.lane.b32.xlu1 %v1551_v57, %s12560_s0  ;;  %vm2627_vm11 = vcmp.eq.s32.totalorder %v2619_v56, %v9933_v36 }
 0x359   : > { %1743 = vrot.lane.b32.xlu0 %v1550_v59, %s12560_s0  ;;  %v8421_v60 = vpop.f32.mrb[10].mxu0  ;;  %8486 = vmatprep.mubr.msk.f32.mxu1 %vm1641_vm15, %v1550_v59  ;;  %vm10177_vm13 = vmpackc.low %vm2627_vm11, %vm2626_vm9  ;;  %v2613_v59 = vld [vmem:[%s12537_s10 + $0x118] sm:$0xff] }
 0x35a   : > { %v1553_v61 = vadd.f32 %v8421_v60, %v9867_v17  ;;  %v1381_v62 = vpop.f32.mrb[11].mxu0  ;;  %8487 = vmatmul.mubr.msk.f32.vlgmr.msra.gmra.mrb[8].mxu1 %vm1641_vm15, %v1551_v57  ;;  %v863_v57 = vld [vmem:[%s12599_s8 + $0x48] sm:$0xff]  ;;  %9233 = vmatprep.subr.msk.bf16.mxu0 %vm10177_vm13, %v12569_v49 }
 0x35b   : > { %v1552_v63 = vadd.f32 %v1381_v62, %v9863_v15  ;;  %8429 = vmatmul.mubr.msk.f32.gmra.mrb[16].mxu0 %vm906_vm1, %v863_v57  ;;  %v866_v62 = vld [vmem:[%s12599_s8 + $0x60] sm:$0xff] }
 0x35c   : > { %1749 = vrot.lane.b32.xlu1 %v1553_v61, %s12560_s0  ;;  %v1570_v28 = vld [vmem:[%s12615_s4] sm:$0xff]  ;;  %8431 = vmatprep.mubr.msk.f32.mxu0 %vm906_vm1, %v864_v58  ;;  %v1576_v50 = vld [vmem:[%s12615_s4 + $0x30] sm:$0xff]  ;;  %v1577_v51 = vld [vmem:[%s12615_s4 + $0x38] sm:$0xff] }
 0x35d   : > { %1747 = vrot.lane.b32.xlu0 %v1552_v63, %s12560_s0  ;;  %8489 = vmatprep.mubr.msk.f32.mxu1 %vm1641_vm15, %v1552_v63  ;;  %s12580_s0 = smov 126   ;;  %v1574_v48 = vld [vmem:[%s12615_s4 + $0x20] sm:$0xff] }
 0x35e   : > { %8490 = vmatmul.mubr.msk.f32.gmra.mrb[10].mxu1 %vm1641_vm15, %v1553_v61  ;;  %v865_v61 = vld [vmem:[%s12599_s8 + $0x58] sm:$0xff]  ;;  %9235 = vmatpush3.bf16.msk.msra.mxu0 %vm10177_vm13, %v12569_v49 }
 0x35f   : > { %8500 = vmatprep.mubr.msk.f32.mxu1 %vm906_vm1, %v1562_v14  ;;  %8432 = vmatmul.mubr.msk.f32.gmra.mrb[18].mxu0 %vm906_vm1, %v865_v61  ;;  %v867_v14 = vld [vmem:[%s12599_s8 + $0x68] sm:$0xff] }
 0x360   : > { %8434 = vmatprep.mubr.msk.f32.mxu0 %vm906_vm1, %v866_v62 }
 0x363   : > { %8435 = vmatmul.mubr.msk.f32.gmra.mrb[20].mxu0 %vm906_vm1, %v867_v14 }
 0x3ca   : > { %v10038_v13 = vpop.permute.xlu1 %1745 }
 0x3cb   : > { %v10040_v0 = vpop.permute.xlu0 %1743 }
 0x3cc   : > { %v9200_v17 = vpack.c.bf16 %v10038_v13, %v10040_v0 }
 0x3ce   : > { %9201 = vmatprep.subr.bf16.mxu1 %v9200_v17  ;;  %v10044_v15 = vpop.permute.xlu1 %1749 }
 0x3cf   : > { %9203 = vmatpush3.bf16.msra.mxu1 %v9200_v17  ;;  %v10046_v1 = vpop.permute.xlu0 %1747  ;;  %v868_v17 = vld [vmem:[%s12599_s8 + $0x70] sm:$0xff] }
 0x3d0   : > { %v9204_v2 = vpack.c.bf16 %v10044_v15, %v10046_v1  ;;  %8437 = vmatprep.mubr.msk.f32.mxu0 %vm906_vm1, %v868_v17 }
 0x3d2   : > { %9205 = vmatprep.subr.bf16.mxu1 %v9204_v2 }
 0x3d3   : > { %9207 = vmatpush3.bf16.msra.mxu1 %v9204_v2  ;;  %v869_v2 = vld [vmem:[%s12599_s8 + $0x78] sm:$0xff] }
 0x3d4   : > { %8438 = vmatmul.mubr.msk.f32.gmra.mrb[22].mxu0 %vm906_vm1, %v869_v2 }
 0x3d6   : > { %8501 = vmatmul.mubr.msk.f32.vlgmr.msra.gmra.mrb[12].mxu1 %vm906_vm1, %v1563_v3  ;;  %v870_v3 = vld [vmem:[%s12599_s8 + $0x80] sm:$0xff] }
 0x3d7   : > { %8503 = vmatprep.mubr.msk.f32.mxu1 %vm906_vm1, %v1564_v4  ;;  %8440 = vmatprep.mubr.msk.f32.mxu0 %vm906_vm1, %v870_v3  ;;  %v871_v4 = vld [vmem:[%s12599_s8 + $0x88] sm:$0xff] }
 0x3d8   : > { %8441 = vmatmul.mubr.msk.f32.gmra.mrb[24].mxu0 %vm906_vm1, %v871_v4 }
 0x3da   : > { %8504 = vmatmul.mubr.msk.f32.gmra.mrb[14].mxu1 %vm906_vm1, %v1565_v5  ;;  %v872_v5 = vld [vmem:[%s12599_s8 + $0x90] sm:$0xff] }
 0x3db   : > { %8506 = vmatprep.mubr.msk.f32.mxu1 %vm906_vm1, %v1566_v6  ;;  %8443 = vmatprep.mubr.msk.f32.mxu0 %vm906_vm1, %v872_v5  ;;  %v873_v6 = vld [vmem:[%s12599_s8 + $0x98] sm:$0xff] }
 0x3dc   : > { %8444 = vmatmul.mubr.msk.f32.gmra.mrb[26].mxu0 %vm906_vm1, %v873_v6 }
 0x3de   : > { %8507 = vmatmul.mubr.msk.f32.gmra.mrb[16].mxu1 %vm906_vm1, %v1567_v7  ;;  %v874_v7 = vld [vmem:[%s12599_s8 + $0xa0] sm:$0xff] }
 0x3df   : > { %8509 = vmatprep.mubr.msk.f32.mxu1 %vm906_vm1, %v1568_v8  ;;  %8446 = vmatprep.mubr.msk.f32.mxu0 %vm906_vm1, %v874_v7  ;;  %v875_v8 = vld [vmem:[%s12599_s8 + $0xa8] sm:$0xff] }
 0x3e0   : > { %8447 = vmatmul.mubr.msk.f32.gmra.mrb[28].mxu0 %vm906_vm1, %v875_v8 }
 0x3e2   : > { %8510 = vmatmul.mubr.msk.f32.gmra.mrb[18].mxu1 %vm906_vm1, %v1569_v9  ;;  %v876_v9 = vld [vmem:[%s12599_s8 + $0xb0] sm:$0xff] }
 0x3e3   : > { %8520 = vmatprep.mubr.msk.f32.mxu1 %vm906_vm1, %v1554_v10  ;;  %8449 = vmatprep.mubr.msk.f32.mxu0 %vm906_vm1, %v876_v9  ;;  %v877_v10 = vld [vmem:[%s12599_s8 + $0xb8] sm:$0xff] }
 0x3e4   : > { %8450 = vmatmul.mubr.msk.f32.gmra.mrb[30].mxu0 %vm906_vm1, %v877_v10 }
 0x42d   : > { %v8488_v11 = vpop.f32.mrb[8].mxu1 }
 0x42e   : > { %v1724_v12 = vpop.f32.mrb[9].mxu1 }
 0x42f   : > { %v9208_v16 = vpack.c.bf16 %v8488_v11, %v1724_v12  ;;  %v878_v11 = vld [vmem:[%s12599_s8 + $0xc0] sm:$0xff]  ;;  %v879_v12 = vld [vmem:[%s12599_s8 + $0xc8] sm:$0xff] }
 0x430   : > { %8452 = vmatprep.mubr.msk.f32.mxu0 %vm906_vm1, %v878_v11 }
 0x431   : > { %v8491_v18 = vpop.f32.mrb[10].mxu1  ;;  %9209 = vmatprep.subr.bf16.mxu1 %v9208_v16  ;;  %8453 = vmatmul.mubr.msk.f32.gmra.mrb[32].mxu0 %vm906_vm1, %v879_v12 }
 0x432   : > { %v1734_v19 = vpop.f32.mrb[11].mxu1  ;;  %9211 = vmatpush3.bf16.msra.mxu1 %v9208_v16  ;;  %v880_v16 = vld [vmem:[%s12599_s8 + $0xd0] sm:$0xff] }
 0x433   : > { %v9212_v20 = vpack.c.bf16 %v8491_v18, %v1734_v19  ;;  %8455 = vmatprep.mubr.msk.f32.mxu0 %vm906_vm1, %v880_v16  ;;  %v881_v18 = vld [vmem:[%s12599_s8 + $0xd8] sm:$0xff]  ;;  %v882_v19 = vld [vmem:[%s12599_s8 + $0xe0] sm:$0xff] }
 0x435   : > { %9213 = vmatprep.subr.bf16.mxu1 %v9212_v20  ;;  %8456 = vmatmul.mubr.msk.f32.gmra.mrb[34].mxu0 %vm906_vm1, %v881_v18 }
 0x436   : > { %9215 = vmatpush3.bf16.msra.mxu1 %v9212_v20  ;;  %8458 = vmatprep.mubr.msk.f32.mxu0 %vm906_vm1, %v882_v19  ;;  %v883_v20 = vld [vmem:[%s12599_s8 + $0xe8] sm:$0xff] }
 0x439   : > { %8521 = vmatmul.mubr.msk.f32.vlgmr.msra.gmra.mrb[12].mxu1 %vm906_vm1, %v1555_v21  ;;  %v884_v21 = vld [vmem:[%s12599_s8 + $0xf0] sm:$0xff]  ;;  %8459 = vmatmul.mubr.msk.f32.gmra.mrb[36].mxu0 %vm906_vm1, %v883_v20 }
 0x43a   : > { %8523 = vmatprep.mubr.msk.f32.mxu1 %vm906_vm1, %v1556_v22  ;;  %8461 = vmatprep.mubr.msk.f32.mxu0 %vm906_vm1, %v884_v21  ;;  %v885_v22 = vld [vmem:[%s12599_s8 + $0xf8] sm:$0xff]  ;;  %v1571_v21 = vld [vmem:[%s12615_s4 + $0x8] sm:$0xff] }
 0x43d   : > { %8524 = vmatmul.mubr.msk.f32.gmra.mrb[14].mxu1 %vm906_vm1, %v1557_v23  ;;  %v886_v23 = vld [vmem:[%s12599_s8 + $0x100] sm:$0xff]  ;;  %8462 = vmatmul.mubr.msk.f32.gmra.mrb[38].mxu0 %vm906_vm1, %v885_v22  ;;  %v1572_v22 = vld [vmem:[%s12615_s4 + $0x10] sm:$0xff] }
 0x43e   : > { %8526 = vmatprep.mubr.msk.f32.mxu1 %vm906_vm1, %v1558_v24  ;;  %8464 = vmatprep.mubr.msk.f32.mxu0 %vm906_vm1, %v886_v23  ;;  %v887_v24 = vld [vmem:[%s12599_s8 + $0x108] sm:$0xff]  ;;  %v1573_v23 = vld [vmem:[%s12615_s4 + $0x18] sm:$0xff] }
 0x441   : > { %8527 = vmatmul.mubr.msk.f32.gmra.mrb[16].mxu1 %vm906_vm1, %v1559_v25  ;;  %v888_v25 = vld [vmem:[%s12599_s8 + $0x110] sm:$0xff]  ;;  %8465 = vmatmul.mubr.msk.f32.gmra.mrb[40].mxu0 %vm906_vm1, %v887_v24  ;;  %v2621_v24 = vadd.s32 2, %v10005_v44  ;;  %v10313_v44 = vpop.f32.mrb[12].mxu0 }
 0x442   : > { %8529 = vmatprep.mubr.msk.f32.mxu1 %vm906_vm1, %v1560_v26  ;;  %8467 = vmatprep.mubr.msk.f32.mxu0 %vm906_vm1, %v888_v25  ;;  %v889_v26 = vld [vmem:[%s12599_s8 + $0x118] sm:$0xff]  ;;  %v10298_v25 = vadd.s32 2, %v10008_v45 }
 0x443   : > { %vm2629_vm14 = vcmp.eq.s32.totalorder %v2621_v24, %v9933_v36 }
 0x444   : > { %vm2628_vm15 = vcmp.eq.s32.totalorder %v10298_v25, %v9933_v36 }
 0x445   : > { %8530 = vmatmul.mubr.msk.f32.gmra.mrb[18].mxu1 %vm906_vm1, %v1561_v27  ;;  %8468 = vmatmul.mubr.msk.f32.gmra.mrb[42].mxu0 %vm906_vm1, %v889_v26  ;;  %v2637_v26 = vsel %vm2629_vm14, 1.0, %v12567_v52  ;;  %vm9237_vm2 = vmpackc.low %vm2651_vm0, %vm2628_vm15  ;;  %v2563_v52 = vld [vmem:[%s12624_s25 + $0x8] sm:$0xff] }
 0x446   : > { %8540 = vmatprep.mubr.msk.f32.mxu1 %vm906_vm1, %v1570_v28 }
 0x50c   : > { %v8522_v27 = vpop.f32.mrb[12].mxu1 }
 0x50d   : > { %v1974_v28 = vpop.f32.mrb[13].mxu1 }
 0x510   : > { %v8525_v29 = vpop.f32.mrb[14].mxu1 }
 0x511   : > { %v1984_v30 = vpop.f32.mrb[15].mxu1 }
 0x514   : > { %v8528_v31 = vpop.f32.mrb[16].mxu1 }
 0x515   : > { %v7459_v32 = vmul.f32 -1.442695, %v8528_v31  ;;  %v1994_v33 = vpop.f32.mrb[17].mxu1 }
 0x516   : > { %v7458_v34 = vmul.f32 -1.442695, %v1994_v33 }
 0x517   : > { %9562 = vpow2.f32 %v7459_v32 }
 0x518   : > { %9564 = vpow2.f32 %v7458_v34  ;;  %v8531_v38 = vpop.f32.mrb[18].mxu1 }
 0x519   : > { %v7461_v43 = vmul.f32 -1.442695, %v8531_v38  ;;  %v2004_v46 = vpop.f32.mrb[19].mxu1 }
 0x51a   : > { %v7460_v53 = vmul.f32 -1.442695, %v2004_v46 }
 0x51b   : > { %9566 = vpow2.f32 %v7461_v43 }
 0x51c   : > { %9568 = vpow2.f32 %v7460_v53 }
 0x51d   : > { %9570 = vtanh.f32 %v8522_v27  ;;  %v10305_v27 = vpack.c.bf16 %v2637_v26, %v12566_v54 }
 0x51e   : > { %9572 = vtanh.f32 %v1974_v28  ;;  %v10315_v28 = vpop.f32.mrb[13].mxu0 }
 0x51f   : > { %9238 = vmatprep.subr.msk.bf16.mxu0 %vm9237_vm2, %v10305_v27 }
 0x520   : > { %9241 = vmatpush3.bf16.msk.msra.mxu0 %vm9237_vm2, %v10305_v27 }
 0x521   : > { %v9563_v56 = vpop.eup %9562 }
 0x522   : > { %v9565_v57 = vpop.eup %9564  ;;  %v2030_v58 = vadd.f32 1.0, %v9563_v56 }
 0x523   : > { %v2029_v61 = vadd.f32 1.0, %v9565_v57 }
 0x524   : > { %9574 = vrcp.f32 %v2030_v58 }
 0x525   : > { %v9567_v62 = vpop.eup %9566  ;;  %9576 = vrcp.f32 %v2029_v61 }
 0x526   : > { %v9569_v14 = vpop.eup %9568  ;;  %9578 = vtanh.f32 %v8525_v29  ;;  %v2032_v17 = vadd.f32 1.0, %v9567_v62  ;;  %v2570_v62 = vld [vmem:[%s12536_s9] sm:$0xff] }
 0x527   : > { %9580 = vtanh.f32 %v1984_v30  ;;  %v2031_v2 = vadd.f32 1.0, %v9569_v14  ;;  %v9571_v3 = vpop.eup %9570  ;;  %v10317_v30 = vpop.f32.mrb[14].mxu0 }
 0x528   : > { %9582 = vrcp.f32 %v2032_v17  ;;  %v9573_v4 = vpop.eup %9572  ;;  %v10320_v33 = vpop.f32.mrb[15].mxu0 }
 0x529   : > { %9584 = vrcp.f32 %v2031_v2  ;;  %v10323_v38 = vpop.f32.mrb[16].mxu0 }
 0x52a   : > { %v10326_v43 = vpop.f32.mrb[17].mxu0 }
 0x52b   : > { %v10330_v53 = vpop.f32.mrb[18].mxu0 }
 0x52e   : > { %v9575_v5 = vpop.eup %9574 }
 0x52f   : > { %v9577_v6 = vpop.eup %9576  ;;  %v2042_v7 = vmul.f32 %v9575_v5, %v9571_v3 }
 0x530   : > { %v9579_v8 = vpop.eup %9578  ;;  %v2041_v9 = vmul.f32 %v9577_v6, %v9573_v4 }
 0x531   : > { %v9581_v10 = vpop.eup %9580 }
 0x532   : > { %v9583_v11 = vpop.eup %9582  ;;  %v9216_v12 = vpack.c.bf16 %v2042_v7, %v2041_v9 }
 0x533   : > { %v9585_v16 = vpop.eup %9584  ;;  %v2044_v18 = vmul.f32 %v9583_v11, %v9579_v8 }
 0x534   : > { %9217 = vmatprep.subr.bf16.mxu1 %v9216_v12  ;;  %v2043_v19 = vmul.f32 %v9585_v16, %v9581_v10 }
 0x535   : > { %9219 = vmatpush3.bf16.msra.mxu1 %v9216_v12 }
 0x536   : > { %v9220_v20 = vpack.c.bf16 %v2044_v18, %v2043_v19 }
 0x538   : > { %9221 = vmatprep.subr.bf16.mxu1 %v9220_v20 }
 0x539   : > { %9223 = vmatpush3.bf16.msra.mxu1 %v9220_v20 }
 0x53c   : > { %8541 = vmatmul.mubr.msk.f32.vlgmr.msra.gmra.mrb[20].mxu1 %vm906_vm1, %v1571_v21 }
 0x53d   : > { %8543 = vmatprep.mubr.msk.f32.mxu1 %vm906_vm1, %v1572_v22 }
 0x540   : > { %8544 = vmatmul.mubr.msk.f32.gmra.mrb[22].mxu1 %vm906_vm1, %v1573_v23 }
 0x541   : > { %8546 = vmatprep.mubr.msk.f32.mxu1 %vm906_vm1, %v1574_v48  ;;  %v1595_v48 = vld [vmem:[%s12615_s4 + $0xc8] sm:$0xff] }
 0x60f   : > { %v8542_v29 = vpop.f32.mrb[20].mxu1 }
 0x610   : > { %v2399_v31 = vadd.f32 %v8542_v29, %v10038_v13  ;;  %v2219_v32 = vpop.f32.mrb[21].mxu1 }
 0x611   : > { %v2398_v34 = vadd.f32 %v2219_v32, %v10040_v0  ;;  %v10334_v0 = vpop.f32.mrb[19].mxu0 }
 0x612   : > { %2742 = vrot.lane.b32.xlu1 %v2399_v31, %s12580_s0  ;;  %v10337_v58 = vpop.f32.mrb[20].mxu0 }
 0x613   : > { %2740 = vrot.lane.b32.xlu0 %v2398_v34, %s12580_s0  ;;  %v8545_v46 = vpop.f32.mrb[22].mxu1  ;;  %8610 = vmatprep.mubr.msk.f32.mxu0 %vm2638_vm3, %v2398_v34  ;;  %v10340_v61 = vpop.f32.mrb[21].mxu0 }
 0x614   : > { %v2401_v13 = vadd.f32 %v8545_v46, %v10044_v15  ;;  %v2229_v56 = vpop.f32.mrb[23].mxu1  ;;  %8611 = vmatmul.mubr.msk.f32.vlgmr.msra.gmra.mrb[44].mxu0 %vm2638_vm3, %v2399_v31  ;;  %v10347_v15 = vpop.f32.mrb[22].mxu0  ;;  %v2571_v46 = vld [vmem:[%s12536_s9 + $0x8] sm:$0xff] }
 0x615   : > { %v2400_v57 = vadd.f32 %v2229_v56, %v10046_v1  ;;  %v10350_v14 = vpop.f32.mrb[23].mxu0  ;;  %v2573_v56 = vld [vmem:[%s12536_s9 + $0x18] sm:$0xff] }
 0x616   : > { %2746 = vrot.lane.b32.xlu1 %v2401_v13, %s12580_s0  ;;  %v10352_v1 = vpop.f32.mrb[24].mxu0 }
 0x617   : > { %2744 = vrot.lane.b32.xlu0 %v2400_v57, %s12580_s0  ;;  %8613 = vmatprep.mubr.msk.f32.mxu0 %vm2638_vm3, %v2400_v57  ;;  %v10355_v17 = vpop.f32.mrb[25].mxu0  ;;  %v2574_v57 = vld [vmem:[%s12536_s9 + $0x20] sm:$0xff] }
 0x618   : > { %8614 = vmatmul.mubr.msk.f32.gmra.mrb[46].mxu0 %vm2638_vm3, %v2401_v13  ;;  %v10357_v2 = vpop.f32.mrb[26].mxu0  ;;  %v2572_v13 = vld [vmem:[%s12536_s9 + $0x10] sm:$0xff] }
 0x619   : > { %8624 = vmatprep.mubr.msk.f32.mxu0 %vm906_vm1, %v2570_v62  ;;  %12622 = vst [vmem:[#allocation9_spill] sm:$0xff] %v10357_v2  ;;  %v10359_v3 = vpop.f32.mrb[27].mxu0  ;;  %v2575_v62 = vld [vmem:[%s12536_s9 + $0x28] sm:$0xff] }
 0x61a   : > { %v10361_v4 = vpop.f32.mrb[28].mxu0 }
 0x61b   : > { %v10363_v5 = vpop.f32.mrb[29].mxu0 }
 0x61c   : > { %v10365_v6 = vpop.f32.mrb[30].mxu0 }
 0x61d   : > { %v10367_v7 = vpop.f32.mrb[31].mxu0 }
 0x61e   : > { %v10369_v8 = vpop.f32.mrb[32].mxu0 }
 0x61f   : > { %v10371_v9 = vpop.f32.mrb[33].mxu0 }
 0x620   : > { %v10373_v10 = vpop.f32.mrb[34].mxu0 }
 0x621   : > { %v10375_v11 = vpop.f32.mrb[35].mxu0 }
 0x622   : > { %v10377_v12 = vpop.f32.mrb[36].mxu0 }
 0x623   : > { %v10379_v16 = vpop.f32.mrb[37].mxu0 }
 0x624   : > { %v10381_v18 = vpop.f32.mrb[38].mxu0 }
 0x625   : > { %v10383_v19 = vpop.f32.mrb[39].mxu0 }
 0x626   : > { %v10385_v20 = vpop.f32.mrb[40].mxu0 }
 0x627   : > { %v10387_v21 = vpop.f32.mrb[41].mxu0 }
 0x628   : > { %v10389_v22 = vpop.f32.mrb[42].mxu0 }
 0x629   : > { %12623 = vst [vmem:[#allocation10_spill] sm:$0xff] %v10389_v22  ;;  %v10391_v23 = vpop.f32.mrb[43].mxu0 }
 0x684   : > { %v10393_v24 = vpop.permute.xlu1 %2742 }
 0x685   : > { %v10395_v26 = vpop.permute.xlu0 %2740 }
 0x686   : > { %v9242_v29 = vpack.c.bf16 %v10393_v24, %v10395_v26 }
 0x688   : > { %9243 = vmatprep.subr.bf16.mxu0 %v9242_v29  ;;  %v10399_v31 = vpop.permute.xlu1 %2746 }
 0x689   : > { %9245 = vmatpush3.bf16.msra.mxu0 %v9242_v29  ;;  %v10401_v32 = vpop.permute.xlu0 %2744  ;;  %v2576_v29 = vld [vmem:[%s12536_s9 + $0x30] sm:$0xff] }
 0x68a   : > { %v9246_v34 = vpack.c.bf16 %v10399_v31, %v10401_v32 }
 0x68c   : > { %9247 = vmatprep.subr.bf16.mxu0 %v9246_v34 }
 0x68d   : > { %9249 = vmatpush3.bf16.msra.mxu0 %v9246_v34  ;;  %v2577_v34 = vld [vmem:[%s12536_s9 + $0x38] sm:$0xff] }
 0x690   : > { %8625 = vmatmul.mubr.msk.f32.vlgmr.msra.gmra.mrb[48].mxu0 %vm906_vm1, %v2571_v46  ;;  %v2562_v46 = vld [vmem:[%s12624_s25] sm:$0xff] }
 0x691   : > { %8627 = vmatprep.mubr.msk.f32.mxu0 %vm906_vm1, %v2572_v13 }
 0x694   : > { %8628 = vmatmul.mubr.msk.f32.gmra.mrb[50].mxu0 %vm906_vm1, %v2573_v56 }
 0x695   : > { %8630 = vmatprep.mubr.msk.f32.mxu0 %vm906_vm1, %v2574_v57 }
 0x698   : > { %8631 = vmatmul.mubr.msk.f32.gmra.mrb[52].mxu0 %vm906_vm1, %v2575_v62 }
 0x699   : > { %8633 = vmatprep.mubr.msk.f32.mxu0 %vm906_vm1, %v2576_v29 }
 0x69c   : > { %8634 = vmatmul.mubr.msk.f32.gmra.mrb[54].mxu0 %vm906_vm1, %v2577_v34  ;;  %v2564_v34 = vld [vmem:[%s12624_s25 + $0x10] sm:$0xff] }
 0x69d   : > { %8644 = vmatprep.mubr.msk.f32.mxu0 %vm906_vm1, %v2562_v46  ;;  %v2565_v46 = vld [vmem:[%s12624_s25 + $0x18] sm:$0xff] }
 0x6e7   : > { %v8612_v13 = vpop.f32.mrb[44].mxu0 }
 0x6e8   : > { %v2721_v56 = vpop.f32.mrb[45].mxu0 }
 0x6e9   : > { %v9250_v57 = vpack.c.bf16 %v8612_v13, %v2721_v56  ;;  %v2567_v13 = vld [vmem:[%s12624_s25 + $0x28] sm:$0xff]  ;;  %v2569_v56 = vld [vmem:[%s12624_s25 + $0x38] sm:$0xff] }
 0x6eb   : > { %v8615_v54 = vpop.f32.mrb[46].mxu0  ;;  %9251 = vmatprep.subr.bf16.mxu0 %v9250_v57 }
 0x6ec   : > { %v2731_v62 = vpop.f32.mrb[47].mxu0  ;;  %9253 = vmatpush3.bf16.msra.mxu0 %v9250_v57  ;;  %v2578_v57 = vld [vmem:[%s12537_s10] sm:$0xff] }
 0x6ed   : > { %v9254_v29 = vpack.c.bf16 %v8615_v54, %v2731_v62  ;;  %v2566_v54 = vld [vmem:[%s12624_s25 + $0x20] sm:$0xff] }
 0x6ef   : > { %9255 = vmatprep.subr.bf16.mxu0 %v9254_v29 }
 0x6f0   : > { %9257 = vmatpush3.bf16.msra.mxu0 %v9254_v29 }
 0x6f3   : > { %8645 = vmatmul.mubr.msk.f32.vlgmr.msra.gmra.mrb[48].mxu0 %vm906_vm1, %v2563_v52  ;;  %v2568_v52 = vld [vmem:[%s12624_s25 + $0x30] sm:$0xff] }
 0x6f4   : > { %8647 = vmatprep.mubr.msk.f32.mxu0 %vm906_vm1, %v2564_v34 }
 0x6f7   : > { %8648 = vmatmul.mubr.msk.f32.gmra.mrb[50].mxu0 %vm906_vm1, %v2565_v46 }
 0x6f8   : > { %8650 = vmatprep.mubr.msk.f32.mxu0 %vm906_vm1, %v2566_v54 }
 0x6fb   : > { %8651 = vmatmul.mubr.msk.f32.gmra.mrb[52].mxu0 %vm906_vm1, %v2567_v13 }
 0x6fc   : > { %8653 = vmatprep.mubr.msk.f32.mxu0 %vm906_vm1, %v2568_v52 }
 0x6ff   : > { %8654 = vmatmul.mubr.msk.f32.gmra.mrb[54].mxu0 %vm906_vm1, %v2569_v56 }
 0x700   : > { %8664 = vmatprep.mubr.msk.f32.mxu0 %vm906_vm1, %v2578_v57 }
 0x7c6   : > { %v8646_v62 = vpop.f32.mrb[48].mxu0 }
 0x7c7   : > { %v2971_v29 = vpop.f32.mrb[49].mxu0 }
 0x7ca   : > { %v8649_v34 = vpop.f32.mrb[50].mxu0 }
 0x7cb   : > { %v2981_v46 = vpop.f32.mrb[51].mxu0 }
 0x7ce   : > { %v8652_v54 = vpop.f32.mrb[52].mxu0 }
 0x7cf   : > { %v7527_v13 = vmul.f32 -1.442695, %v8652_v54  ;;  %v2991_v49 = vpop.f32.mrb[53].mxu0 }
 0x7d0   : > { %v7526_v52 = vmul.f32 -1.442695, %v2991_v49 }
 0x7d1   : > { %9586 = vpow2.f32 %v7527_v13 }
 0x7d2   : > { %9588 = vpow2.f32 %v7526_v52  ;;  %v8655_v45 = vpop.f32.mrb[54].mxu0 }
 0x7d3   : > { %v7529_v42 = vmul.f32 -1.442695, %v8655_v45  ;;  %v3001_v41 = vpop.f32.mrb[55].mxu0 }
 0x7d4   : > { %v7528_v56 = vmul.f32 -1.442695, %v3001_v41 }
 0x7d5   : > { %9590 = vpow2.f32 %v7529_v42 }
 0x7d6   : > { %9592 = vpow2.f32 %v7528_v56 }
 0x7d7   : > { %9594 = vtanh.f32 %v8646_v62 }
 0x7d8   : > { %9596 = vtanh.f32 %v2971_v29 }
 0x7db   : > { %v9587_v40 = vpop.eup %9586 }
 0x7dc   : > { %v9589_v39 = vpop.eup %9588  ;;  %v3027_v57 = vadd.f32 1.0, %v9587_v40 }
 0x7dd   : > { %v3026_v37 = vadd.f32 1.0, %v9589_v39 }
 0x7de   : > { %9598 = vrcp.f32 %v3027_v57 }
 0x7df   : > { %v9591_v35 = vpop.eup %9590  ;;  %9600 = vrcp.f32 %v3026_v37 }
 0x7e0   : > { %v9593_v54 = vpop.eup %9592  ;;  %9602 = vtanh.f32 %v8649_v34  ;;  %v3029_v49 = vadd.f32 1.0, %v9591_v35  ;;  %v2579_v34 = vld [vmem:[%s12537_s10 + $0x8] sm:$0xff] }
 0x7e1   : > { %9604 = vtanh.f32 %v2981_v46  ;;  %v3028_v13 = vadd.f32 1.0, %v9593_v54  ;;  %v9595_v45 = vpop.eup %9594  ;;  %v2580_v46 = vld [vmem:[%s12537_s10 + $0x10] sm:$0xff]  ;;  %v12625_v54 = vmov 1.0|1.0  }
 0x7e2   : > { %9606 = vrcp.f32 %v3029_v49  ;;  %v9597_v41 = vpop.eup %9596  ;;  %v1578_v49 = vld [vmem:[%s12615_s4 + $0x40] sm:$0xff] }
 0x7e3   : > { %9608 = vrcp.f32 %v3028_v13  ;;  %v1579_v13 = vld [vmem:[%s12615_s4 + $0x48] sm:$0xff] }
 0x7e8   : > { %v9599_v42 = vpop.eup %9598 }
 0x7e9   : > { %v9601_v52 = vpop.eup %9600  ;;  %v3039_v56 = vmul.f32 %v9599_v42, %v9595_v45  ;;  %v1580_v45 = vld [vmem:[%s12615_s4 + $0x50] sm:$0xff]  ;;  %v1582_v42 = vld [vmem:[%s12615_s4 + $0x60] sm:$0xff] }
 0x7ea   : > { %v9603_v2 = vpop.eup %9602  ;;  %v3038_v62 = vmul.f32 %v9601_v52, %v9597_v41  ;;  %v1581_v41 = vld [vmem:[%s12615_s4 + $0x58] sm:$0xff]  ;;  %v1583_v52 = vld [vmem:[%s12615_s4 + $0x68] sm:$0xff] }
 0x7eb   : > { %v9605_v40 = vpop.eup %9604 }
 0x7ec   : > { %v9607_v29 = vpop.eup %9606  ;;  %v9258_v39 = vpack.c.bf16 %v3039_v56, %v3038_v62  ;;  %v1584_v56 = vld [vmem:[%s12615_s4 + $0x70] sm:$0xff]  ;;  %v1585_v62 = vld [vmem:[%s12615_s4 + $0x78] sm:$0xff] }
 0x7ed   : > { %v9609_v57 = vpop.eup %9608  ;;  %v3041_v22 = vmul.f32 %v9607_v29, %v9603_v2  ;;  %v2581_v2 = vld [vmem:[%s12537_s10 + $0x18] sm:$0xff]  ;;  %v1587_v29 = vld [vmem:[%s12615_s4 + $0x88] sm:$0xff] }
 0x7ee   : > { %9259 = vmatprep.subr.bf16.mxu0 %v9258_v39  ;;  %v3040_v37 = vmul.f32 %v9609_v57, %v9605_v40  ;;  %v1586_v40 = vld [vmem:[%s12615_s4 + $0x80] sm:$0xff]  ;;  %v1589_v57 = vld [vmem:[%s12615_s4 + $0x98] sm:$0xff] }
 0x7ef   : > { %9261 = vmatpush3.bf16.msra.mxu0 %v9258_v39  ;;  %v1588_v39 = vld [vmem:[%s12615_s4 + $0x90] sm:$0xff] }
 0x7f0   : > { %v9262_v35 = vpack.c.bf16 %v3041_v22, %v3040_v37  ;;  %v1575_v22 = vld [vmem:[%s12615_s4 + $0x28] sm:$0xff]  ;;  %v1590_v37 = vld [vmem:[%s12615_s4 + $0xa0] sm:$0xff] }
 0x7f1   : > { %8547 = vmatmul.mubr.msk.f32.gmra.mrb[24].mxu1 %vm906_vm1, %v1575_v22  ;;  %v1596_v22 = vld [vmem:[%s12615_s4 + $0xd0] sm:$0xff] }
 0x7f2   : > { %9263 = vmatprep.subr.bf16.mxu0 %v9262_v35  ;;  %8549 = vmatprep.mubr.msk.f32.mxu1 %vm906_vm1, %v1576_v50  ;;  %v1597_v50 = vld [vmem:[%s12615_s4 + $0xd8] sm:$0xff] }
 0x7f3   : > { %9265 = vmatpush3.bf16.msra.mxu0 %v9262_v35  ;;  %v1591_v35 = vld [vmem:[%s12615_s4 + $0xa8] sm:$0xff] }
 0x7f4   : > { %9291 = vmatprep.subr.msk.bf16.mxu0 %vm9960_vm6, %v12625_v54 }
 0x7f5   : > { %8550 = vmatmul.mubr.msk.f32.gmra.mrb[26].mxu1 %vm906_vm1, %v1577_v51  ;;  %v1598_v51 = vld [vmem:[%s12615_s4 + $0xe0] sm:$0xff] }
 0x7f6   : > { %8665 = vmatmul.mubr.msk.f32.vlgmr.msra.gmra.mrb[56].mxu0 %vm906_vm1, %v2579_v34  ;;  %8552 = vmatprep.mubr.msk.f32.mxu1 %vm906_vm1, %v1578_v49  ;;  %v1592_v34 = vld [vmem:[%s12615_s4 + $0xb0] sm:$0xff]  ;;  %v1599_v49 = vld [vmem:[%s12615_s4 + $0xe8] sm:$0xff] }
 0x7f7   : > { %8667 = vmatprep.mubr.msk.f32.mxu0 %vm906_vm1, %v2580_v46  ;;  %9293 = vmatpush3.bf16.msk.msra.mxu0 %vm9960_vm6, %v12625_v54  ;;  %v1593_v46 = vld [vmem:[%s12615_s4 + $0xb8] sm:$0xff]  ;;  %vm4499_vm6 = vcmask 1042432  }
 0x7f8   : > { %9295 = vmatprep.subr.msk.bf16.mxu0 %vm9967_vm7, %v12625_v54 }
 0x7f9   : > { %8553 = vmatmul.mubr.msk.f32.gmra.mrb[28].mxu1 %vm906_vm1, %v1579_v13  ;;  %v1600_v13 = vld [vmem:[%s12615_s4 + $0xf0] sm:$0xff] }
 0x7fa   : > { %8668 = vmatmul.mubr.msk.f32.gmra.mrb[58].mxu0 %vm906_vm1, %v2581_v2  ;;  %8555 = vmatprep.mubr.msk.f32.mxu1 %vm906_vm1, %v1580_v45  ;;  %v1594_v2 = vld [vmem:[%s12615_s4 + $0xc0] sm:$0xff]  ;;  %v1601_v45 = vld [vmem:[%s12615_s4 + $0xf8] sm:$0xff] }
 0x7fb   : > { %9297 = vmatpush3.bf16.msk.msra.mxu0 %vm9967_vm7, %v12625_v54  ;;  %vm9303_vm7 = vmpackc.low %vm4499_vm6, %vm1631_vm12  ;;  %vm5471_vm12 = vcmask 1041408  }
 0x7fc   : > { %9299 = vmatprep.subr.msk.bf16.mxu0 %vm9979_vm10, %v12625_v54  ;;  %vm9345_vm4 = vmpackc.low %vm5471_vm12, %vm2628_vm15  ;;  %vm7200_vm12 = vcmask 203776  }
 0x7fd   : > { %8556 = vmatmul.mubr.msk.f32.gmra.mrb[30].mxu1 %vm906_vm1, %v1581_v41  ;;  %v1602_v41 = vld [vmem:[%s12615_s4 + $0x100] sm:$0xff] }
 0x7fe   : > { %8558 = vmatprep.mubr.msk.f32.mxu1 %vm906_vm1, %v1582_v42  ;;  %v1603_v42 = vld [vmem:[%s12615_s4 + $0x108] sm:$0xff] }
 0x7ff   : > { %9301 = vmatpush3.bf16.msk.msra.mxu0 %vm9979_vm10, %v12625_v54  ;;  %vm4486_vm10 = vcmask 482304  }
 0x800   : > { %9304 = vmatprep.subr.msk.bf16.mxu0 %vm9303_vm7, %v10019_v55 }
 0x801   : > { %8559 = vmatmul.mubr.msk.f32.gmra.mrb[32].mxu1 %vm906_vm1, %v1583_v52  ;;  %v1604_v52 = vld [vmem:[%s12615_s4 + $0x110] sm:$0xff] }
 0x802   : > { %8561 = vmatprep.mubr.msk.f32.mxu1 %vm906_vm1, %v1584_v56  ;;  %v1605_v56 = vld [vmem:[%s12615_s4 + $0x118] sm:$0xff] }
 0x803   : > { %9307 = vmatpush3.bf16.msk.msra.mxu0 %vm9303_vm7, %v10019_v55  ;;  %vm7213_vm7 = vcmask 1040384  }
 0x805   : > { %8562 = vmatmul.mubr.msk.f32.gmra.mrb[34].mxu1 %vm906_vm1, %v1585_v62  ;;  %v3567_v62 = vld [vmem:[%s12539_s12] sm:$0xff] }
 0x806   : > { %8564 = vmatprep.mubr.msk.f32.mxu1 %vm906_vm1, %v1586_v40 }
 0x809   : > { %8565 = vmatmul.mubr.msk.f32.gmra.mrb[36].mxu1 %vm906_vm1, %v1587_v29 }
 0x80a   : > { %8567 = vmatprep.mubr.msk.f32.mxu1 %vm906_vm1, %v1588_v39 }
 0x80d   : > { %8568 = vmatmul.mubr.msk.f32.gmra.mrb[38].mxu1 %vm906_vm1, %v1589_v57 }
 0x80e   : > { %8570 = vmatprep.mubr.msk.f32.mxu1 %vm906_vm1, %v1590_v37 }
 0x811   : > { %8571 = vmatmul.mubr.msk.f32.gmra.mrb[40].mxu1 %vm906_vm1, %v1591_v35 }
 0x812   : > { %8573 = vmatprep.mubr.msk.f32.mxu1 %vm906_vm1, %v1592_v34 }
 0x815   : > { %8574 = vmatmul.mubr.msk.f32.gmra.mrb[42].mxu1 %vm906_vm1, %v1593_v46 }
 0x816   : > { %8576 = vmatprep.mubr.msk.f32.mxu1 %vm906_vm1, %v1594_v2 }
 0x819   : > { %8577 = vmatmul.mubr.msk.f32.gmra.mrb[44].mxu1 %vm906_vm1, %v1595_v48 }
 0x81a   : > { %8579 = vmatprep.mubr.msk.f32.mxu1 %vm906_vm1, %v1596_v22 }
 0x81d   : > { %8580 = vmatmul.mubr.msk.f32.gmra.mrb[46].mxu1 %vm906_vm1, %v1597_v50 }
 0x81e   : > { %8582 = vmatprep.mubr.msk.f32.mxu1 %vm906_vm1, %v1598_v51 }
 0x821   : > { %8583 = vmatmul.mubr.msk.f32.gmra.mrb[48].mxu1 %vm906_vm1, %v1599_v49 }
 0x822   : > { %8585 = vmatprep.mubr.msk.f32.mxu1 %vm906_vm1, %v1600_v13 }
 0x825   : > { %8586 = vmatmul.mubr.msk.f32.gmra.mrb[50].mxu1 %vm906_vm1, %v1601_v45 }
 0x826   : > { %8588 = vmatprep.mubr.msk.f32.mxu1 %vm906_vm1, %v1602_v41 }
 0x829   : > { %8589 = vmatmul.mubr.msk.f32.gmra.mrb[52].mxu1 %vm906_vm1, %v1603_v42 }
 0x82a   : > { %8591 = vmatprep.mubr.msk.f32.mxu1 %vm906_vm1, %v1604_v52 }
 0x82d   : > { %8592 = vmatmul.mubr.msk.f32.gmra.mrb[54].mxu1 %vm906_vm1, %v1605_v56 }
 0x82e   : > { %8726 = vmatprep.mubr.msk.f32.mxu1 %vm906_vm1, %v3567_v62 }
 0x8c9   : > { %v8666_v40 = vpop.f32.mrb[56].mxu0 }
 0x8ca   : > { %v3396_v29 = vadd.f32 %v8666_v40, %v10393_v24  ;;  %v3216_v39 = vpop.f32.mrb[57].mxu0  ;;  %v10639_v24 = vpop.f32.mrb[24].mxu1 }
 0x8cb   : > { %v3395_v57 = vadd.f32 %v3216_v39, %v10395_v26  ;;  %12627 = vst [vmem:[#allocation11_spill] sm:$0xff] %v10639_v24  ;;  %v10641_v22 = vpop.f32.mrb[25].mxu1 }
 0x8cc   : > { %3617 = vrot.lane.b32.xlu1 %v3396_v29, %s12626_s27  ;;  %v10643_v26 = vpop.f32.mrb[26].mxu1 }
 0x8cd   : > { %v9274_v37 = vpack.c.bf16 %v3396_v29, %v3395_v57  ;;  %3615 = vrot.lane.b32.xlu0 %v3395_v57, %s12626_s27  ;;  %v8669_v35 = vpop.f32.mrb[58].mxu0  ;;  %12628 = vst [vmem:[#allocation12_spill] sm:$0xff] %v10643_v26  ;;  %v10645_v50 = vpop.f32.mrb[27].mxu1 }
 0x8ce   : > { %v3398_v34 = vadd.f32 %v8669_v35, %v10399_v31  ;;  %v3226_v46 = vpop.f32.mrb[59].mxu0  ;;  %12629 = vst [vmem:[#allocation13_spill] sm:$0xff] %v10645_v50  ;;  %v10647_v51 = vpop.f32.mrb[28].mxu1 }
 0x8cf   : > { %v3397_v2 = vadd.f32 %v3226_v46, %v10401_v32  ;;  %12630 = vst [vmem:[#allocation14_spill] sm:$0xff] %v10647_v51  ;;  %v10649_v49 = vpop.f32.mrb[29].mxu1 }
 0x8d0   : > { %3621 = vrot.lane.b32.xlu1 %v3398_v34, %s12626_s27  ;;  %12631 = vst [vmem:[#allocation15_spill] sm:$0xff] %v10649_v49  ;;  %v10651_v31 = vpop.f32.mrb[30].mxu1 }
 0x8d1   : > { %v9278_v48 = vpack.c.bf16 %v3398_v34, %v3397_v2  ;;  %3619 = vrot.lane.b32.xlu0 %v3397_v2, %s12626_s27  ;;  %12632 = vst [vmem:[#allocation16_spill] sm:$0xff] %v10651_v31  ;;  %v10653_v32 = vpop.f32.mrb[31].mxu1  ;;  %v3561_v31 = vld [vmem:[%s12538_s11 + $0x10] sm:$0xff] }
 0x8d2   : > { %12633 = vst [vmem:[#allocation17_spill] sm:$0xff] %v10653_v32 }
 0x8d4   : > { %v10655_v13 = vpop.f32.mrb[32].mxu1 }
 0x8d5   : > { %12634 = vst [vmem:[#allocation18_spill] sm:$0xff] %v10655_v13  ;;  %v10657_v45 = vpop.f32.mrb[33].mxu1 }
 0x8d6   : > { %12635 = vst [vmem:[#allocation19_spill] sm:$0xff] %v10657_v45 }
 0x8d8   : > { %v10659_v41 = vpop.f32.mrb[34].mxu1 }
 0x8d9   : > { %12636 = vst [vmem:[#allocation20_spill] sm:$0xff] %v10659_v41  ;;  %v10661_v42 = vpop.f32.mrb[35].mxu1  ;;  %v3571_v41 = vld [vmem:[%s12539_s12 + $0x20] sm:$0xff] }
 0x8da   : > { %12637 = vst [vmem:[#allocation21_spill] sm:$0xff] %v10661_v42 }
 0x8dc   : > { %v10665_v56 = vpop.f32.mrb[36].mxu1 }
 0x8dd   : > { %12638 = vst [vmem:[#allocation22_spill] sm:$0xff] %v10665_v56  ;;  %v10669_v40 = vpop.f32.mrb[37].mxu1  ;;  %v3568_v56 = vld [vmem:[%s12539_s12 + $0x8] sm:$0xff] }
 0x8de   : > { %12639 = vst [vmem:[#allocation23_spill] sm:$0xff] %v10669_v40 }
 0x8e0   : > { %v10675_v57 = vpop.f32.mrb[38].mxu1 }
 0x8e1   : > { %12640 = vst [vmem:[#allocation24_spill] sm:$0xff] %v10675_v57  ;;  %v10679_v34 = vpop.f32.mrb[39].mxu1 }
 0x8e2   : > { %12641 = vst [vmem:[#allocation25_spill] sm:$0xff] %v10679_v34 }
 0x8e4   : > { %v10683_v2 = vpop.f32.mrb[40].mxu1 }
 0x8e5   : > { %12642 = vst [vmem:[#allocation26_spill] sm:$0xff] %v10683_v2  ;;  %v10688_v40 = vpop.f32.mrb[41].mxu1 }
 0x8e8   : > { %v10694_v57 = vpop.f32.mrb[42].mxu1 }
 0x8e9   : > { %12643 = vst [vmem:[#allocation27_spill] sm:$0xff] %v10694_v57  ;;  %v10700_v34 = vpop.f32.mrb[43].mxu1 }
 0x8ea   : > { %12644 = vst [vmem:[#allocation28_spill] sm:$0xff] %v10700_v34 }
 0x8ec   : > { %v10706_v42 = vpop.f32.mrb[44].mxu1 }
 0x8ed   : > { %12645 = vst [vmem:[#allocation29_spill] sm:$0xff] %v10706_v42 }
 0x93e   : > { %v10663_v52 = vpop.permute.xlu1 %3617 }
 0x93f   : > { %v10667_v62 = vpop.permute.xlu0 %3615 }
 0x940   : > { %v9266_v29 = vpack.c.bf16 %v10663_v52, %v10667_v62 }
 0x942   : > { %9267 = vmatprep.subr.bf16.mxu1 %v9266_v29  ;;  %v10673_v39 = vpop.permute.xlu1 %3621 }
 0x943   : > { %9269 = vmatpush3.bf16.msra.mxu1 %v9266_v29  ;;  %v10677_v35 = vpop.permute.xlu0 %3619  ;;  %v3569_v29 = vld [vmem:[%s12539_s12 + $0x10] sm:$0xff] }
 0x944   : > { %v9270_v46 = vpack.c.bf16 %v10673_v39, %v10677_v35 }
 0x946   : > { %9271 = vmatprep.subr.bf16.mxu1 %v9270_v46 }
 0x947   : > { %9273 = vmatpush3.bf16.msra.mxu1 %v9270_v46  ;;  %v3570_v46 = vld [vmem:[%s12539_s12 + $0x18] sm:$0xff] }
 0x948   : > { %9275 = vmatprep.subr.bf16.mxu1 %v9274_v37 }
 0x94a   : > { %8727 = vmatmul.mubr.msk.f32.vlgmr.msra.gmra.mrb[56].mxu1 %vm906_vm1, %v3568_v56  ;;  %v10712_v56 = vpop.f32.mrb[45].mxu1 }
 0x94b   : > { %9277 = vmatpush3.bf16.msra.mxu1 %v9274_v37  ;;  %8729 = vmatprep.mubr.msk.f32.mxu1 %vm906_vm1, %v3569_v29  ;;  %v3572_v37 = vld [vmem:[%s12539_s12 + $0x28] sm:$0xff]  ;;  %12646 = vst [vmem:[#allocation30_spill] sm:$0xff] %v10712_v56  ;;  %v3573_v29 = vld [vmem:[%s12539_s12 + $0x30] sm:$0xff]  ;;  %v10718_v13 = vpop.f32.mrb[46].mxu1 }
 0x94c   : > { %9279 = vmatprep.subr.bf16.mxu1 %v9278_v48  ;;  %12647 = vst [vmem:[#allocation31_spill] sm:$0xff] %v10718_v13 }
 0x94e   : > { %8730 = vmatmul.mubr.msk.f32.gmra.mrb[58].mxu1 %vm906_vm1, %v3570_v46  ;;  %v3559_v46 = vld [vmem:[%s12538_s11] sm:$0xff] }
 0x94f   : > { %9281 = vmatpush3.bf16.msra.mxu1 %v9278_v48  ;;  %8732 = vmatprep.mubr.msk.f32.mxu1 %vm906_vm1, %v3571_v41  ;;  %v3574_v48 = vld [vmem:[%s12539_s12 + $0x38] sm:$0xff]  ;;  %v10724_v41 = vpop.f32.mrb[47].mxu1 }
 0x950   : > { %12648 = vst [vmem:[#allocation32_spill] sm:$0xff] %v10724_v41  ;;  %v10730_v45 = vpop.f32.mrb[48].mxu1 }
 0x951   : > { %12649 = vst [vmem:[#allocation33_spill] sm:$0xff] %v10730_v45  ;;  %v3563_v45 = vld [vmem:[%s12538_s11 + $0x20] sm:$0xff] }
 0x952   : > { %8733 = vmatmul.mubr.msk.f32.gmra.mrb[60].mxu1 %vm906_vm1, %v3572_v37  ;;  %v3560_v37 = vld [vmem:[%s12538_s11 + $0x8] sm:$0xff] }
 0x953   : > { %8735 = vmatprep.mubr.msk.f32.mxu1 %vm906_vm1, %v3573_v29  ;;  %v10736_v29 = vpop.f32.mrb[49].mxu1 }
 0x954   : > { %12650 = vst [vmem:[#allocation34_spill] sm:$0xff] %v10736_v29  ;;  %v10742_v13 = vpop.f32.mrb[50].mxu1 }
 0x955   : > { %12651 = vst [vmem:[#allocation35_spill] sm:$0xff] %v10742_v13  ;;  %v3566_v13 = vld [vmem:[%s12538_s11 + $0x38] sm:$0xff] }
 0x956   : > { %8736 = vmatmul.mubr.msk.f32.gmra.mrb[62].mxu1 %vm906_vm1, %v3574_v48  ;;  %v3562_v48 = vld [vmem:[%s12538_s11 + $0x18] sm:$0xff] }
 0x957   : > { %8746 = vmatprep.mubr.msk.f32.mxu1 %vm906_vm1, %v3559_v46  ;;  %v10748_v46 = vpop.f32.mrb[51].mxu1 }
 0x958   : > { %12652 = vst [vmem:[#allocation36_spill] sm:$0xff] %v10748_v46 }
 0x95a   : > { %8747 = vmatmul.mubr.msk.f32.vlgmr.msra.gmra.mrb[56].mxu1 %vm906_vm1, %v3560_v37  ;;  %v3564_v37 = vld [vmem:[%s12538_s11 + $0x28] sm:$0xff] }
 0x95b   : > { %8749 = vmatprep.mubr.msk.f32.mxu1 %vm906_vm1, %v3561_v31  ;;  %v3565_v31 = vld [vmem:[%s12538_s11 + $0x30] sm:$0xff] }
 0x95e   : > { %8750 = vmatmul.mubr.msk.f32.gmra.mrb[58].mxu1 %vm906_vm1, %v3562_v48  ;;  %v10767_v48 = vpop.f32.mrb[52].mxu1 }
 0x95f   : > { %8752 = vmatprep.mubr.msk.f32.mxu1 %vm906_vm1, %v3563_v45  ;;  %12653 = vst [vmem:[#allocation37_spill] sm:$0xff] %v10767_v48  ;;  %v10769_v45 = vpop.f32.mrb[53].mxu1 }
 0x960   : > { %12654 = vst [vmem:[#allocation38_spill] sm:$0xff] %v10769_v45  ;;  %v10771_v46 = vpop.f32.mrb[54].mxu1 }
 0x961   : > { %12655 = vst [vmem:[#allocation39_spill] sm:$0xff] %v10771_v46  ;;  %v10773_v29 = vpop.f32.mrb[55].mxu1  ;;  %v2584_v46 = vld [vmem:[%s12537_s10 + $0x30] sm:$0xff] }
 0x962   : > { %8753 = vmatmul.mubr.msk.f32.gmra.mrb[60].mxu1 %vm906_vm1, %v3564_v37  ;;  %12656 = vst [vmem:[#allocation40_spill] sm:$0xff] %v10773_v29  ;;  %v3575_v37 = vld [vmem:[%s12540_s13] sm:$0xff] }
 0x963   : > { %8755 = vmatprep.mubr.msk.f32.mxu1 %vm906_vm1, %v3565_v31  ;;  %v2582_v31 = vld [vmem:[%s12537_s10 + $0x20] sm:$0xff] }
 0x964   : > { %8670 = vmatprep.mubr.msk.f32.mxu0 %vm906_vm1, %v2582_v31  ;;  %v2586_v29 = vld [vmem:[%s12537_s10 + $0x40] sm:$0xff]  ;;  %v2587_v31 = vld [vmem:[%s12537_s10 + $0x48] sm:$0xff] }
 0x966   : > { %8756 = vmatmul.mubr.msk.f32.gmra.mrb[62].mxu1 %vm906_vm1, %v3566_v13  ;;  %v2583_v13 = vld [vmem:[%s12537_s10 + $0x28] sm:$0xff] }
 0x967   : > { %8766 = vmatprep.mubr.msk.f32.mxu1 %vm906_vm1, %v3575_v37  ;;  %8671 = vmatmul.mubr.msk.f32.gmra.mrb[60].mxu0 %vm906_vm1, %v2583_v13  ;;  %v2585_v37 = vld [vmem:[%s12537_s10 + $0x38] sm:$0xff] }
 0x968   : > { %8673 = vmatprep.mubr.msk.f32.mxu0 %vm906_vm1, %v2584_v46  ;;  %v2588_v46 = vld [vmem:[%s12537_s10 + $0x50] sm:$0xff]  ;;  %v2589_v13 = vld [vmem:[%s12537_s10 + $0x58] sm:$0xff] }
 0x96b   : > { %8674 = vmatmul.mubr.msk.f32.gmra.mrb[62].mxu0 %vm906_vm1, %v2585_v37  ;;  %v2591_v37 = vld [vmem:[%s12537_s10 + $0x68] sm:$0xff] }
 0x96c   : > { %8676 = vmatprep.mubr.msk.f32.mxu0 %vm906_vm1, %v2586_v29  ;;  %v2590_v29 = vld [vmem:[%s12537_s10 + $0x60] sm:$0xff] }
 0x96f   : > { %8677 = vmatmul.mubr.msk.f32.gmra.mrb[64].mxu0 %vm906_vm1, %v2587_v31  ;;  %v2592_v31 = vld [vmem:[%s12537_s10 + $0x70] sm:$0xff] }
 0x970   : > { %8679 = vmatprep.mubr.msk.f32.mxu0 %vm906_vm1, %v2588_v46  ;;  %v2593_v46 = vld [vmem:[%s12537_s10 + $0x78] sm:$0xff] }
 0x973   : > { %8680 = vmatmul.mubr.msk.f32.gmra.mrb[66].mxu0 %vm906_vm1, %v2589_v13  ;;  %v2594_v13 = vld [vmem:[%s12537_s10 + $0x80] sm:$0xff] }
 0x974   : > { %8682 = vmatprep.mubr.msk.f32.mxu0 %vm906_vm1, %v2590_v29  ;;  %v2595_v29 = vld [vmem:[%s12537_s10 + $0x88] sm:$0xff] }
 0x977   : > { %8683 = vmatmul.mubr.msk.f32.gmra.mrb[68].mxu0 %vm906_vm1, %v2591_v37  ;;  %v2596_v37 = vld [vmem:[%s12537_s10 + $0x90] sm:$0xff] }
 0x978   : > { %8685 = vmatprep.mubr.msk.f32.mxu0 %vm906_vm1, %v2592_v31  ;;  %v2597_v31 = vld [vmem:[%s12537_s10 + $0x98] sm:$0xff] }
 0x97b   : > { %8686 = vmatmul.mubr.msk.f32.gmra.mrb[70].mxu0 %vm906_vm1, %v2593_v46  ;;  %v2598_v46 = vld [vmem:[%s12537_s10 + $0xa0] sm:$0xff] }
 0x97c   : > { %8688 = vmatprep.mubr.msk.f32.mxu0 %vm906_vm1, %v2594_v13  ;;  %v2599_v13 = vld [vmem:[%s12537_s10 + $0xa8] sm:$0xff] }
 0x97f   : > { %8689 = vmatmul.mubr.msk.f32.gmra.mrb[72].mxu0 %vm906_vm1, %v2595_v29  ;;  %v2600_v29 = vld [vmem:[%s12537_s10 + $0xb0] sm:$0xff] }
 0x980   : > { %8691 = vmatprep.mubr.msk.f32.mxu0 %vm906_vm1, %v2596_v37  ;;  %v2601_v37 = vld [vmem:[%s12537_s10 + $0xb8] sm:$0xff] }
 0x983   : > { %8692 = vmatmul.mubr.msk.f32.gmra.mrb[74].mxu0 %vm906_vm1, %v2597_v31  ;;  %v2602_v31 = vld [vmem:[%s12537_s10 + $0xc0] sm:$0xff] }
 0x984   : > { %8694 = vmatprep.mubr.msk.f32.mxu0 %vm906_vm1, %v2598_v46  ;;  %v2603_v46 = vld [vmem:[%s12537_s10 + $0xc8] sm:$0xff] }
 0x987   : > { %8695 = vmatmul.mubr.msk.f32.gmra.mrb[76].mxu0 %vm906_vm1, %v2599_v13  ;;  %v2604_v13 = vld [vmem:[%s12537_s10 + $0xd0] sm:$0xff] }
 0x988   : > { %8697 = vmatprep.mubr.msk.f32.mxu0 %vm906_vm1, %v2600_v29  ;;  %v2605_v29 = vld [vmem:[%s12537_s10 + $0xd8] sm:$0xff] }
 0x98b   : > { %8698 = vmatmul.mubr.msk.f32.gmra.mrb[78].mxu0 %vm906_vm1, %v2601_v37  ;;  %v2606_v37 = vld [vmem:[%s12537_s10 + $0xe0] sm:$0xff] }
 0x98c   : > { %8700 = vmatprep.mubr.msk.f32.mxu0 %vm906_vm1, %v2602_v31  ;;  %v2607_v31 = vld [vmem:[%s12537_s10 + $0xe8] sm:$0xff] }
 0x98f   : > { %8701 = vmatmul.mubr.msk.f32.gmra.mrb[80].mxu0 %vm906_vm1, %v2603_v46  ;;  %v2608_v46 = vld [vmem:[%s12537_s10 + $0xf0] sm:$0xff] }
 0x990   : > { %8703 = vmatprep.mubr.msk.f32.mxu0 %vm906_vm1, %v2604_v13  ;;  %v2609_v13 = vld [vmem:[%s12537_s10 + $0xf8] sm:$0xff] }
 0x993   : > { %8704 = vmatmul.mubr.msk.f32.gmra.mrb[82].mxu0 %vm906_vm1, %v2605_v29  ;;  %v2610_v29 = vld [vmem:[%s12537_s10 + $0x100] sm:$0xff] }
 0x994   : > { %8706 = vmatprep.mubr.msk.f32.mxu0 %vm906_vm1, %v2606_v37  ;;  %v2611_v37 = vld [vmem:[%s12537_s10 + $0x108] sm:$0xff] }
 0x997   : > { %8707 = vmatmul.mubr.msk.f32.gmra.mrb[84].mxu0 %vm906_vm1, %v2607_v31  ;;  %v2612_v31 = vld [vmem:[%s12537_s10 + $0x110] sm:$0xff] }
 0x998   : > { %8709 = vmatprep.mubr.msk.f32.mxu0 %vm906_vm1, %v2608_v46 }
 0x99b   : > { %8710 = vmatmul.mubr.msk.f32.gmra.mrb[86].mxu0 %vm906_vm1, %v2609_v13 }
 0x99c   : > { %8712 = vmatprep.mubr.msk.f32.mxu0 %vm906_vm1, %v2610_v29 }
 0x99f   : > { %8713 = vmatmul.mubr.msk.f32.gmra.mrb[88].mxu0 %vm906_vm1, %v2611_v37 }
 0x9a0   : > { %8715 = vmatprep.mubr.msk.f32.mxu0 %vm906_vm1, %v2612_v31 }
 0x9a3   : > { %8716 = vmatmul.mubr.msk.f32.gmra.mrb[90].mxu0 %vm906_vm1, %v2613_v59 }
 0xa2d   : > { %v8748_v46 = vpop.f32.mrb[56].mxu1 }
 0xa2e   : > { %v3846_v48 = vpop.f32.mrb[57].mxu1 }
 0xa31   : > { %v8751_v45 = vpop.f32.mrb[58].mxu1 }
 0xa32   : > { %v3856_v32 = vpop.f32.mrb[59].mxu1 }
 0xa35   : > { %v8754_v51 = vpop.f32.mrb[60].mxu1 }
 0xa36   : > { %v7583_v13 = vmul.f32 -1.442695, %v8754_v51  ;;  %v3866_v41 = vpop.f32.mrb[61].mxu1 }
 0xa37   : > { %v7582_v29 = vmul.f32 -1.442695, %v3866_v41 }
 0xa38   : > { %9610 = vpow2.f32 %v7583_v13 }
 0xa39   : > { %9612 = vpow2.f32 %v7582_v29  ;;  %v8757_v42 = vpop.f32.mrb[62].mxu1 }
 0xa3a   : > { %v7585_v49 = vmul.f32 -1.442695, %v8757_v42  ;;  %v3876_v26 = vpop.f32.mrb[63].mxu1  ;;  %v10942_v60 = vpop.f32.mrb[60].mxu0 }
 0xa3b   : > { %v7584_v56 = vmul.f32 -1.442695, %v3876_v26 }
 0xa3c   : > { %9614 = vpow2.f32 %v7585_v49 }
 0xa3d   : > { %9616 = vpow2.f32 %v7584_v56 }
 0xa3e   : > { %9618 = vtanh.f32 %v8748_v46 }
 0xa3f   : > { %9620 = vtanh.f32 %v3846_v48 }
 0xa42   : > { %v9611_v57 = vpop.eup %9610 }
 0xa43   : > { %v9613_v37 = vpop.eup %9612  ;;  %v3902_v31 = vadd.f32 1.0, %v9611_v57 }
 0xa44   : > { %v3901_v50 = vadd.f32 1.0, %v9613_v37 }
 0xa45   : > { %9622 = vrcp.f32 %v3902_v31 }
 0xa46   : > { %v9615_v24 = vpop.eup %9614  ;;  %9624 = vrcp.f32 %v3901_v50 }
 0xa47   : > { %v9617_v51 = vpop.eup %9616  ;;  %9626 = vtanh.f32 %v8751_v45  ;;  %v3904_v41 = vadd.f32 1.0, %v9615_v24  ;;  %v3577_v45 = vld [vmem:[%s12540_s13 + $0x10] sm:$0xff] }
 0xa48   : > { %9628 = vtanh.f32 %v3856_v32  ;;  %v3903_v13 = vadd.f32 1.0, %v9617_v51  ;;  %v9619_v42 = vpop.eup %9618  ;;  %v3576_v32 = vld [vmem:[%s12540_s13 + $0x8] sm:$0xff] }
 0xa49   : > { %9630 = vrcp.f32 %v3904_v41  ;;  %v9621_v26 = vpop.eup %9620 }
 0xa4a   : > { %9632 = vrcp.f32 %v3903_v13 }
 0xa4f   : > { %v9623_v49 = vpop.eup %9622 }
 0xa50   : > { %v9625_v56 = vpop.eup %9624  ;;  %v3914_v29 = vmul.f32 %v9623_v49, %v9619_v42 }
 0xa51   : > { %v9627_v34 = vpop.eup %9626  ;;  %v3913_v46 = vmul.f32 %v9625_v56, %v9621_v26 }
 0xa52   : > { %v9629_v57 = vpop.eup %9628 }
 0xa53   : > { %v9631_v48 = vpop.eup %9630  ;;  %v9282_v37 = vpack.c.bf16 %v3914_v29, %v3913_v46 }
 0xa54   : > { %v9633_v31 = vpop.eup %9632  ;;  %v3916_v2 = vmul.f32 %v9631_v48, %v9627_v34  ;;  %v3578_v34 = vld [vmem:[%s12540_s13 + $0x18] sm:$0xff] }
 0xa55   : > { %9283 = vmatprep.subr.bf16.mxu1 %v9282_v37  ;;  %v3915_v50 = vmul.f32 %v9633_v31, %v9629_v57 }
 0xa56   : > { %9285 = vmatpush3.bf16.msra.mxu1 %v9282_v37  ;;  %v4442_v37 = vld [vmem:[%s12542_s15] sm:$0xff] }
 0xa57   : > { %v9286_v24 = vpack.c.bf16 %v3916_v2, %v3915_v50  ;;  %v10944_v2 = vpop.f32.mrb[61].mxu0 }
 0xa58   : > { %v10946_v51 = vpop.f32.mrb[62].mxu0 }
 0xa59   : > { %9287 = vmatprep.subr.bf16.mxu1 %v9286_v24  ;;  %12657 = vst [vmem:[#allocation41_spill] sm:$0xff] %v10946_v51  ;;  %v10949_v42 = vpop.f32.mrb[63].mxu0 }
 0xa5a   : > { %9289 = vmatpush3.bf16.msra.mxu1 %v9286_v24  ;;  %v10952_v26 = vpop.f32.mrb[64].mxu0 }
 0xa5b   : > { %9333 = vmatprep.subr.msk.bf16.mxu1 %vm10150_vm5, %v12625_v54  ;;  %12658 = vst [vmem:[#allocation42_spill] sm:$0xff] %v10952_v26  ;;  %v10955_v55 = vpop.f32.mrb[65].mxu0 }
 0xa5c   : > { %12659 = vst [vmem:[#allocation43_spill] sm:$0xff] %v10955_v55  ;;  %v10959_v56 = vpop.f32.mrb[66].mxu0 }
 0xa5d   : > { %8767 = vmatmul.mubr.msk.f32.vlgmr.msra.gmra.mrb[64].mxu1 %vm906_vm1, %v3576_v32  ;;  %12660 = vst [vmem:[#allocation44_spill] sm:$0xff] %v10959_v56  ;;  %v10963_v46 = vpop.f32.mrb[67].mxu0  ;;  %v4435_v56 = vld [vmem:[%s12541_s14 + $0x8] sm:$0xff] }
 0xa5e   : > { %8769 = vmatprep.mubr.msk.f32.mxu1 %vm906_vm1, %v3577_v45  ;;  %9335 = vmatpush3.bf16.msk.msra.mxu1 %vm10150_vm5, %v12625_v54  ;;  %12661 = vst [vmem:[#allocation45_spill] sm:$0xff] %v10963_v46  ;;  %v10966_v57 = vpop.f32.mrb[68].mxu0  ;;  %vm5458_vm5 = vcmask 474112  }
 0xa5f   : > { %9337 = vmatprep.subr.msk.bf16.mxu1 %vm10157_vm8, %v12625_v54  ;;  %12662 = vst [vmem:[#allocation46_spill] sm:$0xff] %v10966_v57  ;;  %v10969_v48 = vpop.f32.mrb[69].mxu0 }
 0xa60   : > { %12663 = vst [vmem:[#allocation47_spill] sm:$0xff] %v10969_v48 }
 0xa61   : > { %8770 = vmatmul.mubr.msk.f32.gmra.mrb[66].mxu1 %vm906_vm1, %v3578_v34 }
 0xa62   : > { %9339 = vmatpush3.bf16.msk.msra.mxu1 %vm10157_vm8, %v12625_v54 }
 0xa63   : > { %9341 = vmatprep.subr.msk.bf16.mxu1 %vm10177_vm13, %v12625_v54 }
 0xa66   : > { %9343 = vmatpush3.bf16.msk.msra.mxu1 %vm10177_vm13, %v12625_v54 }
 0xa67   : > { %9346 = vmatprep.subr.msk.bf16.mxu1 %vm9345_vm4, %v10305_v27 }
 0xa6a   : > { %9349 = vmatpush3.bf16.msk.msra.mxu1 %vm9345_vm4, %v10305_v27  ;;  %vm7302_vm4 = vcmask 105472  }
 0xb30   : > { %v8768_v63 = vpop.f32.mrb[64].mxu1 }
 0xb31   : > { %v4271_v41 = vadd.f32 %v8768_v63, %v10663_v52  ;;  %v4091_v13 = vpop.f32.mrb[65].mxu1 }
 0xb32   : > { %v4270_v47 = vadd.f32 %v4091_v13, %v10667_v62 }
 0xb33   : > { %4589 = vrot.lane.b32.xlu1 %v4271_v41, %s12626_s27 }
 0xb34   : > { %4587 = vrot.lane.b32.xlu0 %v4270_v47, %s12626_s27  ;;  %v8771_v49 = vpop.f32.mrb[66].mxu1  ;;  %8836 = vmatprep.mubr.msk.f32.mxu0 %vm4486_vm10, %v4270_v47 }
 0xb35   : > { %v4273_v52 = vadd.f32 %v8771_v49, %v10673_v39  ;;  %v4101_v29 = vpop.f32.mrb[67].mxu1  ;;  %8837 = vmatmul.mubr.msk.f32.vlgmr.msra.gmra.mrb[92].mxu0 %vm4486_vm10, %v4271_v41  ;;  %v10976_v39 = vpop.f32.mrb[70].mxu0 }
 0xb36   : > { %v4272_v62 = vadd.f32 %v4101_v29, %v10677_v35  ;;  %12664 = vst [vmem:[#allocation48_spill] sm:$0xff] %v10976_v39  ;;  %v10979_v31 = vpop.f32.mrb[71].mxu0 }
 0xb37   : > { %4593 = vrot.lane.b32.xlu1 %v4273_v52, %s12626_s27  ;;  %12665 = vst [vmem:[#allocation49_spill] sm:$0xff] %v10979_v31  ;;  %v10981_v35 = vpop.f32.mrb[72].mxu0 }
 0xb38   : > { %4591 = vrot.lane.b32.xlu0 %v4272_v62, %s12626_s27  ;;  %8839 = vmatprep.mubr.msk.f32.mxu0 %vm4486_vm10, %v4272_v62  ;;  %12666 = vst [vmem:[#allocation50_spill] sm:$0xff] %v10981_v35  ;;  %v10984_v50 = vpop.f32.mrb[73].mxu0 }
 0xb39   : > { %8840 = vmatmul.mubr.msk.f32.gmra.mrb[94].mxu0 %vm4486_vm10, %v4273_v52  ;;  %12667 = vst [vmem:[#allocation51_spill] sm:$0xff] %v10984_v50  ;;  %v10986_v24 = vpop.f32.mrb[74].mxu0 }
 0xb3a   : > { %8850 = vmatprep.mubr.msk.f32.mxu0 %vm906_vm1, %v4442_v37  ;;  %12668 = vst [vmem:[#allocation52_spill] sm:$0xff] %v10986_v24  ;;  %v10988_v32 = vpop.f32.mrb[75].mxu0 }
 0xb3b   : > { %12669 = vst [vmem:[#allocation53_spill] sm:$0xff] %v10988_v32  ;;  %v10990_v45 = vpop.f32.mrb[76].mxu0 }
 0xb3c   : > { %v10992_v34 = vpop.f32.mrb[77].mxu0 }
 0xb3d   : > { %v10994_v59 = vpop.f32.mrb[78].mxu0 }
 0xb3e   : > { %12670 = vst [vmem:[#allocation54_spill] sm:$0xff] %v10994_v59  ;;  %v10996_v63 = vpop.f32.mrb[79].mxu0 }
 0xb3f   : > { %v10998_v41 = vpop.f32.mrb[80].mxu0 }
 0xb40   : > { %12671 = vst [vmem:[#allocation55_spill] sm:$0xff] %v10998_v41  ;;  %v11000_v13 = vpop.f32.mrb[81].mxu0 }
 0xb41   : > { %12672 = vst [vmem:[#allocation56_spill] sm:$0xff] %v11000_v13  ;;  %v11002_v47 = vpop.f32.mrb[82].mxu0 }
 0xb42   : > { %12673 = vst [vmem:[#allocation57_spill] sm:$0xff] %v11002_v47  ;;  %v11004_v49 = vpop.f32.mrb[83].mxu0 }
 0xb43   : > { %12674 = vst [vmem:[#allocation58_spill] sm:$0xff] %v11004_v49  ;;  %v11006_v52 = vpop.f32.mrb[84].mxu0 }
 0xb44   : > { %12675 = vst [vmem:[#allocation59_spill] sm:$0xff] %v11006_v52  ;;  %v11008_v29 = vpop.f32.mrb[85].mxu0 }
 0xb45   : > { %12676 = vst [vmem:[#allocation60_spill] sm:$0xff] %v11008_v29  ;;  %v11010_v62 = vpop.f32.mrb[86].mxu0 }
 0xb46   : > { %12677 = vst [vmem:[#allocation61_spill] sm:$0xff] %v11010_v62  ;;  %v11012_v37 = vpop.f32.mrb[87].mxu0 }
 0xb47   : > { %12678 = vst [vmem:[#allocation62_spill] sm:$0xff] %v11012_v37  ;;  %v11014_v54 = vpop.f32.mrb[88].mxu0 }
 0xb48   : > { %12679 = vst [vmem:[#allocation63_spill] sm:$0xff] %v11014_v54  ;;  %v11016_v24 = vpop.f32.mrb[89].mxu0 }
 0xb49   : > { %12680 = vst [vmem:[#allocation64_spill] sm:$0xff] %v11016_v24  ;;  %v11018_v32 = vpop.f32.mrb[90].mxu0  ;;  %v4447_v24 = vld [vmem:[%s12542_s15 + $0x28] sm:$0xff] }
 0xb4a   : > { %12681 = vst [vmem:[#allocation65_spill] sm:$0xff] %v11018_v32  ;;  %v11020_v35 = vpop.f32.mrb[91].mxu0  ;;  %v4443_v32 = vld [vmem:[%s12542_s15 + $0x8] sm:$0xff] }
 0xb4b   : > { %12682 = vst [vmem:[#allocation66_spill] sm:$0xff] %v11020_v35  ;;  %v4444_v35 = vld [vmem:[%s12542_s15 + $0x10] sm:$0xff] }
 0xba5   : > { %v11022_v50 = vpop.permute.xlu1 %4589 }
 0xba6   : > { %v11024_v39 = vpop.permute.xlu0 %4587 }
 0xba7   : > { %v9308_v31 = vpack.c.bf16 %v11022_v50, %v11024_v39 }
 0xba9   : > { %9309 = vmatprep.subr.bf16.mxu0 %v9308_v31  ;;  %v11028_v57 = vpop.permute.xlu1 %4593 }
 0xbaa   : > { %9311 = vmatpush3.bf16.msra.mxu0 %v9308_v31  ;;  %v11030_v62 = vpop.permute.xlu0 %4591  ;;  %v4445_v31 = vld [vmem:[%s12542_s15 + $0x18] sm:$0xff] }
 0xbab   : > { %v9312_v54 = vpack.c.bf16 %v11028_v57, %v11030_v62 }
 0xbad   : > { %9313 = vmatprep.subr.bf16.mxu0 %v9312_v54 }
 0xbae   : > { %9315 = vmatpush3.bf16.msra.mxu0 %v9312_v54  ;;  %v4446_v54 = vld [vmem:[%s12542_s15 + $0x20] sm:$0xff] }
 0xbb1   : > { %8851 = vmatmul.mubr.msk.f32.vlgmr.msra.gmra.mrb[96].mxu0 %vm906_vm1, %v4443_v32  ;;  %v4449_v32 = vld [vmem:[%s12542_s15 + $0x38] sm:$0xff] }
 0xbb2   : > { %8853 = vmatprep.mubr.msk.f32.mxu0 %vm906_vm1, %v4444_v35  ;;  %v4448_v35 = vld [vmem:[%s12542_s15 + $0x30] sm:$0xff] }
 0xbb5   : > { %8854 = vmatmul.mubr.msk.f32.gmra.mrb[98].mxu0 %vm906_vm1, %v4445_v31  ;;  %v4434_v31 = vld [vmem:[%s12541_s14] sm:$0xff] }
 0xbb6   : > { %8856 = vmatprep.mubr.msk.f32.mxu0 %vm906_vm1, %v4446_v54 }
 0xbb9   : > { %8857 = vmatmul.mubr.msk.f32.gmra.mrb[100].mxu0 %vm906_vm1, %v4447_v24 }
 0xbba   : > { %8859 = vmatprep.mubr.msk.f32.mxu0 %vm906_vm1, %v4448_v35 }
 0xbbd   : > { %8860 = vmatmul.mubr.msk.f32.gmra.mrb[102].mxu0 %vm906_vm1, %v4449_v32  ;;  %v4436_v32 = vld [vmem:[%s12541_s14 + $0x10] sm:$0xff] }
 0xbbe   : > { %8870 = vmatprep.mubr.msk.f32.mxu0 %vm906_vm1, %v4434_v31  ;;  %v4441_v31 = vld [vmem:[%s12541_s14 + $0x38] sm:$0xff] }
 0xc08   : > { %v8838_v54 = vpop.f32.mrb[92].mxu0 }
 0xc09   : > { %v4568_v37 = vpop.f32.mrb[93].mxu0 }
 0xc0a   : > { %v9316_v52 = vpack.c.bf16 %v8838_v54, %v4568_v37  ;;  %v4437_v37 = vld [vmem:[%s12541_s14 + $0x18] sm:$0xff]  ;;  %v4450_v54 = vld [vmem:[%s12543_s16] sm:$0xff] }
 0xc0c   : > { %v8841_v48 = vpop.f32.mrb[94].mxu0  ;;  %9317 = vmatprep.subr.bf16.mxu0 %v9316_v52 }
 0xc0d   : > { %v4578_v24 = vpop.f32.mrb[95].mxu0  ;;  %9319 = vmatpush3.bf16.msra.mxu0 %v9316_v52  ;;  %v4439_v52 = vld [vmem:[%s12541_s14 + $0x28] sm:$0xff] }
 0xc0e   : > { %v9320_v35 = vpack.c.bf16 %v8841_v48, %v4578_v24  ;;  %v4438_v48 = vld [vmem:[%s12541_s14 + $0x20] sm:$0xff] }
 0xc0f   : > { %v3579_v24 = vld [vmem:[%s12540_s13 + $0x20] sm:$0xff] }
 0xc10   : > { %9321 = vmatprep.subr.bf16.mxu0 %v9320_v35  ;;  %8772 = vmatprep.mubr.msk.f32.mxu1 %vm906_vm1, %v3579_v24  ;;  %v3588_v24 = vld [vmem:[%s12540_s13 + $0x68] sm:$0xff] }
 0xc11   : > { %9323 = vmatpush3.bf16.msra.mxu0 %v9320_v35  ;;  %v3580_v35 = vld [vmem:[%s12540_s13 + $0x28] sm:$0xff] }
 0xc12   : > { %8773 = vmatmul.mubr.msk.f32.gmra.mrb[68].mxu1 %vm906_vm1, %v3580_v35  ;;  %v3589_v35 = vld [vmem:[%s12540_s13 + $0x70] sm:$0xff] }
 0xc14   : > { %8871 = vmatmul.mubr.msk.f32.vlgmr.msra.gmra.mrb[96].mxu0 %vm906_vm1, %v4435_v56  ;;  %v4440_v56 = vld [vmem:[%s12541_s14 + $0x30] sm:$0xff] }
 0xc15   : > { %8873 = vmatprep.mubr.msk.f32.mxu0 %vm906_vm1, %v4436_v32  ;;  %v3581_v32 = vld [vmem:[%s12540_s13 + $0x30] sm:$0xff] }
 0xc16   : > { %8775 = vmatprep.mubr.msk.f32.mxu1 %vm906_vm1, %v3581_v32  ;;  %v3590_v32 = vld [vmem:[%s12540_s13 + $0x78] sm:$0xff] }
 0xc18   : > { %8874 = vmatmul.mubr.msk.f32.gmra.mrb[98].mxu0 %vm906_vm1, %v4437_v37  ;;  %v3582_v37 = vld [vmem:[%s12540_s13 + $0x38] sm:$0xff] }
 0xc19   : > { %8876 = vmatprep.mubr.msk.f32.mxu0 %vm906_vm1, %v4438_v48  ;;  %v3583_v48 = vld [vmem:[%s12540_s13 + $0x40] sm:$0xff]  ;;  %8776 = vmatmul.mubr.msk.f32.gmra.mrb[70].mxu1 %vm906_vm1, %v3582_v37 }
 0xc1a   : > { %8778 = vmatprep.mubr.msk.f32.mxu1 %vm906_vm1, %v3583_v48  ;;  %v3591_v37 = vld [vmem:[%s12540_s13 + $0x80] sm:$0xff]  ;;  %v3592_v48 = vld [vmem:[%s12540_s13 + $0x88] sm:$0xff] }
 0xc1c   : > { %8877 = vmatmul.mubr.msk.f32.gmra.mrb[100].mxu0 %vm906_vm1, %v4439_v52  ;;  %v3584_v52 = vld [vmem:[%s12540_s13 + $0x48] sm:$0xff] }
 0xc1d   : > { %8879 = vmatprep.mubr.msk.f32.mxu0 %vm906_vm1, %v4440_v56  ;;  %v3585_v56 = vld [vmem:[%s12540_s13 + $0x50] sm:$0xff]  ;;  %8779 = vmatmul.mubr.msk.f32.gmra.mrb[72].mxu1 %vm906_vm1, %v3584_v52 }
 0xc1e   : > { %8781 = vmatprep.mubr.msk.f32.mxu1 %vm906_vm1, %v3585_v56  ;;  %v3593_v52 = vld [vmem:[%s12540_s13 + $0x90] sm:$0xff]  ;;  %v3594_v56 = vld [vmem:[%s12540_s13 + $0x98] sm:$0xff] }
 0xc20   : > { %8880 = vmatmul.mubr.msk.f32.gmra.mrb[102].mxu0 %vm906_vm1, %v4441_v31  ;;  %v3586_v31 = vld [vmem:[%s12540_s13 + $0x58] sm:$0xff] }
 0xc21   : > { %8890 = vmatprep.mubr.msk.f32.mxu0 %vm906_vm1, %v4450_v54  ;;  %v3587_v54 = vld [vmem:[%s12540_s13 + $0x60] sm:$0xff]  ;;  %8782 = vmatmul.mubr.msk.f32.gmra.mrb[74].mxu1 %vm906_vm1, %v3586_v31 }
 0xc22   : > { %8784 = vmatprep.mubr.msk.f32.mxu1 %vm906_vm1, %v3587_v54  ;;  %v3595_v31 = vld [vmem:[%s12540_s13 + $0xa0] sm:$0xff]  ;;  %v3596_v54 = vld [vmem:[%s12540_s13 + $0xa8] sm:$0xff] }
 0xc25   : > { %8785 = vmatmul.mubr.msk.f32.gmra.mrb[76].mxu1 %vm906_vm1, %v3588_v24  ;;  %v3597_v24 = vld [vmem:[%s12540_s13 + $0xb0] sm:$0xff] }
 0xc26   : > { %8787 = vmatprep.mubr.msk.f32.mxu1 %vm906_vm1, %v3589_v35  ;;  %v3598_v35 = vld [vmem:[%s12540_s13 + $0xb8] sm:$0xff] }
 0xc29   : > { %8788 = vmatmul.mubr.msk.f32.gmra.mrb[78].mxu1 %vm906_vm1, %v3590_v32  ;;  %v3599_v32 = vld [vmem:[%s12540_s13 + $0xc0] sm:$0xff] }
 0xc2a   : > { %8790 = vmatprep.mubr.msk.f32.mxu1 %vm906_vm1, %v3591_v37  ;;  %v3600_v37 = vld [vmem:[%s12540_s13 + $0xc8] sm:$0xff] }
 0xc2d   : > { %8791 = vmatmul.mubr.msk.f32.gmra.mrb[80].mxu1 %vm906_vm1, %v3592_v48  ;;  %v3601_v48 = vld [vmem:[%s12540_s13 + $0xd0] sm:$0xff] }
 0xc2e   : > { %8793 = vmatprep.mubr.msk.f32.mxu1 %vm906_vm1, %v3593_v52  ;;  %v3602_v52 = vld [vmem:[%s12540_s13 + $0xd8] sm:$0xff] }
 0xc31   : > { %8794 = vmatmul.mubr.msk.f32.gmra.mrb[82].mxu1 %vm906_vm1, %v3594_v56  ;;  %v3603_v56 = vld [vmem:[%s12540_s13 + $0xe0] sm:$0xff] }
 0xc32   : > { %8796 = vmatprep.mubr.msk.f32.mxu1 %vm906_vm1, %v3595_v31  ;;  %v3604_v31 = vld [vmem:[%s12540_s13 + $0xe8] sm:$0xff] }
 0xc35   : > { %8797 = vmatmul.mubr.msk.f32.gmra.mrb[84].mxu1 %vm906_vm1, %v3596_v54  ;;  %v3605_v54 = vld [vmem:[%s12540_s13 + $0xf0] sm:$0xff] }
 0xc36   : > { %8799 = vmatprep.mubr.msk.f32.mxu1 %vm906_vm1, %v3597_v24  ;;  %v3606_v24 = vld [vmem:[%s12540_s13 + $0xf8] sm:$0xff] }
 0xc39   : > { %8800 = vmatmul.mubr.msk.f32.gmra.mrb[86].mxu1 %vm906_vm1, %v3598_v35  ;;  %v3607_v35 = vld [vmem:[%s12540_s13 + $0x100] sm:$0xff] }
 0xc3a   : > { %8802 = vmatprep.mubr.msk.f32.mxu1 %vm906_vm1, %v3599_v32  ;;  %v3608_v32 = vld [vmem:[%s12540_s13 + $0x108] sm:$0xff] }
 0xc3d   : > { %8803 = vmatmul.mubr.msk.f32.gmra.mrb[88].mxu1 %vm906_vm1, %v3600_v37  ;;  %v3609_v37 = vld [vmem:[%s12540_s13 + $0x110] sm:$0xff] }
 0xc3e   : > { %8805 = vmatprep.mubr.msk.f32.mxu1 %vm906_vm1, %v3601_v48 }
 0xc41   : > { %8806 = vmatmul.mubr.msk.f32.gmra.mrb[90].mxu1 %vm906_vm1, %v3602_v52 }
 0xc42   : > { %8808 = vmatprep.mubr.msk.f32.mxu1 %vm906_vm1, %v3603_v56 }
 0xc45   : > { %8809 = vmatmul.mubr.msk.f32.gmra.mrb[92].mxu1 %vm906_vm1, %v3604_v31 }
 0xc46   : > { %8811 = vmatprep.mubr.msk.f32.mxu1 %vm906_vm1, %v3605_v54 }
 0xc49   : > { %8812 = vmatmul.mubr.msk.f32.gmra.mrb[94].mxu1 %vm906_vm1, %v3606_v24 }
 0xc4a   : > { %8814 = vmatprep.mubr.msk.f32.mxu1 %vm906_vm1, %v3607_v35 }
 0xc4d   : > { %8815 = vmatmul.mubr.msk.f32.gmra.mrb[96].mxu1 %vm906_vm1, %v3608_v32 }
 0xc4e   : > { %8817 = vmatprep.mubr.msk.f32.mxu1 %vm906_vm1, %v3609_v37 }
 0xce5   : > { %v11263_v27 = vpop.f32.mrb[68].mxu1 }
 0xce7   : > { %v8872_v48 = vpop.f32.mrb[96].mxu0 }
 0xce8   : > { %v4818_v52 = vpop.f32.mrb[97].mxu0 }
 0xceb   : > { %v8875_v56 = vpop.f32.mrb[98].mxu0 }
 0xcec   : > { %v4828_v31 = vpop.f32.mrb[99].mxu0 }
 0xcef   : > { %v8878_v54 = vpop.f32.mrb[100].mxu0 }
 0xcf0   : > { %v7651_v24 = vmul.f32 -1.442695, %v8878_v54  ;;  %v4838_v29 = vpop.f32.mrb[101].mxu0 }
 0xcf1   : > { %v7650_v35 = vmul.f32 -1.442695, %v4838_v29 }
 0xcf2   : > { %9634 = vpow2.f32 %v7651_v24 }
 0xcf3   : > { %9636 = vpow2.f32 %v7650_v35  ;;  %v8881_v47 = vpop.f32.mrb[102].mxu0 }
 0xcf4   : > { %v7653_v46 = vmul.f32 -1.442695, %v8881_v47  ;;  %v4848_v26 = vpop.f32.mrb[103].mxu0 }
 0xcf5   : > { %v7652_v49 = vmul.f32 -1.442695, %v4848_v26 }
 0xcf6   : > { %9638 = vpow2.f32 %v7653_v46 }
 0xcf7   : > { %9640 = vpow2.f32 %v7652_v49 }
 0xcf8   : > { %9642 = vtanh.f32 %v8872_v48 }
 0xcf9   : > { %9644 = vtanh.f32 %v4818_v52 }
 0xcfc   : > { %v9635_v41 = vpop.eup %9634 }
 0xcfd   : > { %v9637_v32 = vpop.eup %9636  ;;  %v4874_v37 = vadd.f32 1.0, %v9635_v41 }
 0xcfe   : > { %v4873_v55 = vadd.f32 1.0, %v9637_v32 }
 0xcff   : > { %9646 = vrcp.f32 %v4874_v37 }
 0xd00   : > { %v9639_v51 = vpop.eup %9638  ;;  %9648 = vrcp.f32 %v4873_v55 }
 0xd01   : > { %v9641_v54 = vpop.eup %9640  ;;  %9650 = vtanh.f32 %v8875_v56  ;;  %v4876_v29 = vadd.f32 1.0, %v9639_v51  ;;  %v4451_v56 = vld [vmem:[%s12543_s16 + $0x8] sm:$0xff] }
 0xd02   : > { %9652 = vtanh.f32 %v4828_v31  ;;  %v4875_v24 = vadd.f32 1.0, %v9641_v54  ;;  %v9643_v47 = vpop.eup %9642  ;;  %v4452_v31 = vld [vmem:[%s12543_s16 + $0x10] sm:$0xff] }
 0xd03   : > { %9654 = vrcp.f32 %v4876_v29  ;;  %v9645_v26 = vpop.eup %9644 }
 0xd04   : > { %9656 = vrcp.f32 %v4875_v24 }
 0xd09   : > { %v9647_v46 = vpop.eup %9646 }
 0xd0a   : > { %v9649_v49 = vpop.eup %9648  ;;  %v4886_v35 = vmul.f32 %v9647_v46, %v9643_v47 }
 0xd0b   : > { %v9651_v13 = vpop.eup %9650  ;;  %v4885_v48 = vmul.f32 %v9649_v49, %v9645_v26 }
 0xd0c   : > { %v9653_v41 = vpop.eup %9652 }
 0xd0d   : > { %v9655_v52 = vpop.eup %9654  ;;  %v9324_v32 = vpack.c.bf16 %v4886_v35, %v4885_v48 }
 0xd0e   : > { %v9657_v37 = vpop.eup %9656  ;;  %v4888_v59 = vmul.f32 %v9655_v52, %v9651_v13  ;;  %v4453_v13 = vld [vmem:[%s12543_s16 + $0x18] sm:$0xff]  ;;  %v4455_v52 = vld [vmem:[%s12543_s16 + $0x28] sm:$0xff] }
 0xd0f   : > { %9325 = vmatprep.subr.bf16.mxu0 %v9324_v32  ;;  %v4887_v55 = vmul.f32 %v9657_v37, %v9653_v41  ;;  %v4457_v37 = vld [vmem:[%s12543_s16 + $0x38] sm:$0xff] }
 0xd10   : > { %9327 = vmatpush3.bf16.msra.mxu0 %v9324_v32  ;;  %v4456_v32 = vld [vmem:[%s12543_s16 + $0x30] sm:$0xff] }
 0xd11   : > { %v9328_v51 = vpack.c.bf16 %v4888_v59, %v4887_v55  ;;  %v3610_v59 = vld [vmem:[%s12540_s13 + $0x118] sm:$0xff]  ;;  %v4458_v55 = vld [vmem:[%s12543_s16 + $0x40] sm:$0xff] }
 0xd12   : > { %8818 = vmatmul.mubr.msk.f32.gmra.mrb[98].mxu1 %vm906_vm1, %v3610_v59  ;;  %v4463_v59 = vld [vmem:[%s12543_s16 + $0x68] sm:$0xff] }
 0xd13   : > { %9329 = vmatprep.subr.bf16.mxu0 %v9328_v51 }
 0xd14   : > { %9331 = vmatpush3.bf16.msra.mxu0 %v9328_v51  ;;  %v4459_v51 = vld [vmem:[%s12543_s16 + $0x48] sm:$0xff] }
 0xd17   : > { %8891 = vmatmul.mubr.msk.f32.vlgmr.msra.gmra.mrb[104].mxu0 %vm906_vm1, %v4451_v56  ;;  %v4460_v56 = vld [vmem:[%s12543_s16 + $0x50] sm:$0xff] }
 0xd18   : > { %8893 = vmatprep.mubr.msk.f32.mxu0 %vm906_vm1, %v4452_v31  ;;  %v4461_v31 = vld [vmem:[%s12543_s16 + $0x58] sm:$0xff] }
 0xd1b   : > { %8894 = vmatmul.mubr.msk.f32.gmra.mrb[106].mxu0 %vm906_vm1, %v4453_v13  ;;  %v4462_v13 = vld [vmem:[%s12543_s16 + $0x60] sm:$0xff] }
 0xdea   : > { %v8892_v54 = vpop.f32.mrb[104].mxu0 }
 0xdeb   : > { %v5243_v29 = vadd.f32 %v8892_v54, %v11022_v50  ;;  %v5063_v24 = vpop.f32.mrb[105].mxu0 }
 0xdec   : > { %v5242_v47 = vadd.f32 %v5063_v24, %v11024_v39 }
 0xdee   : > { %v9526_v26 = vpack.i.bf16 %v5243_v29, %v5242_v47  ;;  %v8895_v46 = vpop.f32.mrb[106].mxu0  ;;  %8960 = vmatprep.mubr.msk.f32.mxu1 %vm5458_vm5, %v5242_v47  ;;  %v4464_v47 = vld [vmem:[%s12543_s16 + $0x70] sm:$0xff] }
 0xdef   : > { %v5245_v49 = vadd.f32 %v8895_v46, %v11028_v57  ;;  %v5073_v35 = vpop.f32.mrb[107].mxu0  ;;  %8961 = vmatmul.mubr.msk.f32.vlgmr.msra.gmra.mrb[100].mxu1 %vm5458_vm5, %v5243_v29  ;;  %v12684_v57 = vld [vmem:[#allocation10_spill] sm:$0xff] }
 0xdf0   : > { %v5244_v25 = vadd.f32 %v5073_v35, %v11030_v62  ;;  %9527 = vrot.lane.b32.xlu0 %v9526_v26, %s12683_s1  ;;  %v4465_v26 = vld [vmem:[%s12543_s16 + $0x78] sm:$0xff] }
 0xdf2   : > { %v9531_v48 = vpack.i.bf16 %v5245_v49, %v5244_v25  ;;  %8963 = vmatprep.mubr.msk.f32.mxu1 %vm5458_vm5, %v5244_v25 }
 0xdf3   : > { %8964 = vmatmul.mubr.msk.f32.gmra.mrb[102].mxu1 %vm5458_vm5, %v5245_v49 }
 0xdf4   : > { %2466 = vrot.lane.b32.xlu0 %v10363_v5, %s12626_s27  ;;  %9532 = vrot.lane.b32.xlu1 %v9531_v48, %s12683_s1  ;;  %v11265_v5 = vpop.f32.mrb[69].mxu1 }
 0xdf8   : > { %2434 = vrot.lane.b32.xlu0 %v10315_v28, %s12626_s27  ;;  %2468 = vrot.lane.b32.xlu1 %v10361_v4, %s12626_s27  ;;  %v11271_v28 = vpop.f32.mrb[70].mxu1 }
 0xdf9   : > { %v11273_v4 = vpop.f32.mrb[71].mxu1 }
 0xdfc   : > { %2470 = vrot.lane.b32.xlu0 %v10367_v7, %s12626_s27  ;;  %2436 = vrot.lane.b32.xlu1 %v10313_v44, %s12626_s27  ;;  %v11279_v44 = vpop.f32.mrb[72].mxu1 }
 0xe00   : > { %2438 = vrot.lane.b32.xlu0 %v10320_v33, %s12626_s27  ;;  %2472 = vrot.lane.b32.xlu1 %v10365_v6, %s12626_s27  ;;  %v11281_v33 = vpop.f32.mrb[73].mxu1 }
 0xe04   : > { %2474 = vrot.lane.b32.xlu0 %v10371_v9, %s12626_s27  ;;  %2440 = vrot.lane.b32.xlu1 %v10317_v30, %s12626_s27  ;;  %v11287_v30 = vpop.f32.mrb[74].mxu1 }
 0xe05   : > { %v11289_v6 = vpop.f32.mrb[75].mxu1 }
 0xe08   : > { %2442 = vrot.lane.b32.xlu0 %v10326_v43, %s12626_s27  ;;  %2476 = vrot.lane.b32.xlu1 %v10369_v8, %s12626_s27  ;;  %v11295_v43 = vpop.f32.mrb[76].mxu1 }
 0xe09   : > { %v11297_v7 = vpop.f32.mrb[77].mxu1 }
 0xe0c   : > { %2478 = vrot.lane.b32.xlu0 %v10375_v11, %s12626_s27  ;;  %2444 = vrot.lane.b32.xlu1 %v10323_v38, %s12626_s27  ;;  %v11303_v38 = vpop.f32.mrb[78].mxu1 }
 0xe0d   : > { %v11305_v8 = vpop.f32.mrb[79].mxu1 }
 0xe10   : > { %2446 = vrot.lane.b32.xlu0 %v10334_v0, %s12626_s27  ;;  %2480 = vrot.lane.b32.xlu1 %v10373_v10, %s12626_s27  ;;  %v11311_v0 = vpop.f32.mrb[80].mxu1 }
 0xe11   : > { %v11313_v9 = vpop.f32.mrb[81].mxu1 }
 0xe14   : > { %2482 = vrot.lane.b32.xlu0 %v10379_v16, %s12626_s27  ;;  %2448 = vrot.lane.b32.xlu1 %v10330_v53, %s12626_s27  ;;  %v11319_v53 = vpop.f32.mrb[82].mxu1  ;;  %v5414_v16 = vld [vmem:[%s12545_s18] sm:$0xff] }
 0xe15   : > { %v11321_v10 = vpop.f32.mrb[83].mxu1  ;;  %8974 = vmatprep.mubr.msk.f32.mxu1 %vm906_vm1, %v5414_v16 }
 0xe18   : > { %2450 = vrot.lane.b32.xlu0 %v10340_v61, %s12626_s27  ;;  %2484 = vrot.lane.b32.xlu1 %v10377_v12, %s12626_s27  ;;  %v11327_v61 = vpop.f32.mrb[84].mxu1 }
 0xe19   : > { %v11329_v11 = vpop.f32.mrb[85].mxu1 }
 0xe1c   : > { %2486 = vrot.lane.b32.xlu0 %v10383_v19, %s12626_s27  ;;  %2452 = vrot.lane.b32.xlu1 %v10337_v58, %s12626_s27  ;;  %v11335_v58 = vpop.f32.mrb[86].mxu1 }
 0xe1d   : > { %v11337_v12 = vpop.f32.mrb[87].mxu1 }
 0xe20   : > { %2454 = vrot.lane.b32.xlu0 %v10350_v14, %s12626_s27  ;;  %2488 = vrot.lane.b32.xlu1 %v10381_v18, %s12626_s27  ;;  %v11343_v14 = vpop.f32.mrb[88].mxu1 }
 0xe21   : > { %v11348_v18 = vpop.f32.mrb[89].mxu1 }
 0xe24   : > { %2490 = vrot.lane.b32.xlu0 %v10387_v21, %s12626_s27  ;;  %2456 = vrot.lane.b32.xlu1 %v10347_v15, %s12626_s27  ;;  %v11351_v15 = vpop.f32.mrb[90].mxu1 }
 0xe28   : > { %2458 = vrot.lane.b32.xlu0 %v10355_v17, %s12626_s27  ;;  %2492 = vrot.lane.b32.xlu1 %v10385_v20, %s12626_s27  ;;  %v11357_v17 = vpop.f32.mrb[91].mxu1 }
 0xe29   : > { %v11359_v19 = vpop.f32.mrb[92].mxu1 }
 0xe2a   : > { %v11361_v20 = vpop.f32.mrb[93].mxu1 }
 0xe2b   : > { %v11363_v21 = vpop.f32.mrb[94].mxu1 }
 0xe2c   : > { %2494 = vrot.lane.b32.xlu0 %v10391_v23, %s12626_s27  ;;  %2460 = vrot.lane.b32.xlu1 %v10352_v1, %s12626_s27  ;;  %v11369_v39 = vpop.f32.mrb[95].mxu1  ;;  %v12685_v1 = vld [vmem:[#allocation9_spill] sm:$0xff] }
 0xe2d   : > { %v11371_v23 = vpop.f32.mrb[96].mxu1 }
 0xe2e   : > { %v11373_v50 = vpop.f32.mrb[97].mxu1 }
 0xe2f   : > { %v11377_v62 = vpop.f32.mrb[98].mxu1 }
 0xe30   : > { %2462 = vrot.lane.b32.xlu0 %v10359_v3, %s12626_s27  ;;  %2496 = vrot.lane.b32.xlu1 %v12684_v57, %s12626_s27  ;;  %v11379_v41 = vpop.f32.mrb[99].mxu1  ;;  %v4454_v3 = vld [vmem:[%s12543_s16 + $0x20] sm:$0xff] }
 0xe31   : > { %8896 = vmatprep.mubr.msk.f32.mxu0 %vm906_vm1, %v4454_v3  ;;  %v4466_v57 = vld [vmem:[%s12543_s16 + $0x80] sm:$0xff] }
 0xe32   : > { %8897 = vmatmul.mubr.msk.f32.gmra.mrb[108].mxu0 %vm906_vm1, %v4455_v52 }
 0xe33   : > { %8899 = vmatprep.mubr.msk.f32.mxu0 %vm906_vm1, %v4456_v32 }
 0xe34   : > { %2464 = vrot.lane.b32.xlu1 %v12685_v1, %s12626_s27  ;;  %v4467_v1 = vld [vmem:[%s12543_s16 + $0x88] sm:$0xff] }
 0xe36   : > { %8900 = vmatmul.mubr.msk.f32.gmra.mrb[110].mxu0 %vm906_vm1, %v4457_v37  ;;  %v12686_v37 = vld [vmem:[#allocation26_spill] sm:$0xff] }
 0xe37   : > { %8902 = vmatprep.mubr.msk.f32.mxu0 %vm906_vm1, %v4458_v55 }
 0xe3a   : > { %8903 = vmatmul.mubr.msk.f32.gmra.mrb[112].mxu0 %vm906_vm1, %v4459_v51  ;;  %v4468_v51 = vld [vmem:[%s12543_s16 + $0x90] sm:$0xff] }
 0xe3b   : > { %8905 = vmatprep.mubr.msk.f32.mxu0 %vm906_vm1, %v4460_v56  ;;  %v5415_v56 = vld [vmem:[%s12545_s18 + $0x8] sm:$0xff] }
 0xe3e   : > { %8906 = vmatmul.mubr.msk.f32.gmra.mrb[114].mxu0 %vm906_vm1, %v4461_v31  ;;  %v4469_v31 = vld [vmem:[%s12543_s16 + $0x98] sm:$0xff] }
 0xe3f   : > { %8908 = vmatprep.mubr.msk.f32.mxu0 %vm906_vm1, %v4462_v13 }
 0xe42   : > { %8909 = vmatmul.mubr.msk.f32.gmra.mrb[116].mxu0 %vm906_vm1, %v4463_v59 }
 0xe43   : > { %8911 = vmatprep.mubr.msk.f32.mxu0 %vm906_vm1, %v4464_v47 }
 0xe46   : > { %8912 = vmatmul.mubr.msk.f32.gmra.mrb[118].mxu0 %vm906_vm1, %v4465_v26  ;;  %v4470_v26 = vld [vmem:[%s12543_s16 + $0xa0] sm:$0xff] }
 0xe47   : > { %8914 = vmatprep.mubr.msk.f32.mxu0 %vm906_vm1, %v4466_v57 }
 0xe4a   : > { %8915 = vmatmul.mubr.msk.f32.gmra.mrb[120].mxu0 %vm906_vm1, %v4467_v1  ;;  %v12690_v1 = vld [vmem:[#allocation27_spill] sm:$0xff] }
 0xe4b   : > { %8917 = vmatprep.mubr.msk.f32.mxu0 %vm906_vm1, %v4468_v51 }
 0xe4e   : > { %8918 = vmatmul.mubr.msk.f32.gmra.mrb[122].mxu0 %vm906_vm1, %v4469_v31 }
 0xe4f   : > { %8920 = vmatprep.mubr.msk.f32.mxu0 %vm906_vm1, %v4470_v26 }
 0xe62   : > { %v9528_v54 = vpop.permute.xlu0 %9527 }
 0xe63   : > { %v9530_v29 = vunpack.i.h.bf16 %v9528_v54  ;;  %v9529_v24 = vunpack.i.l.bf16 %v9528_v54  ;;  %v12687_v54 = vld [vmem:[#allocation28_spill] sm:$0xff] }
 0xe65   : > { %v9350_v46 = vpack.c.bf16 %v9530_v29, %v9529_v24  ;;  %v12688_v24 = vld [vmem:[#allocation11_spill] sm:$0xff] }
 0xe66   : > { %v2467_v49 = vpop.permute.xlu0 %2466  ;;  %v9533_v35 = vpop.permute.xlu1 %9532 }
 0xe67   : > { %v2546_v25 = vadd.f32 %v2467_v49, %v10688_v40  ;;  %v9535_v48 = vunpack.i.h.bf16 %v9533_v35  ;;  %v9534_v16 = vunpack.i.l.bf16 %v9533_v35  ;;  %9351 = vmatprep.subr.bf16.mxu1 %v9350_v46  ;;  %v4471_v49 = vld [vmem:[%s12543_s16 + $0xa8] sm:$0xff]  ;;  %v5418_v35 = vld [vmem:[%s12545_s18 + $0x20] sm:$0xff] }
 0xe68   : > { %9353 = vmatpush3.bf16.msra.mxu1 %v9350_v46  ;;  %v5417_v46 = vld [vmem:[%s12545_s18 + $0x18] sm:$0xff]  ;;  %8921 = vmatmul.mubr.msk.f32.gmra.mrb[124].mxu0 %vm906_vm1, %v4471_v49 }
 0xe69   : > { %3463 = vrot.lane.b32.xlu0 %v2546_v25, %s12683_s1  ;;  %v9354_v3 = vpack.c.bf16 %v9535_v48, %v9534_v16  ;;  %v12689_v16 = vld [vmem:[#allocation13_spill] sm:$0xff] }
 0xe6a   : > { %v2435_v40 = vpop.permute.xlu0 %2434  ;;  %v2469_v52 = vpop.permute.xlu1 %2468 }
 0xe6b   : > { %v2530_v32 = vadd.f32 %v2435_v40, %v10641_v22  ;;  %v2547_v55 = vadd.f32 %v12686_v37, %v2469_v52  ;;  %9355 = vmatprep.subr.bf16.mxu1 %v9354_v3  ;;  %v5416_v22 = vld [vmem:[%s12545_s18 + $0x10] sm:$0xff]  ;;  %v5419_v40 = vld [vmem:[%s12545_s18 + $0x28] sm:$0xff] }
 0xe6c   : > { %9357 = vmatpush3.bf16.msra.mxu1 %v9354_v3  ;;  %v5420_v52 = vld [vmem:[%s12545_s18 + $0x30] sm:$0xff] }
 0xe6d   : > { %3431 = vrot.lane.b32.xlu0 %v2530_v32, %s12683_s1  ;;  %3465 = vrot.lane.b32.xlu1 %v2547_v55, %s12683_s1  ;;  %v12691_v55 = vld [vmem:[#allocation30_spill] sm:$0xff] }
 0xe6e   : > { %v2471_v13 = vpop.permute.xlu0 %2470  ;;  %v2437_v59 = vpop.permute.xlu1 %2436 }
 0xe6f   : > { %v2548_v29 = vadd.f32 %v2471_v13, %v12687_v54  ;;  %v2531_v47 = vadd.f32 %v12688_v24, %v2437_v59  ;;  %8975 = vmatmul.mubr.msk.f32.vlgmr.msra.gmra.mrb[104].mxu1 %vm906_vm1, %v5415_v56  ;;  %v12692_v56 = vld [vmem:[#allocation12_spill] sm:$0xff]  ;;  %v5421_v13 = vld [vmem:[%s12545_s18 + $0x38] sm:$0xff]  ;;  %v5406_v54 = vld [vmem:[%s12544_s17] sm:$0xff] }
 0xe70   : > { %8977 = vmatprep.mubr.msk.f32.mxu1 %vm906_vm1, %v5416_v22  ;;  %v4472_v22 = vld [vmem:[%s12543_s16 + $0xb0] sm:$0xff]  ;;  %v4473_v59 = vld [vmem:[%s12543_s16 + $0xb8] sm:$0xff] }
 0xe71   : > { %3467 = vrot.lane.b32.xlu0 %v2548_v29, %s12683_s1  ;;  %3433 = vrot.lane.b32.xlu1 %v2531_v47, %s12683_s1  ;;  %v12693_v47 = vld [vmem:[#allocation15_spill] sm:$0xff] }
 0xe72   : > { %v2439_v25 = vpop.permute.xlu0 %2438  ;;  %v2473_v48 = vpop.permute.xlu1 %2472  ;;  %8923 = vmatprep.mubr.msk.f32.mxu0 %vm906_vm1, %v4472_v22 }
 0xe73   : > { %v2532_v57 = vadd.f32 %v2439_v25, %v12689_v16  ;;  %v2549_v3 = vadd.f32 %v12690_v1, %v2473_v48  ;;  %8978 = vmatmul.mubr.msk.f32.gmra.mrb[106].mxu1 %vm906_vm1, %v5417_v46  ;;  %8924 = vmatmul.mubr.msk.f32.gmra.mrb[126].mxu0 %vm906_vm1, %v4473_v59  ;;  %v12694_v46 = vld [vmem:[#allocation29_spill] sm:$0xff]  ;;  %v12695_v48 = vld [vmem:[#allocation32_spill] sm:$0xff] }
 0xe74   : > { %8980 = vmatprep.mubr.msk.f32.mxu1 %vm906_vm1, %v5418_v35 }
 0xe75   : > { %3435 = vrot.lane.b32.xlu0 %v2532_v57, %s12683_s1  ;;  %3469 = vrot.lane.b32.xlu1 %v2549_v3, %s12683_s1  ;;  %v12696_v57 = vld [vmem:[#allocation14_spill] sm:$0xff] }
 0xe76   : > { %v2475_v32 = vpop.permute.xlu0 %2474  ;;  %v2441_v37 = vpop.permute.xlu1 %2440  ;;  %v4474_v3 = vld [vmem:[%s12543_s16 + $0xc0] sm:$0xff] }
 0xe77   : > { %v2550_v51 = vadd.f32 %v2475_v32, %v12691_v55  ;;  %v2533_v31 = vadd.f32 %v12692_v56, %v2441_v37  ;;  %8981 = vmatmul.mubr.msk.f32.gmra.mrb[108].mxu1 %vm906_vm1, %v5419_v40  ;;  %8926 = vmatprep.mubr.msk.f32.mxu0 %vm906_vm1, %v4474_v3  ;;  %v4475_v40 = vld [vmem:[%s12543_s16 + $0xc8] sm:$0xff]  ;;  %v12697_v37 = vld [vmem:[#allocation17_spill] sm:$0xff] }
 0xe78   : > { %8983 = vmatprep.mubr.msk.f32.mxu1 %vm906_vm1, %v5420_v52  ;;  %8927 = vmatmul.mubr.msk.f32.gmra.mrb[128].mxu0 %vm906_vm1, %v4475_v40  ;;  %v12704_v40 = vld [vmem:[#allocation18_spill] sm:$0xff] }
 0xe79   : > { %3471 = vrot.lane.b32.xlu0 %v2550_v51, %s12683_s1  ;;  %3437 = vrot.lane.b32.xlu1 %v2533_v31, %s12683_s1  ;;  %v12698_v51 = vld [vmem:[#allocation31_spill] sm:$0xff] }
 0xe7a   : > { %v2443_v29 = vpop.permute.xlu0 %2442  ;;  %v2477_v24 = vpop.permute.xlu1 %2476 }
 0xe7b   : > { %v2534_v26 = vadd.f32 %v2443_v29, %v12693_v47  ;;  %v2551_v49 = vadd.f32 %v12694_v46, %v2477_v24  ;;  %8984 = vmatmul.mubr.msk.f32.gmra.mrb[110].mxu1 %vm906_vm1, %v5421_v13  ;;  %v12699_v13 = vld [vmem:[#allocation34_spill] sm:$0xff]  ;;  %v4476_v24 = vld [vmem:[%s12543_s16 + $0xd0] sm:$0xff]  ;;  %v4477_v47 = vld [vmem:[%s12543_s16 + $0xd8] sm:$0xff] }
 0xe7c   : > { %8994 = vmatprep.mubr.msk.f32.mxu1 %vm906_vm1, %v5406_v54  ;;  %v12700_v54 = vld [vmem:[#allocation16_spill] sm:$0xff]  ;;  %8929 = vmatprep.mubr.msk.f32.mxu0 %vm906_vm1, %v4476_v24 }
 0xe7d   : > { %3439 = vrot.lane.b32.xlu0 %v2534_v26, %s12683_s1  ;;  %3473 = vrot.lane.b32.xlu1 %v2551_v49, %s12683_s1  ;;  %v12701_v49 = vld [vmem:[#allocation19_spill] sm:$0xff] }
 0xe7e   : > { %v2479_v35 = vpop.permute.xlu0 %2478  ;;  %v2445_v25 = vpop.permute.xlu1 %2444  ;;  %8930 = vmatmul.mubr.msk.f32.gmra.mrb[130].mxu0 %vm906_vm1, %v4477_v47  ;;  %v12708_v47 = vld [vmem:[#allocation20_spill] sm:$0xff] }
 0xe7f   : > { %v2552_v16 = vadd.f32 %v2479_v35, %v12695_v48  ;;  %v2535_v1 = vadd.f32 %v12696_v57, %v2445_v25  ;;  %v12702_v25 = vld [vmem:[#allocation33_spill] sm:$0xff] }
 0xe81   : > { %3475 = vrot.lane.b32.xlu0 %v2552_v16, %s12683_s1  ;;  %3441 = vrot.lane.b32.xlu1 %v2535_v1, %s12683_s1  ;;  %v12703_v1 = vld [vmem:[#allocation36_spill] sm:$0xff] }
 0xe82   : > { %v2447_v52 = vpop.permute.xlu0 %2446  ;;  %v2481_v32 = vpop.permute.xlu1 %2480 }
 0xe83   : > { %v2536_v55 = vadd.f32 %v2447_v52, %v12697_v37  ;;  %v2553_v56 = vadd.f32 %v12698_v51, %v2481_v32  ;;  %v4478_v32 = vld [vmem:[%s12543_s16 + $0xe0] sm:$0xff]  ;;  %v4479_v37 = vld [vmem:[%s12543_s16 + $0xe8] sm:$0xff] }
 0xe84   : > { %8932 = vmatprep.mubr.msk.f32.mxu0 %vm906_vm1, %v4478_v32  ;;  %v4483_v32 = vld [vmem:[%s12543_s16 + $0x108] sm:$0xff] }
 0xe85   : > { %3443 = vrot.lane.b32.xlu0 %v2536_v55, %s12683_s1  ;;  %3477 = vrot.lane.b32.xlu1 %v2553_v56, %s12683_s1  ;;  %v12705_v56 = vld [vmem:[#allocation21_spill] sm:$0xff] }
 0xe86   : > { %v2483_v31 = vpop.permute.xlu0 %2482  ;;  %v2449_v22 = vpop.permute.xlu1 %2448  ;;  %8933 = vmatmul.mubr.msk.f32.gmra.mrb[132].mxu0 %vm906_vm1, %v4479_v37  ;;  %v12711_v37 = vld [vmem:[#allocation40_spill] sm:$0xff] }
 0xe87   : > { %v2554_v59 = vadd.f32 %v2483_v31, %v12699_v13  ;;  %v2537_v29 = vadd.f32 %v12700_v54, %v2449_v22  ;;  %v12706_v22 = vld [vmem:[#allocation35_spill] sm:$0xff] }
 0xe89   : > { %3479 = vrot.lane.b32.xlu0 %v2554_v59, %s12683_s1  ;;  %3445 = vrot.lane.b32.xlu1 %v2537_v29, %s12683_s1  ;;  %v12707_v29 = vld [vmem:[#allocation38_spill] sm:$0xff] }
 0xe8a   : > { %v2451_v26 = vpop.permute.xlu0 %2450  ;;  %v2485_v46 = vpop.permute.xlu1 %2484 }
 0xe8b   : > { %v2538_v35 = vadd.f32 %v2451_v26, %v12701_v49  ;;  %v2555_v48 = vadd.f32 %v12702_v25, %v2485_v46  ;;  %v4480_v46 = vld [vmem:[%s12543_s16 + $0xf0] sm:$0xff]  ;;  %v4481_v49 = vld [vmem:[%s12543_s16 + $0xf8] sm:$0xff] }
 0xe8c   : > { %8935 = vmatprep.mubr.msk.f32.mxu0 %vm906_vm1, %v4480_v46  ;;  %v12715_v46 = vld [vmem:[#allocation24_spill] sm:$0xff] }
 0xe8d   : > { %3447 = vrot.lane.b32.xlu0 %v2538_v35, %s12683_s1  ;;  %3481 = vrot.lane.b32.xlu1 %v2555_v48, %s12683_s1  ;;  %v12709_v48 = vld [vmem:[#allocation23_spill] sm:$0xff] }
 0xe8e   : > { %v2487_v16 = vpop.permute.xlu0 %2486  ;;  %v2453_v57 = vpop.permute.xlu1 %2452  ;;  %8936 = vmatmul.mubr.msk.f32.gmra.mrb[134].mxu0 %vm906_vm1, %v4481_v49 }
 0xe8f   : > { %v2556_v3 = vadd.f32 %v2487_v16, %v12703_v1  ;;  %v2539_v52 = vadd.f32 %v12704_v40, %v2453_v57  ;;  %v12710_v57 = vld [vmem:[#allocation37_spill] sm:$0xff] }
 0xe91   : > { %3483 = vrot.lane.b32.xlu0 %v2556_v3, %s12683_s1  ;;  %3449 = vrot.lane.b32.xlu1 %v2539_v52, %s12683_s1  ;;  %v4482_v52 = vld [vmem:[%s12543_s16 + $0x100] sm:$0xff] }
 0xe92   : > { %v2455_v55 = vpop.permute.xlu0 %2454  ;;  %v2489_v51 = vpop.permute.xlu1 %2488  ;;  %8938 = vmatprep.mubr.msk.f32.mxu0 %vm906_vm1, %v4482_v52  ;;  %v5409_v52 = vld [vmem:[%s12544_s17 + $0x18] sm:$0xff] }
 0xe93   : > { %v2540_v31 = vadd.f32 %v2455_v55, %v12705_v56  ;;  %v2557_v13 = vadd.f32 %v12706_v22, %v2489_v51  ;;  %v12712_v51 = vld [vmem:[#allocation22_spill] sm:$0xff]  ;;  %8939 = vmatmul.mubr.msk.f32.gmra.mrb[136].mxu0 %vm906_vm1, %v4483_v32  ;;  %v4485_v22 = vld [vmem:[%s12543_s16 + $0x118] sm:$0xff] }
 0xe94   : > { %v5410_v32 = vld [vmem:[%s12544_s17 + $0x20] sm:$0xff] }
 0xe95   : > { %3451 = vrot.lane.b32.xlu0 %v2540_v31, %s12683_s1  ;;  %3485 = vrot.lane.b32.xlu1 %v2557_v13, %s12683_s1  ;;  %v4484_v31 = vld [vmem:[%s12543_s16 + $0x110] sm:$0xff] }
 0xe96   : > { %v2491_v59 = vpop.permute.xlu0 %2490  ;;  %v2457_v54 = vpop.permute.xlu1 %2456  ;;  %8941 = vmatprep.mubr.msk.f32.mxu0 %vm906_vm1, %v4484_v31 }
 0xe97   : > { %v2558_v24 = vadd.f32 %v2491_v59, %v12707_v29  ;;  %v2541_v26 = vadd.f32 %v12708_v47, %v2457_v54  ;;  %v12713_v54 = vld [vmem:[#allocation25_spill] sm:$0xff]  ;;  %8942 = vmatmul.mubr.msk.f32.gmra.mrb[138].mxu0 %vm906_vm1, %v4485_v22 }
 0xe99   : > { %3487 = vrot.lane.b32.xlu0 %v2558_v24, %s12683_s1  ;;  %3453 = vrot.lane.b32.xlu1 %v2541_v26, %s12683_s1  ;;  %v12714_v24 = vld [vmem:[#allocation39_spill] sm:$0xff] }
 0xe9a   : > { %v2459_v35 = vpop.permute.xlu0 %2458  ;;  %v2493_v25 = vpop.permute.xlu1 %2492 }
 0xe9b   : > { %v2542_v16 = vadd.f32 %v2459_v35, %v12709_v48  ;;  %v2559_v1 = vadd.f32 %v12710_v57, %v2493_v25 }
 0xe9d   : > { %3455 = vrot.lane.b32.xlu0 %v2542_v16, %s12683_s1  ;;  %3489 = vrot.lane.b32.xlu1 %v2559_v1, %s12683_s1 }
 0xe9e   : > { %v2495_v3 = vpop.permute.xlu0 %2494  ;;  %v2461_v40 = vpop.permute.xlu1 %2460 }
 0xe9f   : > { %v2560_v55 = vadd.f32 %v2495_v3, %v12711_v37  ;;  %v2543_v56 = vadd.f32 %v12712_v51, %v2461_v40  ;;  %v5407_v3 = vld [vmem:[%s12544_s17 + $0x8] sm:$0xff]  ;;  %v5408_v40 = vld [vmem:[%s12544_s17 + $0x10] sm:$0xff]  ;;  %v5413_v51 = vld [vmem:[%s12544_s17 + $0x38] sm:$0xff] }
 0xea0   : > { %v5411_v37 = vld [vmem:[%s12544_s17 + $0x28] sm:$0xff] }
 0xea1   : > { %3491 = vrot.lane.b32.xlu0 %v2560_v55, %s12683_s1  ;;  %3457 = vrot.lane.b32.xlu1 %v2543_v56, %s12683_s1  ;;  %v5412_v55 = vld [vmem:[%s12544_s17 + $0x30] sm:$0xff] }
 0xea2   : > { %v2463_v13 = vpop.permute.xlu0 %2462  ;;  %v2497_v59 = vpop.permute.xlu1 %2496 }
 0xea3   : > { %v2544_v29 = vadd.f32 %v2463_v13, %v12713_v54  ;;  %v2561_v47 = vadd.f32 %v12714_v24, %v2497_v59 }
 0xea5   : > { %3459 = vrot.lane.b32.xlu0 %v2544_v29, %s12683_s1  ;;  %3493 = vrot.lane.b32.xlu1 %v2561_v47, %s12683_s1 }
 0xea6   : > { %v2465_v26 = vpop.permute.xlu1 %2464 }
 0xea7   : > { %v2545_v49 = vadd.f32 %v12715_v46, %v2465_v26 }
 0xea9   : > { %3461 = vrot.lane.b32.xlu1 %v2545_v49, %s12683_s1  ;;  %v12716_v49 = vld [vmem:[#allocation54_spill] sm:$0xff] }
 0xec2   : > { %v8962_v35 = vpop.f32.mrb[100].mxu1 }
 0xec3   : > { %v5540_v25 = vpop.f32.mrb[101].mxu1 }
 0xec4   : > { %v9358_v48 = vpack.c.bf16 %v8962_v35, %v5540_v25 }
 0xec6   : > { %v8965_v16 = vpop.f32.mrb[102].mxu1  ;;  %9359 = vmatprep.subr.bf16.mxu1 %v9358_v48 }
 0xec7   : > { %v5550_v57 = vpop.f32.mrb[103].mxu1  ;;  %9361 = vmatpush3.bf16.msra.mxu1 %v9358_v48  ;;  %v12717_v48 = vld [vmem:[#allocation56_spill] sm:$0xff] }
 0xec8   : > { %v9362_v1 = vpack.c.bf16 %v8965_v16, %v5550_v57  ;;  %v12718_v16 = vld [vmem:[#allocation41_spill] sm:$0xff] }
 0xeca   : > { %9363 = vmatprep.subr.bf16.mxu1 %v9362_v1 }
 0xecb   : > { %9365 = vmatpush3.bf16.msra.mxu1 %v9362_v1 }
 0xece   : > { %8995 = vmatmul.mubr.msk.f32.vlgmr.msra.gmra.mrb[104].mxu1 %vm906_vm1, %v5407_v3  ;;  %v12719_v3 = vld [vmem:[#allocation43_spill] sm:$0xff] }
 0xecf   : > { %8997 = vmatprep.mubr.msk.f32.mxu1 %vm906_vm1, %v5408_v40  ;;  %v12720_v40 = vld [vmem:[#allocation55_spill] sm:$0xff] }
 0xed2   : > { %8998 = vmatmul.mubr.msk.f32.gmra.mrb[106].mxu1 %vm906_vm1, %v5409_v52 }
 0xed3   : > { %9000 = vmatprep.mubr.msk.f32.mxu1 %vm906_vm1, %v5410_v32 }
 0xed6   : > { %9001 = vmatmul.mubr.msk.f32.gmra.mrb[108].mxu1 %vm906_vm1, %v5411_v37 }
 0xed7   : > { %9003 = vmatprep.mubr.msk.f32.mxu1 %vm906_vm1, %v5412_v55  ;;  %v12721_v55 = vld [vmem:[#allocation58_spill] sm:$0xff] }
 0xeda   : > { %9004 = vmatmul.mubr.msk.f32.gmra.mrb[110].mxu1 %vm906_vm1, %v5413_v51 }
 0xedb   : > { %v3464_v56 = vpop.permute.xlu0 %3463 }
 0xedc   : > { %v3543_v31 = vadd.f32 %v3464_v56, %v10992_v34  ;;  %v12722_v56 = vld [vmem:[#allocation42_spill] sm:$0xff] }
 0xede   : > { %4338 = vrot.lane.b32.xlu0 %v3543_v31, %s12626_s27 }
 0xedf   : > { %v3432_v22 = vpop.permute.xlu0 %3431  ;;  %v3466_v13 = vpop.permute.xlu1 %3465 }
 0xee0   : > { %v3527_v59 = vadd.f32 %v3432_v22, %v10944_v2  ;;  %v3544_v54 = vadd.f32 %v10990_v45, %v3466_v13 }
 0xee2   : > { %4306 = vrot.lane.b32.xlu0 %v3527_v59, %s12626_s27  ;;  %4340 = vrot.lane.b32.xlu1 %v3544_v54, %s12626_s27  ;;  %v12723_v59 = vld [vmem:[#allocation45_spill] sm:$0xff] }
 0xee3   : > { %v3468_v29 = vpop.permute.xlu0 %3467  ;;  %v3434_v24 = vpop.permute.xlu1 %3433 }
 0xee4   : > { %v3545_v47 = vadd.f32 %v3468_v29, %v10996_v63  ;;  %v3528_v26 = vadd.f32 %v10942_v60, %v3434_v24  ;;  %v12724_v29 = vld [vmem:[#allocation57_spill] sm:$0xff] }
 0xee6   : > { %4342 = vrot.lane.b32.xlu0 %v3545_v47, %s12626_s27  ;;  %4308 = vrot.lane.b32.xlu1 %v3528_v26, %s12626_s27 }
 0xee7   : > { %v3436_v34 = vpop.permute.xlu0 %3435  ;;  %v3470_v46 = vpop.permute.xlu1 %3469 }
 0xee8   : > { %v3529_v2 = vadd.f32 %v3436_v34, %v10949_v42  ;;  %v3546_v45 = vadd.f32 %v12716_v49, %v3470_v46  ;;  %v12725_v34 = vld [vmem:[#allocation60_spill] sm:$0xff] }
 0xeea   : > { %4310 = vrot.lane.b32.xlu0 %v3529_v2, %s12626_s27  ;;  %4344 = vrot.lane.b32.xlu1 %v3546_v45, %s12626_s27  ;;  %v12726_v2 = vld [vmem:[#allocation44_spill] sm:$0xff] }
 0xeeb   : > { %v3472_v35 = vpop.permute.xlu0 %3471  ;;  %v3438_v25 = vpop.permute.xlu1 %3437 }
 0xeec   : > { %v3547_v63 = vadd.f32 %v3472_v35, %v12717_v48  ;;  %v3530_v60 = vadd.f32 %v12718_v16, %v3438_v25  ;;  %v12727_v25 = vld [vmem:[#allocation47_spill] sm:$0xff] }
 0xeee   : > { %4346 = vrot.lane.b32.xlu0 %v3547_v63, %s12626_s27  ;;  %4312 = vrot.lane.b32.xlu1 %v3530_v60, %s12626_s27  ;;  %v12728_v63 = vld [vmem:[#allocation59_spill] sm:$0xff] }
 0xeef   : > { %v3440_v57 = vpop.permute.xlu0 %3439  ;;  %v3474_v1 = vpop.permute.xlu1 %3473 }
 0xef0   : > { %v3531_v42 = vadd.f32 %v3440_v57, %v12719_v3  ;;  %v3548_v52 = vadd.f32 %v12720_v40, %v3474_v1  ;;  %v12729_v1 = vld [vmem:[#allocation62_spill] sm:$0xff] }
 0xef2   : > { %4314 = vrot.lane.b32.xlu0 %v3531_v42, %s12626_s27  ;;  %4348 = vrot.lane.b32.xlu1 %v3548_v52, %s12626_s27  ;;  %v12730_v42 = vld [vmem:[#allocation46_spill] sm:$0xff] }
 0xef3   : > { %v3476_v32 = vpop.permute.xlu0 %3475  ;;  %v3442_v37 = vpop.permute.xlu1 %3441 }
 0xef4   : > { %v3549_v51 = vadd.f32 %v3476_v32, %v12721_v55  ;;  %v3532_v31 = vadd.f32 %v12722_v56, %v3442_v37  ;;  %v12731_v37 = vld [vmem:[#allocation49_spill] sm:$0xff] }
 0xef6   : > { %4350 = vrot.lane.b32.xlu0 %v3549_v51, %s12626_s27  ;;  %4316 = vrot.lane.b32.xlu1 %v3532_v31, %s12626_s27  ;;  %v12732_v51 = vld [vmem:[#allocation61_spill] sm:$0xff] }
 0xef7   : > { %v3444_v22 = vpop.permute.xlu0 %3443  ;;  %v3478_v13 = vpop.permute.xlu1 %3477 }
 0xef8   : > { %v3533_v54 = vadd.f32 %v3444_v22, %v12723_v59  ;;  %v3550_v24 = vadd.f32 %v12724_v29, %v3478_v13  ;;  %v12733_v13 = vld [vmem:[#allocation64_spill] sm:$0xff] }
 0xefa   : > { %4318 = vrot.lane.b32.xlu0 %v3533_v54, %s12626_s27  ;;  %4352 = vrot.lane.b32.xlu1 %v3550_v24, %s12626_s27  ;;  %v12734_v54 = vld [vmem:[#allocation48_spill] sm:$0xff] }
 0xefb   : > { %v3480_v47 = vpop.permute.xlu0 %3479  ;;  %v3446_v26 = vpop.permute.xlu1 %3445 }
 0xefc   : > { %v3551_v46 = vadd.f32 %v3480_v47, %v12725_v34  ;;  %v3534_v49 = vadd.f32 %v12726_v2, %v3446_v26  ;;  %v12735_v26 = vld [vmem:[#allocation51_spill] sm:$0xff] }
 0xefe   : > { %4354 = vrot.lane.b32.xlu0 %v3551_v46, %s12626_s27  ;;  %4320 = vrot.lane.b32.xlu1 %v3534_v49, %s12626_s27  ;;  %v12736_v46 = vld [vmem:[#allocation63_spill] sm:$0xff] }
 0xeff   : > { %v3448_v45 = vpop.permute.xlu0 %3447  ;;  %v3482_v35 = vpop.permute.xlu1 %3481 }
 0xf00   : > { %v3535_v48 = vadd.f32 %v3448_v45, %v12727_v25  ;;  %v3552_v16 = vadd.f32 %v12728_v63, %v3482_v35  ;;  %v12737_v35 = vld [vmem:[#allocation66_spill] sm:$0xff] }
 0xf02   : > { %4322 = vrot.lane.b32.xlu0 %v3535_v48, %s12626_s27  ;;  %4356 = vrot.lane.b32.xlu1 %v3552_v16, %s12626_s27  ;;  %v12738_v48 = vld [vmem:[#allocation50_spill] sm:$0xff] }
 0xf03   : > { %v3484_v60 = vpop.permute.xlu0 %3483  ;;  %v3450_v57 = vpop.permute.xlu1 %3449 }
 0xf04   : > { %v3553_v3 = vadd.f32 %v3484_v60, %v12729_v1  ;;  %v3536_v40 = vadd.f32 %v12730_v42, %v3450_v57  ;;  %v12739_v57 = vld [vmem:[#allocation53_spill] sm:$0xff] }
 0xf06   : > { %4358 = vrot.lane.b32.xlu0 %v3553_v3, %s12626_s27  ;;  %4324 = vrot.lane.b32.xlu1 %v3536_v40, %s12626_s27  ;;  %v12740_v3 = vld [vmem:[#allocation65_spill] sm:$0xff] }
 0xf07   : > { %v3452_v52 = vpop.permute.xlu0 %3451  ;;  %v3486_v32 = vpop.permute.xlu1 %3485 }
 0xf08   : > { %v3537_v55 = vadd.f32 %v3452_v52, %v12731_v37  ;;  %v3554_v56 = vadd.f32 %v12732_v51, %v3486_v32  ;;  %v12741_v52 = vld [vmem:[#allocation52_spill] sm:$0xff]  ;;  %v11697_v37 = vpop.f32.mrb[108].mxu0 }
 0xf0a   : > { %4326 = vrot.lane.b32.xlu0 %v3537_v55, %s12626_s27  ;;  %4360 = vrot.lane.b32.xlu1 %v3554_v56, %s12626_s27  ;;  %v11699_v55 = vpop.f32.mrb[109].mxu0 }
 0xf0b   : > { %v3488_v31 = vpop.permute.xlu0 %3487  ;;  %v3454_v22 = vpop.permute.xlu1 %3453 }
 0xf0c   : > { %v3555_v59 = vadd.f32 %v3488_v31, %v12733_v13  ;;  %v3538_v29 = vadd.f32 %v12734_v54, %v3454_v22  ;;  %v11701_v51 = vpop.f32.mrb[110].mxu0 }
 0xf0d   : > { %v11703_v56 = vpop.f32.mrb[111].mxu0 }
 0xf0e   : > { %4362 = vrot.lane.b32.xlu0 %v3555_v59, %s12626_s27  ;;  %4328 = vrot.lane.b32.xlu1 %v3538_v29, %s12626_s27  ;;  %v11705_v31 = vpop.f32.mrb[112].mxu0 }
 0xf0f   : > { %v3456_v24 = vpop.permute.xlu0 %3455  ;;  %v3490_v47 = vpop.permute.xlu1 %3489 }
 0xf10   : > { %v3539_v34 = vadd.f32 %v3456_v24, %v12735_v26  ;;  %v3556_v2 = vadd.f32 %v12736_v46, %v3490_v47  ;;  %v11707_v22 = vpop.f32.mrb[113].mxu0 }
 0xf11   : > { %v11709_v13 = vpop.f32.mrb[114].mxu0 }
 0xf12   : > { %4330 = vrot.lane.b32.xlu0 %v3539_v34, %s12626_s27  ;;  %4364 = vrot.lane.b32.xlu1 %v3556_v2, %s12626_s27  ;;  %v11711_v59 = vpop.f32.mrb[115].mxu0 }
 0xf13   : > { %v3492_v49 = vpop.permute.xlu0 %3491  ;;  %v3458_v45 = vpop.permute.xlu1 %3457 }
 0xf14   : > { %v3557_v25 = vadd.f32 %v3492_v49, %v12737_v35  ;;  %v3540_v63 = vadd.f32 %v12738_v48, %v3458_v45  ;;  %v5422_v48 = vld [vmem:[%s12546_s19] sm:$0xff] }
 0xf15   : > { %v11713_v54 = vpop.f32.mrb[116].mxu0  ;;  %9014 = vmatprep.mubr.msk.f32.mxu1 %vm906_vm1, %v5422_v48 }
 0xf16   : > { %4366 = vrot.lane.b32.xlu0 %v3557_v25, %s12626_s27  ;;  %4332 = vrot.lane.b32.xlu1 %v3540_v63, %s12626_s27  ;;  %v11715_v29 = vpop.f32.mrb[117].mxu0 }
 0xf17   : > { %v3460_v16 = vpop.permute.xlu0 %3459  ;;  %v3494_v60 = vpop.permute.xlu1 %3493 }
 0xf18   : > { %v3541_v1 = vadd.f32 %v3460_v16, %v12739_v57  ;;  %v3558_v42 = vadd.f32 %v12740_v3, %v3494_v60 }
 0xf19   : > { %v11717_v24 = vpop.f32.mrb[118].mxu0 }
 0xf1a   : > { %4334 = vrot.lane.b32.xlu0 %v3541_v1, %s12626_s27  ;;  %4368 = vrot.lane.b32.xlu1 %v3558_v42, %s12626_s27  ;;  %v11719_v47 = vpop.f32.mrb[119].mxu0 }
 0xf1b   : > { %v3462_v40 = vpop.permute.xlu1 %3461 }
 0xf1c   : > { %v3542_v32 = vadd.f32 %v12741_v52, %v3462_v40 }
 0xf1d   : > { %v11721_v26 = vpop.f32.mrb[120].mxu0 }
 0xf1e   : > { %4336 = vrot.lane.b32.xlu1 %v3542_v32, %s12626_s27  ;;  %v11723_v34 = vpop.f32.mrb[121].mxu0 }
 0xf21   : > { %v11725_v46 = vpop.f32.mrb[122].mxu0 }
 0xf22   : > { %v11727_v2 = vpop.f32.mrb[123].mxu0 }
 0xf3b   : > { %v11729_v49 = vpop.f32.mrb[124].mxu0 }
 0xf3c   : > { %v11731_v45 = vpop.f32.mrb[125].mxu0 }
 0xf46   : > { %v11733_v35 = vpop.f32.mrb[126].mxu0 }
 0xf47   : > { %v11735_v25 = vpop.f32.mrb[127].mxu0 }
 0xf4b   : > { %v11745_v42 = vpop.f32.mrb[128].mxu0 }
 0xf4c   : > { %v11747_v40 = vpop.f32.mrb[129].mxu0 }
 0xf50   : > { %v4339_v63 = vpop.permute.xlu0 %4338 }
 0xf51   : > { %v4418_v16 = vadd.f32 %v4339_v63, %v11329_v11 }
 0xf53   : > { %5310 = vrot.lane.b32.xlu0 %v4418_v16, %s12626_s27 }
 0xf54   : > { %v4307_v60 = vpop.permute.xlu0 %4306  ;;  %v4341_v57 = vpop.permute.xlu1 %4340 }
 0xf55   : > { %v4402_v1 = vadd.f32 %v4307_v60, %v11265_v5  ;;  %v4419_v3 = vadd.f32 %v11327_v61, %v4341_v57  ;;  %v11757_v60 = vpop.f32.mrb[130].mxu0 }
 0xf56   : > { %v11759_v57 = vpop.f32.mrb[131].mxu0 }
 0xf57   : > { %5278 = vrot.lane.b32.xlu0 %v4402_v1, %s12626_s27  ;;  %5312 = vrot.lane.b32.xlu1 %v4419_v3, %s12626_s27 }
 0xf58   : > { %v4343_v52 = vpop.permute.xlu0 %4342  ;;  %v4309_v32 = vpop.permute.xlu1 %4308 }
 0xf59   : > { %v4420_v11 = vadd.f32 %v4343_v52, %v11337_v12  ;;  %v4403_v48 = vadd.f32 %v11263_v27, %v4309_v32 }
 0xf5b   : > { %5314 = vrot.lane.b32.xlu0 %v4420_v11, %s12626_s27  ;;  %5280 = vrot.lane.b32.xlu1 %v4403_v48, %s12626_s27  ;;  %v11769_v11 = vpop.f32.mrb[132].mxu0 }
 0xf5c   : > { %v4311_v5 = vpop.permute.xlu0 %4310  ;;  %v4345_v61 = vpop.permute.xlu1 %4344 }
 0xf5d   : > { %v4404_v63 = vadd.f32 %v4311_v5, %v11273_v4  ;;  %v4421_v16 = vadd.f32 %v11335_v58, %v4345_v61  ;;  %v11771_v48 = vpop.f32.mrb[133].mxu0 }
 0xf5f   : > { %5282 = vrot.lane.b32.xlu0 %v4404_v63, %s12626_s27  ;;  %5316 = vrot.lane.b32.xlu1 %v4421_v16, %s12626_s27 }
 0xf60   : > { %v4347_v12 = vpop.permute.xlu0 %4346  ;;  %v4313_v27 = vpop.permute.xlu1 %4312 }
 0xf61   : > { %v4422_v1 = vadd.f32 %v4347_v12, %v11348_v18  ;;  %v4405_v3 = vadd.f32 %v11271_v28, %v4313_v27  ;;  %v11781_v12 = vpop.f32.mrb[134].mxu0 }
 0xf62   : > { %v11783_v27 = vpop.f32.mrb[135].mxu0 }
 0xf63   : > { %5318 = vrot.lane.b32.xlu0 %v4422_v1, %s12626_s27  ;;  %5284 = vrot.lane.b32.xlu1 %v4405_v3, %s12626_s27 }
 0xf64   : > { %v4315_v4 = vpop.permute.xlu0 %4314  ;;  %v4349_v58 = vpop.permute.xlu1 %4348 }
 0xf65   : > { %v4406_v52 = vadd.f32 %v4315_v4, %v11281_v33  ;;  %v4423_v32 = vadd.f32 %v11343_v14, %v4349_v58 }
 0xf67   : > { %5286 = vrot.lane.b32.xlu0 %v4406_v52, %s12626_s27  ;;  %5320 = vrot.lane.b32.xlu1 %v4423_v32, %s12626_s27  ;;  %v11793_v52 = vpop.f32.mrb[136].mxu0 }
 0xf68   : > { %v4351_v18 = vpop.permute.xlu0 %4350  ;;  %v4317_v28 = vpop.permute.xlu1 %4316 }
 0xf69   : > { %v4424_v5 = vadd.f32 %v4351_v18, %v11357_v17  ;;  %v4407_v61 = vadd.f32 %v11279_v44, %v4317_v28  ;;  %v11795_v32 = vpop.f32.mrb[137].mxu0 }
 0xf6b   : > { %5322 = vrot.lane.b32.xlu0 %v4424_v5, %s12626_s27  ;;  %5288 = vrot.lane.b32.xlu1 %v4407_v61, %s12626_s27 }
 0xf6c   : > { %v4319_v33 = vpop.permute.xlu0 %4318  ;;  %v4353_v14 = vpop.permute.xlu1 %4352 }
 0xf6d   : > { %v4408_v63 = vadd.f32 %v4319_v33, %v11289_v6  ;;  %v4425_v16 = vadd.f32 %v11351_v15, %v4353_v14  ;;  %v11805_v33 = vpop.f32.mrb[138].mxu0 }
 0xf6e   : > { %v11807_v14 = vpop.f32.mrb[139].mxu0 }
 0xf6f   : > { %5290 = vrot.lane.b32.xlu0 %v4408_v63, %s12626_s27  ;;  %5324 = vrot.lane.b32.xlu1 %v4425_v16, %s12626_s27 }
 0xf70   : > { %v4355_v17 = vpop.permute.xlu0 %4354  ;;  %v4321_v44 = vpop.permute.xlu1 %4320 }
 0xf71   : > { %v4426_v1 = vadd.f32 %v4355_v17, %v11361_v20  ;;  %v4409_v3 = vadd.f32 %v11287_v30, %v4321_v44 }
 0xf73   : > { %5326 = vrot.lane.b32.xlu0 %v4426_v1, %s12626_s27  ;;  %5292 = vrot.lane.b32.xlu1 %v4409_v3, %s12626_s27 }
 0xf74   : > { %v4323_v6 = vpop.permute.xlu0 %4322  ;;  %v4357_v15 = vpop.permute.xlu1 %4356 }
 0xf75   : > { %v4410_v4 = vadd.f32 %v4323_v6, %v11297_v7  ;;  %v4427_v58 = vadd.f32 %v11359_v19, %v4357_v15 }
 0xf77   : > { %5294 = vrot.lane.b32.xlu0 %v4410_v4, %s12626_s27  ;;  %5328 = vrot.lane.b32.xlu1 %v4427_v58, %s12626_s27 }
 0xf78   : > { %v4359_v20 = vpop.permute.xlu0 %4358  ;;  %v4325_v30 = vpop.permute.xlu1 %4324 }
 0xf79   : > { %v4428_v18 = vadd.f32 %v4359_v20, %v11369_v39  ;;  %v4411_v28 = vadd.f32 %v11295_v43, %v4325_v30 }
 0xf7b   : > { %5330 = vrot.lane.b32.xlu0 %v4428_v18, %s12626_s27  ;;  %5296 = vrot.lane.b32.xlu1 %v4411_v28, %s12626_s27 }
 0xf7c   : > { %v4327_v7 = vpop.permute.xlu0 %4326  ;;  %v4361_v19 = vpop.permute.xlu1 %4360 }
 0xf7d   : > { %v4412_v5 = vadd.f32 %v4327_v7, %v11305_v8  ;;  %v4429_v61 = vadd.f32 %v11363_v21, %v4361_v19 }
 0xf7f   : > { %5298 = vrot.lane.b32.xlu0 %v4412_v5, %s12626_s27  ;;  %5332 = vrot.lane.b32.xlu1 %v4429_v61, %s12626_s27 }
 0xf80   : > { %v4363_v39 = vpop.permute.xlu0 %4362  ;;  %v4329_v43 = vpop.permute.xlu1 %4328 }
 0xf81   : > { %v4430_v63 = vadd.f32 %v4363_v39, %v11373_v50  ;;  %v4413_v16 = vadd.f32 %v11303_v38, %v4329_v43 }
 0xf83   : > { %5334 = vrot.lane.b32.xlu0 %v4430_v63, %s12626_s27  ;;  %5300 = vrot.lane.b32.xlu1 %v4413_v16, %s12626_s27 }
 0xf84   : > { %v4331_v8 = vpop.permute.xlu0 %4330  ;;  %v4365_v21 = vpop.permute.xlu1 %4364 }
 0xf85   : > { %v4414_v17 = vadd.f32 %v4331_v8, %v11313_v9  ;;  %v4431_v44 = vadd.f32 %v11371_v23, %v4365_v21 }
 0xf87   : > { %5302 = vrot.lane.b32.xlu0 %v4414_v17, %s12626_s27  ;;  %5336 = vrot.lane.b32.xlu1 %v4431_v44, %s12626_s27 }
 0xf88   : > { %v4367_v1 = vpop.permute.xlu0 %4366  ;;  %v4333_v3 = vpop.permute.xlu1 %4332 }
 0xf89   : > { %v4432_v50 = vadd.f32 %v4367_v1, %v11379_v41  ;;  %v4415_v38 = vadd.f32 %v11311_v0, %v4333_v3 }
 0xf8b   : > { %5338 = vrot.lane.b32.xlu0 %v4432_v50, %s12626_s27  ;;  %5304 = vrot.lane.b32.xlu1 %v4415_v38, %s12626_s27 }
 0xf8c   : > { %v4335_v6 = vpop.permute.xlu0 %4334  ;;  %v4369_v15 = vpop.permute.xlu1 %4368 }
 0xf8d   : > { %v4416_v9 = vadd.f32 %v4335_v6, %v11321_v10  ;;  %v4433_v23 = vadd.f32 %v11377_v62, %v4369_v15 }
 0xf8f   : > { %5306 = vrot.lane.b32.xlu0 %v4416_v9, %s12626_s27  ;;  %5340 = vrot.lane.b32.xlu1 %v4433_v23, %s12626_s27 }
 0xf90   : > { %v4337_v4 = vpop.permute.xlu1 %4336 }
 0xf91   : > { %v4417_v58 = vadd.f32 %v11319_v53, %v4337_v4 }
 0xf93   : > { %5308 = vrot.lane.b32.xlu1 %v4417_v58, %s12626_s27 }
 0xfa1   : > { %v8996_v0 = vpop.f32.mrb[104].mxu1 }
 0xfa2   : > { %v5790_v41 = vpop.f32.mrb[105].mxu1 }
 0xfa5   : > { %v8999_v20 = vpop.f32.mrb[106].mxu1 }
 0xfa6   : > { %v5800_v30 = vpop.f32.mrb[107].mxu1 }
 0xfa9   : > { %v9002_v18 = vpop.f32.mrb[108].mxu1 }
 0xfaa   : > { %v7719_v28 = vmul.f32 -1.442695, %v9002_v18  ;;  %v5810_v7 = vpop.f32.mrb[109].mxu1 }
 0xfab   : > { %v7718_v19 = vmul.f32 -1.442695, %v5810_v7 }
 0xfac   : > { %9658 = vpow2.f32 %v7719_v28 }
 0xfad   : > { %9660 = vpow2.f32 %v7718_v19  ;;  %v9005_v10 = vpop.f32.mrb[110].mxu1 }
 0xfae   : > { %v7721_v62 = vmul.f32 -1.442695, %v9005_v10  ;;  %v5820_v5 = vpop.f32.mrb[111].mxu1 }
 0xfaf   : > { %v7720_v61 = vmul.f32 -1.442695, %v5820_v5  ;;  %v5423_v5 = vld [vmem:[%s12546_s19 + $0x8] sm:$0xff] }
 0xfb0   : > { %9662 = vpow2.f32 %v7721_v62 }
 0xfb1   : > { %9664 = vpow2.f32 %v7720_v61  ;;  %v5424_v61 = vld [vmem:[%s12546_s19 + $0x10] sm:$0xff] }
 0xfb2   : > { %9666 = vtanh.f32 %v8996_v0 }
 0xfb3   : > { %9668 = vtanh.f32 %v5790_v41 }
 0xfb6   : > { %v9659_v39 = vpop.eup %9658 }
 0xfb7   : > { %v9661_v53 = vpop.eup %9660  ;;  %v5846_v43 = vadd.f32 1.0, %v9659_v39 }
 0xfb8   : > { %v5845_v63 = vadd.f32 1.0, %v9661_v53 }
 0xfb9   : > { %9670 = vrcp.f32 %v5846_v43  ;;  %v5426_v43 = vld [vmem:[%s12546_s19 + $0x20] sm:$0xff] }
 0xfba   : > { %v9663_v16 = vpop.eup %9662  ;;  %9672 = vrcp.f32 %v5845_v63 }
 0xfbb   : > { %v9665_v8 = vpop.eup %9664  ;;  %9674 = vtanh.f32 %v8999_v20  ;;  %v5848_v21 = vadd.f32 1.0, %v9663_v16 }
 0xfbc   : > { %9676 = vtanh.f32 %v5800_v30  ;;  %v5847_v17 = vadd.f32 1.0, %v9665_v8  ;;  %v9667_v44 = vpop.eup %9666 }
 0xfbd   : > { %9678 = vrcp.f32 %v5848_v21  ;;  %v9669_v1 = vpop.eup %9668  ;;  %v5428_v21 = vld [vmem:[%s12546_s19 + $0x30] sm:$0xff] }
 0xfbe   : > { %9680 = vrcp.f32 %v5847_v17 }
 0xfc3   : > { %v9671_v3 = vpop.eup %9670 }
 0xfc4   : > { %v9673_v50 = vpop.eup %9672  ;;  %v5858_v38 = vmul.f32 %v9671_v3, %v9667_v44  ;;  %v5430_v3 = vld [vmem:[%s12546_s19 + $0x40] sm:$0xff] }
 0xfc5   : > { %v9675_v6 = vpop.eup %9674  ;;  %v11829_v15 = vpop.permute.xlu0 %5310  ;;  %v5857_v9 = vmul.f32 %v9673_v50, %v9669_v1 }
 0xfc6   : > { %v9677_v23 = vpop.eup %9676 }
 0xfc7   : > { %v9679_v4 = vpop.eup %9678  ;;  %v9366_v58 = vpack.c.bf16 %v5858_v38, %v5857_v9  ;;  %v5432_v9 = vld [vmem:[%s12546_s19 + $0x50] sm:$0xff] }
 0xfc8   : > { %v9681_v0 = vpop.eup %9680  ;;  %v5860_v41 = vmul.f32 %v9679_v4, %v9675_v6 }
 0xfc9   : > { %v5279_v20 = vpop.permute.xlu0 %5278  ;;  %v11831_v18 = vpop.permute.xlu1 %5312  ;;  %9367 = vmatprep.subr.bf16.mxu1 %v9366_v58  ;;  %v5859_v30 = vmul.f32 %v9681_v0, %v9677_v23  ;;  %v5434_v0 = vld [vmem:[%s12546_s19 + $0x60] sm:$0xff] }
 0xfca   : > { %v5374_v28 = vadd.f32 %v5279_v20, %v11699_v55  ;;  %9369 = vmatpush3.bf16.msra.mxu1 %v9366_v58 }
 0xfcb   : > { %v9370_v7 = vpack.c.bf16 %v5860_v41, %v5859_v30 }
 0xfcc   : > { %6242 = vrot.lane.b32.xlu0 %v5374_v28, %s12683_s1  ;;  %v5436_v28 = vld [vmem:[%s12546_s19 + $0x70] sm:$0xff] }
 0xfcd   : > { %v11835_v19 = vpop.permute.xlu0 %5314  ;;  %v5281_v10 = vpop.permute.xlu1 %5280  ;;  %9371 = vmatprep.subr.bf16.mxu1 %v9370_v7 }
 0xfce   : > { %v5375_v62 = vadd.f32 %v11697_v37, %v5281_v10  ;;  %9373 = vmatpush3.bf16.msra.mxu1 %v9370_v7  ;;  %v5425_v37 = vld [vmem:[%s12546_s19 + $0x18] sm:$0xff] }
 0xfd0   : > { %6244 = vrot.lane.b32.xlu1 %v5375_v62, %s12683_s1 }
 0xfd1   : > { %v5283_v55 = vpop.permute.xlu0 %5282  ;;  %v11845_v39 = vpop.permute.xlu1 %5316  ;;  %9015 = vmatmul.mubr.msk.f32.vlgmr.msra.gmra.mrb[112].mxu1 %vm906_vm1, %v5423_v5  ;;  %v5438_v5 = vld [vmem:[%s12546_s19 + $0x80] sm:$0xff] }
 0xfd2   : > { %v5376_v53 = vadd.f32 %v5283_v55, %v11703_v56  ;;  %9017 = vmatprep.mubr.msk.f32.mxu1 %vm906_vm1, %v5424_v61  ;;  %v5427_v56 = vld [vmem:[%s12546_s19 + $0x28] sm:$0xff] }
 0xfd4   : > { %6246 = vrot.lane.b32.xlu0 %v5376_v53, %s12683_s1 }
 0xfd5   : > { %v11857_v63 = vpop.permute.xlu0 %5318  ;;  %v5285_v16 = vpop.permute.xlu1 %5284  ;;  %9018 = vmatmul.mubr.msk.f32.gmra.mrb[114].mxu1 %vm906_vm1, %v5425_v37  ;;  %v5440_v37 = vld [vmem:[%s12546_s19 + $0x90] sm:$0xff] }
 0xfd6   : > { %v5377_v8 = vadd.f32 %v11701_v51, %v5285_v16  ;;  %9020 = vmatprep.mubr.msk.f32.mxu1 %vm906_vm1, %v5426_v43  ;;  %v5429_v51 = vld [vmem:[%s12546_s19 + $0x38] sm:$0xff] }
 0xfd8   : > { %6248 = vrot.lane.b32.xlu1 %v5377_v8, %s12683_s1 }
 0xfd9   : > { %v5287_v17 = vpop.permute.xlu0 %5286  ;;  %v11869_v44 = vpop.permute.xlu1 %5320  ;;  %9021 = vmatmul.mubr.msk.f32.gmra.mrb[116].mxu1 %vm906_vm1, %v5427_v56  ;;  %v5442_v56 = vld [vmem:[%s12546_s19 + $0xa0] sm:$0xff] }
 0xfda   : > { %v5378_v1 = vadd.f32 %v5287_v17, %v11707_v22  ;;  %9023 = vmatprep.mubr.msk.f32.mxu1 %vm906_vm1, %v5428_v21  ;;  %v5431_v22 = vld [vmem:[%s12546_s19 + $0x48] sm:$0xff] }
 0xfdc   : > { %6250 = vrot.lane.b32.xlu0 %v5378_v1, %s12683_s1 }
 0xfdd   : > { %v11881_v50 = vpop.permute.xlu0 %5322  ;;  %v5289_v38 = vpop.permute.xlu1 %5288  ;;  %9024 = vmatmul.mubr.msk.f32.gmra.mrb[118].mxu1 %vm906_vm1, %v5429_v51  ;;  %v5444_v51 = vld [vmem:[%s12546_s19 + $0xb0] sm:$0xff] }
 0xfde   : > { %v5379_v6 = vadd.f32 %v11705_v31, %v5289_v38  ;;  %9026 = vmatprep.mubr.msk.f32.mxu1 %vm906_vm1, %v5430_v3  ;;  %v5433_v31 = vld [vmem:[%s12546_s19 + $0x58] sm:$0xff] }
 0xfe0   : > { %6252 = vrot.lane.b32.xlu1 %v5379_v6, %s12683_s1 }
 0xfe1   : > { %v5291_v23 = vpop.permute.xlu0 %5290  ;;  %v11893_v4 = vpop.permute.xlu1 %5324  ;;  %9027 = vmatmul.mubr.msk.f32.gmra.mrb[120].mxu1 %vm906_vm1, %v5431_v22  ;;  %v5446_v22 = vld [vmem:[%s12546_s19 + $0xc0] sm:$0xff] }
 0xfe2   : > { %v5380_v58 = vadd.f32 %v5291_v23, %v11711_v59  ;;  %9029 = vmatprep.mubr.msk.f32.mxu1 %vm906_vm1, %v5432_v9  ;;  %v5435_v59 = vld [vmem:[%s12546_s19 + $0x68] sm:$0xff]  ;;  %v5390_v23 = vadd.f32 %v11829_v15, %v11731_v45  ;;  %v5391_v45 = vadd.f32 %v11729_v49, %v11831_v18  ;;  %v5449_v15 = vld [vmem:[%s12546_s19 + $0xd8] sm:$0xff]  ;;  %v5393_v49 = vadd.f32 %v11733_v35, %v11845_v39 }
 0xfe3   : > { %v5451_v18 = vld [vmem:[%s12546_s19 + $0xe8] sm:$0xff]  ;;  %v5395_v35 = vadd.f32 %v11745_v42, %v11869_v44  ;;  %v5453_v39 = vld [vmem:[%s12546_s19 + $0xf8] sm:$0xff]  ;;  %v5397_v42 = vadd.f32 %v11757_v60, %v11893_v4 }
 0xfe4   : > { %6254 = vrot.lane.b32.xlu0 %v5380_v58, %s12683_s1  ;;  %v5447_v58 = vld [vmem:[%s12546_s19 + $0xc8] sm:$0xff]  ;;  %v5457_v4 = vld [vmem:[%s12546_s19 + $0x118] sm:$0xff] }
 0xfe5   : > { %v11905_v41 = vpop.permute.xlu0 %5326  ;;  %v5293_v20 = vpop.permute.xlu1 %5292  ;;  %9030 = vmatmul.mubr.msk.f32.gmra.mrb[122].mxu1 %vm906_vm1, %v5433_v31  ;;  %v5448_v31 = vld [vmem:[%s12546_s19 + $0xd0] sm:$0xff]  ;;  %v5455_v44 = vld [vmem:[%s12546_s19 + $0x108] sm:$0xff] }
 0xfe6   : > { %v5381_v30 = vadd.f32 %v11709_v13, %v5293_v20  ;;  %9032 = vmatprep.mubr.msk.f32.mxu1 %vm906_vm1, %v5434_v0  ;;  %v5437_v13 = vld [vmem:[%s12546_s19 + $0x78] sm:$0xff]  ;;  %v5450_v0 = vld [vmem:[%s12546_s19 + $0xe0] sm:$0xff] }
 0xfe8   : > { %6256 = vrot.lane.b32.xlu1 %v5381_v30, %s12683_s1 }
 0xfe9   : > { %v5295_v7 = vpop.permute.xlu0 %5294  ;;  %v11917_v10 = vpop.permute.xlu1 %5328  ;;  %9033 = vmatmul.mubr.msk.f32.gmra.mrb[124].mxu1 %vm906_vm1, %v5435_v59 }
 0xfea   : > { %v5382_v62 = vadd.f32 %v5295_v7, %v11715_v29  ;;  %9035 = vmatprep.mubr.msk.f32.mxu1 %vm906_vm1, %v5436_v28  ;;  %v5439_v29 = vld [vmem:[%s12546_s19 + $0x88] sm:$0xff]  ;;  %v5399_v60 = vadd.f32 %v11769_v11, %v11917_v10 }
 0xfec   : > { %6258 = vrot.lane.b32.xlu0 %v5382_v62, %s12683_s1 }
 0xfed   : > { %v11929_v61 = vpop.permute.xlu0 %5330  ;;  %v5297_v55 = vpop.permute.xlu1 %5296  ;;  %9036 = vmatmul.mubr.msk.f32.gmra.mrb[126].mxu1 %vm906_vm1, %v5437_v13 }
 0xfee   : > { %v5383_v53 = vadd.f32 %v11713_v54, %v5297_v55  ;;  %9038 = vmatprep.mubr.msk.f32.mxu1 %vm906_vm1, %v5438_v5  ;;  %v5441_v54 = vld [vmem:[%s12546_s19 + $0x98] sm:$0xff] }
 0xff0   : > { %6260 = vrot.lane.b32.xlu1 %v5383_v53, %s12683_s1 }
 0xff1   : > { %v5299_v43 = vpop.permute.xlu0 %5298  ;;  %v11941_v16 = vpop.permute.xlu1 %5332  ;;  %9039 = vmatmul.mubr.msk.f32.gmra.mrb[128].mxu1 %vm906_vm1, %v5439_v29 }
 0xff2   : > { %v5384_v8 = vadd.f32 %v5299_v43, %v11719_v47  ;;  %9041 = vmatprep.mubr.msk.f32.mxu1 %vm906_vm1, %v5440_v37  ;;  %v5443_v47 = vld [vmem:[%s12546_s19 + $0xa8] sm:$0xff]  ;;  %v5401_v20 = vadd.f32 %v11781_v12, %v11941_v16 }
 0xff4   : > { %6262 = vrot.lane.b32.xlu0 %v5384_v8, %s12683_s1 }
 0xff5   : > { %v11953_v21 = vpop.permute.xlu0 %5334  ;;  %v5301_v17 = vpop.permute.xlu1 %5300  ;;  %9042 = vmatmul.mubr.msk.f32.gmra.mrb[130].mxu1 %vm906_vm1, %v5441_v54 }
 0xff6   : > { %v5385_v1 = vadd.f32 %v11717_v24, %v5301_v17  ;;  %9044 = vmatprep.mubr.msk.f32.mxu1 %vm906_vm1, %v5442_v56  ;;  %v5445_v24 = vld [vmem:[%s12546_s19 + $0xb8] sm:$0xff]  ;;  %v5402_v11 = vadd.f32 %v11953_v21, %v11795_v32 }
 0xff8   : > { %6264 = vrot.lane.b32.xlu1 %v5385_v1, %s12683_s1 }
 0xff9   : > { %v5303_v3 = vpop.permute.xlu0 %5302  ;;  %v5337_v38 = vpop.permute.xlu1 %5336  ;;  %9045 = vmatmul.mubr.msk.f32.gmra.mrb[132].mxu1 %vm906_vm1, %v5443_v47 }
 0xffa   : > { %v5386_v6 = vadd.f32 %v5303_v3, %v11723_v34  ;;  %9047 = vmatprep.mubr.msk.f32.mxu1 %vm906_vm1, %v5444_v51  ;;  %v5403_v30 = vadd.f32 %v11793_v52, %v5337_v38  ;;  %v6403_v52 = vld [vmem:[%s12547_s20 + $0x8] sm:$0xff] }
 0xffb   : > { %6594 = vmatprep.mubr.f32.mxu0 %v6403_v52 }
 0xffc   : > { %6266 = vrot.lane.b32.xlu0 %v5386_v6, %s12683_s1 }
 0xffd   : > { %v5305_v9 = vpop.permute.xlu1 %5304  ;;  %9048 = vmatmul.mubr.msk.f32.gmra.mrb[134].mxu1 %vm906_vm1, %v5445_v24 }
 0xffe   : > { %v5387_v34 = vadd.f32 %v11721_v26, %v5305_v9  ;;  %9050 = vmatprep.mubr.msk.f32.mxu1 %vm906_vm1, %v5446_v22  ;;  %v5392_v26 = vadd.f32 %v11835_v19, %v11735_v25  ;;  %v5394_v25 = vadd.f32 %v11857_v63, %v11747_v40  ;;  %v5452_v19 = vld [vmem:[%s12546_s19 + $0xf0] sm:$0xff]  ;;  %v5396_v40 = vadd.f32 %v11881_v50, %v11759_v57  ;;  %v5454_v63 = vld [vmem:[%s12546_s19 + $0x100] sm:$0xff] }
 0xfff   : > { %v5398_v57 = vadd.f32 %v11905_v41, %v11771_v48  ;;  %v5456_v50 = vld [vmem:[%s12546_s19 + $0x110] sm:$0xff]  ;;  %v5400_v48 = vadd.f32 %v11929_v61, %v11783_v27  ;;  %v5339_v41 = vpop.permute.xlu0 %5338 }
0x1000   : > { %6268 = vrot.lane.b32.xlu1 %v5387_v34, %s12683_s1  ;;  %6274 = vrot.lane.b32.xlu0 %v5390_v23, %s12683_s1  ;;  %v5404_v59 = vadd.f32 %v5339_v41, %v11807_v14 }
0x1001   : > { %9051 = vmatmul.mubr.msk.f32.gmra.mrb[136].mxu1 %vm906_vm1, %v5447_v58  ;;  %v5341_v27 = vpop.permute.xlu1 %5340 }
0x1002   : > { %9053 = vmatprep.mubr.msk.f32.mxu1 %vm906_vm1, %v5448_v31  ;;  %v5405_v12 = vadd.f32 %v11805_v33, %v5341_v27  ;;  %v6438_v27 = vld [vmem:[%s12548_s21 + $0x20] sm:$0xff] }
0x1003   : > { %v5307_v28 = vpop.permute.xlu0 %5306 }
0x1004   : > { %6276 = vrot.lane.b32.xlu1 %v5391_v45, %s12683_s1  ;;  %6278 = vrot.lane.b32.xlu0 %v5392_v26, %s12683_s1  ;;  %v5388_v7 = vadd.f32 %v5307_v28, %v11727_v2 }
0x1005   : > { %9054 = vmatmul.mubr.msk.f32.gmra.mrb[138].mxu1 %vm906_vm1, %v5449_v15  ;;  %v5309_v10 = vpop.permute.xlu1 %5308  ;;  %v6434_v15 = vld [vmem:[%s12548_s21] sm:$0xff] }
0x1006   : > { %9056 = vmatprep.mubr.msk.f32.mxu1 %vm906_vm1, %v5450_v0  ;;  %v5389_v32 = vadd.f32 %v11725_v46, %v5309_v10  ;;  %v6435_v0 = vld [vmem:[%s12548_s21 + $0x8] sm:$0xff] }
0x1008   : > { %6280 = vrot.lane.b32.xlu1 %v5393_v49, %s12683_s1  ;;  %6282 = vrot.lane.b32.xlu0 %v5394_v25, %s12683_s1 }
0x1009   : > { %9057 = vmatmul.mubr.msk.f32.gmra.mrb[140].mxu1 %vm906_vm1, %v5451_v18 }
0x100a   : > { %9059 = vmatprep.mubr.msk.f32.mxu1 %vm906_vm1, %v5452_v19  ;;  %v9695_v19 = vmov 0  }
0x100b   : > { %9536 = vset.pattern.permute.xlu0 %v9695_v19  ;;  %9537 = vset.pattern.permute.xlu1 %v9695_v19 }
0x100c   : > { %6284 = vrot.lane.b32.xlu1 %v5395_v35, %s12683_s1  ;;  %6286 = vrot.lane.b32.xlu0 %v5396_v40, %s12683_s1 }
0x100d   : > { %9060 = vmatmul.mubr.msk.f32.gmra.mrb[142].mxu1 %vm906_vm1, %v5453_v39 }
0x100e   : > { %9062 = vmatprep.mubr.msk.f32.mxu1 %vm906_vm1, %v5454_v63  ;;  %v6436_v63 = vld [vmem:[%s12548_s21 + $0x10] sm:$0xff] }
0x1010   : > { %6288 = vrot.lane.b32.xlu1 %v5397_v42, %s12683_s1  ;;  %6290 = vrot.lane.b32.xlu0 %v5398_v57, %s12683_s1  ;;  %v6437_v42 = vld [vmem:[%s12548_s21 + $0x18] sm:$0xff] }
0x1011   : > { %9063 = vmatmul.mubr.msk.f32.gmra.mrb[144].mxu1 %vm906_vm1, %v5455_v44 }
0x1012   : > { %9065 = vmatprep.mubr.msk.f32.mxu1 %vm906_vm1, %v5456_v50 }
0x1014   : > { %6292 = vrot.lane.b32.xlu1 %v5399_v60, %s12683_s1  ;;  %6294 = vrot.lane.b32.xlu0 %v5400_v48, %s12683_s1 }
0x1015   : > { %9066 = vmatmul.mubr.msk.f32.gmra.mrb[146].mxu1 %vm906_vm1, %v5457_v4 }
0x1018   : > { %6296 = vrot.lane.b32.xlu1 %v5401_v20, %s12683_s1  ;;  %6298 = vrot.lane.b32.xlu0 %v5402_v11, %s12683_s1 }
0x101c   : > { %6300 = vrot.lane.b32.xlu1 %v5403_v30, %s12683_s1  ;;  %6302 = vrot.lane.b32.xlu0 %v5404_v59, %s12683_s1  ;;  %v6439_v30 = vld [vmem:[%s12548_s21 + $0x28] sm:$0xff] }
0x1020   : > { %6304 = vrot.lane.b32.xlu1 %v5405_v12, %s12683_s1  ;;  %6270 = vrot.lane.b32.xlu0 %v5388_v7, %s12683_s1 }
0x1024   : > { %6272 = vrot.lane.b32.xlu1 %v5389_v32, %s12683_s1  ;;  %6452 = vperm.xlu0 %9536, %v6434_v15  }
0x1028   : > { %6457 = vperm.xlu1 %9537, %v6435_v0   ;;  %6467 = vperm.xlu0 %9536, %v6437_v42   ;;  %v6444_v0 = vld [vmem:[%s12548_s21 + $0x50] sm:$0xff]  ;;  %v6446_v42 = vld [vmem:[%s12548_s21 + $0x60] sm:$0xff] }
0x102c   : > { %6462 = vperm.xlu1 %9537, %v6436_v63   ;;  %6477 = vperm.xlu0 %9536, %v6439_v30  }
0x1030   : > { %6472 = vperm.xlu1 %9537, %v6438_v27  }
0x103e   : > { %v6243_v62 = vpop.permute.xlu0 %6242 }
0x1042   : > { %v6245_v14 = vpop.permute.xlu1 %6244 }
0x1046   : > { %v6247_v2 = vpop.permute.xlu0 %6246 }
0x104a   : > { %v6249_v13 = vpop.permute.xlu1 %6248 }
0x104e   : > { %v6251_v33 = vpop.permute.xlu0 %6250 }
0x1052   : > { %v6253_v5 = vpop.permute.xlu1 %6252 }
0x1056   : > { %v6255_v55 = vpop.permute.xlu0 %6254 }
0x105a   : > { %v6257_v61 = vpop.permute.xlu1 %6256 }
0x105e   : > { %v12077_v29 = vpop.permute.xlu0 %6258 }
0x1062   : > { %v12075_v53 = vpop.permute.xlu1 %6260 }
0x1066   : > { %v12081_v37 = vpop.permute.xlu0 %6262 }
0x106a   : > { %v12079_v46 = vpop.permute.xlu1 %6264 }
0x106e   : > { %v12085_v16 = vpop.permute.xlu0 %6266 }
0x1072   : > { %v12083_v43 = vpop.permute.xlu1 %6268  ;;  %v12089_v54 = vpop.permute.xlu0 %6274 }
0x1076   : > { %v12087_v8 = vpop.permute.xlu1 %6276  ;;  %v12093_v21 = vpop.permute.xlu0 %6278 }
0x107a   : > { %v12091_v56 = vpop.permute.xlu1 %6280  ;;  %v12097_v47 = vpop.permute.xlu0 %6282 }
0x107e   : > { %v12095_v17 = vpop.permute.xlu1 %6284  ;;  %v12101_v24 = vpop.permute.xlu0 %6286 }
0x1082   : > { %v12099_v6 = vpop.permute.xlu1 %6288  ;;  %v12111_v49 = vpop.permute.xlu0 %6290 }
0x1086   : > { %v12103_v31 = vpop.permute.xlu1 %6292  ;;  %v12125_v20 = vpop.permute.xlu0 %6294 }
0x108a   : > { %v12121_v48 = vpop.permute.xlu1 %6296 }
0x10a4   : > { %v9016_v1 = vpop.f32.mrb[112].mxu1 }
0x10a5   : > { %v6035_v51 = vpop.f32.mrb[113].mxu1 }
0x10a8   : > { %v9019_v3 = vpop.f32.mrb[114].mxu1 }
0x10a9   : > { %v6043_v38 = vpop.f32.mrb[115].mxu1 }
0x10aa   : > { %v6442_v38 = vld [vmem:[%s12548_s21 + $0x40] sm:$0xff] }
0x10ac   : > { %v9022_v22 = vpop.f32.mrb[116].mxu1 }
0x10ad   : > { %v6339_v9 = vadd.f32 %v9022_v22, %v6245_v14  ;;  %v6051_v23 = vpop.f32.mrb[117].mxu1  ;;  %v6440_v14 = vld [vmem:[%s12548_s21 + $0x30] sm:$0xff]  ;;  %v6443_v22 = vld [vmem:[%s12548_s21 + $0x48] sm:$0xff] }
0x10ae   : > { %v6338_v34 = vadd.f32 %v6243_v62, %v6051_v23  ;;  %v6441_v62 = vld [vmem:[%s12548_s21 + $0x38] sm:$0xff]  ;;  %6482 = vperm.xlu1 %9537, %v6440_v14  }
0x10af   : > { %v6371_v58 = vmax.f32 %v6339_v9, 0.0  ;;  %6487 = vperm.xlu0 %9536, %v6441_v62  }
0x10b0   : > { %v6370_v45 = vmax.f32 %v6338_v34, 0.0  ;;  %v9025_v26 = vpop.f32.mrb[118].mxu1 }
0x10b1   : > { %v6341_v25 = vadd.f32 %v9025_v26, %v6249_v13  ;;  %v6061_v18 = vpop.f32.mrb[119].mxu1  ;;  %v12141_v13 = vpop.permute.xlu1 %6300 }
0x10b2   : > { %v12113_v35 = vpack.c.bf16 %v6371_v58, %v6370_v45  ;;  %v6340_v40 = vadd.f32 %v6247_v2, %v6061_v18  ;;  %6492 = vperm.xlu1 %9537, %v6442_v38  }
0x10b3   : > { %v6373_v39 = vmax.f32 %v6341_v25, 0.0  ;;  %6497 = vperm.xlu0 %9536, %v6443_v22  }
0x10b4   : > { %v6372_v57 = vmax.f32 %v6340_v40, 0.0  ;;  %v9028_v44 = vpop.f32.mrb[120].mxu1 }
0x10b5   : > { %v6343_v50 = vadd.f32 %v9028_v44, %v6253_v5  ;;  %v6071_v60 = vpop.f32.mrb[121].mxu1  ;;  %v12156_v58 = vpop.permute.xlu1 %6304 }
0x10b6   : > { %v12123_v4 = vpack.c.bf16 %v6373_v39, %v6372_v57  ;;  %v6342_v41 = vadd.f32 %v6251_v33, %v6071_v60  ;;  %v12143_v33 = vpop.permute.xlu0 %6298  ;;  %6502 = vperm.xlu1 %9537, %v6444_v0   ;;  %v6447_v57 = vld [vmem:[%s12548_s21 + $0x68] sm:$0xff] }
0x10b7   : > { %v6375_v11 = vmax.f32 %v6343_v50, 0.0 }
0x10b8   : > { %v6374_v59 = vmax.f32 %v6342_v41, 0.0  ;;  %v9031_v28 = vpop.f32.mrb[122].mxu1 }
0x10b9   : > { %v6345_v7 = vadd.f32 %v9031_v28, %v6257_v61  ;;  %v6081_v12 = vpop.f32.mrb[123].mxu1  ;;  %v6273_v44 = vpop.permute.xlu1 %6272  ;;  %v6449_v28 = vld [vmem:[%s12548_s21 + $0x78] sm:$0xff] }
0x10ba   : > { %v12133_v10 = vpack.c.bf16 %v6375_v11, %v6374_v59  ;;  %v6344_v32 = vadd.f32 %v6255_v55, %v6081_v12  ;;  %v12161_v26 = vpop.permute.xlu0 %6302  ;;  %6512 = vperm.xlu1 %9537, %v6446_v42   ;;  %v6448_v59 = vld [vmem:[%s12548_s21 + $0x70] sm:$0xff] }
0x10bb   : > { %v6377_v52 = vmax.f32 %v6345_v7, 0.0 }
0x10bc   : > { %v6376_v2 = vmax.f32 %v6344_v32, 0.0  ;;  %v9034_v5 = vpop.f32.mrb[124].mxu1 }
0x10bd   : > { %v6347_v61 = vadd.f32 %v9034_v5, %v12075_v53  ;;  %v6091_v55 = vpop.f32.mrb[125].mxu1 }
0x10be   : > { %v12146_v1 = vpack.c.bf16 %v6377_v52, %v6376_v2  ;;  %v6346_v51 = vadd.f32 %v12077_v29, %v6091_v55  ;;  %6522 = vperm.xlu1 %9537, %v6448_v59  }
0x10bf   : > { %v6379_v3 = vmax.f32 %v6347_v61, 0.0 }
0x10c0   : > { %v6378_v9 = vmax.f32 %v6346_v51, 0.0  ;;  %v9037_v23 = vpop.f32.mrb[126].mxu1 }
0x10c1   : > { %v6349_v53 = vadd.f32 %v9037_v23, %v12079_v46  ;;  %v6101_v34 = vpop.f32.mrb[127].mxu1  ;;  %v6445_v46 = vld [vmem:[%s12548_s21 + $0x58] sm:$0xff] }
0x10c2   : > { %v12158_v45 = vpack.c.bf16 %v6379_v3, %v6378_v9  ;;  %v6348_v29 = vadd.f32 %v12081_v37, %v6101_v34  ;;  %6507 = vperm.xlu0 %9536, %v6445_v46  }
0x10c3   : > { %v6381_v15 = vmax.f32 %v6349_v53, 0.0 }
0x10c4   : > { %v6380_v25 = vmax.f32 %v6348_v29, 0.0  ;;  %v9040_v18 = vpop.f32.mrb[128].mxu1 }
0x10c5   : > { %v6351_v19 = vadd.f32 %v9040_v18, %v12083_v43  ;;  %v6111_v40 = vpop.f32.mrb[129].mxu1  ;;  %v6271_v43 = vpop.permute.xlu0 %6270 }
0x10c6   : > { %v12170_v39 = vpack.c.bf16 %v6381_v15, %v6380_v25  ;;  %v6350_v37 = vadd.f32 %v12085_v16, %v6111_v40  ;;  %6517 = vperm.xlu0 %9536, %v6447_v57  }
0x10c7   : > { %v6383_v63 = vmax.f32 %v6351_v19, 0.0 }
0x10c8   : > { %v6382_v50 = vmax.f32 %v6350_v37, 0.0  ;;  %v9043_v60 = vpop.f32.mrb[130].mxu1 }
0x10c9   : > { %v6353_v41 = vadd.f32 %v9043_v60, %v6273_v44  ;;  %v6121_v11 = vpop.f32.mrb[131].mxu1 }
0x10ca   : > { %v12179_v27 = vpack.c.bf16 %v6383_v63, %v6382_v50  ;;  %v6352_v16 = vadd.f32 %v6271_v43, %v6121_v11  ;;  %6527 = vperm.xlu0 %9536, %v6449_v28  }
0x10cb   : > { %v6385_v30 = vmax.f32 %v6353_v41, 0.0 }
0x10cc   : > { %v6384_v7 = vmax.f32 %v6352_v16, 0.0  ;;  %v9046_v12 = vpop.f32.mrb[132].mxu1 }
0x10cd   : > { %v6355_v32 = vadd.f32 %v9046_v12, %v12087_v8  ;;  %v6131_v52 = vpop.f32.mrb[133].mxu1  ;;  %v6408_v12 = vld [vmem:[%s12547_s20 + $0x30] sm:$0xff] }
0x10ce   : > { %v12188_v14 = vpack.c.bf16 %v6385_v30, %v6384_v7  ;;  %v6354_v62 = vadd.f32 %v12089_v54, %v6131_v52  ;;  %v6409_v7 = vld [vmem:[%s12547_s20 + $0x38] sm:$0xff]  ;;  %v6410_v52 = vld [vmem:[%s12547_s20 + $0x40] sm:$0xff] }
0x10cf   : > { %v6387_v2 = vmax.f32 %v6355_v32, 0.0  ;;  %v6411_v32 = vld [vmem:[%s12547_s20 + $0x48] sm:$0xff] }
0x10d0   : > { %v6386_v5 = vmax.f32 %v6354_v62, 0.0  ;;  %v9049_v61 = vpop.f32.mrb[134].mxu1  ;;  %v6412_v62 = vld [vmem:[%s12547_s20 + $0x50] sm:$0xff] }
0x10d1   : > { %v6357_v55 = vadd.f32 %v9049_v61, %v12091_v56  ;;  %v6141_v51 = vpop.f32.mrb[135].mxu1  ;;  %v6417_v61 = vld [vmem:[%s12547_s20 + $0x78] sm:$0xff] }
0x10d2   : > { %v9374_v3 = vpack.c.bf16 %v6387_v2, %v6386_v5  ;;  %v6356_v38 = vadd.f32 %v12093_v21, %v6141_v51  ;;  %v6415_v2 = vld [vmem:[%s12547_s20 + $0x68] sm:$0xff]  ;;  %v6414_v5 = vld [vmem:[%s12547_s20 + $0x60] sm:$0xff] }
0x10d3   : > { %v6389_v22 = vmax.f32 %v6357_v55, 0.0  ;;  %v6416_v55 = vld [vmem:[%s12547_s20 + $0x70] sm:$0xff]  ;;  %v6419_v51 = vld [vmem:[%s12547_s20 + $0x88] sm:$0xff] }
0x10d4   : > { %v6388_v9 = vmax.f32 %v6356_v38, 0.0  ;;  %v9052_v23 = vpop.f32.mrb[136].mxu1  ;;  %9375 = vmatprep.subr.bf16.mxu0 %v9374_v3  ;;  %v6418_v3 = vld [vmem:[%s12547_s20 + $0x80] sm:$0xff]  ;;  %v6421_v38 = vld [vmem:[%s12547_s20 + $0x98] sm:$0xff] }
0x10d5   : > { %v6359_v8 = vadd.f32 %v9052_v23, %v12095_v17  ;;  %v6151_v53 = vpop.f32.mrb[137].mxu1  ;;  %9377 = vmatpush3.bf16.msra.mxu0 %v12113_v35  ;;  %v6422_v23 = vld [vmem:[%s12547_s20 + $0xa0] sm:$0xff] }
0x10d6   : > { %v9378_v54 = vpack.c.bf16 %v6389_v22, %v6388_v9  ;;  %v6358_v34 = vadd.f32 %v12097_v47, %v6151_v53  ;;  %v6420_v22 = vld [vmem:[%s12547_s20 + $0x90] sm:$0xff]  ;;  %v6423_v9 = vld [vmem:[%s12547_s20 + $0xa8] sm:$0xff] }
0x10d7   : > { %v6391_v29 = vmax.f32 %v6359_v8, 0.0  ;;  %v6425_v8 = vld [vmem:[%s12547_s20 + $0xb8] sm:$0xff]  ;;  %v6424_v53 = vld [vmem:[%s12547_s20 + $0xb0] sm:$0xff] }
0x10d8   : > { %v6390_v15 = vmax.f32 %v6358_v34, 0.0  ;;  %v9055_v0 = vpop.f32.mrb[138].mxu1  ;;  %9379 = vmatprep.subr.bf16.mxu0 %v9378_v54  ;;  %v6427_v54 = vld [vmem:[%s12547_s20 + $0xc8] sm:$0xff]  ;;  %v6426_v34 = vld [vmem:[%s12547_s20 + $0xc0] sm:$0xff] }
0x10d9   : > { %v6361_v56 = vadd.f32 %v9055_v0, %v12099_v6  ;;  %v6161_v46 = vpop.f32.mrb[139].mxu1  ;;  %9381 = vmatpush3.bf16.msra.mxu0 %v12123_v4  ;;  %v6431_v0 = vld [vmem:[%s12547_s20 + $0xe8] sm:$0xff] }
0x10da   : > { %v9382_v21 = vpack.c.bf16 %v6391_v29, %v6390_v15  ;;  %v6360_v25 = vadd.f32 %v12101_v24, %v6161_v46  ;;  %v6429_v29 = vld [vmem:[%s12547_s20 + $0xd8] sm:$0xff]  ;;  %v6428_v15 = vld [vmem:[%s12547_s20 + $0xd0] sm:$0xff] }
0x10db   : > { %v6393_v18 = vmax.f32 %v6361_v56, 0.0  ;;  %v6430_v56 = vld [vmem:[%s12547_s20 + $0xe0] sm:$0xff]  ;;  %v6433_v46 = vld [vmem:[%s12547_s20 + $0xf8] sm:$0xff] }
0x10dc   : > { %v6392_v17 = vmax.f32 %v6360_v25, 0.0  ;;  %v9058_v19 = vpop.f32.mrb[140].mxu1  ;;  %9383 = vmatprep.subr.bf16.mxu0 %v9382_v21  ;;  %v6432_v21 = vld [vmem:[%s12547_s20 + $0xf0] sm:$0xff]  ;;  %v12307_v25 = vmul.u32 2, %v9933_v36 }
0x10dd   : > { %v6363_v35 = vadd.f32 %v9058_v19, %v12103_v31  ;;  %v6171_v40 = vpop.f32.mrb[141].mxu1  ;;  %9385 = vmatpush3.bf16.msra.mxu0 %v12133_v10  ;;  %v12747_v36 = vld [vmem:[#allocation4_spill] sm:$0xff] }
0x10de   : > { %v9386_v47 = vpack.c.bf16 %v6393_v18, %v6392_v17  ;;  %v6362_v37 = vadd.f32 %v12111_v49, %v6171_v40  ;;  %v12742_v18 = vld [vmem:[#allocation2_spill] sm:$0xff]  ;;  %v12743_v17 = vld [vmem:[#allocation3_spill] sm:$0xff]  ;;  %vm6838_vm11 = vcmp.eq.s32.totalorder %v12747_v36, %v12307_v25  ;;  %v12748_v40 = vld [vmem:[#allocation5_spill] sm:$0xff] }
0x10df   : > { %v6395_v63 = vmax.f32 %v6363_v35, 0.0  ;;  %vm6836_vm1 = vcmp.eq.s32.totalorder %v12742_v18, %v12307_v25  ;;  %vm6837_vm8 = vcmp.eq.s32.totalorder %v12743_v17, %v12307_v25  ;;  %v12746_v35 = vmov 1.0|1.0   ;;  %vm9455_vm10 = vmpackc.low %vm7213_vm7, %vm6838_vm11 }
0x10e0   : > { %v6394_v6 = vmax.f32 %v6362_v37, 0.0  ;;  %v9061_v42 = vpop.f32.mrb[142].mxu1  ;;  %9387 = vmatprep.subr.bf16.mxu0 %v9386_v47  ;;  %vm12313_vm9 = vmpackc.low %vm6837_vm8, %vm6836_vm1  ;;  %vm6839_vm13 = vcmp.eq.s32.totalorder %v12748_v40, %v12307_v25  ;;  %v12749_v47 = vld [vmem:[#allocation6_spill] sm:$0xff]  ;;  %v12750_v37 = vld [vmem:[#allocation7_spill] sm:$0xff] }
0x10e1   : > { %v6365_v4 = vadd.f32 %v9061_v42, %v12121_v48  ;;  %v6181_v57 = vpop.f32.mrb[143].mxu1  ;;  %9389 = vmatpush3.bf16.msra.mxu0 %v12146_v1  ;;  %9407 = vmatprep.subr.msk.bf16.mxu1 %vm12313_vm9, %v12746_v35  ;;  %vm9410_vm14 = vmpackc.low %vm6839_vm13, %vm6838_vm11  ;;  %vm6840_vm15 = vcmp.eq.s32.totalorder %v12749_v47, %v12307_v25  ;;  %vm6841_vm2 = vcmp.eq.s32.totalorder %v12750_v37, %v12307_v25  ;;  %v12751_v42 = vld [vmem:[#allocation8_spill] sm:$0xff] }
0x10e2   : > { %v9390_v24 = vpack.c.bf16 %v6395_v63, %v6394_v6  ;;  %v6364_v44 = vadd.f32 %v12125_v20, %v6181_v57  ;;  %9409 = vmatpush3.bf16.msk.msra.mxu1 %vm12313_vm9, %v12746_v35  ;;  %vm9414_vm3 = vmpackc.low %vm6841_vm2, %vm6840_vm15  ;;  %vm6842_vm6 = vcmp.eq.s32.totalorder %v12751_v42, %v12307_v25  ;;  %v12752_v57 = vmov 0.0  }
0x10e3   : > { %v6397_v50 = vmax.f32 %v6365_v4, 0.0  ;;  %9411 = vmatprep.subr.msk.bf16.mxu1 %vm9410_vm14, %v12746_v35 }
0x10e4   : > { %v6396_v31 = vmax.f32 %v6364_v44, 0.0  ;;  %v9064_v60 = vpop.f32.mrb[144].mxu1  ;;  %9391 = vmatprep.subr.bf16.mxu0 %v9390_v24  ;;  %v6849_v24 = vsel %vm6842_vm6, 1.0, %v12752_v57  ;;  %v6453_v44 = vpop.permute.xlu0 %6452 }
0x10e5   : > { %v6367_v10 = vadd.f32 %v9064_v60, %v12141_v13  ;;  %v6191_v43 = vpop.f32.mrb[145].mxu1  ;;  %9393 = vmatpush3.bf16.msra.mxu0 %v12158_v45 }
0x10e6   : > { %v9394_v49 = vpack.c.bf16 %v6397_v50, %v6396_v31  ;;  %v6366_v41 = vadd.f32 %v12143_v33, %v6191_v43  ;;  %v6402_v33 = vld [vmem:[%s12547_s20] sm:$0xff]  ;;  %9413 = vmatpush3.bf16.msk.msra.mxu1 %vm9410_vm14, %v12746_v35 }
0x10e7   : > { %v6399_v11 = vmax.f32 %v6367_v10, 0.0  ;;  %9415 = vmatprep.subr.msk.bf16.mxu1 %vm9414_vm3, %v12746_v35  ;;  %v6458_v10 = vpop.permute.xlu1 %6457 }
0x10e8   : > { %v6398_v48 = vmax.f32 %v6366_v41, 0.0  ;;  %v9067_v16 = vpop.f32.mrb[146].mxu1  ;;  %9395 = vmatprep.subr.bf16.mxu0 %v9394_v49 }
0x10e9   : > { %v6369_v1 = vadd.f32 %v9067_v16, %v12156_v58  ;;  %v6201_v30 = vpop.f32.mrb[147].mxu1  ;;  %9397 = vmatpush3.bf16.msra.mxu0 %v12170_v39  ;;  %v6405_v58 = vld [vmem:[%s12547_s20 + $0x18] sm:$0xff]  ;;  %v6407_v39 = vld [vmem:[%s12547_s20 + $0x28] sm:$0xff] }
0x10ea   : > { %v9398_v20 = vpack.c.bf16 %v6399_v11, %v6398_v48  ;;  %v6368_v59 = vadd.f32 %v12161_v26, %v6201_v30  ;;  %v6404_v26 = vld [vmem:[%s12547_s20 + $0x10] sm:$0xff]  ;;  %9417 = vmatpush3.bf16.msk.msra.mxu1 %vm9414_vm3, %v12746_v35 }
0x10eb   : > { %v6401_v28 = vmax.f32 %v6369_v1, 0.0  ;;  %9080 = vmatprep.subr.msk.mxu1 %vm2651_vm0, %v6849_v24  ;;  %v6463_v30 = vpop.permute.xlu1 %6462 }
0x10ec   : > { %v6400_v13 = vmax.f32 %v6368_v59, 0.0  ;;  %9399 = vmatprep.subr.bf16.mxu0 %v9398_v20 }
0x10ed   : > { %9401 = vmatpush3.bf16.msra.mxu0 %v12179_v27  ;;  %v6406_v27 = vld [vmem:[%s12547_s20 + $0x20] sm:$0xff] }
0x10ee   : > { %v9402_v45 = vpack.c.bf16 %v6401_v28, %v6400_v13  ;;  %9081 = vmatpush3.msk.msra.mxu1 %vm2651_vm0, %v6849_v24  ;;  %vm6850_vm0 = vcmask 441344  }
0x10f0   : > { %9403 = vmatprep.subr.bf16.mxu0 %v9402_v45 }
0x10f1   : > { %9405 = vmatpush3.bf16.msra.mxu0 %v12188_v14  ;;  %v6413_v14 = vld [vmem:[%s12547_s20 + $0x58] sm:$0xff] }
0x10f4   : > { %6595 = vmatmul.mubr.f32.vlgmr.msra.gmra.mrb[140].mxu0 %v6402_v33  ;;  %v6468_v33 = vpop.permute.xlu0 %6467 }
0x10f5   : > { %6599 = vmatprep.mubr.f32.mxu0 %v6405_v58 }
0x10f8   : > { %6600 = vmatmul.mubr.f32.gmra.mrb[142].mxu0 %v6404_v26 }
0x10f9   : > { %6604 = vmatprep.mubr.f32.mxu0 %v6407_v39 }
0x10fc   : > { %6605 = vmatmul.mubr.f32.gmra.mrb[144].mxu0 %v6406_v27 }
0x10fd   : > { %6609 = vmatprep.mubr.f32.mxu0 %v6409_v7 }
0x1100   : > { %6610 = vmatmul.mubr.f32.gmra.mrb[146].mxu0 %v6408_v12  ;;  %v6473_v12 = vpop.permute.xlu1 %6472 }
0x1101   : > { %6614 = vmatprep.mubr.f32.mxu0 %v6411_v32 }
0x1104   : > { %6615 = vmatmul.mubr.f32.gmra.mrb[148].mxu0 %v6410_v52 }
0x1105   : > { %6619 = vmatprep.mubr.f32.mxu0 %v6413_v14 }
0x1108   : > { %6620 = vmatmul.mubr.f32.gmra.mrb[150].mxu0 %v6412_v62 }
0x1109   : > { %6624 = vmatprep.mubr.f32.mxu0 %v6415_v2 }
0x110c   : > { %6625 = vmatmul.mubr.f32.gmra.mrb[152].mxu0 %v6414_v5  ;;  %v6478_v5 = vpop.permute.xlu0 %6477 }
0x110d   : > { %6629 = vmatprep.mubr.f32.mxu0 %v6417_v61 }
0x1110   : > { %6630 = vmatmul.mubr.f32.gmra.mrb[154].mxu0 %v6416_v55 }
0x1111   : > { %6634 = vmatprep.mubr.f32.mxu0 %v6419_v51 }
0x1114   : > { %6635 = vmatmul.mubr.f32.gmra.mrb[156].mxu0 %v6418_v3 }
0x1115   : > { %6639 = vmatprep.mubr.f32.mxu0 %v6421_v38 }
0x1118   : > { %6640 = vmatmul.mubr.f32.gmra.mrb[158].mxu0 %v6420_v22 }
0x1119   : > { %6644 = vmatprep.mubr.f32.mxu0 %v6423_v9 }
0x111c   : > { %6645 = vmatmul.mubr.f32.gmra.mrb[160].mxu0 %v6422_v23 }
0x111d   : > { %6649 = vmatprep.mubr.f32.mxu0 %v6425_v8 }
0x1120   : > { %6650 = vmatmul.mubr.f32.gmra.mrb[162].mxu0 %v6424_v53 }
0x1121   : > { %6654 = vmatprep.mubr.f32.mxu0 %v6427_v54 }
0x1124   : > { %6655 = vmatmul.mubr.f32.gmra.mrb[164].mxu0 %v6426_v34 }
0x1125   : > { %6659 = vmatprep.mubr.f32.mxu0 %v6429_v29 }
0x1128   : > { %6660 = vmatmul.mubr.f32.gmra.mrb[166].mxu0 %v6428_v15 }
0x1129   : > { %6664 = vmatprep.mubr.f32.mxu0 %v6431_v0 }
0x112c   : > { %6665 = vmatmul.mubr.f32.gmra.mrb[168].mxu0 %v6430_v56 }
0x112d   : > { %6669 = vmatprep.mubr.f32.mxu0 %v6433_v46  ;;  %v6483_v22 = vpop.permute.xlu1 %6482 }
0x112e   : > { %v6488_v34 = vpop.permute.xlu0 %6487 }
0x1130   : > { %6670 = vmatmul.mubr.f32.gmra.mrb[170].mxu0 %v6432_v21 }
0x1131   : > { %v6493_v21 = vpop.permute.xlu1 %6492 }
0x11c7   : > { %v8261_v63 = vpop.f32.mrb[140].mxu0 }
0x11c8   : > { %v8262_v6 = vpop.f32.mrb[141].mxu0 }
0x11c9   : > { %v8263_v4 = vadd.f32 %v8262_v6, %v8261_v63  ;;  %v6498_v6 = vpop.permute.xlu0 %6497 }
0x11cb   : > { %v6597_v50 = vadd.f32 %v8263_v4, %v6453_v44  ;;  %v8264_v31 = vpop.f32.mrb[142].mxu0 }
0x11cc   : > { %v8265_v60 = vpop.f32.mrb[143].mxu0 }
0x11cd   : > { %v12346_v43 = vmax.f32 %v6597_v50, 0.0  ;;  %v8266_v49 = vadd.f32 %v8265_v60, %v8264_v31  ;;  %v6503_v31 = vpop.permute.xlu1 %6502 }
0x11cf   : > { %v6602_v41 = vadd.f32 %v8266_v49, %v6458_v10  ;;  %v8267_v11 = vpop.f32.mrb[144].mxu0  ;;  %6707 = vrot.lane.b32.xlu1 %v12346_v43, %s12626_s27 }
0x11d0   : > { %v8268_v48 = vpop.f32.mrb[145].mxu0 }
0x11d1   : > { %v12350_v16 = vmax.f32 %v6602_v41, 0.0  ;;  %v8269_v1 = vadd.f32 %v8268_v48, %v8267_v11  ;;  %v6508_v48 = vpop.permute.xlu0 %6507 }
0x11d3   : > { %v6607_v20 = vadd.f32 %v8269_v1, %v6463_v30  ;;  %v8270_v59 = vpop.f32.mrb[146].mxu0  ;;  %6709 = vrot.lane.b32.xlu0 %v12350_v16, %s12626_s27  ;;  %6771 = vrot.lane.b32.xlu1 %v12346_v43, %s12683_s1 }
0x11d4   : > { %v8271_v28 = vpop.f32.mrb[147].mxu0 }
0x11d5   : > { %v12356_v13 = vmax.f32 %v6607_v20, 0.0  ;;  %v8272_v45 = vadd.f32 %v8271_v28, %v8270_v59 }
0x11d7   : > { %v6612_v58 = vadd.f32 %v8272_v45, %v6468_v33  ;;  %v8273_v26 = vpop.f32.mrb[148].mxu0  ;;  %6773 = vrot.lane.b32.xlu0 %v12350_v16, %s12683_s1  ;;  %6711 = vrot.lane.b32.xlu1 %v12356_v13, %s12626_s27  ;;  %v6513_v45 = vpop.permute.xlu1 %6512 }
0x11d8   : > { %v8274_v39 = vpop.f32.mrb[149].mxu0 }
0x11d9   : > { %v12362_v27 = vmax.f32 %v6612_v58, 0.0  ;;  %v8275_v7 = vadd.f32 %v8274_v39, %v8273_v26 }
0x11db   : > { %v6617_v32 = vadd.f32 %v8275_v7, %v6473_v12  ;;  %v8276_v52 = vpop.f32.mrb[150].mxu0  ;;  %6775 = vrot.lane.b32.xlu1 %v12356_v13, %s12683_s1  ;;  %6713 = vrot.lane.b32.xlu0 %v12362_v27, %s12626_s27  ;;  %v6518_v12 = vpop.permute.xlu0 %6517 }
0x11dc   : > { %v8277_v14 = vpop.f32.mrb[151].mxu0 }
0x11dd   : > { %v12368_v62 = vmax.f32 %v6617_v32, 0.0  ;;  %v8278_v2 = vadd.f32 %v8277_v14, %v8276_v52 }
0x11df   : > { %v6622_v61 = vadd.f32 %v8278_v2, %v6478_v5  ;;  %v8279_v55 = vpop.f32.mrb[152].mxu0  ;;  %6715 = vrot.lane.b32.xlu1 %v12368_v62, %s12626_s27  ;;  %6777 = vrot.lane.b32.xlu0 %v12362_v27, %s12683_s1 }
0x11e0   : > { %v8280_v51 = vpop.f32.mrb[153].mxu0 }
0x11e1   : > { %v12374_v3 = vmax.f32 %v6622_v61, 0.0  ;;  %v8281_v38 = vadd.f32 %v8280_v51, %v8279_v55  ;;  %v6523_v61 = vpop.permute.xlu1 %6522 }
0x11e3   : > { %v6627_v9 = vadd.f32 %v8281_v38, %v6483_v22  ;;  %v8282_v23 = vpop.f32.mrb[154].mxu0  ;;  %6779 = vrot.lane.b32.xlu1 %v12368_v62, %s12683_s1  ;;  %6717 = vrot.lane.b32.xlu0 %v12374_v3, %s12626_s27 }
0x11e4   : > { %v8283_v8 = vpop.f32.mrb[155].mxu0 }
0x11e5   : > { %v12380_v53 = vmax.f32 %v6627_v9, 0.0  ;;  %v8284_v54 = vadd.f32 %v8283_v8, %v8282_v23  ;;  %v6528_v23 = vpop.permute.xlu0 %6527 }
0x11e7   : > { %v6632_v29 = vadd.f32 %v8284_v54, %v6488_v34  ;;  %v8285_v15 = vpop.f32.mrb[156].mxu0  ;;  %6719 = vrot.lane.b32.xlu1 %v12380_v53, %s12626_s27  ;;  %6781 = vrot.lane.b32.xlu0 %v12374_v3, %s12683_s1  ;;  %v7051_v34 = vld [vmem:[%s12550_s23] sm:$0xff] }
0x11e8   : > { %v8286_v0 = vpop.f32.mrb[157].mxu0 }
0x11e9   : > { %v12386_v56 = vmax.f32 %v6632_v29, 0.0  ;;  %v8287_v46 = vadd.f32 %v8286_v0, %v8285_v15  ;;  %v7053_v29 = vld [vmem:[%s12550_s23 + $0x10] sm:$0xff]  ;;  %v7052_v15 = vld [vmem:[%s12550_s23 + $0x8] sm:$0xff]  ;;  %v7054_v0 = vld [vmem:[%s12550_s23 + $0x18] sm:$0xff] }
0x11eb   : > { %v6637_v18 = vadd.f32 %v8287_v46, %v6493_v21  ;;  %v8288_v17 = vpop.f32.mrb[158].mxu0  ;;  %6783 = vrot.lane.b32.xlu1 %v12380_v53, %s12683_s1  ;;  %6721 = vrot.lane.b32.xlu0 %v12386_v56, %s12626_s27 }
0x11ec   : > { %v8289_v47 = vpop.f32.mrb[159].mxu0 }
0x11ed   : > { %v12392_v37 = vmax.f32 %v6637_v18, 0.0  ;;  %v8290_v63 = vadd.f32 %v8289_v47, %v8288_v17 }
0x11ef   : > { %v6642_v42 = vadd.f32 %v8290_v63, %v6498_v6  ;;  %v8291_v4 = vpop.f32.mrb[160].mxu0  ;;  %6723 = vrot.lane.b32.xlu1 %v12392_v37, %s12626_s27  ;;  %6785 = vrot.lane.b32.xlu0 %v12386_v56, %s12683_s1 }
0x11f0   : > { %v8292_v24 = vpop.f32.mrb[161].mxu0 }
0x11f1   : > { %v12398_v44 = vmax.f32 %v6642_v42, 0.0  ;;  %v8293_v50 = vadd.f32 %v8292_v24, %v8291_v4 }
0x11f3   : > { %v6647_v60 = vadd.f32 %v8293_v50, %v6503_v31  ;;  %v8294_v10 = vpop.f32.mrb[162].mxu0  ;;  %6787 = vrot.lane.b32.xlu1 %v12392_v37, %s12683_s1  ;;  %6725 = vrot.lane.b32.xlu0 %v12398_v44, %s12626_s27 }
0x11f4   : > { %v8295_v49 = vpop.f32.mrb[163].mxu0 }
0x11f5   : > { %v12404_v41 = vmax.f32 %v6647_v60, 0.0  ;;  %v8296_v11 = vadd.f32 %v8295_v49, %v8294_v10 }
0x11f7   : > { %v6652_v1 = vadd.f32 %v8296_v11, %v6508_v48  ;;  %v8297_v30 = vpop.f32.mrb[164].mxu0  ;;  %6727 = vrot.lane.b32.xlu1 %v12404_v41, %s12626_s27  ;;  %6789 = vrot.lane.b32.xlu0 %v12398_v44, %s12683_s1 }
0x11f8   : > { %v8298_v20 = vpop.f32.mrb[165].mxu0 }
0x11f9   : > { %v12410_v59 = vmax.f32 %v6652_v1, 0.0  ;;  %v8299_v28 = vadd.f32 %v8298_v20, %v8297_v30 }
0x11fb   : > { %v6657_v33 = vadd.f32 %v8299_v28, %v6513_v45  ;;  %v8300_v58 = vpop.f32.mrb[166].mxu0  ;;  %6791 = vrot.lane.b32.xlu1 %v12404_v41, %s12683_s1  ;;  %6729 = vrot.lane.b32.xlu0 %v12410_v59, %s12626_s27 }
0x11fc   : > { %v8301_v26 = vpop.f32.mrb[167].mxu0 }
0x11fd   : > { %v12416_v39 = vmax.f32 %v6657_v33, 0.0  ;;  %v8302_v7 = vadd.f32 %v8301_v26, %v8300_v58 }
0x11ff   : > { %v6662_v32 = vadd.f32 %v8302_v7, %v6518_v12  ;;  %v8303_v52 = vpop.f32.mrb[168].mxu0  ;;  %6731 = vrot.lane.b32.xlu1 %v12416_v39, %s12626_s27  ;;  %6793 = vrot.lane.b32.xlu0 %v12410_v59, %s12683_s1 }
0x1200   : > { %v8304_v14 = vpop.f32.mrb[169].mxu0 }
0x1201   : > { %v12422_v2 = vmax.f32 %v6662_v32, 0.0  ;;  %v8305_v5 = vadd.f32 %v8304_v14, %v8303_v52 }
0x1203   : > { %v6667_v55 = vadd.f32 %v8305_v5, %v6523_v61  ;;  %v8306_v51 = vpop.f32.mrb[170].mxu0  ;;  %6795 = vrot.lane.b32.xlu1 %v12416_v39, %s12683_s1  ;;  %6733 = vrot.lane.b32.xlu0 %v12422_v2, %s12626_s27 }
0x1204   : > { %v8307_v38 = vpop.f32.mrb[171].mxu0 }
0x1205   : > { %v12428_v22 = vmax.f32 %v6667_v55, 0.0  ;;  %v8308_v9 = vadd.f32 %v8307_v38, %v8306_v51 }
0x1207   : > { %v6672_v8 = vadd.f32 %v8308_v9, %v6528_v23  ;;  %6735 = vrot.lane.b32.xlu1 %v12428_v22, %s12626_s27  ;;  %6797 = vrot.lane.b32.xlu0 %v12422_v2, %s12683_s1 }
0x1209   : > { %v12434_v54 = vmax.f32 %v6672_v8, 0.0 }
0x120b   : > { %6799 = vrot.lane.b32.xlu1 %v12428_v22, %s12683_s1  ;;  %6737 = vrot.lane.b32.xlu0 %v12434_v54, %s12626_s27 }
0x120f   : > { %7057 = vperm.xlu1 %9537, %v7051_v34   ;;  %6801 = vrot.lane.b32.xlu0 %v12434_v54, %s12683_s1 }
0x1213   : > { %7067 = vperm.xlu1 %9537, %v7053_v29   ;;  %7062 = vperm.xlu0 %9536, %v7052_v15  }
0x1217   : > { %7072 = vperm.xlu0 %9536, %v7054_v0  }
0x1241   : > { %v6708_v46 = vpop.permute.xlu1 %6707 }
0x1242   : > { %v6755_v21 = vmax.f32 %v12346_v43, %v6708_v46 }
0x1245   : > { %v6772_v18 = vpop.permute.xlu1 %6771  ;;  %v6710_v17 = vpop.permute.xlu0 %6709 }
0x1246   : > { %v6819_v47 = vmax.f32 %v6755_v21, %v6772_v18  ;;  %v6756_v63 = vmax.f32 %v12350_v16, %v6710_v17 }
0x1248   : > { %9082 = vmatprep.mubr.msk.f32.mxu1 %vm6850_vm0, %v6819_v47 }
0x1249   : > { %v6712_v6 = vpop.permute.xlu1 %6711  ;;  %v6774_v42 = vpop.permute.xlu0 %6773 }
0x124a   : > { %v6820_v4 = vmax.f32 %v6756_v63, %v6774_v42  ;;  %v6757_v24 = vmax.f32 %v12356_v13, %v6712_v6 }
0x124c   : > { %9083 = vmatmul.mubr.msk.f32.vlgmr.msra.gmra.mrb[148].mxu1 %vm6850_vm0, %v6820_v4 }
0x124d   : > { %v6776_v50 = vpop.permute.xlu1 %6775  ;;  %v6714_v31 = vpop.permute.xlu0 %6713 }
0x124e   : > { %v6821_v60 = vmax.f32 %v6757_v24, %v6776_v50  ;;  %v6758_v43 = vmax.f32 %v12362_v27, %v6714_v31 }
0x1250   : > { %9085 = vmatprep.mubr.msk.f32.mxu1 %vm6850_vm0, %v6821_v60 }
0x1251   : > { %v6716_v10 = vpop.permute.xlu1 %6715  ;;  %v6778_v49 = vpop.permute.xlu0 %6777 }
0x1252   : > { %v6822_v11 = vmax.f32 %v6758_v43, %v6778_v49  ;;  %v6759_v16 = vmax.f32 %v12368_v62, %v6716_v10 }
0x1254   : > { %9086 = vmatmul.mubr.msk.f32.gmra.mrb[150].mxu1 %vm6850_vm0, %v6822_v11 }
0x1255   : > { %v6780_v48 = vpop.permute.xlu1 %6779  ;;  %v6718_v1 = vpop.permute.xlu0 %6717 }
0x1256   : > { %v6823_v30 = vmax.f32 %v6759_v16, %v6780_v48  ;;  %v6760_v13 = vmax.f32 %v12374_v3, %v6718_v1 }
0x1258   : > { %9088 = vmatprep.mubr.msk.f32.mxu1 %vm6850_vm0, %v6823_v30 }
0x1259   : > { %v6720_v20 = vpop.permute.xlu1 %6719  ;;  %v6782_v28 = vpop.permute.xlu0 %6781 }
0x125a   : > { %v6824_v45 = vmax.f32 %v6760_v13, %v6782_v28  ;;  %v6761_v27 = vmax.f32 %v12380_v53, %v6720_v20 }
0x125c   : > { %9089 = vmatmul.mubr.msk.f32.gmra.mrb[152].mxu1 %vm6850_vm0, %v6824_v45 }
0x125d   : > { %v6784_v33 = vpop.permute.xlu1 %6783  ;;  %v6722_v58 = vpop.permute.xlu0 %6721 }
0x125e   : > { %v6825_v26 = vmax.f32 %v6761_v27, %v6784_v33  ;;  %v6762_v62 = vmax.f32 %v12386_v56, %v6722_v58 }
0x1260   : > { %9091 = vmatprep.mubr.msk.f32.mxu1 %vm6850_vm0, %v6825_v26 }
0x1261   : > { %v6724_v7 = vpop.permute.xlu1 %6723  ;;  %v6786_v12 = vpop.permute.xlu0 %6785 }
0x1262   : > { %v6826_v32 = vmax.f32 %v6762_v62, %v6786_v12  ;;  %v6763_v3 = vmax.f32 %v12392_v37, %v6724_v7  ;;  %v7048_v12 = vld [vmem:[%s12549_s22 + $0x8] sm:$0xff] }
0x1264   : > { %9092 = vmatmul.mubr.msk.f32.gmra.mrb[154].mxu1 %vm6850_vm0, %v6826_v32  ;;  %v7049_v32 = vld [vmem:[%s12549_s22 + $0x10] sm:$0xff] }
0x1265   : > { %v6788_v52 = vpop.permute.xlu1 %6787  ;;  %v6726_v14 = vpop.permute.xlu0 %6725 }
0x1266   : > { %v6827_v5 = vmax.f32 %v6763_v3, %v6788_v52  ;;  %v6764_v53 = vmax.f32 %v12398_v44, %v6726_v14  ;;  %v7050_v3 = vld [vmem:[%s12549_s22 + $0x18] sm:$0xff]  ;;  %v6846_v52 = vsel %vm6839_vm13, 1.0, %v12752_v57  ;;  %v12753_v14 = vmov 1.0  }
0x1268   : > { %9094 = vmatprep.mubr.msk.f32.mxu1 %vm6850_vm0, %v6827_v5  ;;  %v9454_v5 = vpack.c.bf16 %v6846_v52, %v12753_v14 }
0x1269   : > { %v6728_v61 = vpop.permute.xlu1 %6727  ;;  %v6790_v55 = vpop.permute.xlu0 %6789 }
0x126a   : > { %v6828_v51 = vmax.f32 %v6764_v53, %v6790_v55  ;;  %v6765_v56 = vmax.f32 %v12404_v41, %v6728_v61 }
0x126c   : > { %9095 = vmatmul.mubr.msk.f32.gmra.mrb[156].mxu1 %vm6850_vm0, %v6828_v51 }
0x126d   : > { %v6792_v38 = vpop.permute.xlu1 %6791  ;;  %v6730_v9 = vpop.permute.xlu0 %6729 }
0x126e   : > { %v6829_v23 = vmax.f32 %v6765_v56, %v6792_v38  ;;  %v6766_v37 = vmax.f32 %v12410_v59, %v6730_v9 }
0x1270   : > { %9097 = vmatprep.mubr.msk.f32.mxu1 %vm6850_vm0, %v6829_v23 }
0x1271   : > { %v6732_v8 = vpop.permute.xlu1 %6731  ;;  %v6794_v34 = vpop.permute.xlu0 %6793 }
0x1272   : > { %v6830_v29 = vmax.f32 %v6766_v37, %v6794_v34  ;;  %v6767_v44 = vmax.f32 %v12416_v39, %v6732_v8 }
0x1274   : > { %9098 = vmatmul.mubr.msk.f32.gmra.mrb[158].mxu1 %vm6850_vm0, %v6830_v29 }
0x1275   : > { %v6796_v15 = vpop.permute.xlu1 %6795  ;;  %v6734_v0 = vpop.permute.xlu0 %6733 }
0x1276   : > { %v6831_v46 = vmax.f32 %v6767_v44, %v6796_v15  ;;  %v6768_v41 = vmax.f32 %v12422_v2, %v6734_v0  ;;  %v7047_v2 = vld [vmem:[%s12549_s22] sm:$0xff] }
0x1277   : > { %9138 = vmatprep.mubr.f32.mxu0 %v7047_v2 }
0x1278   : > { %9100 = vmatprep.mubr.msk.f32.mxu1 %vm6850_vm0, %v6831_v46 }
0x1279   : > { %v6736_v21 = vpop.permute.xlu1 %6735  ;;  %v6798_v18 = vpop.permute.xlu0 %6797 }
0x127a   : > { %v6832_v17 = vmax.f32 %v6768_v41, %v6798_v18  ;;  %v6769_v59 = vmax.f32 %v12428_v22, %v6736_v21 }
0x127c   : > { %9101 = vmatmul.mubr.msk.f32.gmra.mrb[160].mxu1 %vm6850_vm0, %v6832_v17 }
0x127d   : > { %v6800_v47 = vpop.permute.xlu1 %6799  ;;  %v6738_v63 = vpop.permute.xlu0 %6737 }
0x127e   : > { %v6833_v6 = vmax.f32 %v6769_v59, %v6800_v47  ;;  %v6770_v39 = vmax.f32 %v12434_v54, %v6738_v63 }
0x1280   : > { %9103 = vmatprep.mubr.msk.f32.mxu1 %vm6850_vm0, %v6833_v6 }
0x1281   : > { %v6802_v42 = vpop.permute.xlu0 %6801 }
0x1282   : > { %v6834_v4 = vmax.f32 %v6770_v39, %v6802_v42 }
0x1284   : > { %9104 = vmatmul.mubr.msk.f32.gmra.mrb[162].mxu1 %vm6850_vm0, %v6834_v4 }
0x128e   : > { %v7058_v55 = vpop.permute.xlu1 %7057 }
0x1292   : > { %v7063_v53 = vpop.permute.xlu0 %7062  ;;  %v7068_v23 = vpop.permute.xlu1 %7067 }
0x1296   : > { %v7073_v57 = vpop.permute.xlu0 %7072 }
0x131f   : > { %v9084_v24 = vpop.f32.mrb[148].mxu1 }
0x1320   : > { %v6968_v22 = vpop.f32.mrb[149].mxu1 }
0x1321   : > { %v9418_v50 = vpack.c.bf16 %v9084_v24, %v6968_v22 }
0x1323   : > { %9419 = vmatprep.subr.bf16.mxu0 %v9418_v50 }
0x1324   : > { %9421 = vmatpush3.bf16.msra.mxu0 %v9418_v50 }
0x1327   : > { %v9087_v31 = vpop.f32.mrb[150].mxu1 }
0x1328   : > { %v6978_v60 = vpop.f32.mrb[151].mxu1 }
0x1329   : > { %v9422_v43 = vpack.c.bf16 %v9087_v31, %v6978_v60 }
0x132b   : > { %9423 = vmatprep.subr.bf16.mxu0 %v9422_v43 }
0x132c   : > { %9425 = vmatpush3.bf16.msra.mxu0 %v9422_v43 }
0x132f   : > { %v9090_v54 = vpop.f32.mrb[152].mxu1 }
0x1330   : > { %v6988_v10 = vpop.f32.mrb[153].mxu1 }
0x1331   : > { %v9426_v49 = vpack.c.bf16 %v9090_v54, %v6988_v10 }
0x1333   : > { %9427 = vmatprep.subr.bf16.mxu0 %v9426_v49 }
0x1334   : > { %9429 = vmatpush3.bf16.msra.mxu0 %v9426_v49 }
0x1337   : > { %v9093_v11 = vpop.f32.mrb[154].mxu1 }
0x1338   : > { %v6998_v16 = vpop.f32.mrb[155].mxu1 }
0x1339   : > { %v9430_v48 = vpack.c.bf16 %v9093_v11, %v6998_v16 }
0x133b   : > { %9431 = vmatprep.subr.bf16.mxu0 %v9430_v48 }
0x133c   : > { %9433 = vmatpush3.bf16.msra.mxu0 %v9430_v48 }
0x133f   : > { %v9096_v1 = vpop.f32.mrb[156].mxu1 }
0x1340   : > { %v7008_v30 = vpop.f32.mrb[157].mxu1 }
0x1341   : > { %v9434_v13 = vpack.c.bf16 %v9096_v1, %v7008_v30 }
0x1343   : > { %9435 = vmatprep.subr.bf16.mxu0 %v9434_v13 }
0x1344   : > { %9437 = vmatpush3.bf16.msra.mxu0 %v9434_v13 }
0x1347   : > { %v9099_v20 = vpop.f32.mrb[158].mxu1 }
0x1348   : > { %v7018_v28 = vpop.f32.mrb[159].mxu1 }
0x1349   : > { %v9438_v45 = vpack.c.bf16 %v9099_v20, %v7018_v28 }
0x134b   : > { %9439 = vmatprep.subr.bf16.mxu0 %v9438_v45 }
0x134c   : > { %9441 = vmatpush3.bf16.msra.mxu0 %v9438_v45 }
0x134f   : > { %v9102_v27 = vpop.f32.mrb[160].mxu1 }
0x1350   : > { %v7028_v33 = vpop.f32.mrb[161].mxu1 }
0x1351   : > { %v9442_v58 = vpack.c.bf16 %v9102_v27, %v7028_v33 }
0x1353   : > { %9443 = vmatprep.subr.bf16.mxu0 %v9442_v58 }
0x1354   : > { %9445 = vmatpush3.bf16.msra.mxu0 %v9442_v58 }
0x1357   : > { %v9105_v26 = vpop.f32.mrb[162].mxu1 }
0x1358   : > { %v7038_v62 = vpop.f32.mrb[163].mxu1 }
0x1359   : > { %v9446_v7 = vpack.c.bf16 %v9105_v26, %v7038_v62 }
0x135b   : > { %9447 = vmatprep.subr.bf16.mxu0 %v9446_v7 }
0x135c   : > { %9449 = vmatpush3.bf16.msra.mxu0 %v9446_v7 }
0x135d   : > { %9451 = vmatprep.subr.msk.bf16.mxu0 %vm12313_vm9, %v12746_v35 }
0x135f   : > { %9139 = vmatmul.mubr.f32.vlgmr.msra.gmra.mrb[172].mxu0 %v7048_v12 }
0x1360   : > { %9141 = vmatprep.mubr.f32.mxu0 %v7049_v32  ;;  %9453 = vmatpush3.bf16.msk.msra.mxu0 %vm12313_vm9, %v12746_v35 }
0x1361   : > { %9456 = vmatprep.subr.msk.bf16.mxu0 %vm9455_vm10, %v9454_v5 }
0x1363   : > { %9142 = vmatmul.mubr.f32.gmra.mrb[174].mxu0 %v7050_v3 }
0x1364   : > { %9459 = vmatpush3.bf16.msk.msra.mxu0 %vm9455_vm10, %v9454_v5 }
0x1432   : > { %v9140_v61 = vpop.f32.mrb[172].mxu0 }
0x1433   : > { %v7147_v19 = vadd.f32 %v9140_v61, %v7063_v53  ;;  %v7141_v35 = vpop.f32.mrb[173].mxu0 }
0x1434   : > { %v7142_v51 = vadd.f32 %v7141_v35, %v7058_v55 }
0x1435   : > { %v7161_v56 = vmax.f32 %v7147_v19, 0.0 }
0x1436   : > { %v7160_v38 = vmax.f32 %v7142_v51, 0.0  ;;  %v9143_v9 = vpop.f32.mrb[174].mxu0 }
0x1437   : > { %v7151_v40 = vpop.f32.mrb[175].mxu0  ;;  %7170 = vrot.lane.b32.xlu0 %v7161_v56, %s12626_s27  ;;  %v7157_v25 = vadd.f32 %v9143_v9, %v7073_v57 }
0x1438   : > { %7168 = vrot.lane.b32.xlu1 %v7160_v38, %s12626_s27  ;;  %v7152_v36 = vadd.f32 %v7151_v40, %v7068_v23 }
0x1439   : > { %v7163_v37 = vmax.f32 %v7157_v25, 0.0 }
0x143a   : > { %v7162_v8 = vmax.f32 %v7152_v36, 0.0 }
0x143b   : > { %7186 = vrot.lane.b32.xlu0 %v7161_v56, %s12683_s1 }
0x143c   : > { %7184 = vrot.lane.b32.xlu1 %v7160_v38, %s12683_s1 }
0x143f   : > { %7174 = vrot.lane.b32.xlu0 %v7163_v37, %s12626_s27 }
0x1440   : > { %7172 = vrot.lane.b32.xlu1 %v7162_v8, %s12626_s27  ;;  %s7791_s27 = sshll.u32 %s12755_s26, 5 }
0x1441   : > { %s734_s3 = scalar_lea.vmem %s12551_s24, %s7791_s27 }
0x1443   : > { %7190 = vrot.lane.b32.xlu0 %v7163_v37, %s12683_s1 }
0x1444   : > { %7188 = vrot.lane.b32.xlu1 %v7162_v8, %s12683_s1 }
0x14a9   : > { %v7171_v34 = vpop.permute.xlu0 %7170 }
0x14aa   : > { %v7169_v29 = vpop.permute.xlu1 %7168  ;;  %v7181_v0 = vmax.f32 %v7161_v56, %v7171_v34 }
0x14ab   : > { %v7180_v44 = vmax.f32 %v7160_v38, %v7169_v29 }
0x14ad   : > { %v7187_v15 = vpop.permute.xlu0 %7186 }
0x14ae   : > { %v7185_v46 = vpop.permute.xlu1 %7184  ;;  %v7197_v21 = vmax.f32 %v7181_v0, %v7187_v15 }
0x14af   : > { %v7196_v41 = vmax.f32 %v7180_v44, %v7185_v46 }
0x14b1   : > { %9152 = vmatprep.mubr.msk.f32.mxu0 %vm7200_vm12, %v7196_v41  ;;  %v7175_v18 = vpop.permute.xlu0 %7174 }
0x14b2   : > { %v7173_v17 = vpop.permute.xlu1 %7172  ;;  %9153 = vmatmul.mubr.msk.f32.vlgmr.msra.gmra.mrb[176].mxu0 %vm7200_vm12, %v7197_v21  ;;  %v7183_v63 = vmax.f32 %v7163_v37, %v7175_v18 }
0x14b3   : > { %v7182_v59 = vmax.f32 %v7162_v8, %v7173_v17 }
0x14b5   : > { %v7191_v47 = vpop.permute.xlu0 %7190 }
0x14b6   : > { %v7189_v6 = vpop.permute.xlu1 %7188  ;;  %v7199_v42 = vmax.f32 %v7183_v63, %v7191_v47 }
0x14b7   : > { %v7198_v39 = vmax.f32 %v7182_v59, %v7189_v6 }
0x14b9   : > { %9155 = vmatprep.mubr.msk.f32.mxu0 %vm7200_vm12, %v7198_v39 }
0x14ba   : > { %9156 = vmatmul.mubr.msk.f32.gmra.mrb[178].mxu0 %vm7200_vm12, %v7199_v42 }
0x1585   : > { %v9154_v4 = vpop.f32.mrb[176].mxu0 }
0x1586   : > { %7304 = vst.msk [vmem:[%s734_s3 + $0x8] sm:$0xff] %vm7302_vm4, %v9154_v4  ;;  %v7283_v2 = vpop.f32.mrb[177].mxu0 }
0x1587   : > { %7303 = vst.msk [vmem:[%s734_s3] sm:$0xff] %vm7302_vm4, %v7283_v2 }
0x158d   : > { %v9157_v24 = vpop.f32.mrb[178].mxu0 }
0x158e   : > { %7306 = vst.msk [vmem:[%s734_s3 + $0x18] sm:$0xff] %vm7302_vm4, %v9157_v24  ;;  %v7293_v22 = vpop.f32.mrb[179].mxu0 }
0x158f   : > { %7305 = vst.msk [vmem:[%s734_s3 + $0x10] sm:$0xff] %vm7302_vm4, %v7293_v22 }
0x1590 PF: > { %s34_s5 = sadd.s32 1, %s9688_s5  }
0x1591   : > { %p31_p4 = scmp.ge.s32.totalorder %s34_s5, 4  }
0x1593   :  { %33 = sbr.rel (!%p31_p4) target bundleno = 10 (0xa), region = 146 }

</bundles_post_ra>
